<compile_context>
chip_gen: v7x
topology: tpu7x:2x2x1
jax: 0.10.0
libtpu: 0.0.40
codegen_flags: <defaults>
</compile_context>

<pallas_src>
import functools

import jax
import jax.numpy as jnp
from jax.experimental import pallas as pl
from jax.experimental.pallas import tpu as pltpu


# ------------------------------ small helpers ------------------------------ #

def _round_up(x, m):
    return (x + m - 1) // m * m


def _pick_tile(dim, max_tile, quantum):
    """Largest multiple of `quantum` that is <= max_tile and divides `dim`.
    `dim` must itself be a multiple of `quantum`."""
    t = min(max_tile, dim)
    t -= t % quantum
    while dim % t:
        t -= quantum
    return t


# ------------------------------ Pallas kernels ----------------------------- #

def _conv_matmul_kernel(p_ref, w_ref, b_ref, o_ref, acc_ref, *, apply_relu):
    """One (tm, tn) output tile of patches @ weights with K reduced over grid axis 2.
    bf16 MXU inputs, f32 VMEM accumulator, fused bias + ReLU epilogue in f32."""
    k = pl.program_id(2)

    @pl.when(k == 0)
    def _init():
        acc_ref[...] = jnp.zeros_like(acc_ref)

    acc_ref[...] += jnp.dot(p_ref[...], w_ref[...],
                            preferred_element_type=jnp.float32)

    @pl.when(k == pl.num_programs(2) - 1)
    def _finalize():
        out = acc_ref[...] + b_ref[...]            # (tm, tn) + (1, tn), f32
        if apply_relu:
            out = jnp.maximum(out, 0.0)
        o_ref[...] = out.astype(o_ref.dtype)


def _max4_kernel(a_ref, b_ref, c_ref, d_ref, o_ref):
    """Elementwise max of the four 2x2 pooling taps (VPU)."""
    o_ref[...] = jnp.maximum(jnp.maximum(a_ref[...], b_ref[...]),
                             jnp.maximum(c_ref[...], d_ref[...]))


def _l1_partial_kernel(a_ref, b_ref, o_ref, acc_ref):
    """Accumulate |a - b| (f32) over the grid into a resident (tr, 128) block."""
    i = pl.program_id(0)

    @pl.when(i == 0)
    def _init():
        acc_ref[...] = jnp.zeros_like(acc_ref)

    diff = a_ref[...].astype(jnp.float32) - b_ref[...].astype(jnp.float32)
    acc_ref[...] += jnp.abs(diff)

    @pl.when(i == pl.num_programs(0) - 1)
    def _finalize():
        o_ref[...] = acc_ref[...]


# ------------------------------ op wrappers --------------------------------- #

def conv3x3_relu_pallas(x_nhwc, w_hwio, bias, *, apply_relu=True,
                        max_tm=512, max_tn=256, max_tk=512):
    """3x3 / stride-1 / pad-1 conv (+ optional ReLU) via tiled im2col MXU matmul."""
    N, H, W, Cin = x_nhwc.shape
    kh, kw, _, Cout = w_hwio.shape
    assert (kh, kw) == (3, 3)

    x = x_nhwc.astype(jnp.bfloat16)
    xp = jnp.pad(x, ((0, 0), (1, 1), (1, 1), (0, 0)))
    # im2col: (ki, kj) outer, channel inner -> matches HWIO weight flattening.
    cols = [xp[:, ki:ki + H, kj:kj + W, :] for ki in range(3) for kj in range(3)]
    patches = jnp.stack(cols, axis=3).reshape(N * H * W, 9 * Cin)

    M, K = patches.shape
    Mp = _round_up(M, 16)
    Kp = _round_up(K, 128)
    Cp = _round_up(Cout, 128)
    tm = _pick_tile(Mp, max_tm, 16)
    tk = _pick_tile(Kp, max_tk, 128)
    tn = _pick_tile(Cp, max_tn, 128)

    patches = jnp.pad(patches, ((0, Mp - M), (0, Kp - K)))
    w_mat = jnp.pad(w_hwio.reshape(K, Cout).astype(jnp.bfloat16),
                    ((0, Kp - K), (0, Cp - Cout)))
    b_row = jnp.pad(bias.astype(jnp.float32).reshape(1, Cout),
                    ((0, 0), (0, Cp - Cout)))

    grid = (Mp // tm, Cp // tn, Kp // tk)
    flops = 2 * Mp * Kp * Cp
    bytes_accessed = 2 * (Mp * Kp + Kp * Cp + Mp * Cp) + 4 * Cp

    out = pl.pallas_call(
        functools.partial(_conv_matmul_kernel, apply_relu=apply_relu),
        out_shape=jax.ShapeDtypeStruct((Mp, Cp), jnp.bfloat16),
        grid=grid,
        in_specs=[
            pl.BlockSpec((tm, tk), lambda i, j, k: (i, k)),
            pl.BlockSpec((tk, tn), lambda i, j, k: (k, j)),
            pl.BlockSpec((1, tn), lambda i, j, k: (0, j)),
        ],
        out_specs=pl.BlockSpec((tm, tn), lambda i, j, k: (i, j)),
        scratch_shapes=[pltpu.VMEM((tm, tn), jnp.float32)],
        compiler_params=pltpu.CompilerParams(
            dimension_semantics=("parallel", "parallel", "arbitrary"),
            vmem_limit_bytes=48 * 1024 * 1024,
        ),
        cost_estimate=pl.CostEstimate(flops=flops, transcendentals=0,
                                      bytes_accessed=bytes_accessed),
    )(patches, w_mat, b_row)

    return out[:M, :Cout].reshape(N, H, W, Cout)


def maxpool2x2_pallas(x_nhwc, *, max_tm=1024):
    """MaxPool2d(kernel_size=2, stride=2) as an elementwise max-of-4-taps kernel."""
    N, H, W, C = x_nhwc.shape
    Ho, Wo = H // 2, W // 2
    taps = [x_nhwc[:, di::2, dj::2, :].reshape(N * Ho * Wo, C)
            for di in (0, 1) for dj in (0, 1)]
    M = N * Ho * Wo
    Mp = _round_up(M, 16)
    tm = _pick_tile(Mp, max_tm, 16)
    taps = [jnp.pad(t, ((0, Mp - M), (0, 0))) for t in taps]

    out = pl.pallas_call(
        _max4_kernel,
        out_shape=jax.ShapeDtypeStruct((Mp, C), x_nhwc.dtype),
        grid=(Mp // tm,),
        in_specs=[pl.BlockSpec((tm, C), lambda i: (i, 0)) for _ in range(4)],
        out_specs=pl.BlockSpec((tm, C), lambda i: (i, 0)),
        compiler_params=pltpu.CompilerParams(
            dimension_semantics=("parallel",)),
    )(*taps)
    return out[:M].reshape(N, Ho, Wo, C)


def l1_mean_pallas(a, b, *, max_tr=256):
    """nn.L1Loss(reduction='mean') between two equally shaped feature tensors."""
    assert a.shape == b.shape
    n_elem = a.size
    rows = _round_up(pl.cdiv(n_elem, 128), 16)
    tr = _pick_tile(rows, max_tr, 16)
    pad = rows * 128 - n_elem
    af = jnp.pad(a.reshape(-1), (0, pad)).reshape(rows, 128)
    bf = jnp.pad(b.reshape(-1), (0, pad)).reshape(rows, 128)

    partial = pl.pallas_call(
        _l1_partial_kernel,
        out_shape=jax.ShapeDtypeStruct((tr, 128), jnp.float32),
        grid=(rows // tr,),
        in_specs=[pl.BlockSpec((tr, 128), lambda i: (i, 0)) for _ in range(2)],
        out_specs=pl.BlockSpec((tr, 128), lambda i: (0, 0)),
        scratch_shapes=[pltpu.VMEM((tr, 128), jnp.float32)],
        compiler_params=pltpu.CompilerParams(
            dimension_semantics=("arbitrary",)),
    )(af, bf)
    return jnp.sum(partial) / n_elem


# ------------------------- VGG19 structure / VGGLoss ------------------------ #

# torchvision vgg19.features grouped by the VGG19 wrapper's slices (each slice ends
# right after a ReLU): relu1_1, relu2_1, relu3_1, relu4_1, relu5_1.
_SLICE_OPS = (
    ("conv",),
    ("conv", "pool", "conv"),
    ("conv", "pool", "conv"),
    ("conv", "conv", "conv", "pool", "conv"),
    ("conv", "conv", "conv", "pool", "conv"),
)
_LOSS_WEIGHTS = (1.0 / 32, 1.0 / 16, 1.0 / 8, 1.0 / 4, 1.0)


def vgg19_channel_plan(in_nc=3, base=64):
    c1, c2, c3, c4 = base, base * 2, base * 4, base * 8
    return (
        (in_nc, c1),                                    # slice1
        (c1, c1), (c1, c2),                             # slice2
        (c2, c2), (c2, c3),                             # slice3
        (c3, c3), (c3, c3), (c3, c3), (c3, c4),         # slice4
        (c4, c4), (c4, c4), (c4, c4), (c4, c4),         # slice5
    )


def init_vgg19_params(key, channel_plan):
    """Deterministic synthetic He-init weights, HWIO layout, zero bias."""
    params = []
    for cin, cout in channel_plan:
        key, wk = jax.random.split(key)
        std = (2.0 / (9 * cin)) ** 0.5
        w = jax.random.normal(wk, (3, 3, cin, cout), jnp.float32) * std
        params.append((w, jnp.zeros((cout,), jnp.float32)))
    return tuple(params)


def vgg19_features(x_nchw, conv_params):
    """Returns [h_relu1 .. h_relu5] (NHWC, bf16), matching VGG19.forward."""
    x = jnp.transpose(x_nchw, (0, 2, 3, 1)).astype(jnp.bfloat16)  # NCHW -> NHWC
    feats = []
    ci = 0
    for ops in _SLICE_OPS:
        for op in ops:
            if op == "conv":
                w, bias = conv_params[ci]
                ci += 1
                x = conv3x3_relu_pallas(x, w, bias, apply_relu=True)
            else:
                x = maxpool2x2_pallas(x)
        feats.append(x)
    return feats


def vgg_loss(x_nchw, y_nchw, conv_params):
    """VGGLoss.forward: weighted L1 between VGG19 feature slices of x and y."""
    fx = vgg19_features(x_nchw, conv_params)
    fy = vgg19_features(y_nchw, conv_params)   # y features are detached (no grad here)
    loss = jnp.float32(0.0)
    for wgt, fa, fb in zip(_LOSS_WEIGHTS, fx, fy):
        loss = loss + wgt * l1_mean_pallas(fa, fb)
    return loss


# ---------------------------------- main ------------------------------------ #

if __name__ == "__main__":
    key = jax.random.PRNGKey(0)
    kx, ky, kp = jax.random.split(key, 3)

    # Small shapes consistent with the module: batch=2, 3-channel 32x32 images,
    # full VGG19 slice structure with base width 16 (real VGG19 uses base 64).
    N, C, H, W = 2, 3, 32, 32
    x = jax.random.normal(kx, (N, C, H, W), jnp.float32)
    y = jax.random.normal(ky, (N, C, H, W), jnp.float32)

    plan = vgg19_channel_plan(in_nc=C, base=16)
    params = init_vgg19_params(kp, plan)

    loss_fn = jax.jit(vgg_loss)
    loss = jax.block_until_ready(loss_fn(x, y, params))

    assert loss.shape == (), loss.shape
    assert bool(jnp.isfinite(loss)), loss
    print("KERNEL_OK")
</pallas_src>

<mosaic_0001>
module attributes {stable_mosaic.version = 11 : i64} {
  func.func @_conv_matmul_kernel(%arg0: i32, %arg1: i32, %arg2: i32, %arg3: memref<512x128xbf16, #tpu.memory_space<vmem>>, %arg4: memref<128x128xbf16, #tpu.memory_space<vmem>>, %arg5: memref<1x128xf32, #tpu.memory_space<vmem>>, %arg6: memref<512x128xbf16, #tpu.memory_space<vmem>>, %arg7: memref<512x128xf32, #tpu.memory_space<vmem>>) attributes {dimension_semantics = [#tpu.dimension_semantics<parallel>, #tpu.dimension_semantics<parallel>, #tpu.dimension_semantics<arbitrary>], iteration_bounds = array<i64: 4, 1, 1>, scalar_prefetch = 0 : i64, scratch_operands = 1 : i64, tpu.core_type = #tpu.core_type<tc>, window_params = [{transform_indices = @transform_0, window_bounds = array<i64: 512, 128>}, {transform_indices = @transform_1, window_bounds = array<i64: 128, 128>}, {transform_indices = @transform_2, window_bounds = array<i64: 1, 128>}, {transform_indices = @transform_3, window_bounds = array<i64: 512, 128>}]} {
    %c0_i32 = arith.constant 0 : i32
    %0 = arith.cmpi eq, %arg2, %c0_i32 : i32
    %1 = arith.extui %0 : i1 to i32
    %c0_i32_0 = arith.constant 0 : i32
    %2 = arith.cmpi ne, %1, %c0_i32_0 : i32
    scf.if %2 {
      %cst_10 = arith.constant 0.000000e+00 : f32
      %12 = vector.broadcast %cst_10 : f32 to vector<512x128xf32>
      %c0_11 = arith.constant 0 : index
      %c0_12 = arith.constant 0 : index
      %13 = vector.load %arg7[%c0_11, %c0_12] : memref<512x128xf32, #tpu.memory_space<vmem>>, vector<512x128xf32>
      tpu.vector_store %arg7[%c0_11, %c0_12], %12 {strides = array<i32>} : memref<512x128xf32, #tpu.memory_space<vmem>>, vector<512x128xf32>,
    } else {
    }
    %c0 = arith.constant 0 : index
    %c0_1 = arith.constant 0 : index
    %3 = vector.load %arg7[%c0, %c0_1] : memref<512x128xf32, #tpu.memory_space<vmem>>, vector<512x128xf32>
    %c0_2 = arith.constant 0 : index
    %c0_3 = arith.constant 0 : index
    %4 = vector.load %arg3[%c0_2, %c0_3] : memref<512x128xbf16, #tpu.memory_space<vmem>>, vector<512x128xbf16>
    %c0_4 = arith.constant 0 : index
    %c0_5 = arith.constant 0 : index
    %5 = vector.load %arg4[%c0_4, %c0_5] : memref<128x128xbf16, #tpu.memory_space<vmem>>, vector<128x128xbf16>
    %cst = arith.constant dense<0.000000e+00> : vector<512x128xf32>
    %6 = tpu.matmul %4, %5, %cst {dimension_numbers = #tpu.dot_dimension_numbers<[1], [0], [0], [1], [0, 0, 1, 1], [], []>} : vector<512x128xbf16>, vector<128x128xbf16>, vector<512x128xf32> -> vector<512x128xf32>
    %7 = arith.addf %3, %6 : vector<512x128xf32>
    %c0_6 = arith.constant 0 : index
    %c0_7 = arith.constant 0 : index
    %8 = vector.load %arg7[%c0_6, %c0_7] : memref<512x128xf32, #tpu.memory_space<vmem>>, vector<512x128xf32>
    tpu.vector_store %arg7[%c0_6, %c0_7], %7 {strides = array<i32>} : memref<512x128xf32, #tpu.memory_space<vmem>>, vector<512x128xf32>,
    %c0_i32_8 = arith.constant 0 : i32
    %9 = arith.cmpi eq, %arg2, %c0_i32_8 : i32
    %10 = arith.extui %9 : i1 to i32
    %c0_i32_9 = arith.constant 0 : i32
    %11 = arith.cmpi ne, %10, %c0_i32_9 : i32
    scf.if %11 {
      %c0_10 = arith.constant 0 : index
      %c0_11 = arith.constant 0 : index
      %12 = vector.load %arg7[%c0_10, %c0_11] : memref<512x128xf32, #tpu.memory_space<vmem>>, vector<512x128xf32>
      %c0_12 = arith.constant 0 : index
      %c0_13 = arith.constant 0 : index
      %13 = vector.load %arg5[%c0_12, %c0_13] : memref<1x128xf32, #tpu.memory_space<vmem>>, vector<1x128xf32>
      %14 = vector.broadcast %13 : vector<1x128xf32> to vector<512x128xf32>
      %15 = arith.addf %12, %14 : vector<512x128xf32>
      %cst_14 = arith.constant 0.000000e+00 : f32
      %16 = vector.broadcast %cst_14 : f32 to vector<512x128xf32>
      %17 = arith.maximumf %15, %16 : vector<512x128xf32>
      %18 = arith.truncf %17 : vector<512x128xf32> to vector<512x128xbf16>
      %c0_15 = arith.constant 0 : index
      %c0_16 = arith.constant 0 : index
      %19 = vector.load %arg6[%c0_15, %c0_16] : memref<512x128xbf16, #tpu.memory_space<vmem>>, vector<512x128xbf16>
      tpu.vector_store %arg6[%c0_15, %c0_16], %18 {strides = array<i32>} : memref<512x128xbf16, #tpu.memory_space<vmem>>, vector<512x128xbf16>,
    } else {
    }
    return
  }
  func.func @transform_0(%arg0: i32, %arg1: i32, %arg2: i32) -> (i32, i32) {
    %c0_i32 = arith.constant 0 : i32
    return %arg0, %arg2 : i32, i32
  }
  func.func @transform_1(%arg0: i32, %arg1: i32, %arg2: i32) -> (i32, i32) {
    %c0_i32 = arith.constant 0 : i32
    return %arg2, %arg1 : i32, i32
  }
  func.func @transform_2(%arg0: i32, %arg1: i32, %arg2: i32) -> (i32, i32) {
    %c0_i32 = arith.constant 0 : i32
    %c0_i32_0 = arith.constant 0 : i32
    return %c0_i32, %arg1 : i32, i32
  }
  func.func @transform_3(%arg0: i32, %arg1: i32, %arg2: i32) -> (i32, i32) {
    %c0_i32 = arith.constant 0 : i32
    return %arg0, %arg1 : i32, i32
  }
}

module attributes {stable_mosaic.version = 11 : i64} {
  func.func @_l1_partial_kernel(%arg0: i32, %arg1: memref<256x128xbf16, #tpu.memory_space<vmem>>, %arg2: memref<256x128xbf16, #tpu.memory_space<vmem>>, %arg3: memref<256x128xf32, #tpu.memory_space<vmem>>, %arg4: memref<256x128xf32, #tpu.memory_space<vmem>>) attributes {dimension_semantics = [#tpu.dimension_semantics<arbitrary>], iteration_bounds = array<i64: 1>, scalar_prefetch = 0 : i64, scratch_operands = 1 : i64, tpu.core_type = #tpu.core_type<tc>, window_params = [{transform_indices = @transform_0, window_bounds = array<i64: 256, 128>}, {transform_indices = @transform_1, window_bounds = array<i64: 256, 128>}, {pipeline_mode = #tpu.pipeline_mode<synchronous>, transform_indices = @transform_2, window_bounds = array<i64: 256, 128>}]} {
    %c0_i32 = arith.constant 0 : i32
    %0 = arith.cmpi eq, %arg0, %c0_i32 : i32
    %1 = arith.extui %0 : i1 to i32
    %c0_i32_0 = arith.constant 0 : i32
    %2 = arith.cmpi ne, %1, %c0_i32_0 : i32
    scf.if %2 {
      %cst = arith.constant 0.000000e+00 : f32
      %15 = vector.broadcast %cst : f32 to vector<256x128xf32>
      %c0_10 = arith.constant 0 : index
      %c0_11 = arith.constant 0 : index
      %16 = vector.load %arg4[%c0_10, %c0_11] : memref<256x128xf32, #tpu.memory_space<vmem>>, vector<256x128xf32>
      tpu.vector_store %arg4[%c0_10, %c0_11], %15 {strides = array<i32>} : memref<256x128xf32, #tpu.memory_space<vmem>>, vector<256x128xf32>,
    } else {
    }
    %c0 = arith.constant 0 : index
    %c0_1 = arith.constant 0 : index
    %3 = vector.load %arg1[%c0, %c0_1] : memref<256x128xbf16, #tpu.memory_space<vmem>>, vector<256x128xbf16>
    %4 = arith.extf %3 : vector<256x128xbf16> to vector<256x128xf32>
    %c0_2 = arith.constant 0 : index
    %c0_3 = arith.constant 0 : index
    %5 = vector.load %arg2[%c0_2, %c0_3] : memref<256x128xbf16, #tpu.memory_space<vmem>>, vector<256x128xbf16>
    %6 = arith.extf %5 : vector<256x128xbf16> to vector<256x128xf32>
    %7 = arith.subf %4, %6 : vector<256x128xf32>
    %c0_4 = arith.constant 0 : index
    %c0_5 = arith.constant 0 : index
    %8 = vector.load %arg4[%c0_4, %c0_5] : memref<256x128xf32, #tpu.memory_space<vmem>>, vector<256x128xf32>
    %9 = math.absf %7 : vector<256x128xf32>
    %10 = arith.addf %8, %9 : vector<256x128xf32>
    %c0_6 = arith.constant 0 : index
    %c0_7 = arith.constant 0 : index
    %11 = vector.load %arg4[%c0_6, %c0_7] : memref<256x128xf32, #tpu.memory_space<vmem>>, vector<256x128xf32>
    tpu.vector_store %arg4[%c0_6, %c0_7], %10 {strides = array<i32>} : memref<256x128xf32, #tpu.memory_space<vmem>>, vector<256x128xf32>,
    %c0_i32_8 = arith.constant 0 : i32
    %12 = arith.cmpi eq, %arg0, %c0_i32_8 : i32
    %13 = arith.extui %12 : i1 to i32
    %c0_i32_9 = arith.constant 0 : i32
    %14 = arith.cmpi ne, %13, %c0_i32_9 : i32
    scf.if %14 {
      %c0_10 = arith.constant 0 : index
      %c0_11 = arith.constant 0 : index
      %15 = vector.load %arg4[%c0_10, %c0_11] : memref<256x128xf32, #tpu.memory_space<vmem>>, vector<256x128xf32>
      %c0_12 = arith.constant 0 : index
      %c0_13 = arith.constant 0 : index
      %16 = vector.load %arg3[%c0_12, %c0_13] : memref<256x128xf32, #tpu.memory_space<vmem>>, vector<256x128xf32>
      tpu.vector_store %arg3[%c0_12, %c0_13], %15 {strides = array<i32>} : memref<256x128xf32, #tpu.memory_space<vmem>>, vector<256x128xf32>,
    } else {
    }
    return
  }
  func.func @transform_0(%arg0: i32) -> (i32, i32) {
    %c0_i32 = arith.constant 0 : i32
    %c0_i32_0 = arith.constant 0 : i32
    return %arg0, %c0_i32 : i32, i32
  }
  func.func @transform_1(%arg0: i32) -> (i32, i32) {
    %c0_i32 = arith.constant 0 : i32
    %c0_i32_0 = arith.constant 0 : i32
    return %arg0, %c0_i32 : i32, i32
  }
  func.func @transform_2(%arg0: i32) -> (i32, i32) {
    %c0_i32 = arith.constant 0 : i32
    %c0_i32_0 = arith.constant 0 : i32
    %c0_i32_1 = arith.constant 0 : i32
    return %c0_i32, %c0_i32_0 : i32, i32
  }
}

module attributes {stable_mosaic.version = 11 : i64} {
  func.func @_conv_matmul_kernel(%arg0: i32, %arg1: i32, %arg2: i32, %arg3: memref<512x256xbf16, #tpu.memory_space<vmem>>, %arg4: memref<256x128xbf16, #tpu.memory_space<vmem>>, %arg5: memref<1x128xf32, #tpu.memory_space<vmem>>, %arg6: memref<512x128xbf16, #tpu.memory_space<vmem>>, %arg7: memref<512x128xf32, #tpu.memory_space<vmem>>) attributes {dimension_semantics = [#tpu.dimension_semantics<parallel>, #tpu.dimension_semantics<parallel>, #tpu.dimension_semantics<arbitrary>], iteration_bounds = array<i64: 4, 1, 1>, scalar_prefetch = 0 : i64, scratch_operands = 1 : i64, tpu.core_type = #tpu.core_type<tc>, window_params = [{transform_indices = @transform_0, window_bounds = array<i64: 512, 256>}, {transform_indices = @transform_1, window_bounds = array<i64: 256, 128>}, {transform_indices = @transform_2, window_bounds = array<i64: 1, 128>}, {transform_indices = @transform_3, window_bounds = array<i64: 512, 128>}]} {
    %c0_i32 = arith.constant 0 : i32
    %0 = arith.cmpi eq, %arg2, %c0_i32 : i32
    %1 = arith.extui %0 : i1 to i32
    %c0_i32_0 = arith.constant 0 : i32
    %2 = arith.cmpi ne, %1, %c0_i32_0 : i32
    scf.if %2 {
      %cst_10 = arith.constant 0.000000e+00 : f32
      %12 = vector.broadcast %cst_10 : f32 to vector<512x128xf32>
      %c0_11 = arith.constant 0 : index
      %c0_12 = arith.constant 0 : index
      %13 = vector.load %arg7[%c0_11, %c0_12] : memref<512x128xf32, #tpu.memory_space<vmem>>, vector<512x128xf32>
      tpu.vector_store %arg7[%c0_11, %c0_12], %12 {strides = array<i32>} : memref<512x128xf32, #tpu.memory_space<vmem>>, vector<512x128xf32>,
    } else {
    }
    %c0 = arith.constant 0 : index
    %c0_1 = arith.constant 0 : index
    %3 = vector.load %arg7[%c0, %c0_1] : memref<512x128xf32, #tpu.memory_space<vmem>>, vector<512x128xf32>
    %c0_2 = arith.constant 0 : index
    %c0_3 = arith.constant 0 : index
    %4 = vector.load %arg3[%c0_2, %c0_3] : memref<512x256xbf16, #tpu.memory_space<vmem>>, vector<512x256xbf16>
    %c0_4 = arith.constant 0 : index
    %c0_5 = arith.constant 0 : index
    %5 = vector.load %arg4[%c0_4, %c0_5] : memref<256x128xbf16, #tpu.memory_space<vmem>>, vector<256x128xbf16>
    %cst = arith.constant dense<0.000000e+00> : vector<512x128xf32>
    %6 = tpu.matmul %4, %5, %cst {dimension_numbers = #tpu.dot_dimension_numbers<[1], [0], [0], [1], [0, 0, 1, 1], [], []>} : vector<512x256xbf16>, vector<256x128xbf16>, vector<512x128xf32> -> vector<512x128xf32>
    %7 = arith.addf %3, %6 : vector<512x128xf32>
    %c0_6 = arith.constant 0 : index
    %c0_7 = arith.constant 0 : index
    %8 = vector.load %arg7[%c0_6, %c0_7] : memref<512x128xf32, #tpu.memory_space<vmem>>, vector<512x128xf32>
    tpu.vector_store %arg7[%c0_6, %c0_7], %7 {strides = array<i32>} : memref<512x128xf32, #tpu.memory_space<vmem>>, vector<512x128xf32>,
    %c0_i32_8 = arith.constant 0 : i32
    %9 = arith.cmpi eq, %arg2, %c0_i32_8 : i32
    %10 = arith.extui %9 : i1 to i32
    %c0_i32_9 = arith.constant 0 : i32
    %11 = arith.cmpi ne, %10, %c0_i32_9 : i32
    scf.if %11 {
      %c0_10 = arith.constant 0 : index
      %c0_11 = arith.constant 0 : index
      %12 = vector.load %arg7[%c0_10, %c0_11] : memref<512x128xf32, #tpu.memory_space<vmem>>, vector<512x128xf32>
      %c0_12 = arith.constant 0 : index
      %c0_13 = arith.constant 0 : index
      %13 = vector.load %arg5[%c0_12, %c0_13] : memref<1x128xf32, #tpu.memory_space<vmem>>, vector<1x128xf32>
      %14 = vector.broadcast %13 : vector<1x128xf32> to vector<512x128xf32>
      %15 = arith.addf %12, %14 : vector<512x128xf32>
      %cst_14 = arith.constant 0.000000e+00 : f32
      %16 = vector.broadcast %cst_14 : f32 to vector<512x128xf32>
      %17 = arith.maximumf %15, %16 : vector<512x128xf32>
      %18 = arith.truncf %17 : vector<512x128xf32> to vector<512x128xbf16>
      %c0_15 = arith.constant 0 : index
      %c0_16 = arith.constant 0 : index
      %19 = vector.load %arg6[%c0_15, %c0_16] : memref<512x128xbf16, #tpu.memory_space<vmem>>, vector<512x128xbf16>
      tpu.vector_store %arg6[%c0_15, %c0_16], %18 {strides = array<i32>} : memref<512x128xbf16, #tpu.memory_space<vmem>>, vector<512x128xbf16>,
    } else {
    }
    return
  }
  func.func @transform_0(%arg0: i32, %arg1: i32, %arg2: i32) -> (i32, i32) {
    %c0_i32 = arith.constant 0 : i32
    return %arg0, %arg2 : i32, i32
  }
  func.func @transform_1(%arg0: i32, %arg1: i32, %arg2: i32) -> (i32, i32) {
    %c0_i32 = arith.constant 0 : i32
    return %arg2, %arg1 : i32, i32
  }
  func.func @transform_2(%arg0: i32, %arg1: i32, %arg2: i32) -> (i32, i32) {
    %c0_i32 = arith.constant 0 : i32
    %c0_i32_0 = arith.constant 0 : i32
    return %c0_i32, %arg1 : i32, i32
  }
  func.func @transform_3(%arg0: i32, %arg1: i32, %arg2: i32) -> (i32, i32) {
    %c0_i32 = arith.constant 0 : i32
    return %arg0, %arg1 : i32, i32
  }
}

module attributes {stable_mosaic.version = 11 : i64} {
  func.func @_max4_kernel(%arg0: i32, %arg1: memref<512x16xbf16, #tpu.memory_space<vmem>>, %arg2: memref<512x16xbf16, #tpu.memory_space<vmem>>, %arg3: memref<512x16xbf16, #tpu.memory_space<vmem>>, %arg4: memref<512x16xbf16, #tpu.memory_space<vmem>>, %arg5: memref<512x16xbf16, #tpu.memory_space<vmem>>) attributes {dimension_semantics = [#tpu.dimension_semantics<parallel>], iteration_bounds = array<i64: 1>, scalar_prefetch = 0 : i64, scratch_operands = 0 : i64, tpu.core_type = #tpu.core_type<tc>, window_params = [{transform_indices = @transform_0, window_bounds = array<i64: 512, 16>}, {transform_indices = @transform_1, window_bounds = array<i64: 512, 16>}, {transform_indices = @transform_2, window_bounds = array<i64: 512, 16>}, {transform_indices = @transform_3, window_bounds = array<i64: 512, 16>}, {transform_indices = @transform_4, window_bounds = array<i64: 512, 16>}]} {
    %c0 = arith.constant 0 : index
    %c0_0 = arith.constant 0 : index
    %0 = vector.load %arg1[%c0, %c0_0] : memref<512x16xbf16, #tpu.memory_space<vmem>>, vector<512x16xbf16>
    %c0_1 = arith.constant 0 : index
    %c0_2 = arith.constant 0 : index
    %1 = vector.load %arg2[%c0_1, %c0_2] : memref<512x16xbf16, #tpu.memory_space<vmem>>, vector<512x16xbf16>
    %2 = arith.maximumf %0, %1 : vector<512x16xbf16>
    %c0_3 = arith.constant 0 : index
    %c0_4 = arith.constant 0 : index
    %3 = vector.load %arg3[%c0_3, %c0_4] : memref<512x16xbf16, #tpu.memory_space<vmem>>, vector<512x16xbf16>
    %c0_5 = arith.constant 0 : index
    %c0_6 = arith.constant 0 : index
    %4 = vector.load %arg4[%c0_5, %c0_6] : memref<512x16xbf16, #tpu.memory_space<vmem>>, vector<512x16xbf16>
    %5 = arith.maximumf %3, %4 : vector<512x16xbf16>
    %6 = arith.maximumf %2, %5 : vector<512x16xbf16>
    %c0_7 = arith.constant 0 : index
    %c0_8 = arith.constant 0 : index
    %7 = vector.load %arg5[%c0_7, %c0_8] : memref<512x16xbf16, #tpu.memory_space<vmem>>, vector<512x16xbf16>
    tpu.vector_store %arg5[%c0_7, %c0_8], %6 {strides = array<i32>} : memref<512x16xbf16, #tpu.memory_space<vmem>>, vector<512x16xbf16>,
    return
  }
  func.func @transform_0(%arg0: i32) -> (i32, i32) {
    %c0_i32 = arith.constant 0 : i32
    %c0_i32_0 = arith.constant 0 : i32
    return %arg0, %c0_i32 : i32, i32
  }
  func.func @transform_1(%arg0: i32) -> (i32, i32) {
    %c0_i32 = arith.constant 0 : i32
    %c0_i32_0 = arith.constant 0 : i32
    return %arg0, %c0_i32 : i32, i32
  }
  func.func @transform_2(%arg0: i32) -> (i32, i32) {
    %c0_i32 = arith.constant 0 : i32
    %c0_i32_0 = arith.constant 0 : i32
    return %arg0, %c0_i32 : i32, i32
  }
  func.func @transform_3(%arg0: i32) -> (i32, i32) {
    %c0_i32 = arith.constant 0 : i32
    %c0_i32_0 = arith.constant 0 : i32
    return %arg0, %c0_i32 : i32, i32
  }
  func.func @transform_4(%arg0: i32) -> (i32, i32) {
    %c0_i32 = arith.constant 0 : i32
    %c0_i32_0 = arith.constant 0 : i32
    return %arg0, %c0_i32 : i32, i32
  }
}

module attributes {stable_mosaic.version = 11 : i64} {
  func.func @_conv_matmul_kernel(%arg0: i32, %arg1: i32, %arg2: i32, %arg3: memref<512x256xbf16, #tpu.memory_space<vmem>>, %arg4: memref<256x128xbf16, #tpu.memory_space<vmem>>, %arg5: memref<1x128xf32, #tpu.memory_space<vmem>>, %arg6: memref<512x128xbf16, #tpu.memory_space<vmem>>, %arg7: memref<512x128xf32, #tpu.memory_space<vmem>>) attributes {dimension_semantics = [#tpu.dimension_semantics<parallel>, #tpu.dimension_semantics<parallel>, #tpu.dimension_semantics<arbitrary>], iteration_bounds = array<i64: 1, 1, 1>, scalar_prefetch = 0 : i64, scratch_operands = 1 : i64, tpu.core_type = #tpu.core_type<tc>, window_params = [{transform_indices = @transform_0, window_bounds = array<i64: 512, 256>}, {transform_indices = @transform_1, window_bounds = array<i64: 256, 128>}, {transform_indices = @transform_2, window_bounds = array<i64: 1, 128>}, {transform_indices = @transform_3, window_bounds = array<i64: 512, 128>}]} {
    %c0_i32 = arith.constant 0 : i32
    %0 = arith.cmpi eq, %arg2, %c0_i32 : i32
    %1 = arith.extui %0 : i1 to i32
    %c0_i32_0 = arith.constant 0 : i32
    %2 = arith.cmpi ne, %1, %c0_i32_0 : i32
    scf.if %2 {
      %cst_10 = arith.constant 0.000000e+00 : f32
      %12 = vector.broadcast %cst_10 : f32 to vector<512x128xf32>
      %c0_11 = arith.constant 0 : index
      %c0_12 = arith.constant 0 : index
      %13 = vector.load %arg7[%c0_11, %c0_12] : memref<512x128xf32, #tpu.memory_space<vmem>>, vector<512x128xf32>
      tpu.vector_store %arg7[%c0_11, %c0_12], %12 {strides = array<i32>} : memref<512x128xf32, #tpu.memory_space<vmem>>, vector<512x128xf32>,
    } else {
    }
    %c0 = arith.constant 0 : index
    %c0_1 = arith.constant 0 : index
    %3 = vector.load %arg7[%c0, %c0_1] : memref<512x128xf32, #tpu.memory_space<vmem>>, vector<512x128xf32>
    %c0_2 = arith.constant 0 : index
    %c0_3 = arith.constant 0 : index
    %4 = vector.load %arg3[%c0_2, %c0_3] : memref<512x256xbf16, #tpu.memory_space<vmem>>, vector<512x256xbf16>
    %c0_4 = arith.constant 0 : index
    %c0_5 = arith.constant 0 : index
    %5 = vector.load %arg4[%c0_4, %c0_5] : memref<256x128xbf16, #tpu.memory_space<vmem>>, vector<256x128xbf16>
    %cst = arith.constant dense<0.000000e+00> : vector<512x128xf32>
    %6 = tpu.matmul %4, %5, %cst {dimension_numbers = #tpu.dot_dimension_numbers<[1], [0], [0], [1], [0, 0, 1, 1], [], []>} : vector<512x256xbf16>, vector<256x128xbf16>, vector<512x128xf32> -> vector<512x128xf32>
    %7 = arith.addf %3, %6 : vector<512x128xf32>
    %c0_6 = arith.constant 0 : index
    %c0_7 = arith.constant 0 : index
    %8 = vector.load %arg7[%c0_6, %c0_7] : memref<512x128xf32, #tpu.memory_space<vmem>>, vector<512x128xf32>
    tpu.vector_store %arg7[%c0_6, %c0_7], %7 {strides = array<i32>} : memref<512x128xf32, #tpu.memory_space<vmem>>, vector<512x128xf32>,
    %c0_i32_8 = arith.constant 0 : i32
    %9 = arith.cmpi eq, %arg2, %c0_i32_8 : i32
    %10 = arith.extui %9 : i1 to i32
    %c0_i32_9 = arith.constant 0 : i32
    %11 = arith.cmpi ne, %10, %c0_i32_9 : i32
    scf.if %11 {
      %c0_10 = arith.constant 0 : index
      %c0_11 = arith.constant 0 : index
      %12 = vector.load %arg7[%c0_10, %c0_11] : memref<512x128xf32, #tpu.memory_space<vmem>>, vector<512x128xf32>
      %c0_12 = arith.constant 0 : index
      %c0_13 = arith.constant 0 : index
      %13 = vector.load %arg5[%c0_12, %c0_13] : memref<1x128xf32, #tpu.memory_space<vmem>>, vector<1x128xf32>
      %14 = vector.broadcast %13 : vector<1x128xf32> to vector<512x128xf32>
      %15 = arith.addf %12, %14 : vector<512x128xf32>
      %cst_14 = arith.constant 0.000000e+00 : f32
      %16 = vector.broadcast %cst_14 : f32 to vector<512x128xf32>
      %17 = arith.maximumf %15, %16 : vector<512x128xf32>
      %18 = arith.truncf %17 : vector<512x128xf32> to vector<512x128xbf16>
      %c0_15 = arith.constant 0 : index
      %c0_16 = arith.constant 0 : index
      %19 = vector.load %arg6[%c0_15, %c0_16] : memref<512x128xbf16, #tpu.memory_space<vmem>>, vector<512x128xbf16>
      tpu.vector_store %arg6[%c0_15, %c0_16], %18 {strides = array<i32>} : memref<512x128xbf16, #tpu.memory_space<vmem>>, vector<512x128xbf16>,
    } else {
    }
    return
  }
  func.func @transform_0(%arg0: i32, %arg1: i32, %arg2: i32) -> (i32, i32) {
    %c0_i32 = arith.constant 0 : i32
    return %arg0, %arg2 : i32, i32
  }
  func.func @transform_1(%arg0: i32, %arg1: i32, %arg2: i32) -> (i32, i32) {
    %c0_i32 = arith.constant 0 : i32
    return %arg2, %arg1 : i32, i32
  }
  func.func @transform_2(%arg0: i32, %arg1: i32, %arg2: i32) -> (i32, i32) {
    %c0_i32 = arith.constant 0 : i32
    %c0_i32_0 = arith.constant 0 : i32
    return %c0_i32, %arg1 : i32, i32
  }
  func.func @transform_3(%arg0: i32, %arg1: i32, %arg2: i32) -> (i32, i32) {
    %c0_i32 = arith.constant 0 : i32
    return %arg0, %arg1 : i32, i32
  }
}

module attributes {stable_mosaic.version = 11 : i64} {
  func.func @_l1_partial_kernel(%arg0: i32, %arg1: memref<128x128xbf16, #tpu.memory_space<vmem>>, %arg2: memref<128x128xbf16, #tpu.memory_space<vmem>>, %arg3: memref<128x128xf32, #tpu.memory_space<vmem>>, %arg4: memref<128x128xf32, #tpu.memory_space<vmem>>) attributes {dimension_semantics = [#tpu.dimension_semantics<arbitrary>], iteration_bounds = array<i64: 1>, scalar_prefetch = 0 : i64, scratch_operands = 1 : i64, tpu.core_type = #tpu.core_type<tc>, window_params = [{transform_indices = @transform_0, window_bounds = array<i64: 128, 128>}, {transform_indices = @transform_1, window_bounds = array<i64: 128, 128>}, {pipeline_mode = #tpu.pipeline_mode<synchronous>, transform_indices = @transform_2, window_bounds = array<i64: 128, 128>}]} {
    %c0_i32 = arith.constant 0 : i32
    %0 = arith.cmpi eq, %arg0, %c0_i32 : i32
    %1 = arith.extui %0 : i1 to i32
    %c0_i32_0 = arith.constant 0 : i32
    %2 = arith.cmpi ne, %1, %c0_i32_0 : i32
    scf.if %2 {
      %cst = arith.constant 0.000000e+00 : f32
      %15 = vector.broadcast %cst : f32 to vector<128x128xf32>
      %c0_10 = arith.constant 0 : index
      %c0_11 = arith.constant 0 : index
      %16 = vector.load %arg4[%c0_10, %c0_11] : memref<128x128xf32, #tpu.memory_space<vmem>>, vector<128x128xf32>
      tpu.vector_store %arg4[%c0_10, %c0_11], %15 {strides = array<i32>} : memref<128x128xf32, #tpu.memory_space<vmem>>, vector<128x128xf32>,
    } else {
    }
    %c0 = arith.constant 0 : index
    %c0_1 = arith.constant 0 : index
    %3 = vector.load %arg1[%c0, %c0_1] : memref<128x128xbf16, #tpu.memory_space<vmem>>, vector<128x128xbf16>
    %4 = arith.extf %3 : vector<128x128xbf16> to vector<128x128xf32>
    %c0_2 = arith.constant 0 : index
    %c0_3 = arith.constant 0 : index
    %5 = vector.load %arg2[%c0_2, %c0_3] : memref<128x128xbf16, #tpu.memory_space<vmem>>, vector<128x128xbf16>
    %6 = arith.extf %5 : vector<128x128xbf16> to vector<128x128xf32>
    %7 = arith.subf %4, %6 : vector<128x128xf32>
    %c0_4 = arith.constant 0 : index
    %c0_5 = arith.constant 0 : index
    %8 = vector.load %arg4[%c0_4, %c0_5] : memref<128x128xf32, #tpu.memory_space<vmem>>, vector<128x128xf32>
    %9 = math.absf %7 : vector<128x128xf32>
    %10 = arith.addf %8, %9 : vector<128x128xf32>
    %c0_6 = arith.constant 0 : index
    %c0_7 = arith.constant 0 : index
    %11 = vector.load %arg4[%c0_6, %c0_7] : memref<128x128xf32, #tpu.memory_space<vmem>>, vector<128x128xf32>
    tpu.vector_store %arg4[%c0_6, %c0_7], %10 {strides = array<i32>} : memref<128x128xf32, #tpu.memory_space<vmem>>, vector<128x128xf32>,
    %c0_i32_8 = arith.constant 0 : i32
    %12 = arith.cmpi eq, %arg0, %c0_i32_8 : i32
    %13 = arith.extui %12 : i1 to i32
    %c0_i32_9 = arith.constant 0 : i32
    %14 = arith.cmpi ne, %13, %c0_i32_9 : i32
    scf.if %14 {
      %c0_10 = arith.constant 0 : index
      %c0_11 = arith.constant 0 : index
      %15 = vector.load %arg4[%c0_10, %c0_11] : memref<128x128xf32, #tpu.memory_space<vmem>>, vector<128x128xf32>
      %c0_12 = arith.constant 0 : index
      %c0_13 = arith.constant 0 : index
      %16 = vector.load %arg3[%c0_12, %c0_13] : memref<128x128xf32, #tpu.memory_space<vmem>>, vector<128x128xf32>
      tpu.vector_store %arg3[%c0_12, %c0_13], %15 {strides = array<i32>} : memref<128x128xf32, #tpu.memory_space<vmem>>, vector<128x128xf32>,
    } else {
    }
    return
  }
  func.func @transform_0(%arg0: i32) -> (i32, i32) {
    %c0_i32 = arith.constant 0 : i32
    %c0_i32_0 = arith.constant 0 : i32
    return %arg0, %c0_i32 : i32, i32
  }
  func.func @transform_1(%arg0: i32) -> (i32, i32) {
    %c0_i32 = arith.constant 0 : i32
    %c0_i32_0 = arith.constant 0 : i32
    return %arg0, %c0_i32 : i32, i32
  }
  func.func @transform_2(%arg0: i32) -> (i32, i32) {
    %c0_i32 = arith.constant 0 : i32
    %c0_i32_0 = arith.constant 0 : i32
    %c0_i32_1 = arith.constant 0 : i32
    return %c0_i32, %c0_i32_0 : i32, i32
  }
}

module attributes {stable_mosaic.version = 11 : i64} {
  func.func @_conv_matmul_kernel(%arg0: i32, %arg1: i32, %arg2: i32, %arg3: memref<512x384xbf16, #tpu.memory_space<vmem>>, %arg4: memref<384x128xbf16, #tpu.memory_space<vmem>>, %arg5: memref<1x128xf32, #tpu.memory_space<vmem>>, %arg6: memref<512x128xbf16, #tpu.memory_space<vmem>>, %arg7: memref<512x128xf32, #tpu.memory_space<vmem>>) attributes {dimension_semantics = [#tpu.dimension_semantics<parallel>, #tpu.dimension_semantics<parallel>, #tpu.dimension_semantics<arbitrary>], iteration_bounds = array<i64: 1, 1, 1>, scalar_prefetch = 0 : i64, scratch_operands = 1 : i64, tpu.core_type = #tpu.core_type<tc>, window_params = [{transform_indices = @transform_0, window_bounds = array<i64: 512, 384>}, {transform_indices = @transform_1, window_bounds = array<i64: 384, 128>}, {transform_indices = @transform_2, window_bounds = array<i64: 1, 128>}, {transform_indices = @transform_3, window_bounds = array<i64: 512, 128>}]} {
    %c0_i32 = arith.constant 0 : i32
    %0 = arith.cmpi eq, %arg2, %c0_i32 : i32
    %1 = arith.extui %0 : i1 to i32
    %c0_i32_0 = arith.constant 0 : i32
    %2 = arith.cmpi ne, %1, %c0_i32_0 : i32
    scf.if %2 {
      %cst_10 = arith.constant 0.000000e+00 : f32
      %12 = vector.broadcast %cst_10 : f32 to vector<512x128xf32>
      %c0_11 = arith.constant 0 : index
      %c0_12 = arith.constant 0 : index
      %13 = vector.load %arg7[%c0_11, %c0_12] : memref<512x128xf32, #tpu.memory_space<vmem>>, vector<512x128xf32>
      tpu.vector_store %arg7[%c0_11, %c0_12], %12 {strides = array<i32>} : memref<512x128xf32, #tpu.memory_space<vmem>>, vector<512x128xf32>,
    } else {
    }
    %c0 = arith.constant 0 : index
    %c0_1 = arith.constant 0 : index
    %3 = vector.load %arg7[%c0, %c0_1] : memref<512x128xf32, #tpu.memory_space<vmem>>, vector<512x128xf32>
    %c0_2 = arith.constant 0 : index
    %c0_3 = arith.constant 0 : index
    %4 = vector.load %arg3[%c0_2, %c0_3] : memref<512x384xbf16, #tpu.memory_space<vmem>>, vector<512x384xbf16>
    %c0_4 = arith.constant 0 : index
    %c0_5 = arith.constant 0 : index
    %5 = vector.load %arg4[%c0_4, %c0_5] : memref<384x128xbf16, #tpu.memory_space<vmem>>, vector<384x128xbf16>
    %cst = arith.constant dense<0.000000e+00> : vector<512x128xf32>
    %6 = tpu.matmul %4, %5, %cst {dimension_numbers = #tpu.dot_dimension_numbers<[1], [0], [0], [1], [0, 0, 1, 1], [], []>} : vector<512x384xbf16>, vector<384x128xbf16>, vector<512x128xf32> -> vector<512x128xf32>
    %7 = arith.addf %3, %6 : vector<512x128xf32>
    %c0_6 = arith.constant 0 : index
    %c0_7 = arith.constant 0 : index
    %8 = vector.load %arg7[%c0_6, %c0_7] : memref<512x128xf32, #tpu.memory_space<vmem>>, vector<512x128xf32>
    tpu.vector_store %arg7[%c0_6, %c0_7], %7 {strides = array<i32>} : memref<512x128xf32, #tpu.memory_space<vmem>>, vector<512x128xf32>,
    %c0_i32_8 = arith.constant 0 : i32
    %9 = arith.cmpi eq, %arg2, %c0_i32_8 : i32
    %10 = arith.extui %9 : i1 to i32
    %c0_i32_9 = arith.constant 0 : i32
    %11 = arith.cmpi ne, %10, %c0_i32_9 : i32
    scf.if %11 {
      %c0_10 = arith.constant 0 : index
      %c0_11 = arith.constant 0 : index
      %12 = vector.load %arg7[%c0_10, %c0_11] : memref<512x128xf32, #tpu.memory_space<vmem>>, vector<512x128xf32>
      %c0_12 = arith.constant 0 : index
      %c0_13 = arith.constant 0 : index
      %13 = vector.load %arg5[%c0_12, %c0_13] : memref<1x128xf32, #tpu.memory_space<vmem>>, vector<1x128xf32>
      %14 = vector.broadcast %13 : vector<1x128xf32> to vector<512x128xf32>
      %15 = arith.addf %12, %14 : vector<512x128xf32>
      %cst_14 = arith.constant 0.000000e+00 : f32
      %16 = vector.broadcast %cst_14 : f32 to vector<512x128xf32>
      %17 = arith.maximumf %15, %16 : vector<512x128xf32>
      %18 = arith.truncf %17 : vector<512x128xf32> to vector<512x128xbf16>
      %c0_15 = arith.constant 0 : index
      %c0_16 = arith.constant 0 : index
      %19 = vector.load %arg6[%c0_15, %c0_16] : memref<512x128xbf16, #tpu.memory_space<vmem>>, vector<512x128xbf16>
      tpu.vector_store %arg6[%c0_15, %c0_16], %18 {strides = array<i32>} : memref<512x128xbf16, #tpu.memory_space<vmem>>, vector<512x128xbf16>,
    } else {
    }
    return
  }
  func.func @transform_0(%arg0: i32, %arg1: i32, %arg2: i32) -> (i32, i32) {
    %c0_i32 = arith.constant 0 : i32
    return %arg0, %arg2 : i32, i32
  }
  func.func @transform_1(%arg0: i32, %arg1: i32, %arg2: i32) -> (i32, i32) {
    %c0_i32 = arith.constant 0 : i32
    return %arg2, %arg1 : i32, i32
  }
  func.func @transform_2(%arg0: i32, %arg1: i32, %arg2: i32) -> (i32, i32) {
    %c0_i32 = arith.constant 0 : i32
    %c0_i32_0 = arith.constant 0 : i32
    return %c0_i32, %arg1 : i32, i32
  }
  func.func @transform_3(%arg0: i32, %arg1: i32, %arg2: i32) -> (i32, i32) {
    %c0_i32 = arith.constant 0 : i32
    return %arg0, %arg1 : i32, i32
  }
}

module attributes {stable_mosaic.version = 11 : i64} {
  func.func @_max4_kernel(%arg0: i32, %arg1: memref<128x32xbf16, #tpu.memory_space<vmem>>, %arg2: memref<128x32xbf16, #tpu.memory_space<vmem>>, %arg3: memref<128x32xbf16, #tpu.memory_space<vmem>>, %arg4: memref<128x32xbf16, #tpu.memory_space<vmem>>, %arg5: memref<128x32xbf16, #tpu.memory_space<vmem>>) attributes {dimension_semantics = [#tpu.dimension_semantics<parallel>], iteration_bounds = array<i64: 1>, scalar_prefetch = 0 : i64, scratch_operands = 0 : i64, tpu.core_type = #tpu.core_type<tc>, window_params = [{transform_indices = @transform_0, window_bounds = array<i64: 128, 32>}, {transform_indices = @transform_1, window_bounds = array<i64: 128, 32>}, {transform_indices = @transform_2, window_bounds = array<i64: 128, 32>}, {transform_indices = @transform_3, window_bounds = array<i64: 128, 32>}, {transform_indices = @transform_4, window_bounds = array<i64: 128, 32>}]} {
    %c0 = arith.constant 0 : index
    %c0_0 = arith.constant 0 : index
    %0 = vector.load %arg1[%c0, %c0_0] : memref<128x32xbf16, #tpu.memory_space<vmem>>, vector<128x32xbf16>
    %c0_1 = arith.constant 0 : index
    %c0_2 = arith.constant 0 : index
    %1 = vector.load %arg2[%c0_1, %c0_2] : memref<128x32xbf16, #tpu.memory_space<vmem>>, vector<128x32xbf16>
    %2 = arith.maximumf %0, %1 : vector<128x32xbf16>
    %c0_3 = arith.constant 0 : index
    %c0_4 = arith.constant 0 : index
    %3 = vector.load %arg3[%c0_3, %c0_4] : memref<128x32xbf16, #tpu.memory_space<vmem>>, vector<128x32xbf16>
    %c0_5 = arith.constant 0 : index
    %c0_6 = arith.constant 0 : index
    %4 = vector.load %arg4[%c0_5, %c0_6] : memref<128x32xbf16, #tpu.memory_space<vmem>>, vector<128x32xbf16>
    %5 = arith.maximumf %3, %4 : vector<128x32xbf16>
    %6 = arith.maximumf %2, %5 : vector<128x32xbf16>
    %c0_7 = arith.constant 0 : index
    %c0_8 = arith.constant 0 : index
    %7 = vector.load %arg5[%c0_7, %c0_8] : memref<128x32xbf16, #tpu.memory_space<vmem>>, vector<128x32xbf16>
    tpu.vector_store %arg5[%c0_7, %c0_8], %6 {strides = array<i32>} : memref<128x32xbf16, #tpu.memory_space<vmem>>, vector<128x32xbf16>,
    return
  }
  func.func @transform_0(%arg0: i32) -> (i32, i32) {
    %c0_i32 = arith.constant 0 : i32
    %c0_i32_0 = arith.constant 0 : i32
    return %arg0, %c0_i32 : i32, i32
  }
  func.func @transform_1(%arg0: i32) -> (i32, i32) {
    %c0_i32 = arith.constant 0 : i32
    %c0_i32_0 = arith.constant 0 : i32
    return %arg0, %c0_i32 : i32, i32
  }
  func.func @transform_2(%arg0: i32) -> (i32, i32) {
    %c0_i32 = arith.constant 0 : i32
    %c0_i32_0 = arith.constant 0 : i32
    return %arg0, %c0_i32 : i32, i32
  }
  func.func @transform_3(%arg0: i32) -> (i32, i32) {
    %c0_i32 = arith.constant 0 : i32
    %c0_i32_0 = arith.constant 0 : i32
    return %arg0, %c0_i32 : i32, i32
  }
  func.func @transform_4(%arg0: i32) -> (i32, i32) {
    %c0_i32 = arith.constant 0 : i32
    %c0_i32_0 = arith.constant 0 : i32
    return %arg0, %c0_i32 : i32, i32
  }
}

module attributes {stable_mosaic.version = 11 : i64} {
  func.func @_conv_matmul_kernel(%arg0: i32, %arg1: i32, %arg2: i32, %arg3: memref<128x384xbf16, #tpu.memory_space<vmem>>, %arg4: memref<384x128xbf16, #tpu.memory_space<vmem>>, %arg5: memref<1x128xf32, #tpu.memory_space<vmem>>, %arg6: memref<128x128xbf16, #tpu.memory_space<vmem>>, %arg7: memref<128x128xf32, #tpu.memory_space<vmem>>) attributes {dimension_semantics = [#tpu.dimension_semantics<parallel>, #tpu.dimension_semantics<parallel>, #tpu.dimension_semantics<arbitrary>], iteration_bounds = array<i64: 1, 1, 1>, scalar_prefetch = 0 : i64, scratch_operands = 1 : i64, tpu.core_type = #tpu.core_type<tc>, window_params = [{transform_indices = @transform_0, window_bounds = array<i64: 128, 384>}, {transform_indices = @transform_1, window_bounds = array<i64: 384, 128>}, {transform_indices = @transform_2, window_bounds = array<i64: 1, 128>}, {transform_indices = @transform_3, window_bounds = array<i64: 128, 128>}]} {
    %c0_i32 = arith.constant 0 : i32
    %0 = arith.cmpi eq, %arg2, %c0_i32 : i32
    %1 = arith.extui %0 : i1 to i32
    %c0_i32_0 = arith.constant 0 : i32
    %2 = arith.cmpi ne, %1, %c0_i32_0 : i32
    scf.if %2 {
      %cst_10 = arith.constant 0.000000e+00 : f32
      %12 = vector.broadcast %cst_10 : f32 to vector<128x128xf32>
      %c0_11 = arith.constant 0 : index
      %c0_12 = arith.constant 0 : index
      %13 = vector.load %arg7[%c0_11, %c0_12] : memref<128x128xf32, #tpu.memory_space<vmem>>, vector<128x128xf32>
      tpu.vector_store %arg7[%c0_11, %c0_12], %12 {strides = array<i32>} : memref<128x128xf32, #tpu.memory_space<vmem>>, vector<128x128xf32>,
    } else {
    }
    %c0 = arith.constant 0 : index
    %c0_1 = arith.constant 0 : index
    %3 = vector.load %arg7[%c0, %c0_1] : memref<128x128xf32, #tpu.memory_space<vmem>>, vector<128x128xf32>
    %c0_2 = arith.constant 0 : index
    %c0_3 = arith.constant 0 : index
    %4 = vector.load %arg3[%c0_2, %c0_3] : memref<128x384xbf16, #tpu.memory_space<vmem>>, vector<128x384xbf16>
    %c0_4 = arith.constant 0 : index
    %c0_5 = arith.constant 0 : index
    %5 = vector.load %arg4[%c0_4, %c0_5] : memref<384x128xbf16, #tpu.memory_space<vmem>>, vector<384x128xbf16>
    %cst = arith.constant dense<0.000000e+00> : vector<128x128xf32>
    %6 = tpu.matmul %4, %5, %cst {dimension_numbers = #tpu.dot_dimension_numbers<[1], [0], [0], [1], [0, 0, 1, 1], [], []>} : vector<128x384xbf16>, vector<384x128xbf16>, vector<128x128xf32> -> vector<128x128xf32>
    %7 = arith.addf %3, %6 : vector<128x128xf32>
    %c0_6 = arith.constant 0 : index
    %c0_7 = arith.constant 0 : index
    %8 = vector.load %arg7[%c0_6, %c0_7] : memref<128x128xf32, #tpu.memory_space<vmem>>, vector<128x128xf32>
    tpu.vector_store %arg7[%c0_6, %c0_7], %7 {strides = array<i32>} : memref<128x128xf32, #tpu.memory_space<vmem>>, vector<128x128xf32>,
    %c0_i32_8 = arith.constant 0 : i32
    %9 = arith.cmpi eq, %arg2, %c0_i32_8 : i32
    %10 = arith.extui %9 : i1 to i32
    %c0_i32_9 = arith.constant 0 : i32
    %11 = arith.cmpi ne, %10, %c0_i32_9 : i32
    scf.if %11 {
      %c0_10 = arith.constant 0 : index
      %c0_11 = arith.constant 0 : index
      %12 = vector.load %arg7[%c0_10, %c0_11] : memref<128x128xf32, #tpu.memory_space<vmem>>, vector<128x128xf32>
      %c0_12 = arith.constant 0 : index
      %c0_13 = arith.constant 0 : index
      %13 = vector.load %arg5[%c0_12, %c0_13] : memref<1x128xf32, #tpu.memory_space<vmem>>, vector<1x128xf32>
      %14 = vector.broadcast %13 : vector<1x128xf32> to vector<128x128xf32>
      %15 = arith.addf %12, %14 : vector<128x128xf32>
      %cst_14 = arith.constant 0.000000e+00 : f32
      %16 = vector.broadcast %cst_14 : f32 to vector<128x128xf32>
      %17 = arith.maximumf %15, %16 : vector<128x128xf32>
      %18 = arith.truncf %17 : vector<128x128xf32> to vector<128x128xbf16>
      %c0_15 = arith.constant 0 : index
      %c0_16 = arith.constant 0 : index
      %19 = vector.load %arg6[%c0_15, %c0_16] : memref<128x128xbf16, #tpu.memory_space<vmem>>, vector<128x128xbf16>
      tpu.vector_store %arg6[%c0_15, %c0_16], %18 {strides = array<i32>} : memref<128x128xbf16, #tpu.memory_space<vmem>>, vector<128x128xbf16>,
    } else {
    }
    return
  }
  func.func @transform_0(%arg0: i32, %arg1: i32, %arg2: i32) -> (i32, i32) {
    %c0_i32 = arith.constant 0 : i32
    return %arg0, %arg2 : i32, i32
  }
  func.func @transform_1(%arg0: i32, %arg1: i32, %arg2: i32) -> (i32, i32) {
    %c0_i32 = arith.constant 0 : i32
    return %arg2, %arg1 : i32, i32
  }
  func.func @transform_2(%arg0: i32, %arg1: i32, %arg2: i32) -> (i32, i32) {
    %c0_i32 = arith.constant 0 : i32
    %c0_i32_0 = arith.constant 0 : i32
    return %c0_i32, %arg1 : i32, i32
  }
  func.func @transform_3(%arg0: i32, %arg1: i32, %arg2: i32) -> (i32, i32) {
    %c0_i32 = arith.constant 0 : i32
    return %arg0, %arg1 : i32, i32
  }
}

module attributes {stable_mosaic.version = 11 : i64} {
  func.func @_l1_partial_kernel(%arg0: i32, %arg1: memref<64x128xbf16, #tpu.memory_space<vmem>>, %arg2: memref<64x128xbf16, #tpu.memory_space<vmem>>, %arg3: memref<64x128xf32, #tpu.memory_space<vmem>>, %arg4: memref<64x128xf32, #tpu.memory_space<vmem>>) attributes {dimension_semantics = [#tpu.dimension_semantics<arbitrary>], iteration_bounds = array<i64: 1>, scalar_prefetch = 0 : i64, scratch_operands = 1 : i64, tpu.core_type = #tpu.core_type<tc>, window_params = [{transform_indices = @transform_0, window_bounds = array<i64: 64, 128>}, {transform_indices = @transform_1, window_bounds = array<i64: 64, 128>}, {pipeline_mode = #tpu.pipeline_mode<synchronous>, transform_indices = @transform_2, window_bounds = array<i64: 64, 128>}]} {
    %c0_i32 = arith.constant 0 : i32
    %0 = arith.cmpi eq, %arg0, %c0_i32 : i32
    %1 = arith.extui %0 : i1 to i32
    %c0_i32_0 = arith.constant 0 : i32
    %2 = arith.cmpi ne, %1, %c0_i32_0 : i32
    scf.if %2 {
      %cst = arith.constant 0.000000e+00 : f32
      %15 = vector.broadcast %cst : f32 to vector<64x128xf32>
      %c0_10 = arith.constant 0 : index
      %c0_11 = arith.constant 0 : index
      %16 = vector.load %arg4[%c0_10, %c0_11] : memref<64x128xf32, #tpu.memory_space<vmem>>, vector<64x128xf32>
      tpu.vector_store %arg4[%c0_10, %c0_11], %15 {strides = array<i32>} : memref<64x128xf32, #tpu.memory_space<vmem>>, vector<64x128xf32>,
    } else {
    }
    %c0 = arith.constant 0 : index
    %c0_1 = arith.constant 0 : index
    %3 = vector.load %arg1[%c0, %c0_1] : memref<64x128xbf16, #tpu.memory_space<vmem>>, vector<64x128xbf16>
    %4 = arith.extf %3 : vector<64x128xbf16> to vector<64x128xf32>
    %c0_2 = arith.constant 0 : index
    %c0_3 = arith.constant 0 : index
    %5 = vector.load %arg2[%c0_2, %c0_3] : memref<64x128xbf16, #tpu.memory_space<vmem>>, vector<64x128xbf16>
    %6 = arith.extf %5 : vector<64x128xbf16> to vector<64x128xf32>
    %7 = arith.subf %4, %6 : vector<64x128xf32>
    %c0_4 = arith.constant 0 : index
    %c0_5 = arith.constant 0 : index
    %8 = vector.load %arg4[%c0_4, %c0_5] : memref<64x128xf32, #tpu.memory_space<vmem>>, vector<64x128xf32>
    %9 = math.absf %7 : vector<64x128xf32>
    %10 = arith.addf %8, %9 : vector<64x128xf32>
    %c0_6 = arith.constant 0 : index
    %c0_7 = arith.constant 0 : index
    %11 = vector.load %arg4[%c0_6, %c0_7] : memref<64x128xf32, #tpu.memory_space<vmem>>, vector<64x128xf32>
    tpu.vector_store %arg4[%c0_6, %c0_7], %10 {strides = array<i32>} : memref<64x128xf32, #tpu.memory_space<vmem>>, vector<64x128xf32>,
    %c0_i32_8 = arith.constant 0 : i32
    %12 = arith.cmpi eq, %arg0, %c0_i32_8 : i32
    %13 = arith.extui %12 : i1 to i32
    %c0_i32_9 = arith.constant 0 : i32
    %14 = arith.cmpi ne, %13, %c0_i32_9 : i32
    scf.if %14 {
      %c0_10 = arith.constant 0 : index
      %c0_11 = arith.constant 0 : index
      %15 = vector.load %arg4[%c0_10, %c0_11] : memref<64x128xf32, #tpu.memory_space<vmem>>, vector<64x128xf32>
      %c0_12 = arith.constant 0 : index
      %c0_13 = arith.constant 0 : index
      %16 = vector.load %arg3[%c0_12, %c0_13] : memref<64x128xf32, #tpu.memory_space<vmem>>, vector<64x128xf32>
      tpu.vector_store %arg3[%c0_12, %c0_13], %15 {strides = array<i32>} : memref<64x128xf32, #tpu.memory_space<vmem>>, vector<64x128xf32>,
    } else {
    }
    return
  }
  func.func @transform_0(%arg0: i32) -> (i32, i32) {
    %c0_i32 = arith.constant 0 : i32
    %c0_i32_0 = arith.constant 0 : i32
    return %arg0, %c0_i32 : i32, i32
  }
  func.func @transform_1(%arg0: i32) -> (i32, i32) {
    %c0_i32 = arith.constant 0 : i32
    %c0_i32_0 = arith.constant 0 : i32
    return %arg0, %c0_i32 : i32, i32
  }
  func.func @transform_2(%arg0: i32) -> (i32, i32) {
    %c0_i32 = arith.constant 0 : i32
    %c0_i32_0 = arith.constant 0 : i32
    %c0_i32_1 = arith.constant 0 : i32
    return %c0_i32, %c0_i32_0 : i32, i32
  }
}

module attributes {stable_mosaic.version = 11 : i64} {
  func.func @_conv_matmul_kernel(%arg0: i32, %arg1: i32, %arg2: i32, %arg3: memref<128x128xbf16, #tpu.memory_space<vmem>>, %arg4: memref<128x128xbf16, #tpu.memory_space<vmem>>, %arg5: memref<1x128xf32, #tpu.memory_space<vmem>>, %arg6: memref<128x128xbf16, #tpu.memory_space<vmem>>, %arg7: memref<128x128xf32, #tpu.memory_space<vmem>>) attributes {dimension_semantics = [#tpu.dimension_semantics<parallel>, #tpu.dimension_semantics<parallel>, #tpu.dimension_semantics<arbitrary>], iteration_bounds = array<i64: 1, 1, 5>, scalar_prefetch = 0 : i64, scratch_operands = 1 : i64, tpu.core_type = #tpu.core_type<tc>, window_params = [{transform_indices = @transform_0, window_bounds = array<i64: 128, 128>}, {transform_indices = @transform_1, window_bounds = array<i64: 128, 128>}, {transform_indices = @transform_2, window_bounds = array<i64: 1, 128>}, {transform_indices = @transform_3, window_bounds = array<i64: 128, 128>}]} {
    %c0_i32 = arith.constant 0 : i32
    %0 = arith.cmpi eq, %arg2, %c0_i32 : i32
    %1 = arith.extui %0 : i1 to i32
    %c0_i32_0 = arith.constant 0 : i32
    %2 = arith.cmpi ne, %1, %c0_i32_0 : i32
    scf.if %2 {
      %cst_9 = arith.constant 0.000000e+00 : f32
      %12 = vector.broadcast %cst_9 : f32 to vector<128x128xf32>
      %c0_10 = arith.constant 0 : index
      %c0_11 = arith.constant 0 : index
      %13 = vector.load %arg7[%c0_10, %c0_11] : memref<128x128xf32, #tpu.memory_space<vmem>>, vector<128x128xf32>
      tpu.vector_store %arg7[%c0_10, %c0_11], %12 {strides = array<i32>} : memref<128x128xf32, #tpu.memory_space<vmem>>, vector<128x128xf32>,
    } else {
    }
    %c0 = arith.constant 0 : index
    %c0_1 = arith.constant 0 : index
    %3 = vector.load %arg7[%c0, %c0_1] : memref<128x128xf32, #tpu.memory_space<vmem>>, vector<128x128xf32>
    %c0_2 = arith.constant 0 : index
    %c0_3 = arith.constant 0 : index
    %4 = vector.load %arg3[%c0_2, %c0_3] : memref<128x128xbf16, #tpu.memory_space<vmem>>, vector<128x128xbf16>
    %c0_4 = arith.constant 0 : index
    %c0_5 = arith.constant 0 : index
    %5 = vector.load %arg4[%c0_4, %c0_5] : memref<128x128xbf16, #tpu.memory_space<vmem>>, vector<128x128xbf16>
    %cst = arith.constant dense<0.000000e+00> : vector<128x128xf32>
    %6 = tpu.matmul %4, %5, %cst {dimension_numbers = #tpu.dot_dimension_numbers<[1], [0], [0], [1], [0, 0, 1, 1], [], []>} : vector<128x128xbf16>, vector<128x128xbf16>, vector<128x128xf32> -> vector<128x128xf32>
    %7 = arith.addf %3, %6 : vector<128x128xf32>
    %c0_6 = arith.constant 0 : index
    %c0_7 = arith.constant 0 : index
    %8 = vector.load %arg7[%c0_6, %c0_7] : memref<128x128xf32, #tpu.memory_space<vmem>>, vector<128x128xf32>
    tpu.vector_store %arg7[%c0_6, %c0_7], %7 {strides = array<i32>} : memref<128x128xf32, #tpu.memory_space<vmem>>, vector<128x128xf32>,
    %c4_i32 = arith.constant 4 : i32
    %9 = arith.cmpi eq, %arg2, %c4_i32 : i32
    %10 = arith.extui %9 : i1 to i32
    %c0_i32_8 = arith.constant 0 : i32
    %11 = arith.cmpi ne, %10, %c0_i32_8 : i32
    scf.if %11 {
      %c0_9 = arith.constant 0 : index
      %c0_10 = arith.constant 0 : index
      %12 = vector.load %arg7[%c0_9, %c0_10] : memref<128x128xf32, #tpu.memory_space<vmem>>, vector<128x128xf32>
      %c0_11 = arith.constant 0 : index
      %c0_12 = arith.constant 0 : index
      %13 = vector.load %arg5[%c0_11, %c0_12] : memref<1x128xf32, #tpu.memory_space<vmem>>, vector<1x128xf32>
      %14 = vector.broadcast %13 : vector<1x128xf32> to vector<128x128xf32>
      %15 = arith.addf %12, %14 : vector<128x128xf32>
      %cst_13 = arith.constant 0.000000e+00 : f32
      %16 = vector.broadcast %cst_13 : f32 to vector<128x128xf32>
      %17 = arith.maximumf %15, %16 : vector<128x128xf32>
      %18 = arith.truncf %17 : vector<128x128xf32> to vector<128x128xbf16>
      %c0_14 = arith.constant 0 : index
      %c0_15 = arith.constant 0 : index
      %19 = vector.load %arg6[%c0_14, %c0_15] : memref<128x128xbf16, #tpu.memory_space<vmem>>, vector<128x128xbf16>
      tpu.vector_store %arg6[%c0_14, %c0_15], %18 {strides = array<i32>} : memref<128x128xbf16, #tpu.memory_space<vmem>>, vector<128x128xbf16>,
    } else {
    }
    return
  }
  func.func @transform_0(%arg0: i32, %arg1: i32, %arg2: i32) -> (i32, i32) {
    %c0_i32 = arith.constant 0 : i32
    return %arg0, %arg2 : i32, i32
  }
  func.func @transform_1(%arg0: i32, %arg1: i32, %arg2: i32) -> (i32, i32) {
    %c0_i32 = arith.constant 0 : i32
    return %arg2, %arg1 : i32, i32
  }
  func.func @transform_2(%arg0: i32, %arg1: i32, %arg2: i32) -> (i32, i32) {
    %c0_i32 = arith.constant 0 : i32
    %c0_i32_0 = arith.constant 0 : i32
    return %c0_i32, %arg1 : i32, i32
  }
  func.func @transform_3(%arg0: i32, %arg1: i32, %arg2: i32) -> (i32, i32) {
    %c0_i32 = arith.constant 0 : i32
    return %arg0, %arg1 : i32, i32
  }
}

module attributes {stable_mosaic.version = 11 : i64} {
  func.func @_max4_kernel(%arg0: i32, %arg1: memref<32x64xbf16, #tpu.memory_space<vmem>>, %arg2: memref<32x64xbf16, #tpu.memory_space<vmem>>, %arg3: memref<32x64xbf16, #tpu.memory_space<vmem>>, %arg4: memref<32x64xbf16, #tpu.memory_space<vmem>>, %arg5: memref<32x64xbf16, #tpu.memory_space<vmem>>) attributes {dimension_semantics = [#tpu.dimension_semantics<parallel>], iteration_bounds = array<i64: 1>, scalar_prefetch = 0 : i64, scratch_operands = 0 : i64, tpu.core_type = #tpu.core_type<tc>, window_params = [{transform_indices = @transform_0, window_bounds = array<i64: 32, 64>}, {transform_indices = @transform_1, window_bounds = array<i64: 32, 64>}, {transform_indices = @transform_2, window_bounds = array<i64: 32, 64>}, {transform_indices = @transform_3, window_bounds = array<i64: 32, 64>}, {transform_indices = @transform_4, window_bounds = array<i64: 32, 64>}]} {
    %c0 = arith.constant 0 : index
    %c0_0 = arith.constant 0 : index
    %0 = vector.load %arg1[%c0, %c0_0] : memref<32x64xbf16, #tpu.memory_space<vmem>>, vector<32x64xbf16>
    %c0_1 = arith.constant 0 : index
    %c0_2 = arith.constant 0 : index
    %1 = vector.load %arg2[%c0_1, %c0_2] : memref<32x64xbf16, #tpu.memory_space<vmem>>, vector<32x64xbf16>
    %2 = arith.maximumf %0, %1 : vector<32x64xbf16>
    %c0_3 = arith.constant 0 : index
    %c0_4 = arith.constant 0 : index
    %3 = vector.load %arg3[%c0_3, %c0_4] : memref<32x64xbf16, #tpu.memory_space<vmem>>, vector<32x64xbf16>
    %c0_5 = arith.constant 0 : index
    %c0_6 = arith.constant 0 : index
    %4 = vector.load %arg4[%c0_5, %c0_6] : memref<32x64xbf16, #tpu.memory_space<vmem>>, vector<32x64xbf16>
    %5 = arith.maximumf %3, %4 : vector<32x64xbf16>
    %6 = arith.maximumf %2, %5 : vector<32x64xbf16>
    %c0_7 = arith.constant 0 : index
    %c0_8 = arith.constant 0 : index
    %7 = vector.load %arg5[%c0_7, %c0_8] : memref<32x64xbf16, #tpu.memory_space<vmem>>, vector<32x64xbf16>
    tpu.vector_store %arg5[%c0_7, %c0_8], %6 {strides = array<i32>} : memref<32x64xbf16, #tpu.memory_space<vmem>>, vector<32x64xbf16>,
    return
  }
  func.func @transform_0(%arg0: i32) -> (i32, i32) {
    %c0_i32 = arith.constant 0 : i32
    %c0_i32_0 = arith.constant 0 : i32
    return %arg0, %c0_i32 : i32, i32
  }
  func.func @transform_1(%arg0: i32) -> (i32, i32) {
    %c0_i32 = arith.constant 0 : i32
    %c0_i32_0 = arith.constant 0 : i32
    return %arg0, %c0_i32 : i32, i32
  }
  func.func @transform_2(%arg0: i32) -> (i32, i32) {
    %c0_i32 = arith.constant 0 : i32
    %c0_i32_0 = arith.constant 0 : i32
    return %arg0, %c0_i32 : i32, i32
  }
  func.func @transform_3(%arg0: i32) -> (i32, i32) {
    %c0_i32 = arith.constant 0 : i32
    %c0_i32_0 = arith.constant 0 : i32
    return %arg0, %c0_i32 : i32, i32
  }
  func.func @transform_4(%arg0: i32) -> (i32, i32) {
    %c0_i32 = arith.constant 0 : i32
    %c0_i32_0 = arith.constant 0 : i32
    return %arg0, %c0_i32 : i32, i32
  }
}

module attributes {stable_mosaic.version = 11 : i64} {
  func.func @_conv_matmul_kernel(%arg0: i32, %arg1: i32, %arg2: i32, %arg3: memref<32x128xbf16, #tpu.memory_space<vmem>>, %arg4: memref<128x128xbf16, #tpu.memory_space<vmem>>, %arg5: memref<1x128xf32, #tpu.memory_space<vmem>>, %arg6: memref<32x128xbf16, #tpu.memory_space<vmem>>, %arg7: memref<32x128xf32, #tpu.memory_space<vmem>>) attributes {dimension_semantics = [#tpu.dimension_semantics<parallel>, #tpu.dimension_semantics<parallel>, #tpu.dimension_semantics<arbitrary>], iteration_bounds = array<i64: 1, 1, 5>, scalar_prefetch = 0 : i64, scratch_operands = 1 : i64, tpu.core_type = #tpu.core_type<tc>, window_params = [{transform_indices = @transform_0, window_bounds = array<i64: 32, 128>}, {transform_indices = @transform_1, window_bounds = array<i64: 128, 128>}, {transform_indices = @transform_2, window_bounds = array<i64: 1, 128>}, {transform_indices = @transform_3, window_bounds = array<i64: 32, 128>}]} {
    %c0_i32 = arith.constant 0 : i32
    %0 = arith.cmpi eq, %arg2, %c0_i32 : i32
    %1 = arith.extui %0 : i1 to i32
    %c0_i32_0 = arith.constant 0 : i32
    %2 = arith.cmpi ne, %1, %c0_i32_0 : i32
    scf.if %2 {
      %cst_9 = arith.constant 0.000000e+00 : f32
      %12 = vector.broadcast %cst_9 : f32 to vector<32x128xf32>
      %c0_10 = arith.constant 0 : index
      %c0_11 = arith.constant 0 : index
      %13 = vector.load %arg7[%c0_10, %c0_11] : memref<32x128xf32, #tpu.memory_space<vmem>>, vector<32x128xf32>
      tpu.vector_store %arg7[%c0_10, %c0_11], %12 {strides = array<i32>} : memref<32x128xf32, #tpu.memory_space<vmem>>, vector<32x128xf32>,
    } else {
    }
    %c0 = arith.constant 0 : index
    %c0_1 = arith.constant 0 : index
    %3 = vector.load %arg7[%c0, %c0_1] : memref<32x128xf32, #tpu.memory_space<vmem>>, vector<32x128xf32>
    %c0_2 = arith.constant 0 : index
    %c0_3 = arith.constant 0 : index
    %4 = vector.load %arg3[%c0_2, %c0_3] : memref<32x128xbf16, #tpu.memory_space<vmem>>, vector<32x128xbf16>
    %c0_4 = arith.constant 0 : index
    %c0_5 = arith.constant 0 : index
    %5 = vector.load %arg4[%c0_4, %c0_5] : memref<128x128xbf16, #tpu.memory_space<vmem>>, vector<128x128xbf16>
    %cst = arith.constant dense<0.000000e+00> : vector<32x128xf32>
    %6 = tpu.matmul %4, %5, %cst {dimension_numbers = #tpu.dot_dimension_numbers<[1], [0], [0], [1], [0, 0, 1, 1], [], []>} : vector<32x128xbf16>, vector<128x128xbf16>, vector<32x128xf32> -> vector<32x128xf32>
    %7 = arith.addf %3, %6 : vector<32x128xf32>
    %c0_6 = arith.constant 0 : index
    %c0_7 = arith.constant 0 : index
    %8 = vector.load %arg7[%c0_6, %c0_7] : memref<32x128xf32, #tpu.memory_space<vmem>>, vector<32x128xf32>
    tpu.vector_store %arg7[%c0_6, %c0_7], %7 {strides = array<i32>} : memref<32x128xf32, #tpu.memory_space<vmem>>, vector<32x128xf32>,
    %c4_i32 = arith.constant 4 : i32
    %9 = arith.cmpi eq, %arg2, %c4_i32 : i32
    %10 = arith.extui %9 : i1 to i32
    %c0_i32_8 = arith.constant 0 : i32
    %11 = arith.cmpi ne, %10, %c0_i32_8 : i32
    scf.if %11 {
      %c0_9 = arith.constant 0 : index
      %c0_10 = arith.constant 0 : index
      %12 = vector.load %arg7[%c0_9, %c0_10] : memref<32x128xf32, #tpu.memory_space<vmem>>, vector<32x128xf32>
      %c0_11 = arith.constant 0 : index
      %c0_12 = arith.constant 0 : index
      %13 = vector.load %arg5[%c0_11, %c0_12] : memref<1x128xf32, #tpu.memory_space<vmem>>, vector<1x128xf32>
      %14 = vector.broadcast %13 : vector<1x128xf32> to vector<32x128xf32>
      %15 = arith.addf %12, %14 : vector<32x128xf32>
      %cst_13 = arith.constant 0.000000e+00 : f32
      %16 = vector.broadcast %cst_13 : f32 to vector<32x128xf32>
      %17 = arith.maximumf %15, %16 : vector<32x128xf32>
      %18 = arith.truncf %17 : vector<32x128xf32> to vector<32x128xbf16>
      %c0_14 = arith.constant 0 : index
      %c0_15 = arith.constant 0 : index
      %19 = vector.load %arg6[%c0_14, %c0_15] : memref<32x128xbf16, #tpu.memory_space<vmem>>, vector<32x128xbf16>
      tpu.vector_store %arg6[%c0_14, %c0_15], %18 {strides = array<i32>} : memref<32x128xbf16, #tpu.memory_space<vmem>>, vector<32x128xbf16>,
    } else {
    }
    return
  }
  func.func @transform_0(%arg0: i32, %arg1: i32, %arg2: i32) -> (i32, i32) {
    %c0_i32 = arith.constant 0 : i32
    return %arg0, %arg2 : i32, i32
  }
  func.func @transform_1(%arg0: i32, %arg1: i32, %arg2: i32) -> (i32, i32) {
    %c0_i32 = arith.constant 0 : i32
    return %arg2, %arg1 : i32, i32
  }
  func.func @transform_2(%arg0: i32, %arg1: i32, %arg2: i32) -> (i32, i32) {
    %c0_i32 = arith.constant 0 : i32
    %c0_i32_0 = arith.constant 0 : i32
    return %c0_i32, %arg1 : i32, i32
  }
  func.func @transform_3(%arg0: i32, %arg1: i32, %arg2: i32) -> (i32, i32) {
    %c0_i32 = arith.constant 0 : i32
    return %arg0, %arg1 : i32, i32
  }
}

module attributes {stable_mosaic.version = 11 : i64} {
  func.func @_l1_partial_kernel(%arg0: i32, %arg1: memref<32x128xbf16, #tpu.memory_space<vmem>>, %arg2: memref<32x128xbf16, #tpu.memory_space<vmem>>, %arg3: memref<32x128xf32, #tpu.memory_space<vmem>>, %arg4: memref<32x128xf32, #tpu.memory_space<vmem>>) attributes {dimension_semantics = [#tpu.dimension_semantics<arbitrary>], iteration_bounds = array<i64: 1>, scalar_prefetch = 0 : i64, scratch_operands = 1 : i64, tpu.core_type = #tpu.core_type<tc>, window_params = [{transform_indices = @transform_0, window_bounds = array<i64: 32, 128>}, {transform_indices = @transform_1, window_bounds = array<i64: 32, 128>}, {pipeline_mode = #tpu.pipeline_mode<synchronous>, transform_indices = @transform_2, window_bounds = array<i64: 32, 128>}]} {
    %c0_i32 = arith.constant 0 : i32
    %0 = arith.cmpi eq, %arg0, %c0_i32 : i32
    %1 = arith.extui %0 : i1 to i32
    %c0_i32_0 = arith.constant 0 : i32
    %2 = arith.cmpi ne, %1, %c0_i32_0 : i32
    scf.if %2 {
      %cst = arith.constant 0.000000e+00 : f32
      %15 = vector.broadcast %cst : f32 to vector<32x128xf32>
      %c0_10 = arith.constant 0 : index
      %c0_11 = arith.constant 0 : index
      %16 = vector.load %arg4[%c0_10, %c0_11] : memref<32x128xf32, #tpu.memory_space<vmem>>, vector<32x128xf32>
      tpu.vector_store %arg4[%c0_10, %c0_11], %15 {strides = array<i32>} : memref<32x128xf32, #tpu.memory_space<vmem>>, vector<32x128xf32>,
    } else {
    }
    %c0 = arith.constant 0 : index
    %c0_1 = arith.constant 0 : index
    %3 = vector.load %arg1[%c0, %c0_1] : memref<32x128xbf16, #tpu.memory_space<vmem>>, vector<32x128xbf16>
    %4 = arith.extf %3 : vector<32x128xbf16> to vector<32x128xf32>
    %c0_2 = arith.constant 0 : index
    %c0_3 = arith.constant 0 : index
    %5 = vector.load %arg2[%c0_2, %c0_3] : memref<32x128xbf16, #tpu.memory_space<vmem>>, vector<32x128xbf16>
    %6 = arith.extf %5 : vector<32x128xbf16> to vector<32x128xf32>
    %7 = arith.subf %4, %6 : vector<32x128xf32>
    %c0_4 = arith.constant 0 : index
    %c0_5 = arith.constant 0 : index
    %8 = vector.load %arg4[%c0_4, %c0_5] : memref<32x128xf32, #tpu.memory_space<vmem>>, vector<32x128xf32>
    %9 = math.absf %7 : vector<32x128xf32>
    %10 = arith.addf %8, %9 : vector<32x128xf32>
    %c0_6 = arith.constant 0 : index
    %c0_7 = arith.constant 0 : index
    %11 = vector.load %arg4[%c0_6, %c0_7] : memref<32x128xf32, #tpu.memory_space<vmem>>, vector<32x128xf32>
    tpu.vector_store %arg4[%c0_6, %c0_7], %10 {strides = array<i32>} : memref<32x128xf32, #tpu.memory_space<vmem>>, vector<32x128xf32>,
    %c0_i32_8 = arith.constant 0 : i32
    %12 = arith.cmpi eq, %arg0, %c0_i32_8 : i32
    %13 = arith.extui %12 : i1 to i32
    %c0_i32_9 = arith.constant 0 : i32
    %14 = arith.cmpi ne, %13, %c0_i32_9 : i32
    scf.if %14 {
      %c0_10 = arith.constant 0 : index
      %c0_11 = arith.constant 0 : index
      %15 = vector.load %arg4[%c0_10, %c0_11] : memref<32x128xf32, #tpu.memory_space<vmem>>, vector<32x128xf32>
      %c0_12 = arith.constant 0 : index
      %c0_13 = arith.constant 0 : index
      %16 = vector.load %arg3[%c0_12, %c0_13] : memref<32x128xf32, #tpu.memory_space<vmem>>, vector<32x128xf32>
      tpu.vector_store %arg3[%c0_12, %c0_13], %15 {strides = array<i32>} : memref<32x128xf32, #tpu.memory_space<vmem>>, vector<32x128xf32>,
    } else {
    }
    return
  }
  func.func @transform_0(%arg0: i32) -> (i32, i32) {
    %c0_i32 = arith.constant 0 : i32
    %c0_i32_0 = arith.constant 0 : i32
    return %arg0, %c0_i32 : i32, i32
  }
  func.func @transform_1(%arg0: i32) -> (i32, i32) {
    %c0_i32 = arith.constant 0 : i32
    %c0_i32_0 = arith.constant 0 : i32
    return %arg0, %c0_i32 : i32, i32
  }
  func.func @transform_2(%arg0: i32) -> (i32, i32) {
    %c0_i32 = arith.constant 0 : i32
    %c0_i32_0 = arith.constant 0 : i32
    %c0_i32_1 = arith.constant 0 : i32
    return %c0_i32, %c0_i32_0 : i32, i32
  }
}

module attributes {stable_mosaic.version = 11 : i64} {
  func.func @_conv_matmul_kernel(%arg0: i32, %arg1: i32, %arg2: i32, %arg3: memref<32x384xbf16, #tpu.memory_space<vmem>>, %arg4: memref<384x128xbf16, #tpu.memory_space<vmem>>, %arg5: memref<1x128xf32, #tpu.memory_space<vmem>>, %arg6: memref<32x128xbf16, #tpu.memory_space<vmem>>, %arg7: memref<32x128xf32, #tpu.memory_space<vmem>>) attributes {dimension_semantics = [#tpu.dimension_semantics<parallel>, #tpu.dimension_semantics<parallel>, #tpu.dimension_semantics<arbitrary>], iteration_bounds = array<i64: 1, 1, 3>, scalar_prefetch = 0 : i64, scratch_operands = 1 : i64, tpu.core_type = #tpu.core_type<tc>, window_params = [{transform_indices = @transform_0, window_bounds = array<i64: 32, 384>}, {transform_indices = @transform_1, window_bounds = array<i64: 384, 128>}, {transform_indices = @transform_2, window_bounds = array<i64: 1, 128>}, {transform_indices = @transform_3, window_bounds = array<i64: 32, 128>}]} {
    %c0_i32 = arith.constant 0 : i32
    %0 = arith.cmpi eq, %arg2, %c0_i32 : i32
    %1 = arith.extui %0 : i1 to i32
    %c0_i32_0 = arith.constant 0 : i32
    %2 = arith.cmpi ne, %1, %c0_i32_0 : i32
    scf.if %2 {
      %cst_9 = arith.constant 0.000000e+00 : f32
      %12 = vector.broadcast %cst_9 : f32 to vector<32x128xf32>
      %c0_10 = arith.constant 0 : index
      %c0_11 = arith.constant 0 : index
      %13 = vector.load %arg7[%c0_10, %c0_11] : memref<32x128xf32, #tpu.memory_space<vmem>>, vector<32x128xf32>
      tpu.vector_store %arg7[%c0_10, %c0_11], %12 {strides = array<i32>} : memref<32x128xf32, #tpu.memory_space<vmem>>, vector<32x128xf32>,
    } else {
    }
    %c0 = arith.constant 0 : index
    %c0_1 = arith.constant 0 : index
    %3 = vector.load %arg7[%c0, %c0_1] : memref<32x128xf32, #tpu.memory_space<vmem>>, vector<32x128xf32>
    %c0_2 = arith.constant 0 : index
    %c0_3 = arith.constant 0 : index
    %4 = vector.load %arg3[%c0_2, %c0_3] : memref<32x384xbf16, #tpu.memory_space<vmem>>, vector<32x384xbf16>
    %c0_4 = arith.constant 0 : index
    %c0_5 = arith.constant 0 : index
    %5 = vector.load %arg4[%c0_4, %c0_5] : memref<384x128xbf16, #tpu.memory_space<vmem>>, vector<384x128xbf16>
    %cst = arith.constant dense<0.000000e+00> : vector<32x128xf32>
    %6 = tpu.matmul %4, %5, %cst {dimension_numbers = #tpu.dot_dimension_numbers<[1], [0], [0], [1], [0, 0, 1, 1], [], []>} : vector<32x384xbf16>, vector<384x128xbf16>, vector<32x128xf32> -> vector<32x128xf32>
    %7 = arith.addf %3, %6 : vector<32x128xf32>
    %c0_6 = arith.constant 0 : index
    %c0_7 = arith.constant 0 : index
    %8 = vector.load %arg7[%c0_6, %c0_7] : memref<32x128xf32, #tpu.memory_space<vmem>>, vector<32x128xf32>
    tpu.vector_store %arg7[%c0_6, %c0_7], %7 {strides = array<i32>} : memref<32x128xf32, #tpu.memory_space<vmem>>, vector<32x128xf32>,
    %c2_i32 = arith.constant 2 : i32
    %9 = arith.cmpi eq, %arg2, %c2_i32 : i32
    %10 = arith.extui %9 : i1 to i32
    %c0_i32_8 = arith.constant 0 : i32
    %11 = arith.cmpi ne, %10, %c0_i32_8 : i32
    scf.if %11 {
      %c0_9 = arith.constant 0 : index
      %c0_10 = arith.constant 0 : index
      %12 = vector.load %arg7[%c0_9, %c0_10] : memref<32x128xf32, #tpu.memory_space<vmem>>, vector<32x128xf32>
      %c0_11 = arith.constant 0 : index
      %c0_12 = arith.constant 0 : index
      %13 = vector.load %arg5[%c0_11, %c0_12] : memref<1x128xf32, #tpu.memory_space<vmem>>, vector<1x128xf32>
      %14 = vector.broadcast %13 : vector<1x128xf32> to vector<32x128xf32>
      %15 = arith.addf %12, %14 : vector<32x128xf32>
      %cst_13 = arith.constant 0.000000e+00 : f32
      %16 = vector.broadcast %cst_13 : f32 to vector<32x128xf32>
      %17 = arith.maximumf %15, %16 : vector<32x128xf32>
      %18 = arith.truncf %17 : vector<32x128xf32> to vector<32x128xbf16>
      %c0_14 = arith.constant 0 : index
      %c0_15 = arith.constant 0 : index
      %19 = vector.load %arg6[%c0_14, %c0_15] : memref<32x128xbf16, #tpu.memory_space<vmem>>, vector<32x128xbf16>
      tpu.vector_store %arg6[%c0_14, %c0_15], %18 {strides = array<i32>} : memref<32x128xbf16, #tpu.memory_space<vmem>>, vector<32x128xbf16>,
    } else {
    }
    return
  }
  func.func @transform_0(%arg0: i32, %arg1: i32, %arg2: i32) -> (i32, i32) {
    %c0_i32 = arith.constant 0 : i32
    return %arg0, %arg2 : i32, i32
  }
  func.func @transform_1(%arg0: i32, %arg1: i32, %arg2: i32) -> (i32, i32) {
    %c0_i32 = arith.constant 0 : i32
    return %arg2, %arg1 : i32, i32
  }
  func.func @transform_2(%arg0: i32, %arg1: i32, %arg2: i32) -> (i32, i32) {
    %c0_i32 = arith.constant 0 : i32
    %c0_i32_0 = arith.constant 0 : i32
    return %c0_i32, %arg1 : i32, i32
  }
  func.func @transform_3(%arg0: i32, %arg1: i32, %arg2: i32) -> (i32, i32) {
    %c0_i32 = arith.constant 0 : i32
    return %arg0, %arg1 : i32, i32
  }
}

module attributes {stable_mosaic.version = 11 : i64} {
  func.func @_max4_kernel(%arg0: i32, %arg1: memref<16x128xbf16, #tpu.memory_space<vmem>>, %arg2: memref<16x128xbf16, #tpu.memory_space<vmem>>, %arg3: memref<16x128xbf16, #tpu.memory_space<vmem>>, %arg4: memref<16x128xbf16, #tpu.memory_space<vmem>>, %arg5: memref<16x128xbf16, #tpu.memory_space<vmem>>) attributes {dimension_semantics = [#tpu.dimension_semantics<parallel>], iteration_bounds = array<i64: 1>, scalar_prefetch = 0 : i64, scratch_operands = 0 : i64, tpu.core_type = #tpu.core_type<tc>, window_params = [{transform_indices = @transform_0, window_bounds = array<i64: 16, 128>}, {transform_indices = @transform_1, window_bounds = array<i64: 16, 128>}, {transform_indices = @transform_2, window_bounds = array<i64: 16, 128>}, {transform_indices = @transform_3, window_bounds = array<i64: 16, 128>}, {transform_indices = @transform_4, window_bounds = array<i64: 16, 128>}]} {
    %c0 = arith.constant 0 : index
    %c0_0 = arith.constant 0 : index
    %0 = vector.load %arg1[%c0, %c0_0] : memref<16x128xbf16, #tpu.memory_space<vmem>>, vector<16x128xbf16>
    %c0_1 = arith.constant 0 : index
    %c0_2 = arith.constant 0 : index
    %1 = vector.load %arg2[%c0_1, %c0_2] : memref<16x128xbf16, #tpu.memory_space<vmem>>, vector<16x128xbf16>
    %2 = arith.maximumf %0, %1 : vector<16x128xbf16>
    %c0_3 = arith.constant 0 : index
    %c0_4 = arith.constant 0 : index
    %3 = vector.load %arg3[%c0_3, %c0_4] : memref<16x128xbf16, #tpu.memory_space<vmem>>, vector<16x128xbf16>
    %c0_5 = arith.constant 0 : index
    %c0_6 = arith.constant 0 : index
    %4 = vector.load %arg4[%c0_5, %c0_6] : memref<16x128xbf16, #tpu.memory_space<vmem>>, vector<16x128xbf16>
    %5 = arith.maximumf %3, %4 : vector<16x128xbf16>
    %6 = arith.maximumf %2, %5 : vector<16x128xbf16>
    %c0_7 = arith.constant 0 : index
    %c0_8 = arith.constant 0 : index
    %7 = vector.load %arg5[%c0_7, %c0_8] : memref<16x128xbf16, #tpu.memory_space<vmem>>, vector<16x128xbf16>
    tpu.vector_store %arg5[%c0_7, %c0_8], %6 {strides = array<i32>} : memref<16x128xbf16, #tpu.memory_space<vmem>>, vector<16x128xbf16>,
    return
  }
  func.func @transform_0(%arg0: i32) -> (i32, i32) {
    %c0_i32 = arith.constant 0 : i32
    %c0_i32_0 = arith.constant 0 : i32
    return %arg0, %c0_i32 : i32, i32
  }
  func.func @transform_1(%arg0: i32) -> (i32, i32) {
    %c0_i32 = arith.constant 0 : i32
    %c0_i32_0 = arith.constant 0 : i32
    return %arg0, %c0_i32 : i32, i32
  }
  func.func @transform_2(%arg0: i32) -> (i32, i32) {
    %c0_i32 = arith.constant 0 : i32
    %c0_i32_0 = arith.constant 0 : i32
    return %arg0, %c0_i32 : i32, i32
  }
  func.func @transform_3(%arg0: i32) -> (i32, i32) {
    %c0_i32 = arith.constant 0 : i32
    %c0_i32_0 = arith.constant 0 : i32
    return %arg0, %c0_i32 : i32, i32
  }
  func.func @transform_4(%arg0: i32) -> (i32, i32) {
    %c0_i32 = arith.constant 0 : i32
    %c0_i32_0 = arith.constant 0 : i32
    return %arg0, %c0_i32 : i32, i32
  }
}

module attributes {stable_mosaic.version = 11 : i64} {
  func.func @_conv_matmul_kernel(%arg0: i32, %arg1: i32, %arg2: i32, %arg3: memref<16x384xbf16, #tpu.memory_space<vmem>>, %arg4: memref<384x128xbf16, #tpu.memory_space<vmem>>, %arg5: memref<1x128xf32, #tpu.memory_space<vmem>>, %arg6: memref<16x128xbf16, #tpu.memory_space<vmem>>, %arg7: memref<16x128xf32, #tpu.memory_space<vmem>>) attributes {dimension_semantics = [#tpu.dimension_semantics<parallel>, #tpu.dimension_semantics<parallel>, #tpu.dimension_semantics<arbitrary>], iteration_bounds = array<i64: 1, 1, 3>, scalar_prefetch = 0 : i64, scratch_operands = 1 : i64, tpu.core_type = #tpu.core_type<tc>, window_params = [{transform_indices = @transform_0, window_bounds = array<i64: 16, 384>}, {transform_indices = @transform_1, window_bounds = array<i64: 384, 128>}, {transform_indices = @transform_2, window_bounds = array<i64: 1, 128>}, {transform_indices = @transform_3, window_bounds = array<i64: 16, 128>}]} {
    %c0_i32 = arith.constant 0 : i32
    %0 = arith.cmpi eq, %arg2, %c0_i32 : i32
    %1 = arith.extui %0 : i1 to i32
    %c0_i32_0 = arith.constant 0 : i32
    %2 = arith.cmpi ne, %1, %c0_i32_0 : i32
    scf.if %2 {
      %cst_9 = arith.constant 0.000000e+00 : f32
      %12 = vector.broadcast %cst_9 : f32 to vector<16x128xf32>
      %c0_10 = arith.constant 0 : index
      %c0_11 = arith.constant 0 : index
      %13 = vector.load %arg7[%c0_10, %c0_11] : memref<16x128xf32, #tpu.memory_space<vmem>>, vector<16x128xf32>
      tpu.vector_store %arg7[%c0_10, %c0_11], %12 {strides = array<i32>} : memref<16x128xf32, #tpu.memory_space<vmem>>, vector<16x128xf32>,
    } else {
    }
    %c0 = arith.constant 0 : index
    %c0_1 = arith.constant 0 : index
    %3 = vector.load %arg7[%c0, %c0_1] : memref<16x128xf32, #tpu.memory_space<vmem>>, vector<16x128xf32>
    %c0_2 = arith.constant 0 : index
    %c0_3 = arith.constant 0 : index
    %4 = vector.load %arg3[%c0_2, %c0_3] : memref<16x384xbf16, #tpu.memory_space<vmem>>, vector<16x384xbf16>
    %c0_4 = arith.constant 0 : index
    %c0_5 = arith.constant 0 : index
    %5 = vector.load %arg4[%c0_4, %c0_5] : memref<384x128xbf16, #tpu.memory_space<vmem>>, vector<384x128xbf16>
    %cst = arith.constant dense<0.000000e+00> : vector<16x128xf32>
    %6 = tpu.matmul %4, %5, %cst {dimension_numbers = #tpu.dot_dimension_numbers<[1], [0], [0], [1], [0, 0, 1, 1], [], []>} : vector<16x384xbf16>, vector<384x128xbf16>, vector<16x128xf32> -> vector<16x128xf32>
    %7 = arith.addf %3, %6 : vector<16x128xf32>
    %c0_6 = arith.constant 0 : index
    %c0_7 = arith.constant 0 : index
    %8 = vector.load %arg7[%c0_6, %c0_7] : memref<16x128xf32, #tpu.memory_space<vmem>>, vector<16x128xf32>
    tpu.vector_store %arg7[%c0_6, %c0_7], %7 {strides = array<i32>} : memref<16x128xf32, #tpu.memory_space<vmem>>, vector<16x128xf32>,
    %c2_i32 = arith.constant 2 : i32
    %9 = arith.cmpi eq, %arg2, %c2_i32 : i32
    %10 = arith.extui %9 : i1 to i32
    %c0_i32_8 = arith.constant 0 : i32
    %11 = arith.cmpi ne, %10, %c0_i32_8 : i32
    scf.if %11 {
      %c0_9 = arith.constant 0 : index
      %c0_10 = arith.constant 0 : index
      %12 = vector.load %arg7[%c0_9, %c0_10] : memref<16x128xf32, #tpu.memory_space<vmem>>, vector<16x128xf32>
      %c0_11 = arith.constant 0 : index
      %c0_12 = arith.constant 0 : index
      %13 = vector.load %arg5[%c0_11, %c0_12] : memref<1x128xf32, #tpu.memory_space<vmem>>, vector<1x128xf32>
      %14 = vector.broadcast %13 : vector<1x128xf32> to vector<16x128xf32>
      %15 = arith.addf %12, %14 : vector<16x128xf32>
      %cst_13 = arith.constant 0.000000e+00 : f32
      %16 = vector.broadcast %cst_13 : f32 to vector<16x128xf32>
      %17 = arith.maximumf %15, %16 : vector<16x128xf32>
      %18 = arith.truncf %17 : vector<16x128xf32> to vector<16x128xbf16>
      %c0_14 = arith.constant 0 : index
      %c0_15 = arith.constant 0 : index
      %19 = vector.load %arg6[%c0_14, %c0_15] : memref<16x128xbf16, #tpu.memory_space<vmem>>, vector<16x128xbf16>
      tpu.vector_store %arg6[%c0_14, %c0_15], %18 {strides = array<i32>} : memref<16x128xbf16, #tpu.memory_space<vmem>>, vector<16x128xbf16>,
    } else {
    }
    return
  }
  func.func @transform_0(%arg0: i32, %arg1: i32, %arg2: i32) -> (i32, i32) {
    %c0_i32 = arith.constant 0 : i32
    return %arg0, %arg2 : i32, i32
  }
  func.func @transform_1(%arg0: i32, %arg1: i32, %arg2: i32) -> (i32, i32) {
    %c0_i32 = arith.constant 0 : i32
    return %arg2, %arg1 : i32, i32
  }
  func.func @transform_2(%arg0: i32, %arg1: i32, %arg2: i32) -> (i32, i32) {
    %c0_i32 = arith.constant 0 : i32
    %c0_i32_0 = arith.constant 0 : i32
    return %c0_i32, %arg1 : i32, i32
  }
  func.func @transform_3(%arg0: i32, %arg1: i32, %arg2: i32) -> (i32, i32) {
    %c0_i32 = arith.constant 0 : i32
    return %arg0, %arg1 : i32, i32
  }
}

module attributes {stable_mosaic.version = 11 : i64} {
  func.func @_l1_partial_kernel(%arg0: i32, %arg1: memref<16x128xbf16, #tpu.memory_space<vmem>>, %arg2: memref<16x128xbf16, #tpu.memory_space<vmem>>, %arg3: memref<16x128xf32, #tpu.memory_space<vmem>>, %arg4: memref<16x128xf32, #tpu.memory_space<vmem>>) attributes {dimension_semantics = [#tpu.dimension_semantics<arbitrary>], iteration_bounds = array<i64: 1>, scalar_prefetch = 0 : i64, scratch_operands = 1 : i64, tpu.core_type = #tpu.core_type<tc>, window_params = [{transform_indices = @transform_0, window_bounds = array<i64: 16, 128>}, {transform_indices = @transform_1, window_bounds = array<i64: 16, 128>}, {pipeline_mode = #tpu.pipeline_mode<synchronous>, transform_indices = @transform_2, window_bounds = array<i64: 16, 128>}]} {
    %c0_i32 = arith.constant 0 : i32
    %0 = arith.cmpi eq, %arg0, %c0_i32 : i32
    %1 = arith.extui %0 : i1 to i32
    %c0_i32_0 = arith.constant 0 : i32
    %2 = arith.cmpi ne, %1, %c0_i32_0 : i32
    scf.if %2 {
      %cst = arith.constant 0.000000e+00 : f32
      %15 = vector.broadcast %cst : f32 to vector<16x128xf32>
      %c0_10 = arith.constant 0 : index
      %c0_11 = arith.constant 0 : index
      %16 = vector.load %arg4[%c0_10, %c0_11] : memref<16x128xf32, #tpu.memory_space<vmem>>, vector<16x128xf32>
      tpu.vector_store %arg4[%c0_10, %c0_11], %15 {strides = array<i32>} : memref<16x128xf32, #tpu.memory_space<vmem>>, vector<16x128xf32>,
    } else {
    }
    %c0 = arith.constant 0 : index
    %c0_1 = arith.constant 0 : index
    %3 = vector.load %arg1[%c0, %c0_1] : memref<16x128xbf16, #tpu.memory_space<vmem>>, vector<16x128xbf16>
    %4 = arith.extf %3 : vector<16x128xbf16> to vector<16x128xf32>
    %c0_2 = arith.constant 0 : index
    %c0_3 = arith.constant 0 : index
    %5 = vector.load %arg2[%c0_2, %c0_3] : memref<16x128xbf16, #tpu.memory_space<vmem>>, vector<16x128xbf16>
    %6 = arith.extf %5 : vector<16x128xbf16> to vector<16x128xf32>
    %7 = arith.subf %4, %6 : vector<16x128xf32>
    %c0_4 = arith.constant 0 : index
    %c0_5 = arith.constant 0 : index
    %8 = vector.load %arg4[%c0_4, %c0_5] : memref<16x128xf32, #tpu.memory_space<vmem>>, vector<16x128xf32>
    %9 = math.absf %7 : vector<16x128xf32>
    %10 = arith.addf %8, %9 : vector<16x128xf32>
    %c0_6 = arith.constant 0 : index
    %c0_7 = arith.constant 0 : index
    %11 = vector.load %arg4[%c0_6, %c0_7] : memref<16x128xf32, #tpu.memory_space<vmem>>, vector<16x128xf32>
    tpu.vector_store %arg4[%c0_6, %c0_7], %10 {strides = array<i32>} : memref<16x128xf32, #tpu.memory_space<vmem>>, vector<16x128xf32>,
    %c0_i32_8 = arith.constant 0 : i32
    %12 = arith.cmpi eq, %arg0, %c0_i32_8 : i32
    %13 = arith.extui %12 : i1 to i32
    %c0_i32_9 = arith.constant 0 : i32
    %14 = arith.cmpi ne, %13, %c0_i32_9 : i32
    scf.if %14 {
      %c0_10 = arith.constant 0 : index
      %c0_11 = arith.constant 0 : index
      %15 = vector.load %arg4[%c0_10, %c0_11] : memref<16x128xf32, #tpu.memory_space<vmem>>, vector<16x128xf32>
      %c0_12 = arith.constant 0 : index
      %c0_13 = arith.constant 0 : index
      %16 = vector.load %arg3[%c0_12, %c0_13] : memref<16x128xf32, #tpu.memory_space<vmem>>, vector<16x128xf32>
      tpu.vector_store %arg3[%c0_12, %c0_13], %15 {strides = array<i32>} : memref<16x128xf32, #tpu.memory_space<vmem>>, vector<16x128xf32>,
    } else {
    }
    return
  }
  func.func @transform_0(%arg0: i32) -> (i32, i32) {
    %c0_i32 = arith.constant 0 : i32
    %c0_i32_0 = arith.constant 0 : i32
    return %arg0, %c0_i32 : i32, i32
  }
  func.func @transform_1(%arg0: i32) -> (i32, i32) {
    %c0_i32 = arith.constant 0 : i32
    %c0_i32_0 = arith.constant 0 : i32
    return %arg0, %c0_i32 : i32, i32
  }
  func.func @transform_2(%arg0: i32) -> (i32, i32) {
    %c0_i32 = arith.constant 0 : i32
    %c0_i32_0 = arith.constant 0 : i32
    %c0_i32_1 = arith.constant 0 : i32
    return %c0_i32, %c0_i32_0 : i32, i32
  }
}

</mosaic_0001>

<bundles_post_ra>
// kernel: vgg_loss.39
= control target key start
LH: loop header
LB: loop body
LE: loop exit
PB: predicated region body
PF: predicated region fallthrough
CT: control target
= control target key end

     0   :  { %s2379_s12 = smov 0   ;;  %s2381_s13 = smov 0   ;;  %s2580_s0 = inlined_call_operand.vmem [shape: bf16[2048,128], index: 0, kind: input, shape index: {}]   ;;  %s2581_s1 = inlined_call_operand.vmem [shape: bf16[128,128], index: 1, kind: input, shape index: {}]   ;;  %s2582_s2 = inlined_call_operand.vmem [shape: f32[1,128], index: 2, kind: input, shape index: {}]   ;;  %s2583_s3 = inlined_call_operand.vmem [shape: bf16[2048,128], index: 3, kind: output, shape index: {}]  }
   0x1   :  { %s2383_s14 = smov 0  }
   0x2 LB: > { %s32_s15 = sadd.s32 1, %s2353_s13  ;;  %p1768_p0 = scmp.ge.s32.totalorder %s2357_s14, 1  ;;  %s2357_s14 = sphi %s2383_s14, %s13_s14   ;;  %s2353_s13 = sphi %s2381_s13, %s2585_s13   ;;  %s2349_s12 = sphi %s2379_s12, %s2584_s12  }
   0x3   : > { %p34_p1 = scmp.ge.s32.totalorder %s32_s15, 4  ;;  %p188_p2 = scmp.lt.s32.totalorder %s2357_s14, 5 }
   0x5   : > { %s2587_s15 = smov (%p34_p1, %s32_s15), 0  ;;  %p189_p3 = pnand %p1768_p0, %p188_p2 }
   0x6   : > { %v2295_v0 = vld [vmem:[%s2581_s1] sm:$0xff] (!%p189_p3)   ;;  %s1769_s18 = sshll.u32 (!%p189_p3), %s2349_s12, 6  ;;  %v2296_v1 = vld [vmem:[%s2581_s1 + $0x8] sm:$0xff] (!%p189_p3)   ;;  %v2297_v2 = vld [vmem:[%s2581_s1 + $0x10] sm:$0xff] (!%p189_p3)  }
   0x7   : > { %192 = sbr.rel (%p189_p3) target bundleno = 317 (0x13d), region = 32  ;;  %p230_p4 = scmp.lt.s32.totalorder (!%p189_p3), %s1769_s18, 255  ;;  %2175 = vmatprep.subr.bf16.mxu0 (!%p189_p3), %v2295_v0  ;;  %2255 = vmatprep.subr.bf16.mxu1 (!%p189_p3), %v2295_v0  ;;  %v2298_v3 = vld [vmem:[%s2581_s1 + $0x18] sm:$0xff] (!%p189_p3)   ;;  %v2299_v6 = vld [vmem:[%s2581_s1 + $0x20] sm:$0xff] (!%p189_p3)   ;;  %v2300_v7 = vld [vmem:[%s2581_s1 + $0x28] sm:$0xff] (!%p189_p3)  }
   0x8   : > { %2176 = vmatpush3.bf16.msra.mxu0 (!%p189_p3), %v2295_v0  ;;  %2263 = vmatpush3.bf16.msra.mxu1 (!%p189_p3), %v2295_v0  ;;  %v2301_v8 = vld [vmem:[%s2581_s1 + $0x30] sm:$0xff] (!%p189_p3)   ;;  %v2302_v9 = vld [vmem:[%s2581_s1 + $0x38] sm:$0xff] (!%p189_p3)   ;;  %v2466_v40 = vld [vmem:[%s2582_s2] ss:$0 sm:$0xff] (!%p189_p3) }
   0x9   : > { %2177 = vmatprep.subr.bf16.mxu0 (!%p189_p3), %v2296_v1  ;;  %2256 = vmatprep.subr.bf16.mxu1 (!%p189_p3), %v2296_v1 }
   0xc   : > { %2178 = vmatpush3.bf16.msra.mxu0 (!%p189_p3), %v2296_v1  ;;  %2264 = vmatpush3.bf16.msra.mxu1 (!%p189_p3), %v2296_v1 }
   0xd   : > { %2179 = vmatprep.subr.bf16.mxu0 (!%p189_p3), %v2297_v2  ;;  %2257 = vmatprep.subr.bf16.mxu1 (!%p189_p3), %v2297_v2 }
   0xe   : > { %s2589_s18 = smov (!%p230_p4, %s1769_s18), 255 }
   0xf   : > { %s1770_s23 = sshll.u32 %s2589_s18, 2 }
  0x10   : > { %s2414_s26 = scalar_lea.vmem %s2580_s0, %s1770_s23  ;;  %2180 = vmatpush3.bf16.msra.mxu0 %v2297_v2  ;;  %2265 = vmatpush3.bf16.msra.mxu1 %v2297_v2  ;;  %s2481_s17 = scalar_lea.vmem %s2583_s3, %s1770_s23 }
  0x11   : > { %v2303_v4 = vld [vmem:[%s2414_s26] sm:$0xff]   ;;  %2181 = vmatprep.subr.bf16.mxu0 %v2298_v3  ;;  %2258 = vmatprep.subr.bf16.mxu1 %v2298_v3  ;;  %v2305_v10 = vld [vmem:[%s2414_s26 + $0x8] sm:$0xff]   ;;  %v2307_v12 = vld [vmem:[%s2414_s26 + $0x10] sm:$0xff]  }
  0x12   : > { %v2304_v5 = vld [vmem:[%s2414_s26 + $0x80] sm:$0xff]   ;;  %2191 = vmatprep.mubr.bf16.mxu0 %v2303_v4  ;;  %v2306_v11 = vld [vmem:[%s2414_s26 + $0x88] sm:$0xff]   ;;  %v2308_v13 = vld [vmem:[%s2414_s26 + $0x90] sm:$0xff]  }
  0x13   : > { %2223 = vmatprep.mubr.bf16.mxu1 %v2304_v5  ;;  %v2309_v14 = vld [vmem:[%s2414_s26 + $0x18] sm:$0xff]   ;;  %v2311_v16 = vld [vmem:[%s2414_s26 + $0x20] sm:$0xff]   ;;  %v2313_v18 = vld [vmem:[%s2414_s26 + $0x28] sm:$0xff]  }
  0x14   : > { %2182 = vmatpush3.bf16.msra.mxu0 %v2298_v3  ;;  %2266 = vmatpush3.bf16.msra.mxu1 %v2298_v3  ;;  %v2310_v15 = vld [vmem:[%s2414_s26 + $0x98] sm:$0xff]   ;;  %v2312_v17 = vld [vmem:[%s2414_s26 + $0xa0] sm:$0xff]   ;;  %v2314_v19 = vld [vmem:[%s2414_s26 + $0xa8] sm:$0xff]  }
  0x15   : > { %2183 = vmatprep.subr.bf16.mxu0 %v2299_v6  ;;  %2259 = vmatprep.subr.bf16.mxu1 %v2299_v6  ;;  %v2315_v20 = vld [vmem:[%s2414_s26 + $0x30] sm:$0xff]   ;;  %v2317_v22 = vld [vmem:[%s2414_s26 + $0x38] sm:$0xff]   ;;  %v2319_v24 = vld [vmem:[%s2414_s26 + $0x40] sm:$0xff]  }
  0x16   : > { %v2316_v21 = vld [vmem:[%s2414_s26 + $0xb0] sm:$0xff]   ;;  %v2318_v23 = vld [vmem:[%s2414_s26 + $0xb8] sm:$0xff]   ;;  %v2320_v25 = vld [vmem:[%s2414_s26 + $0xc0] sm:$0xff]  }
  0x17   : > { %v2321_v26 = vld [vmem:[%s2414_s26 + $0x48] sm:$0xff]   ;;  %v2323_v28 = vld [vmem:[%s2414_s26 + $0x50] sm:$0xff]   ;;  %v2325_v30 = vld [vmem:[%s2414_s26 + $0x58] sm:$0xff]  }
  0x18   : > { %2184 = vmatpush3.bf16.msra.mxu0 %v2299_v6  ;;  %2267 = vmatpush3.bf16.msra.mxu1 %v2299_v6  ;;  %v2322_v27 = vld [vmem:[%s2414_s26 + $0xc8] sm:$0xff]   ;;  %v2324_v29 = vld [vmem:[%s2414_s26 + $0xd0] sm:$0xff]   ;;  %v2326_v31 = vld [vmem:[%s2414_s26 + $0xd8] sm:$0xff]  }
  0x19   : > { %2185 = vmatprep.subr.bf16.mxu0 %v2300_v7  ;;  %2260 = vmatprep.subr.bf16.mxu1 %v2300_v7  ;;  %v2327_v32 = vld [vmem:[%s2414_s26 + $0x60] sm:$0xff]   ;;  %v2329_v34 = vld [vmem:[%s2414_s26 + $0x68] sm:$0xff]   ;;  %v2331_v36 = vld [vmem:[%s2414_s26 + $0x70] sm:$0xff]  }
  0x1a   : > { %v2328_v33 = vld [vmem:[%s2414_s26 + $0xe0] sm:$0xff]   ;;  %v2330_v35 = vld [vmem:[%s2414_s26 + $0xe8] sm:$0xff]   ;;  %v2332_v37 = vld [vmem:[%s2414_s26 + $0xf0] sm:$0xff]  }
  0x1b   : > { %v2333_v38 = vld [vmem:[%s2414_s26 + $0x78] sm:$0xff]  }
  0x1c   : > { %2186 = vmatpush3.bf16.msra.mxu0 %v2300_v7  ;;  %2268 = vmatpush3.bf16.msra.mxu1 %v2300_v7  ;;  %v2334_v39 = vld [vmem:[%s2414_s26 + $0xf8] sm:$0xff]  }
  0x1d   : > { %2187 = vmatprep.subr.bf16.mxu0 %v2301_v8  ;;  %2261 = vmatprep.subr.bf16.mxu1 %v2301_v8 }
  0x20   : > { %2188 = vmatpush3.bf16.msra.mxu0 %v2301_v8  ;;  %2269 = vmatpush3.bf16.msra.mxu1 %v2301_v8 }
  0x21   : > { %2189 = vmatprep.subr.bf16.mxu0 %v2302_v9  ;;  %2262 = vmatprep.subr.bf16.mxu1 %v2302_v9 }
  0x24   : > { %2190 = vmatpush3.bf16.msra.mxu0 %v2302_v9  ;;  %2270 = vmatpush3.bf16.msra.mxu1 %v2302_v9 }
  0x27   : > { %2192 = vmatmul.mubr.bf16.vlgmr.msra.gmra.mrb[0].mxu0 %v2305_v10  ;;  %2224 = vmatmul.mubr.bf16.vlgmr.msra.gmra.mrb[0].mxu1 %v2306_v11 }
  0x28   : > { %2195 = vmatprep.mubr.bf16.mxu0 %v2307_v12  ;;  %2227 = vmatprep.mubr.bf16.mxu1 %v2308_v13 }
  0x2f   : > { %2196 = vmatmul.mubr.bf16.gmra.mrb[4].mxu0 %v2309_v14  ;;  %2228 = vmatmul.mubr.bf16.gmra.mrb[4].mxu1 %v2310_v15 }
  0x30   : > { %2199 = vmatprep.mubr.bf16.mxu0 %v2311_v16  ;;  %2231 = vmatprep.mubr.bf16.mxu1 %v2312_v17 }
  0x37   : > { %2200 = vmatmul.mubr.bf16.gmra.mrb[8].mxu0 %v2313_v18  ;;  %2232 = vmatmul.mubr.bf16.gmra.mrb[8].mxu1 %v2314_v19 }
  0x38   : > { %2203 = vmatprep.mubr.bf16.mxu0 %v2315_v20  ;;  %2235 = vmatprep.mubr.bf16.mxu1 %v2316_v21 }
  0x3f   : > { %2204 = vmatmul.mubr.bf16.gmra.mrb[12].mxu0 %v2317_v22  ;;  %2236 = vmatmul.mubr.bf16.gmra.mrb[12].mxu1 %v2318_v23 }
  0x40   : > { %2207 = vmatprep.mubr.bf16.mxu0 %v2319_v24  ;;  %2239 = vmatprep.mubr.bf16.mxu1 %v2320_v25 }
  0x47   : > { %2208 = vmatmul.mubr.bf16.gmra.mrb[16].mxu0 %v2321_v26  ;;  %2240 = vmatmul.mubr.bf16.gmra.mrb[16].mxu1 %v2322_v27 }
  0x48   : > { %2211 = vmatprep.mubr.bf16.mxu0 %v2323_v28  ;;  %2243 = vmatprep.mubr.bf16.mxu1 %v2324_v29 }
  0x4f   : > { %2212 = vmatmul.mubr.bf16.gmra.mrb[20].mxu0 %v2325_v30  ;;  %2244 = vmatmul.mubr.bf16.gmra.mrb[20].mxu1 %v2326_v31 }
  0x50   : > { %2215 = vmatprep.mubr.bf16.mxu0 %v2327_v32  ;;  %2247 = vmatprep.mubr.bf16.mxu1 %v2328_v33 }
  0x57   : > { %2216 = vmatmul.mubr.bf16.gmra.mrb[24].mxu0 %v2329_v34  ;;  %2248 = vmatmul.mubr.bf16.gmra.mrb[24].mxu1 %v2330_v35 }
  0x58   : > { %2219 = vmatprep.mubr.bf16.mxu0 %v2331_v36  ;;  %2251 = vmatprep.mubr.bf16.mxu1 %v2332_v37 }
  0x5f   : > { %2220 = vmatmul.mubr.bf16.gmra.mrb[28].mxu0 %v2333_v38  ;;  %2252 = vmatmul.mubr.bf16.gmra.mrb[28].mxu1 %v2334_v39 }
  0xfa   : > { %v2193_v41 = vpop.f32.mrb[0].mxu0  ;;  %v2225_v42 = vpop.f32.mrb[0].mxu1 }
  0xfb   : > { %v1205_v43 = vadd.f32 %v2193_v41, %v2466_v40  ;;  %v1237_v44 = vadd.f32 %v2225_v42, %v2466_v40  ;;  %v746_v45 = vpop.f32.mrb[1].mxu0  ;;  %v874_v46 = vpop.f32.mrb[1].mxu1 }
  0xfc   : > { %v1203_v47 = vadd.f32 %v2466_v40, %v746_v45  ;;  %v1235_v48 = vadd.f32 %v2466_v40, %v874_v46  ;;  %v2194_v49 = vpop.f32.mrb[2].mxu0  ;;  %v2226_v50 = vpop.f32.mrb[2].mxu1 }
  0xfd   : > { %v1206_v51 = vadd.f32 %v2194_v49, %v2466_v40  ;;  %v1238_v52 = vadd.f32 %v2226_v50, %v2466_v40  ;;  %v749_v53 = vpop.f32.mrb[3].mxu0  ;;  %v877_v54 = vpop.f32.mrb[3].mxu1  ;;  %v1269_v57 = vmax.f32 %v1205_v43, 0.0  ;;  %v1301_v58 = vmax.f32 %v1237_v44, 0.0 }
  0xfe   : > { %v1204_v55 = vadd.f32 %v2466_v40, %v749_v53  ;;  %v1236_v56 = vadd.f32 %v2466_v40, %v877_v54  ;;  %v1267_v61 = vmax.f32 %v1203_v47, 0.0  ;;  %v1299_v62 = vmax.f32 %v1235_v48, 0.0 }
  0xff   : > { %v1270_v59 = vmax.f32 %v1206_v51, 0.0  ;;  %v1302_v60 = vmax.f32 %v1238_v52, 0.0 }
 0x100   : > { %v1268_v63 = vmax.f32 %v1204_v55, 0.0  ;;  %v1300_v0 = vmax.f32 %v1236_v56, 0.0 }
 0x101   : > { %v1952_v1 = vpack.c.bf16 %v1270_v59, %v1269_v57  ;;  %v2032_v2 = vpack.c.bf16 %v1302_v60, %v1301_v58 }
 0x102   : > { %v1947_v3 = vpack.c.bf16 %v1268_v63, %v1267_v61  ;;  %v2027_v4 = vpack.c.bf16 %v1300_v0, %v1299_v62  ;;  %v2197_v5 = vpop.f32.mrb[4].mxu0  ;;  %v2229_v6 = vpop.f32.mrb[4].mxu1 }
 0x103   : > { %2104 = vst [vmem:[%s2481_s17 + $0x8] sm:$0xff] %v1952_v1   ;;  %2120 = vst [vmem:[%s2481_s17 + $0x88] sm:$0xff] %v2032_v2   ;;  %v1209_v7 = vadd.f32 %v2197_v5, %v2466_v40  ;;  %v1241_v8 = vadd.f32 %v2229_v6, %v2466_v40  ;;  %v762_v9 = vpop.f32.mrb[5].mxu0  ;;  %v890_v10 = vpop.f32.mrb[5].mxu1 }
 0x104   : > { %1948 = vst [vmem:[%s2481_s17] sm:$0xff] %v1947_v3   ;;  %2119 = vst [vmem:[%s2481_s17 + $0x80] sm:$0xff] %v2027_v4   ;;  %v1207_v11 = vadd.f32 %v2466_v40, %v762_v9  ;;  %v1239_v12 = vadd.f32 %v2466_v40, %v890_v10  ;;  %v2198_v13 = vpop.f32.mrb[6].mxu0  ;;  %v2230_v14 = vpop.f32.mrb[6].mxu1 }
 0x105   : > { %v1210_v15 = vadd.f32 %v2198_v13, %v2466_v40  ;;  %v1242_v16 = vadd.f32 %v2230_v14, %v2466_v40  ;;  %v765_v17 = vpop.f32.mrb[7].mxu0  ;;  %v893_v18 = vpop.f32.mrb[7].mxu1  ;;  %v1273_v21 = vmax.f32 %v1209_v7, 0.0  ;;  %v1305_v22 = vmax.f32 %v1241_v8, 0.0 }
 0x106   : > { %v1208_v19 = vadd.f32 %v2466_v40, %v765_v17  ;;  %v1240_v20 = vadd.f32 %v2466_v40, %v893_v18  ;;  %v1271_v25 = vmax.f32 %v1207_v11, 0.0  ;;  %v1303_v26 = vmax.f32 %v1239_v12, 0.0 }
 0x107   : > { %v1274_v23 = vmax.f32 %v1210_v15, 0.0  ;;  %v1306_v24 = vmax.f32 %v1242_v16, 0.0 }
 0x108   : > { %v1272_v27 = vmax.f32 %v1208_v19, 0.0  ;;  %v1304_v28 = vmax.f32 %v1240_v20, 0.0 }
 0x109   : > { %v1962_v29 = vpack.c.bf16 %v1274_v23, %v1273_v21  ;;  %v2042_v30 = vpack.c.bf16 %v1306_v24, %v1305_v22 }
 0x10a   : > { %v1957_v31 = vpack.c.bf16 %v1272_v27, %v1271_v25  ;;  %v2037_v32 = vpack.c.bf16 %v1304_v28, %v1303_v26  ;;  %v2201_v33 = vpop.f32.mrb[8].mxu0  ;;  %v2233_v34 = vpop.f32.mrb[8].mxu1 }
 0x10b   : > { %2106 = vst [vmem:[%s2481_s17 + $0x18] sm:$0xff] %v1962_v29   ;;  %2122 = vst [vmem:[%s2481_s17 + $0x98] sm:$0xff] %v2042_v30   ;;  %v1213_v35 = vadd.f32 %v2201_v33, %v2466_v40  ;;  %v1245_v36 = vadd.f32 %v2233_v34, %v2466_v40  ;;  %v778_v37 = vpop.f32.mrb[9].mxu0  ;;  %v906_v38 = vpop.f32.mrb[9].mxu1 }
 0x10c   : > { %2105 = vst [vmem:[%s2481_s17 + $0x10] sm:$0xff] %v1957_v31   ;;  %2121 = vst [vmem:[%s2481_s17 + $0x90] sm:$0xff] %v2037_v32   ;;  %v1211_v39 = vadd.f32 %v2466_v40, %v778_v37  ;;  %v1243_v41 = vadd.f32 %v2466_v40, %v906_v38  ;;  %v2202_v42 = vpop.f32.mrb[10].mxu0  ;;  %v2234_v43 = vpop.f32.mrb[10].mxu1 }
 0x10d   : > { %v1214_v44 = vadd.f32 %v2202_v42, %v2466_v40  ;;  %v1246_v45 = vadd.f32 %v2234_v43, %v2466_v40  ;;  %v781_v46 = vpop.f32.mrb[11].mxu0  ;;  %v909_v47 = vpop.f32.mrb[11].mxu1  ;;  %v1277_v50 = vmax.f32 %v1213_v35, 0.0  ;;  %v1309_v51 = vmax.f32 %v1245_v36, 0.0 }
 0x10e   : > { %v1212_v48 = vadd.f32 %v2466_v40, %v781_v46  ;;  %v1244_v49 = vadd.f32 %v2466_v40, %v909_v47  ;;  %v1275_v54 = vmax.f32 %v1211_v39, 0.0  ;;  %v1307_v55 = vmax.f32 %v1243_v41, 0.0 }
 0x10f   : > { %v1278_v52 = vmax.f32 %v1214_v44, 0.0  ;;  %v1310_v53 = vmax.f32 %v1246_v45, 0.0 }
 0x110   : > { %v1276_v56 = vmax.f32 %v1212_v48, 0.0  ;;  %v1308_v57 = vmax.f32 %v1244_v49, 0.0 }
 0x111   : > { %v1972_v58 = vpack.c.bf16 %v1278_v52, %v1277_v50  ;;  %v2052_v59 = vpack.c.bf16 %v1310_v53, %v1309_v51 }
 0x112   : > { %v1967_v60 = vpack.c.bf16 %v1276_v56, %v1275_v54  ;;  %v2047_v61 = vpack.c.bf16 %v1308_v57, %v1307_v55  ;;  %v2205_v62 = vpop.f32.mrb[12].mxu0  ;;  %v2237_v63 = vpop.f32.mrb[12].mxu1 }
 0x113   : > { %2108 = vst [vmem:[%s2481_s17 + $0x28] sm:$0xff] %v1972_v58   ;;  %2124 = vst [vmem:[%s2481_s17 + $0xa8] sm:$0xff] %v2052_v59   ;;  %v1217_v0 = vadd.f32 %v2205_v62, %v2466_v40  ;;  %v1249_v1 = vadd.f32 %v2237_v63, %v2466_v40  ;;  %v794_v2 = vpop.f32.mrb[13].mxu0  ;;  %v922_v3 = vpop.f32.mrb[13].mxu1 }
 0x114   : > { %2107 = vst [vmem:[%s2481_s17 + $0x20] sm:$0xff] %v1967_v60   ;;  %2123 = vst [vmem:[%s2481_s17 + $0xa0] sm:$0xff] %v2047_v61   ;;  %v1215_v4 = vadd.f32 %v2466_v40, %v794_v2  ;;  %v1247_v5 = vadd.f32 %v2466_v40, %v922_v3  ;;  %v2206_v6 = vpop.f32.mrb[14].mxu0  ;;  %v2238_v7 = vpop.f32.mrb[14].mxu1 }
 0x115   : > { %v1218_v8 = vadd.f32 %v2206_v6, %v2466_v40  ;;  %v1250_v9 = vadd.f32 %v2238_v7, %v2466_v40  ;;  %v797_v10 = vpop.f32.mrb[15].mxu0  ;;  %v925_v11 = vpop.f32.mrb[15].mxu1  ;;  %v1281_v14 = vmax.f32 %v1217_v0, 0.0  ;;  %v1313_v15 = vmax.f32 %v1249_v1, 0.0 }
 0x116   : > { %v1216_v12 = vadd.f32 %v2466_v40, %v797_v10  ;;  %v1248_v13 = vadd.f32 %v2466_v40, %v925_v11  ;;  %v1279_v18 = vmax.f32 %v1215_v4, 0.0  ;;  %v1311_v19 = vmax.f32 %v1247_v5, 0.0 }
 0x117   : > { %v1282_v16 = vmax.f32 %v1218_v8, 0.0  ;;  %v1314_v17 = vmax.f32 %v1250_v9, 0.0 }
 0x118   : > { %v1280_v20 = vmax.f32 %v1216_v12, 0.0  ;;  %v1312_v21 = vmax.f32 %v1248_v13, 0.0 }
 0x119   : > { %v1982_v22 = vpack.c.bf16 %v1282_v16, %v1281_v14  ;;  %v2062_v23 = vpack.c.bf16 %v1314_v17, %v1313_v15 }
 0x11a   : > { %v1977_v24 = vpack.c.bf16 %v1280_v20, %v1279_v18  ;;  %v2057_v25 = vpack.c.bf16 %v1312_v21, %v1311_v19  ;;  %v2209_v26 = vpop.f32.mrb[16].mxu0  ;;  %v2241_v27 = vpop.f32.mrb[16].mxu1 }
 0x11b   : > { %2110 = vst [vmem:[%s2481_s17 + $0x38] sm:$0xff] %v1982_v22   ;;  %2126 = vst [vmem:[%s2481_s17 + $0xb8] sm:$0xff] %v2062_v23   ;;  %v1221_v28 = vadd.f32 %v2209_v26, %v2466_v40  ;;  %v1253_v29 = vadd.f32 %v2241_v27, %v2466_v40  ;;  %v810_v30 = vpop.f32.mrb[17].mxu0  ;;  %v938_v31 = vpop.f32.mrb[17].mxu1 }
 0x11c   : > { %2109 = vst [vmem:[%s2481_s17 + $0x30] sm:$0xff] %v1977_v24   ;;  %2125 = vst [vmem:[%s2481_s17 + $0xb0] sm:$0xff] %v2057_v25   ;;  %v1219_v32 = vadd.f32 %v2466_v40, %v810_v30  ;;  %v1251_v33 = vadd.f32 %v2466_v40, %v938_v31  ;;  %v2210_v34 = vpop.f32.mrb[18].mxu0  ;;  %v2242_v35 = vpop.f32.mrb[18].mxu1 }
 0x11d   : > { %v1222_v36 = vadd.f32 %v2210_v34, %v2466_v40  ;;  %v1254_v37 = vadd.f32 %v2242_v35, %v2466_v40  ;;  %v813_v38 = vpop.f32.mrb[19].mxu0  ;;  %v941_v39 = vpop.f32.mrb[19].mxu1  ;;  %v1285_v43 = vmax.f32 %v1221_v28, 0.0  ;;  %v1317_v44 = vmax.f32 %v1253_v29, 0.0 }
 0x11e   : > { %v1220_v41 = vadd.f32 %v2466_v40, %v813_v38  ;;  %v1252_v42 = vadd.f32 %v2466_v40, %v941_v39  ;;  %v1283_v47 = vmax.f32 %v1219_v32, 0.0  ;;  %v1315_v48 = vmax.f32 %v1251_v33, 0.0 }
 0x11f   : > { %v1286_v45 = vmax.f32 %v1222_v36, 0.0  ;;  %v1318_v46 = vmax.f32 %v1254_v37, 0.0 }
 0x120   : > { %v1284_v49 = vmax.f32 %v1220_v41, 0.0  ;;  %v1316_v50 = vmax.f32 %v1252_v42, 0.0 }
 0x121   : > { %v1992_v51 = vpack.c.bf16 %v1286_v45, %v1285_v43  ;;  %v2072_v52 = vpack.c.bf16 %v1318_v46, %v1317_v44 }
 0x122   : > { %v1987_v53 = vpack.c.bf16 %v1284_v49, %v1283_v47  ;;  %v2067_v54 = vpack.c.bf16 %v1316_v50, %v1315_v48  ;;  %v2213_v55 = vpop.f32.mrb[20].mxu0  ;;  %v2245_v56 = vpop.f32.mrb[20].mxu1 }
 0x123   : > { %2112 = vst [vmem:[%s2481_s17 + $0x48] sm:$0xff] %v1992_v51   ;;  %2128 = vst [vmem:[%s2481_s17 + $0xc8] sm:$0xff] %v2072_v52   ;;  %v1225_v57 = vadd.f32 %v2213_v55, %v2466_v40  ;;  %v1257_v58 = vadd.f32 %v2245_v56, %v2466_v40  ;;  %v826_v59 = vpop.f32.mrb[21].mxu0  ;;  %v954_v60 = vpop.f32.mrb[21].mxu1 }
 0x124   : > { %2111 = vst [vmem:[%s2481_s17 + $0x40] sm:$0xff] %v1987_v53   ;;  %2127 = vst [vmem:[%s2481_s17 + $0xc0] sm:$0xff] %v2067_v54   ;;  %v1223_v61 = vadd.f32 %v2466_v40, %v826_v59  ;;  %v1255_v62 = vadd.f32 %v2466_v40, %v954_v60  ;;  %v2214_v63 = vpop.f32.mrb[22].mxu0  ;;  %v2246_v0 = vpop.f32.mrb[22].mxu1 }
 0x125   : > { %v1226_v1 = vadd.f32 %v2214_v63, %v2466_v40  ;;  %v1258_v2 = vadd.f32 %v2246_v0, %v2466_v40  ;;  %v829_v3 = vpop.f32.mrb[23].mxu0  ;;  %v957_v4 = vpop.f32.mrb[23].mxu1  ;;  %v1289_v7 = vmax.f32 %v1225_v57, 0.0  ;;  %v1321_v8 = vmax.f32 %v1257_v58, 0.0 }
 0x126   : > { %v1224_v5 = vadd.f32 %v2466_v40, %v829_v3  ;;  %v1256_v6 = vadd.f32 %v2466_v40, %v957_v4  ;;  %v1287_v11 = vmax.f32 %v1223_v61, 0.0  ;;  %v1319_v12 = vmax.f32 %v1255_v62, 0.0 }
 0x127   : > { %v1290_v9 = vmax.f32 %v1226_v1, 0.0  ;;  %v1322_v10 = vmax.f32 %v1258_v2, 0.0 }
 0x128   : > { %v1288_v13 = vmax.f32 %v1224_v5, 0.0  ;;  %v1320_v14 = vmax.f32 %v1256_v6, 0.0 }
 0x129   : > { %v2002_v15 = vpack.c.bf16 %v1290_v9, %v1289_v7  ;;  %v2082_v16 = vpack.c.bf16 %v1322_v10, %v1321_v8 }
 0x12a   : > { %v1997_v17 = vpack.c.bf16 %v1288_v13, %v1287_v11  ;;  %v2077_v18 = vpack.c.bf16 %v1320_v14, %v1319_v12  ;;  %v2217_v19 = vpop.f32.mrb[24].mxu0  ;;  %v2249_v20 = vpop.f32.mrb[24].mxu1 }
 0x12b   : > { %2114 = vst [vmem:[%s2481_s17 + $0x58] sm:$0xff] %v2002_v15   ;;  %2130 = vst [vmem:[%s2481_s17 + $0xd8] sm:$0xff] %v2082_v16   ;;  %v1229_v21 = vadd.f32 %v2217_v19, %v2466_v40  ;;  %v1261_v22 = vadd.f32 %v2249_v20, %v2466_v40  ;;  %v842_v23 = vpop.f32.mrb[25].mxu0  ;;  %v970_v24 = vpop.f32.mrb[25].mxu1 }
 0x12c   : > { %2113 = vst [vmem:[%s2481_s17 + $0x50] sm:$0xff] %v1997_v17   ;;  %2129 = vst [vmem:[%s2481_s17 + $0xd0] sm:$0xff] %v2077_v18   ;;  %v1227_v25 = vadd.f32 %v2466_v40, %v842_v23  ;;  %v1259_v26 = vadd.f32 %v2466_v40, %v970_v24  ;;  %v2218_v27 = vpop.f32.mrb[26].mxu0  ;;  %v2250_v28 = vpop.f32.mrb[26].mxu1 }
 0x12d   : > { %v1230_v29 = vadd.f32 %v2218_v27, %v2466_v40  ;;  %v1262_v30 = vadd.f32 %v2250_v28, %v2466_v40  ;;  %v845_v31 = vpop.f32.mrb[27].mxu0  ;;  %v973_v32 = vpop.f32.mrb[27].mxu1  ;;  %v1293_v35 = vmax.f32 %v1229_v21, 0.0  ;;  %v1325_v36 = vmax.f32 %v1261_v22, 0.0 }
 0x12e   : > { %v1228_v33 = vadd.f32 %v2466_v40, %v845_v31  ;;  %v1260_v34 = vadd.f32 %v2466_v40, %v973_v32  ;;  %v1291_v39 = vmax.f32 %v1227_v25, 0.0  ;;  %v1323_v41 = vmax.f32 %v1259_v26, 0.0 }
 0x12f   : > { %v1294_v37 = vmax.f32 %v1230_v29, 0.0  ;;  %v1326_v38 = vmax.f32 %v1262_v30, 0.0 }
 0x130   : > { %v1292_v42 = vmax.f32 %v1228_v33, 0.0  ;;  %v1324_v43 = vmax.f32 %v1260_v34, 0.0 }
 0x131   : > { %v2012_v44 = vpack.c.bf16 %v1294_v37, %v1293_v35  ;;  %v2092_v45 = vpack.c.bf16 %v1326_v38, %v1325_v36 }
 0x132   : > { %v2007_v46 = vpack.c.bf16 %v1292_v42, %v1291_v39  ;;  %v2087_v47 = vpack.c.bf16 %v1324_v43, %v1323_v41  ;;  %v2221_v48 = vpop.f32.mrb[28].mxu0  ;;  %v2253_v49 = vpop.f32.mrb[28].mxu1 }
 0x133   : > { %2116 = vst [vmem:[%s2481_s17 + $0x68] sm:$0xff] %v2012_v44   ;;  %2132 = vst [vmem:[%s2481_s17 + $0xe8] sm:$0xff] %v2092_v45   ;;  %v1233_v50 = vadd.f32 %v2221_v48, %v2466_v40  ;;  %v1265_v51 = vadd.f32 %v2253_v49, %v2466_v40  ;;  %v858_v52 = vpop.f32.mrb[29].mxu0  ;;  %v986_v53 = vpop.f32.mrb[29].mxu1 }
 0x134   : > { %2115 = vst [vmem:[%s2481_s17 + $0x60] sm:$0xff] %v2007_v46   ;;  %2131 = vst [vmem:[%s2481_s17 + $0xe0] sm:$0xff] %v2087_v47   ;;  %v1231_v54 = vadd.f32 %v2466_v40, %v858_v52  ;;  %v1263_v55 = vadd.f32 %v2466_v40, %v986_v53  ;;  %v2222_v56 = vpop.f32.mrb[30].mxu0  ;;  %v2254_v57 = vpop.f32.mrb[30].mxu1 }
 0x135   : > { %v1234_v58 = vadd.f32 %v2222_v56, %v2466_v40  ;;  %v1266_v59 = vadd.f32 %v2254_v57, %v2466_v40  ;;  %v861_v60 = vpop.f32.mrb[31].mxu0  ;;  %v989_v61 = vpop.f32.mrb[31].mxu1  ;;  %v1297_v0 = vmax.f32 %v1233_v50, 0.0  ;;  %v1329_v1 = vmax.f32 %v1265_v51, 0.0 }
 0x136   : > { %v1232_v62 = vadd.f32 %v2466_v40, %v861_v60  ;;  %v1264_v63 = vadd.f32 %v2466_v40, %v989_v61  ;;  %v1295_v4 = vmax.f32 %v1231_v54, 0.0  ;;  %v1327_v5 = vmax.f32 %v1263_v55, 0.0 }
 0x137   : > { %v1298_v2 = vmax.f32 %v1234_v58, 0.0  ;;  %v1330_v3 = vmax.f32 %v1266_v59, 0.0 }
 0x138   : > { %v1296_v6 = vmax.f32 %v1232_v62, 0.0  ;;  %v1328_v7 = vmax.f32 %v1264_v63, 0.0 }
 0x139   : > { %v2022_v8 = vpack.c.bf16 %v1298_v2, %v1297_v0  ;;  %v2102_v9 = vpack.c.bf16 %v1330_v3, %v1329_v1 }
 0x13a   : > { %v2017_v10 = vpack.c.bf16 %v1296_v6, %v1295_v4  ;;  %v2097_v11 = vpack.c.bf16 %v1328_v7, %v1327_v5 }
 0x13b   : > { %2118 = vst [vmem:[%s2481_s17 + $0x78] sm:$0xff] %v2022_v8   ;;  %2134 = vst [vmem:[%s2481_s17 + $0xf8] sm:$0xff] %v2102_v9  }
 0x13c   : > { %2117 = vst [vmem:[%s2481_s17 + $0x70] sm:$0xff] %v2017_v10   ;;  %2133 = vst [vmem:[%s2481_s17 + $0xf0] sm:$0xff] %v2097_v11  }
 0x13d PF: > { %s13_s14 = sadd.s32 1, %s2357_s14   ;;  %s2584_s12 = smov %s2353_s13 }
 0x13e   : > { %p10_p5 = scmp.ge.s32.totalorder %s13_s14, 6   ;;  %s2585_s13 = smov %s2587_s15 }
 0x140   :  { %12 = sbr.rel (!%p10_p5) target bundleno = 2 (0x2), region = 76 }

// kernel: vgg_loss.73
= control target key start
LH: loop header
LB: loop body
LE: loop exit
PB: predicated region body
PF: predicated region fallthrough
CT: control target
= control target key end

     0   :  { %s771_s0 = inlined_call_operand.vmem [shape: bf16[256,128], index: 0, kind: input, shape index: {}]   ;;  %s772_s1 = inlined_call_operand.vmem [shape: bf16[256,128], index: 1, kind: input, shape index: {}]   ;;  %s773_s2 = inlined_call_operand.vmem [shape: f32[256,128], index: 2, kind: output, shape index: {}]  }
   0x1   :  { %v407_v0 = vld [vmem:[%s771_s0] sm:$0xff]   ;;  %v534_v2 = vld [vmem:[%s771_s0 + $0x8] sm:$0xff]   ;;  %v535_v8 = vld [vmem:[%s771_s0 + $0x10] sm:$0xff]  }
   0x2   :  { %v471_v1 = vld [vmem:[%s772_s1] sm:$0xff]   ;;  %v408_v3 = vunpack.c.l.bf16 %v407_v0  ;;  %v409_v5 = vunpack.c.h.bf16 %v407_v0  ;;  %v549_v7 = vld [vmem:[%s772_s1 + $0x8] sm:$0xff]   ;;  %v550_v9 = vld [vmem:[%s772_s1 + $0x10] sm:$0xff]   ;;  %v412_v10 = vunpack.c.l.bf16 %v534_v2  ;;  %v413_v12 = vunpack.c.h.bf16 %v534_v2 }
   0x3   :  { %v472_v4 = vunpack.c.l.bf16 %v471_v1  ;;  %v473_v6 = vunpack.c.h.bf16 %v471_v1  ;;  %v476_v11 = vunpack.c.l.bf16 %v549_v7  ;;  %v477_v13 = vunpack.c.h.bf16 %v549_v7  ;;  %v536_v14 = vld [vmem:[%s771_s0 + $0x18] sm:$0xff]   ;;  %v537_v24 = vld [vmem:[%s771_s0 + $0x20] sm:$0xff]   ;;  %v538_v34 = vld [vmem:[%s771_s0 + $0x28] sm:$0xff]  }
   0x4   :  { %v416_v17 = vunpack.c.l.bf16 %v535_v8  ;;  %v480_v18 = vunpack.c.l.bf16 %v550_v9  ;;  %v551_v19 = vld [vmem:[%s772_s1 + $0x18] sm:$0xff]   ;;  %v417_v22 = vunpack.c.h.bf16 %v535_v8  ;;  %v481_v23 = vunpack.c.h.bf16 %v550_v9  ;;  %v552_v29 = vld [vmem:[%s772_s1 + $0x20] sm:$0xff]   ;;  %v553_v35 = vld [vmem:[%s772_s1 + $0x28] sm:$0xff]  }
   0x5   :  { %v175_v15 = vsub.f32 %v408_v3, %v472_v4  ;;  %v176_v16 = vsub.f32 %v409_v5, %v473_v6  ;;  %v177_v20 = vsub.f32 %v412_v10, %v476_v11  ;;  %v178_v21 = vsub.f32 %v413_v12, %v477_v13  ;;  %v539_v44 = vld [vmem:[%s771_s0 + $0x30] sm:$0xff]   ;;  %v540_v54 = vld [vmem:[%s771_s0 + $0x38] sm:$0xff]   ;;  %v541_v0 = vld [vmem:[%s771_s0 + $0x40] sm:$0xff]  }
   0x6   :  { %v179_v27 = vsub.f32 %v416_v17, %v480_v18  ;;  %v420_v28 = vunpack.c.l.bf16 %v536_v14  ;;  %v180_v32 = vsub.f32 %v417_v22, %v481_v23  ;;  %v484_v33 = vunpack.c.l.bf16 %v551_v19  ;;  %v554_v49 = vld [vmem:[%s772_s1 + $0x30] sm:$0xff]   ;;  %v555_v59 = vld [vmem:[%s772_s1 + $0x38] sm:$0xff]   ;;  %v556_v1 = vld [vmem:[%s772_s1 + $0x40] sm:$0xff]  }
   0x7   :  { %v239_v25 = vand.u32 2147483647, %v175_v15  ;;  %v240_v26 = vand.u32 2147483647, %v176_v16  ;;  %v241_v30 = vand.u32 2147483647, %v177_v20  ;;  %v421_v37 = vunpack.c.h.bf16 %v536_v14 }
   0x8   :  { %v242_v31 = vand.u32 2147483647, %v178_v21  ;;  %v243_v36 = vand.u32 2147483647, %v179_v27  ;;  %v485_v38 = vunpack.c.h.bf16 %v551_v19  ;;  %v424_v39 = vunpack.c.l.bf16 %v537_v24  ;;  %v542_v10 = vld [vmem:[%s771_s0 + $0x48] sm:$0xff]   ;;  %v543_v20 = vld [vmem:[%s771_s0 + $0x50] sm:$0xff]  }
   0x9   :  { %370 = vst [vmem:[%s773_s2] sm:$0xff] %v239_v25  ;;  %371 = vst [vmem:[%s773_s2 + $0x8] sm:$0xff] %v240_v26  ;;  %v244_v40 = vand.u32 2147483647, %v180_v32  ;;  %v181_v41 = vsub.f32 %v420_v28, %v484_v33  ;;  %v488_v42 = vunpack.c.l.bf16 %v552_v29  ;;  %v425_v43 = vunpack.c.h.bf16 %v537_v24  ;;  %v557_v15 = vld [vmem:[%s772_s1 + $0x48] sm:$0xff]   ;;  %v558_v25 = vld [vmem:[%s772_s1 + $0x50] sm:$0xff]  }
   0xa   :  { %372 = vst [vmem:[%s773_s2 + $0x10] sm:$0xff] %v241_v30  ;;  %373 = vst [vmem:[%s773_s2 + $0x18] sm:$0xff] %v242_v31  ;;  %v182_v45 = vsub.f32 %v421_v37, %v485_v38  ;;  %v489_v46 = vunpack.c.h.bf16 %v552_v29  ;;  %v428_v47 = vunpack.c.l.bf16 %v538_v34  ;;  %v492_v48 = vunpack.c.l.bf16 %v553_v35  ;;  %v544_v30 = vld [vmem:[%s771_s0 + $0x58] sm:$0xff]  }
   0xb   :  { %374 = vst [vmem:[%s773_s2 + $0x20] sm:$0xff] %v243_v36  ;;  %375 = vst [vmem:[%s773_s2 + $0x28] sm:$0xff] %v244_v40  ;;  %v245_v50 = vand.u32 2147483647, %v181_v41  ;;  %v183_v51 = vsub.f32 %v424_v39, %v488_v42  ;;  %v429_v52 = vunpack.c.h.bf16 %v538_v34  ;;  %v493_v53 = vunpack.c.h.bf16 %v553_v35  ;;  %v559_v31 = vld [vmem:[%s772_s1 + $0x58] sm:$0xff]   ;;  %v545_v40 = vld [vmem:[%s771_s0 + $0x60] sm:$0xff]  }
   0xc   :  { %v246_v55 = vand.u32 2147483647, %v182_v45  ;;  %v184_v56 = vsub.f32 %v425_v43, %v489_v46  ;;  %v185_v57 = vsub.f32 %v428_v47, %v492_v48  ;;  %v432_v58 = vunpack.c.l.bf16 %v539_v44  ;;  %v560_v45 = vld [vmem:[%s772_s1 + $0x60] sm:$0xff]  }
   0xd   :  { %376 = vst [vmem:[%s773_s2 + $0x30] sm:$0xff] %v245_v50  ;;  %v247_v60 = vand.u32 2147483647, %v183_v51  ;;  %v186_v61 = vsub.f32 %v429_v52, %v493_v53  ;;  %v496_v62 = vunpack.c.l.bf16 %v554_v49  ;;  %v433_v63 = vunpack.c.h.bf16 %v539_v44  ;;  %v546_v50 = vld [vmem:[%s771_s0 + $0x68] sm:$0xff]  }
   0xe   :  { %377 = vst [vmem:[%s773_s2 + $0x38] sm:$0xff] %v246_v55  ;;  %v248_v2 = vand.u32 2147483647, %v184_v56  ;;  %v249_v3 = vand.u32 2147483647, %v185_v57  ;;  %v497_v4 = vunpack.c.h.bf16 %v554_v49  ;;  %v436_v5 = vunpack.c.l.bf16 %v540_v54  ;;  %v561_v55 = vld [vmem:[%s772_s1 + $0x68] sm:$0xff]  }
   0xf   :  { %378 = vst [vmem:[%s773_s2 + $0x40] sm:$0xff] %v247_v60  ;;  %v250_v6 = vand.u32 2147483647, %v186_v61  ;;  %v187_v7 = vsub.f32 %v432_v58, %v496_v62  ;;  %v500_v8 = vunpack.c.l.bf16 %v555_v59  ;;  %v437_v9 = vunpack.c.h.bf16 %v540_v54  ;;  %v547_v60 = vld [vmem:[%s771_s0 + $0x70] sm:$0xff]  }
  0x10   :  { %379 = vst [vmem:[%s773_s2 + $0x48] sm:$0xff] %v248_v2  ;;  %380 = vst [vmem:[%s773_s2 + $0x50] sm:$0xff] %v249_v3  ;;  %v188_v11 = vsub.f32 %v433_v63, %v497_v4  ;;  %v501_v12 = vunpack.c.h.bf16 %v555_v59  ;;  %v440_v13 = vunpack.c.l.bf16 %v541_v0  ;;  %v504_v14 = vunpack.c.l.bf16 %v556_v1  ;;  %v562_v61 = vld [vmem:[%s772_s1 + $0x70] sm:$0xff]  }
  0x11   :  { %381 = vst [vmem:[%s773_s2 + $0x58] sm:$0xff] %v250_v6  ;;  %v251_v16 = vand.u32 2147483647, %v187_v7  ;;  %v189_v17 = vsub.f32 %v436_v5, %v500_v8  ;;  %v441_v18 = vunpack.c.h.bf16 %v541_v0  ;;  %v505_v19 = vunpack.c.h.bf16 %v556_v1  ;;  %v548_v6 = vld [vmem:[%s771_s0 + $0x78] sm:$0xff]  }
  0x12   :  { %v252_v21 = vand.u32 2147483647, %v188_v11  ;;  %v190_v22 = vsub.f32 %v437_v9, %v501_v12  ;;  %v191_v23 = vsub.f32 %v440_v13, %v504_v14  ;;  %v444_v24 = vunpack.c.l.bf16 %v542_v10  ;;  %v563_v11 = vld [vmem:[%s772_s1 + $0x78] sm:$0xff]  }
  0x13   :  { %382 = vst [vmem:[%s773_s2 + $0x60] sm:$0xff] %v251_v16  ;;  %v253_v26 = vand.u32 2147483647, %v189_v17  ;;  %v192_v27 = vsub.f32 %v441_v18, %v505_v19  ;;  %v508_v28 = vunpack.c.l.bf16 %v557_v15  ;;  %v445_v29 = vunpack.c.h.bf16 %v542_v10 }
  0x14   :  { %383 = vst [vmem:[%s773_s2 + $0x68] sm:$0xff] %v252_v21  ;;  %v254_v32 = vand.u32 2147483647, %v190_v22  ;;  %v255_v33 = vand.u32 2147483647, %v191_v23  ;;  %v509_v34 = vunpack.c.h.bf16 %v557_v15  ;;  %v448_v35 = vunpack.c.l.bf16 %v543_v20 }
  0x15   :  { %384 = vst [vmem:[%s773_s2 + $0x70] sm:$0xff] %v253_v26  ;;  %v256_v36 = vand.u32 2147483647, %v192_v27  ;;  %v193_v37 = vsub.f32 %v444_v24, %v508_v28  ;;  %v512_v38 = vunpack.c.l.bf16 %v558_v25  ;;  %v449_v39 = vunpack.c.h.bf16 %v543_v20 }
  0x16   :  { %385 = vst [vmem:[%s773_s2 + $0x78] sm:$0xff] %v254_v32  ;;  %386 = vst [vmem:[%s773_s2 + $0x80] sm:$0xff] %v255_v33  ;;  %v194_v41 = vsub.f32 %v445_v29, %v509_v34  ;;  %v513_v42 = vunpack.c.h.bf16 %v558_v25  ;;  %v452_v43 = vunpack.c.l.bf16 %v544_v30  ;;  %v516_v44 = vunpack.c.l.bf16 %v559_v31 }
  0x17   :  { %387 = vst [vmem:[%s773_s2 + $0x88] sm:$0xff] %v256_v36  ;;  %v257_v46 = vand.u32 2147483647, %v193_v37  ;;  %v195_v47 = vsub.f32 %v448_v35, %v512_v38  ;;  %v453_v48 = vunpack.c.h.bf16 %v544_v30  ;;  %v517_v49 = vunpack.c.h.bf16 %v559_v31 }
  0x18   :  { %v258_v51 = vand.u32 2147483647, %v194_v41  ;;  %v196_v52 = vsub.f32 %v449_v39, %v513_v42  ;;  %v197_v53 = vsub.f32 %v452_v43, %v516_v44  ;;  %v456_v54 = vunpack.c.l.bf16 %v545_v40 }
  0x19   :  { %388 = vst [vmem:[%s773_s2 + $0x90] sm:$0xff] %v257_v46  ;;  %v259_v56 = vand.u32 2147483647, %v195_v47  ;;  %v198_v57 = vsub.f32 %v453_v48, %v517_v49  ;;  %v520_v58 = vunpack.c.l.bf16 %v560_v45  ;;  %v457_v59 = vunpack.c.h.bf16 %v545_v40 }
  0x1a   :  { %389 = vst [vmem:[%s773_s2 + $0x98] sm:$0xff] %v258_v51  ;;  %v260_v62 = vand.u32 2147483647, %v196_v52  ;;  %v261_v63 = vand.u32 2147483647, %v197_v53  ;;  %v521_v0 = vunpack.c.h.bf16 %v560_v45  ;;  %v460_v1 = vunpack.c.l.bf16 %v546_v50 }
  0x1b   :  { %390 = vst [vmem:[%s773_s2 + $0xa0] sm:$0xff] %v259_v56  ;;  %v262_v2 = vand.u32 2147483647, %v198_v57  ;;  %v199_v3 = vsub.f32 %v456_v54, %v520_v58  ;;  %v524_v4 = vunpack.c.l.bf16 %v561_v55  ;;  %v461_v5 = vunpack.c.h.bf16 %v546_v50 }
  0x1c   :  { %391 = vst [vmem:[%s773_s2 + $0xa8] sm:$0xff] %v260_v62  ;;  %392 = vst [vmem:[%s773_s2 + $0xb0] sm:$0xff] %v261_v63  ;;  %v200_v7 = vsub.f32 %v457_v59, %v521_v0  ;;  %v525_v8 = vunpack.c.h.bf16 %v561_v55  ;;  %v464_v9 = vunpack.c.l.bf16 %v547_v60  ;;  %v528_v10 = vunpack.c.l.bf16 %v562_v61 }
  0x1d   :  { %393 = vst [vmem:[%s773_s2 + $0xb8] sm:$0xff] %v262_v2  ;;  %v263_v12 = vand.u32 2147483647, %v199_v3  ;;  %v201_v13 = vsub.f32 %v460_v1, %v524_v4  ;;  %v465_v14 = vunpack.c.h.bf16 %v547_v60  ;;  %v529_v15 = vunpack.c.h.bf16 %v562_v61 }
  0x1e   :  { %v264_v16 = vand.u32 2147483647, %v200_v7  ;;  %v202_v17 = vsub.f32 %v461_v5, %v525_v8  ;;  %v203_v18 = vsub.f32 %v464_v9, %v528_v10  ;;  %v468_v19 = vunpack.c.l.bf16 %v548_v6 }
  0x1f   :  { %394 = vst [vmem:[%s773_s2 + $0xc0] sm:$0xff] %v263_v12  ;;  %v265_v20 = vand.u32 2147483647, %v201_v13  ;;  %v204_v21 = vsub.f32 %v465_v14, %v529_v15  ;;  %v532_v22 = vunpack.c.l.bf16 %v563_v11  ;;  %v469_v23 = vunpack.c.h.bf16 %v548_v6 }
  0x20   :  { %395 = vst [vmem:[%s773_s2 + $0xc8] sm:$0xff] %v264_v16  ;;  %v266_v24 = vand.u32 2147483647, %v202_v17  ;;  %v267_v25 = vand.u32 2147483647, %v203_v18  ;;  %v533_v26 = vunpack.c.h.bf16 %v563_v11 }
  0x21   :  { %396 = vst [vmem:[%s773_s2 + $0xd0] sm:$0xff] %v265_v20  ;;  %v268_v27 = vand.u32 2147483647, %v204_v21  ;;  %v205_v28 = vsub.f32 %v468_v19, %v532_v22 }
  0x22   :  { %397 = vst [vmem:[%s773_s2 + $0xd8] sm:$0xff] %v266_v24  ;;  %398 = vst [vmem:[%s773_s2 + $0xe0] sm:$0xff] %v267_v25  ;;  %v206_v29 = vsub.f32 %v469_v23, %v533_v26 }
  0x23   :  { %399 = vst [vmem:[%s773_s2 + $0xe8] sm:$0xff] %v268_v27  ;;  %v269_v30 = vand.u32 2147483647, %v205_v28 }
  0x24   :  { %v270_v31 = vand.u32 2147483647, %v206_v29 }
  0x25   :  { %400 = vst [vmem:[%s773_s2 + $0xf0] sm:$0xff] %v269_v30 }
  0x26   :  { %401 = vst [vmem:[%s773_s2 + $0xf8] sm:$0xff] %v270_v31 }

// kernel: vgg_loss.40
= control target key start
LH: loop header
LB: loop body
LE: loop exit
PB: predicated region body
PF: predicated region fallthrough
CT: control target
= control target key end

     0   :  { %s2594_s12 = smov 0   ;;  %s2596_s13 = smov 0   ;;  %s2880_s0 = inlined_call_operand.vmem [shape: bf16[2048,256], index: 0, kind: input, shape index: {}]   ;;  %s2881_s1 = inlined_call_operand.vmem [shape: bf16[256,128], index: 1, kind: input, shape index: {}]   ;;  %s2882_s2 = inlined_call_operand.vmem [shape: f32[1,128], index: 2, kind: input, shape index: {}]   ;;  %s2883_s3 = inlined_call_operand.vmem [shape: bf16[2048,128], index: 3, kind: output, shape index: {}]  }
   0x1   :  { %s2598_s14 = smov 0  }
   0x2 LB: > { %s32_s15 = sadd.s32 1, %s2567_s13  ;;  %p1971_p0 = scmp.ge.s32.totalorder %s2571_s14, 1  ;;  %s2571_s14 = sphi %s2598_s14, %s13_s14   ;;  %s2567_s13 = sphi %s2596_s13, %s2885_s13   ;;  %s2563_s12 = sphi %s2594_s12, %s2884_s12  }
   0x3   : > { %p34_p1 = scmp.ge.s32.totalorder %s32_s15, 4  ;;  %p191_p2 = scmp.lt.s32.totalorder %s2571_s14, 5 }
   0x5   : > { %s2887_s15 = smov (%p34_p1, %s32_s15), 0  ;;  %p192_p3 = pnand %p1971_p0, %p191_p2 }
   0x6   : > { %v2437_v0 = vld [vmem:[%s2881_s1] sm:$0xff] (!%p192_p3)   ;;  %v2573_v1 = vmov (!%p192_p3), 0   ;;  %s1972_s18 = sshll.u32 (!%p192_p3), %s2563_s12, 6  ;;  %v2438_v2 = vld [vmem:[%s2881_s1 + $0x8] sm:$0xff] (!%p192_p3)   ;;  %v2439_v3 = vld [vmem:[%s2881_s1 + $0x10] sm:$0xff] (!%p192_p3)  }
   0x7   : > { %195 = sbr.rel (%p192_p3) target bundleno = 412 (0x19c), region = 32  ;;  %912 = vmatprep.subr.bf16.mxu0 (!%p192_p3), %v2573_v1  ;;  %2380 = vmatprep.subr.bf16.mxu1 (!%p192_p3), %v2573_v1  ;;  %p236_p4 = scmp.lt.s32.totalorder (!%p192_p3), %s1972_s18, 255  ;;  %v2440_v4 = vld [vmem:[%s2881_s1 + $0x18] sm:$0xff] (!%p192_p3)   ;;  %v2441_v5 = vld [vmem:[%s2881_s1 + $0x20] sm:$0xff] (!%p192_p3)   ;;  %v2442_v7 = vld [vmem:[%s2881_s1 + $0x28] sm:$0xff] (!%p192_p3)  }
   0x8   : > { %913 = vmatpush1.bf16.msra.mxu0 (!%p192_p3), %v2437_v0  ;;  %2396 = vmatpush1.bf16.msra.mxu1 (!%p192_p3), %v2437_v0  ;;  %v2443_v9 = vld [vmem:[%s2881_s1 + $0x30] sm:$0xff] (!%p192_p3)   ;;  %v2444_v10 = vld [vmem:[%s2881_s1 + $0x38] sm:$0xff] (!%p192_p3)   ;;  %v2445_v11 = vld [vmem:[%s2881_s1 + $0x40] sm:$0xff] (!%p192_p3)  }
   0x9   : > { %914 = vmatprep.subr.bf16.mxu0 (!%p192_p3), %v2573_v1  ;;  %2381 = vmatprep.subr.bf16.mxu1 (!%p192_p3), %v2573_v1  ;;  %v2446_v12 = vld [vmem:[%s2881_s1 + $0x48] sm:$0xff] (!%p192_p3)   ;;  %v2447_v13 = vld [vmem:[%s2881_s1 + $0x50] sm:$0xff] (!%p192_p3)   ;;  %v2448_v14 = vld [vmem:[%s2881_s1 + $0x58] sm:$0xff] (!%p192_p3)  }
   0xa   : > { %v2449_v15 = vld [vmem:[%s2881_s1 + $0x60] sm:$0xff] (!%p192_p3)   ;;  %v2450_v16 = vld [vmem:[%s2881_s1 + $0x68] sm:$0xff] (!%p192_p3)   ;;  %v2451_v17 = vld [vmem:[%s2881_s1 + $0x70] sm:$0xff] (!%p192_p3)  }
   0xb   : > { %v2452_v18 = vld [vmem:[%s2881_s1 + $0x78] sm:$0xff] (!%p192_p3)  }
   0xc   : > { %915 = vmatpush1.bf16.msra.mxu0 (!%p192_p3), %v2438_v2  ;;  %2397 = vmatpush1.bf16.msra.mxu1 (!%p192_p3), %v2438_v2 }
   0xd   : > { %916 = vmatprep.subr.bf16.mxu0 (!%p192_p3), %v2573_v1  ;;  %2382 = vmatprep.subr.bf16.mxu1 (!%p192_p3), %v2573_v1 }
   0xe   : > { %s2889_s18 = smov (!%p236_p4, %s1972_s18), 255 }
   0xf   : > { %s2124_s25 = sshll.u32 %s2889_s18, 3  ;;  %s1976_s6 = sshll.u32 %s2889_s18, 2 }
  0x10   : > { %917 = vmatpush1.bf16.msra.mxu0 %v2439_v3  ;;  %2398 = vmatpush1.bf16.msra.mxu1 %v2439_v3  ;;  %s2641_s30 = scalar_lea.vmem %s2880_s0, %s2124_s25  ;;  %s2777_s8 = scalar_lea.vmem %s2883_s3, %s1976_s6 }
  0x11   : > { %918 = vmatprep.subr.bf16.mxu0 %v2573_v1  ;;  %2383 = vmatprep.subr.bf16.mxu1 %v2573_v1  ;;  %v2455_v6 = vld [vmem:[%s2641_s30 + $0x4] ss:$8 sps:$4 sm:$0xff]   ;;  %v2453_v19 = vld [vmem:[%s2641_s30] ss:$8 sps:$4 sm:$0xff]   ;;  %v2459_v21 = vld [vmem:[%s2641_s30 + $0x14] ss:$8 sps:$4 sm:$0xff]  }
  0x12   : > { %v2458_v8 = vld [vmem:[%s2641_s30 + $0x104] ss:$8 sps:$4 sm:$0xff]   ;;  %944 = vmatprep.mubr.bf16.mxu0 %v2455_v6  ;;  %v2456_v20 = vld [vmem:[%s2641_s30 + $0x100] ss:$8 sps:$4 sm:$0xff]   ;;  %v2461_v22 = vld [vmem:[%s2641_s30 + $0x114] ss:$8 sps:$4 sm:$0xff]  }
  0x13   : > { %1072 = vmatprep.mubr.bf16.mxu1 %v2458_v8  ;;  %v2463_v23 = vld [vmem:[%s2641_s30 + $0x10] ss:$8 sps:$4 sm:$0xff]   ;;  %v2465_v25 = vld [vmem:[%s2641_s30 + $0x24] ss:$8 sps:$4 sm:$0xff]   ;;  %v2469_v27 = vld [vmem:[%s2641_s30 + $0x20] ss:$8 sps:$4 sm:$0xff]  }
  0x14   : > { %919 = vmatpush1.bf16.msra.mxu0 %v2440_v4  ;;  %2399 = vmatpush1.bf16.msra.mxu1 %v2440_v4  ;;  %v2464_v24 = vld [vmem:[%s2641_s30 + $0x110] ss:$8 sps:$4 sm:$0xff]   ;;  %v2467_v26 = vld [vmem:[%s2641_s30 + $0x124] ss:$8 sps:$4 sm:$0xff]   ;;  %v2470_v28 = vld [vmem:[%s2641_s30 + $0x120] ss:$8 sps:$4 sm:$0xff]  }
  0x15   : > { %920 = vmatprep.subr.bf16.mxu0 %v2573_v1  ;;  %2384 = vmatprep.subr.bf16.mxu1 %v2573_v1  ;;  %v2471_v29 = vld [vmem:[%s2641_s30 + $0x34] ss:$8 sps:$4 sm:$0xff]   ;;  %v2475_v31 = vld [vmem:[%s2641_s30 + $0x30] ss:$8 sps:$4 sm:$0xff]   ;;  %v2477_v33 = vld [vmem:[%s2641_s30 + $0x44] ss:$8 sps:$4 sm:$0xff]  }
  0x16   : > { %v2473_v30 = vld [vmem:[%s2641_s30 + $0x134] ss:$8 sps:$4 sm:$0xff]   ;;  %v2476_v32 = vld [vmem:[%s2641_s30 + $0x130] ss:$8 sps:$4 sm:$0xff]   ;;  %v2479_v34 = vld [vmem:[%s2641_s30 + $0x144] ss:$8 sps:$4 sm:$0xff]  }
  0x17   : > { %v2481_v35 = vld [vmem:[%s2641_s30 + $0x40] ss:$8 sps:$4 sm:$0xff]   ;;  %v2483_v37 = vld [vmem:[%s2641_s30 + $0x54] ss:$8 sps:$4 sm:$0xff]   ;;  %v2487_v39 = vld [vmem:[%s2641_s30 + $0x50] ss:$8 sps:$4 sm:$0xff]  }
  0x18   : > { %921 = vmatpush1.bf16.msra.mxu0 %v2441_v5  ;;  %2400 = vmatpush1.bf16.msra.mxu1 %v2441_v5  ;;  %v2482_v36 = vld [vmem:[%s2641_s30 + $0x140] ss:$8 sps:$4 sm:$0xff]   ;;  %v2485_v38 = vld [vmem:[%s2641_s30 + $0x154] ss:$8 sps:$4 sm:$0xff]   ;;  %v2488_v40 = vld [vmem:[%s2641_s30 + $0x150] ss:$8 sps:$4 sm:$0xff]  }
  0x19   : > { %922 = vmatprep.subr.bf16.mxu0 %v2573_v1  ;;  %2385 = vmatprep.subr.bf16.mxu1 %v2573_v1  ;;  %v2489_v41 = vld [vmem:[%s2641_s30 + $0x64] ss:$8 sps:$4 sm:$0xff]   ;;  %v2493_v43 = vld [vmem:[%s2641_s30 + $0x60] ss:$8 sps:$4 sm:$0xff]   ;;  %v2495_v45 = vld [vmem:[%s2641_s30 + $0x74] ss:$8 sps:$4 sm:$0xff]  }
  0x1a   : > { %v2491_v42 = vld [vmem:[%s2641_s30 + $0x164] ss:$8 sps:$4 sm:$0xff]   ;;  %v2494_v44 = vld [vmem:[%s2641_s30 + $0x160] ss:$8 sps:$4 sm:$0xff]   ;;  %v2497_v46 = vld [vmem:[%s2641_s30 + $0x174] ss:$8 sps:$4 sm:$0xff]  }
  0x1b   : > { %v2499_v47 = vld [vmem:[%s2641_s30 + $0x70] ss:$8 sps:$4 sm:$0xff]   ;;  %v2501_v49 = vld [vmem:[%s2641_s30 + $0x84] ss:$8 sps:$4 sm:$0xff]   ;;  %v2505_v51 = vld [vmem:[%s2641_s30 + $0x80] ss:$8 sps:$4 sm:$0xff]  }
  0x1c   : > { %923 = vmatpush1.bf16.msra.mxu0 %v2442_v7  ;;  %2401 = vmatpush1.bf16.msra.mxu1 %v2442_v7  ;;  %v2500_v48 = vld [vmem:[%s2641_s30 + $0x170] ss:$8 sps:$4 sm:$0xff]   ;;  %v2503_v50 = vld [vmem:[%s2641_s30 + $0x184] ss:$8 sps:$4 sm:$0xff]   ;;  %v2506_v52 = vld [vmem:[%s2641_s30 + $0x180] ss:$8 sps:$4 sm:$0xff]  }
  0x1d   : > { %924 = vmatprep.subr.bf16.mxu0 %v2573_v1  ;;  %2386 = vmatprep.subr.bf16.mxu1 %v2573_v1  ;;  %v2507_v53 = vld [vmem:[%s2641_s30 + $0x94] ss:$8 sps:$4 sm:$0xff]   ;;  %v2511_v55 = vld [vmem:[%s2641_s30 + $0x90] ss:$8 sps:$4 sm:$0xff]   ;;  %v2513_v57 = vld [vmem:[%s2641_s30 + $0xa4] ss:$8 sps:$4 sm:$0xff]  }
  0x1e   : > { %v2509_v54 = vld [vmem:[%s2641_s30 + $0x194] ss:$8 sps:$4 sm:$0xff]   ;;  %v2512_v56 = vld [vmem:[%s2641_s30 + $0x190] ss:$8 sps:$4 sm:$0xff]   ;;  %v2515_v58 = vld [vmem:[%s2641_s30 + $0x1a4] ss:$8 sps:$4 sm:$0xff]  }
  0x1f   : > { %v2517_v59 = vld [vmem:[%s2641_s30 + $0xa0] ss:$8 sps:$4 sm:$0xff]   ;;  %v2519_v61 = vld [vmem:[%s2641_s30 + $0xb4] ss:$8 sps:$4 sm:$0xff]   ;;  %v2523_v63 = vld [vmem:[%s2641_s30 + $0xb0] ss:$8 sps:$4 sm:$0xff]  }
  0x20   : > { %925 = vmatpush1.bf16.msra.mxu0 %v2443_v9  ;;  %2402 = vmatpush1.bf16.msra.mxu1 %v2443_v9  ;;  %v2518_v60 = vld [vmem:[%s2641_s30 + $0x1a0] ss:$8 sps:$4 sm:$0xff]   ;;  %v2521_v62 = vld [vmem:[%s2641_s30 + $0x1b4] ss:$8 sps:$4 sm:$0xff]   ;;  %v2524_v0 = vld [vmem:[%s2641_s30 + $0x1b0] ss:$8 sps:$4 sm:$0xff]  }
  0x21   : > { %926 = vmatprep.subr.bf16.mxu0 %v2573_v1  ;;  %2387 = vmatprep.subr.bf16.mxu1 %v2573_v1  ;;  %v2527_v2 = vld [vmem:[%s2641_s30 + $0x1c4] ss:$8 sps:$4 sm:$0xff]   ;;  %v2529_v3 = vld [vmem:[%s2641_s30 + $0xc0] ss:$8 sps:$4 sm:$0xff]   ;;  %v2531_v5 = vld [vmem:[%s2641_s30 + $0xd4] ss:$8 sps:$4 sm:$0xff]  }
  0x22   : > { %v2530_v4 = vld [vmem:[%s2641_s30 + $0x1c0] ss:$8 sps:$4 sm:$0xff]   ;;  %v2533_v6 = vld [vmem:[%s2641_s30 + $0x1d4] ss:$8 sps:$4 sm:$0xff]   ;;  %v2535_v7 = vld [vmem:[%s2641_s30 + $0xd0] ss:$8 sps:$4 sm:$0xff]  }
  0x23   : > { %v2536_v8 = vld [vmem:[%s2641_s30 + $0x1d0] ss:$8 sps:$4 sm:$0xff]   ;;  %v2537_v9 = vld [vmem:[%s2641_s30 + $0xe4] ss:$8 sps:$4 sm:$0xff]  }
  0x24   : > { %927 = vmatpush1.bf16.msra.mxu0 %v2444_v10  ;;  %2403 = vmatpush1.bf16.msra.mxu1 %v2444_v10  ;;  %v2539_v10 = vld [vmem:[%s2641_s30 + $0x1e4] ss:$8 sps:$4 sm:$0xff]  }
  0x25   : > { %928 = vmatprep.subr.bf16.mxu0 %v2573_v1  ;;  %2388 = vmatprep.subr.bf16.mxu1 %v2573_v1 }
  0x28   : > { %929 = vmatpush1.bf16.msra.mxu0 %v2445_v11  ;;  %2404 = vmatpush1.bf16.msra.mxu1 %v2445_v11  ;;  %v2541_v11 = vld [vmem:[%s2641_s30 + $0xe0] ss:$8 sps:$4 sm:$0xff]  }
  0x29   : > { %930 = vmatprep.subr.bf16.mxu0 %v2573_v1  ;;  %2389 = vmatprep.subr.bf16.mxu1 %v2573_v1 }
  0x2c   : > { %931 = vmatpush1.bf16.msra.mxu0 %v2446_v12  ;;  %2405 = vmatpush1.bf16.msra.mxu1 %v2446_v12  ;;  %v2542_v12 = vld [vmem:[%s2641_s30 + $0x1e0] ss:$8 sps:$4 sm:$0xff]  }
  0x2d   : > { %932 = vmatprep.subr.bf16.mxu0 %v2573_v1  ;;  %2390 = vmatprep.subr.bf16.mxu1 %v2573_v1 }
  0x30   : > { %933 = vmatpush1.bf16.msra.mxu0 %v2447_v13  ;;  %2406 = vmatpush1.bf16.msra.mxu1 %v2447_v13  ;;  %v2543_v13 = vld [vmem:[%s2641_s30 + $0xf4] ss:$8 sps:$4 sm:$0xff]  }
  0x31   : > { %934 = vmatprep.subr.bf16.mxu0 %v2573_v1  ;;  %2391 = vmatprep.subr.bf16.mxu1 %v2573_v1 }
  0x34   : > { %935 = vmatpush1.bf16.msra.mxu0 %v2448_v14  ;;  %2407 = vmatpush1.bf16.msra.mxu1 %v2448_v14  ;;  %v2545_v14 = vld [vmem:[%s2641_s30 + $0x1f4] ss:$8 sps:$4 sm:$0xff]  }
  0x35   : > { %936 = vmatprep.subr.bf16.mxu0 %v2573_v1  ;;  %2392 = vmatprep.subr.bf16.mxu1 %v2573_v1 }
  0x38   : > { %937 = vmatpush1.bf16.msra.mxu0 %v2449_v15  ;;  %2408 = vmatpush1.bf16.msra.mxu1 %v2449_v15  ;;  %v2547_v15 = vld [vmem:[%s2641_s30 + $0xf0] ss:$8 sps:$4 sm:$0xff]  }
  0x39   : > { %938 = vmatprep.subr.bf16.mxu0 %v2573_v1  ;;  %2393 = vmatprep.subr.bf16.mxu1 %v2573_v1 }
  0x3c   : > { %939 = vmatpush1.bf16.msra.mxu0 %v2450_v16  ;;  %2409 = vmatpush1.bf16.msra.mxu1 %v2450_v16  ;;  %v2548_v16 = vld [vmem:[%s2641_s30 + $0x1f0] ss:$8 sps:$4 sm:$0xff]  }
  0x3d   : > { %940 = vmatprep.subr.bf16.mxu0 %v2573_v1  ;;  %2394 = vmatprep.subr.bf16.mxu1 %v2573_v1 }
  0x40   : > { %941 = vmatpush1.bf16.msra.mxu0 %v2451_v17  ;;  %2410 = vmatpush1.bf16.msra.mxu1 %v2451_v17  ;;  %v2767_v17 = vld [vmem:[%s2882_s2] ss:$0 sm:$0xff] }
  0x41   : > { %942 = vmatprep.subr.bf16.mxu0 %v2573_v1  ;;  %2395 = vmatprep.subr.bf16.mxu1 %v2573_v1  ;;  %v2525_v1 = vld [vmem:[%s2641_s30 + $0xc4] ss:$8 sps:$4 sm:$0xff]  }
  0x44   : > { %943 = vmatpush1.bf16.msra.mxu0 %v2452_v18  ;;  %2411 = vmatpush1.bf16.msra.mxu1 %v2452_v18 }
  0x47   : > { %945 = vmatmul.mubr.bf16.vlgmr.msra.gmra.mrb[0].mxu0 %v2453_v19  ;;  %1073 = vmatmul.mubr.bf16.vlgmr.msra.gmra.mrb[0].mxu1 %v2456_v20 }
  0x48   : > { %952 = vmatprep.mubr.bf16.mxu0 %v2459_v21  ;;  %1080 = vmatprep.mubr.bf16.mxu1 %v2461_v22 }
  0x4f   : > { %953 = vmatmul.mubr.bf16.gmra.mrb[4].mxu0 %v2463_v23  ;;  %1081 = vmatmul.mubr.bf16.gmra.mrb[4].mxu1 %v2464_v24 }
  0x50   : > { %960 = vmatprep.mubr.bf16.mxu0 %v2465_v25  ;;  %1088 = vmatprep.mubr.bf16.mxu1 %v2467_v26 }
  0x57   : > { %961 = vmatmul.mubr.bf16.gmra.mrb[8].mxu0 %v2469_v27  ;;  %1089 = vmatmul.mubr.bf16.gmra.mrb[8].mxu1 %v2470_v28 }
  0x58   : > { %968 = vmatprep.mubr.bf16.mxu0 %v2471_v29  ;;  %1096 = vmatprep.mubr.bf16.mxu1 %v2473_v30 }
  0x5f   : > { %969 = vmatmul.mubr.bf16.gmra.mrb[12].mxu0 %v2475_v31  ;;  %1097 = vmatmul.mubr.bf16.gmra.mrb[12].mxu1 %v2476_v32 }
  0x60   : > { %976 = vmatprep.mubr.bf16.mxu0 %v2477_v33  ;;  %1104 = vmatprep.mubr.bf16.mxu1 %v2479_v34 }
  0x67   : > { %977 = vmatmul.mubr.bf16.gmra.mrb[16].mxu0 %v2481_v35  ;;  %1105 = vmatmul.mubr.bf16.gmra.mrb[16].mxu1 %v2482_v36 }
  0x68   : > { %984 = vmatprep.mubr.bf16.mxu0 %v2483_v37  ;;  %1112 = vmatprep.mubr.bf16.mxu1 %v2485_v38 }
  0x6f   : > { %985 = vmatmul.mubr.bf16.gmra.mrb[20].mxu0 %v2487_v39  ;;  %1113 = vmatmul.mubr.bf16.gmra.mrb[20].mxu1 %v2488_v40 }
  0x70   : > { %992 = vmatprep.mubr.bf16.mxu0 %v2489_v41  ;;  %1120 = vmatprep.mubr.bf16.mxu1 %v2491_v42 }
  0x77   : > { %993 = vmatmul.mubr.bf16.gmra.mrb[24].mxu0 %v2493_v43  ;;  %1121 = vmatmul.mubr.bf16.gmra.mrb[24].mxu1 %v2494_v44 }
  0x78   : > { %1000 = vmatprep.mubr.bf16.mxu0 %v2495_v45  ;;  %1128 = vmatprep.mubr.bf16.mxu1 %v2497_v46 }
  0x7f   : > { %1001 = vmatmul.mubr.bf16.gmra.mrb[28].mxu0 %v2499_v47  ;;  %1129 = vmatmul.mubr.bf16.gmra.mrb[28].mxu1 %v2500_v48 }
  0x80   : > { %1008 = vmatprep.mubr.bf16.mxu0 %v2501_v49  ;;  %1136 = vmatprep.mubr.bf16.mxu1 %v2503_v50 }
  0x87   : > { %1009 = vmatmul.mubr.bf16.gmra.mrb[32].mxu0 %v2505_v51  ;;  %1137 = vmatmul.mubr.bf16.gmra.mrb[32].mxu1 %v2506_v52 }
  0x88   : > { %1016 = vmatprep.mubr.bf16.mxu0 %v2507_v53  ;;  %1144 = vmatprep.mubr.bf16.mxu1 %v2509_v54 }
  0x8f   : > { %1017 = vmatmul.mubr.bf16.gmra.mrb[36].mxu0 %v2511_v55  ;;  %1145 = vmatmul.mubr.bf16.gmra.mrb[36].mxu1 %v2512_v56 }
  0x90   : > { %1024 = vmatprep.mubr.bf16.mxu0 %v2513_v57  ;;  %1152 = vmatprep.mubr.bf16.mxu1 %v2515_v58 }
  0x97   : > { %1025 = vmatmul.mubr.bf16.gmra.mrb[40].mxu0 %v2517_v59  ;;  %1153 = vmatmul.mubr.bf16.gmra.mrb[40].mxu1 %v2518_v60 }
  0x98   : > { %1032 = vmatprep.mubr.bf16.mxu0 %v2519_v61  ;;  %1160 = vmatprep.mubr.bf16.mxu1 %v2521_v62 }
  0x9f   : > { %1033 = vmatmul.mubr.bf16.gmra.mrb[44].mxu0 %v2523_v63  ;;  %1161 = vmatmul.mubr.bf16.gmra.mrb[44].mxu1 %v2524_v0 }
  0xa0   : > { %1040 = vmatprep.mubr.bf16.mxu0 %v2525_v1  ;;  %1168 = vmatprep.mubr.bf16.mxu1 %v2527_v2 }
  0xa7   : > { %1041 = vmatmul.mubr.bf16.gmra.mrb[48].mxu0 %v2529_v3  ;;  %1169 = vmatmul.mubr.bf16.gmra.mrb[48].mxu1 %v2530_v4 }
  0xa8   : > { %1048 = vmatprep.mubr.bf16.mxu0 %v2531_v5  ;;  %1176 = vmatprep.mubr.bf16.mxu1 %v2533_v6 }
  0xaf   : > { %1049 = vmatmul.mubr.bf16.gmra.mrb[52].mxu0 %v2535_v7  ;;  %1177 = vmatmul.mubr.bf16.gmra.mrb[52].mxu1 %v2536_v8 }
  0xb0   : > { %1056 = vmatprep.mubr.bf16.mxu0 %v2537_v9  ;;  %1184 = vmatprep.mubr.bf16.mxu1 %v2539_v10 }
  0xb7   : > { %1057 = vmatmul.mubr.bf16.gmra.mrb[56].mxu0 %v2541_v11  ;;  %1185 = vmatmul.mubr.bf16.gmra.mrb[56].mxu1 %v2542_v12 }
  0xb8   : > { %1064 = vmatprep.mubr.bf16.mxu0 %v2543_v13  ;;  %1192 = vmatprep.mubr.bf16.mxu1 %v2545_v14 }
  0xbf   : > { %1065 = vmatmul.mubr.bf16.gmra.mrb[60].mxu0 %v2547_v15  ;;  %1193 = vmatmul.mubr.bf16.gmra.mrb[60].mxu1 %v2548_v16 }
 0x11a   : > { %v946_v18 = vpop.f32.mrb[0].mxu0  ;;  %v1074_v19 = vpop.f32.mrb[0].mxu1 }
 0x11b   : > { %v1403_v20 = vadd.f32 %v2767_v17, %v946_v18  ;;  %v1435_v21 = vadd.f32 %v2767_v17, %v1074_v19  ;;  %v948_v22 = vpop.f32.mrb[1].mxu0  ;;  %v1076_v23 = vpop.f32.mrb[1].mxu1 }
 0x11c   : > { %v949_v24 = vpop.f32.mrb[2].mxu0  ;;  %v1077_v25 = vpop.f32.mrb[2].mxu1 }
 0x11d   : > { %v1404_v26 = vadd.f32 %v2767_v17, %v949_v24  ;;  %v1436_v27 = vadd.f32 %v2767_v17, %v1077_v25  ;;  %v951_v28 = vpop.f32.mrb[3].mxu0  ;;  %v1079_v29 = vpop.f32.mrb[3].mxu1  ;;  %v1467_v30 = vmax.f32 %v1403_v20, 0.0  ;;  %v1499_v31 = vmax.f32 %v1435_v21, 0.0 }
 0x11f   : > { %v1468_v32 = vmax.f32 %v1404_v26, 0.0  ;;  %v1500_v33 = vmax.f32 %v1436_v27, 0.0 }
 0x121   : > { %v2192_v34 = vpack.c.bf16 %v1468_v32, %v1467_v30  ;;  %v2272_v35 = vpack.c.bf16 %v1500_v33, %v1499_v31 }
 0x122   : > { %v954_v36 = vpop.f32.mrb[4].mxu0  ;;  %v1082_v37 = vpop.f32.mrb[4].mxu1 }
 0x123   : > { %2193 = vst [vmem:[%s2777_s8] sm:$0xff] %v2192_v34   ;;  %2364 = vst [vmem:[%s2777_s8 + $0x80] sm:$0xff] %v2272_v35   ;;  %v1405_v38 = vadd.f32 %v2767_v17, %v954_v36  ;;  %v1437_v39 = vadd.f32 %v2767_v17, %v1082_v37  ;;  %v956_v40 = vpop.f32.mrb[5].mxu0  ;;  %v1084_v41 = vpop.f32.mrb[5].mxu1 }
 0x124   : > { %v957_v42 = vpop.f32.mrb[6].mxu0  ;;  %v1085_v43 = vpop.f32.mrb[6].mxu1 }
 0x125   : > { %v1406_v44 = vadd.f32 %v2767_v17, %v957_v42  ;;  %v1438_v45 = vadd.f32 %v2767_v17, %v1085_v43  ;;  %v959_v46 = vpop.f32.mrb[7].mxu0  ;;  %v1087_v47 = vpop.f32.mrb[7].mxu1  ;;  %v1469_v48 = vmax.f32 %v1405_v38, 0.0  ;;  %v1501_v49 = vmax.f32 %v1437_v39, 0.0 }
 0x127   : > { %v1470_v50 = vmax.f32 %v1406_v44, 0.0  ;;  %v1502_v51 = vmax.f32 %v1438_v45, 0.0 }
 0x129   : > { %v2197_v52 = vpack.c.bf16 %v1470_v50, %v1469_v48  ;;  %v2277_v53 = vpack.c.bf16 %v1502_v51, %v1501_v49 }
 0x12a   : > { %v962_v54 = vpop.f32.mrb[8].mxu0  ;;  %v1090_v55 = vpop.f32.mrb[8].mxu1 }
 0x12b   : > { %2349 = vst [vmem:[%s2777_s8 + $0x8] sm:$0xff] %v2197_v52   ;;  %2365 = vst [vmem:[%s2777_s8 + $0x88] sm:$0xff] %v2277_v53   ;;  %v1407_v56 = vadd.f32 %v2767_v17, %v962_v54  ;;  %v1439_v57 = vadd.f32 %v2767_v17, %v1090_v55  ;;  %v964_v58 = vpop.f32.mrb[9].mxu0  ;;  %v1092_v59 = vpop.f32.mrb[9].mxu1 }
 0x12c   : > { %v965_v60 = vpop.f32.mrb[10].mxu0  ;;  %v1093_v61 = vpop.f32.mrb[10].mxu1 }
 0x12d   : > { %v1408_v62 = vadd.f32 %v2767_v17, %v965_v60  ;;  %v1440_v63 = vadd.f32 %v2767_v17, %v1093_v61  ;;  %v967_v0 = vpop.f32.mrb[11].mxu0  ;;  %v1095_v1 = vpop.f32.mrb[11].mxu1  ;;  %v1471_v2 = vmax.f32 %v1407_v56, 0.0  ;;  %v1503_v3 = vmax.f32 %v1439_v57, 0.0 }
 0x12f   : > { %v1472_v4 = vmax.f32 %v1408_v62, 0.0  ;;  %v1504_v5 = vmax.f32 %v1440_v63, 0.0 }
 0x131   : > { %v2202_v6 = vpack.c.bf16 %v1472_v4, %v1471_v2  ;;  %v2282_v7 = vpack.c.bf16 %v1504_v5, %v1503_v3 }
 0x132   : > { %v970_v8 = vpop.f32.mrb[12].mxu0  ;;  %v1098_v9 = vpop.f32.mrb[12].mxu1 }
 0x133   : > { %2350 = vst [vmem:[%s2777_s8 + $0x10] sm:$0xff] %v2202_v6   ;;  %2366 = vst [vmem:[%s2777_s8 + $0x90] sm:$0xff] %v2282_v7   ;;  %v1409_v10 = vadd.f32 %v2767_v17, %v970_v8  ;;  %v1441_v11 = vadd.f32 %v2767_v17, %v1098_v9  ;;  %v972_v12 = vpop.f32.mrb[13].mxu0  ;;  %v1100_v13 = vpop.f32.mrb[13].mxu1 }
 0x134   : > { %v973_v14 = vpop.f32.mrb[14].mxu0  ;;  %v1101_v15 = vpop.f32.mrb[14].mxu1 }
 0x135   : > { %v1410_v16 = vadd.f32 %v2767_v17, %v973_v14  ;;  %v1442_v18 = vadd.f32 %v2767_v17, %v1101_v15  ;;  %v975_v19 = vpop.f32.mrb[15].mxu0  ;;  %v1103_v20 = vpop.f32.mrb[15].mxu1  ;;  %v1473_v21 = vmax.f32 %v1409_v10, 0.0  ;;  %v1505_v22 = vmax.f32 %v1441_v11, 0.0 }
 0x137   : > { %v1474_v23 = vmax.f32 %v1410_v16, 0.0  ;;  %v1506_v24 = vmax.f32 %v1442_v18, 0.0 }
 0x139   : > { %v2207_v25 = vpack.c.bf16 %v1474_v23, %v1473_v21  ;;  %v2287_v26 = vpack.c.bf16 %v1506_v24, %v1505_v22 }
 0x13a   : > { %v978_v27 = vpop.f32.mrb[16].mxu0  ;;  %v1106_v28 = vpop.f32.mrb[16].mxu1 }
 0x13b   : > { %2351 = vst [vmem:[%s2777_s8 + $0x18] sm:$0xff] %v2207_v25   ;;  %2367 = vst [vmem:[%s2777_s8 + $0x98] sm:$0xff] %v2287_v26   ;;  %v1411_v29 = vadd.f32 %v2767_v17, %v978_v27  ;;  %v1443_v30 = vadd.f32 %v2767_v17, %v1106_v28  ;;  %v980_v31 = vpop.f32.mrb[17].mxu0  ;;  %v1108_v32 = vpop.f32.mrb[17].mxu1 }
 0x13c   : > { %v981_v33 = vpop.f32.mrb[18].mxu0  ;;  %v1109_v34 = vpop.f32.mrb[18].mxu1 }
 0x13d   : > { %v1412_v35 = vadd.f32 %v2767_v17, %v981_v33  ;;  %v1444_v36 = vadd.f32 %v2767_v17, %v1109_v34  ;;  %v983_v37 = vpop.f32.mrb[19].mxu0  ;;  %v1111_v38 = vpop.f32.mrb[19].mxu1  ;;  %v1475_v39 = vmax.f32 %v1411_v29, 0.0  ;;  %v1507_v40 = vmax.f32 %v1443_v30, 0.0 }
 0x13f   : > { %v1476_v41 = vmax.f32 %v1412_v35, 0.0  ;;  %v1508_v42 = vmax.f32 %v1444_v36, 0.0 }
 0x141   : > { %v2212_v43 = vpack.c.bf16 %v1476_v41, %v1475_v39  ;;  %v2292_v44 = vpack.c.bf16 %v1508_v42, %v1507_v40 }
 0x142   : > { %v986_v45 = vpop.f32.mrb[20].mxu0  ;;  %v1114_v46 = vpop.f32.mrb[20].mxu1 }
 0x143   : > { %2352 = vst [vmem:[%s2777_s8 + $0x20] sm:$0xff] %v2212_v43   ;;  %2368 = vst [vmem:[%s2777_s8 + $0xa0] sm:$0xff] %v2292_v44   ;;  %v1413_v47 = vadd.f32 %v2767_v17, %v986_v45  ;;  %v1445_v48 = vadd.f32 %v2767_v17, %v1114_v46  ;;  %v988_v49 = vpop.f32.mrb[21].mxu0  ;;  %v1116_v50 = vpop.f32.mrb[21].mxu1 }
 0x144   : > { %v989_v51 = vpop.f32.mrb[22].mxu0  ;;  %v1117_v52 = vpop.f32.mrb[22].mxu1 }
 0x145   : > { %v1414_v53 = vadd.f32 %v2767_v17, %v989_v51  ;;  %v1446_v54 = vadd.f32 %v2767_v17, %v1117_v52  ;;  %v991_v55 = vpop.f32.mrb[23].mxu0  ;;  %v1119_v56 = vpop.f32.mrb[23].mxu1  ;;  %v1477_v57 = vmax.f32 %v1413_v47, 0.0  ;;  %v1509_v58 = vmax.f32 %v1445_v48, 0.0 }
 0x147   : > { %v1478_v59 = vmax.f32 %v1414_v53, 0.0  ;;  %v1510_v60 = vmax.f32 %v1446_v54, 0.0 }
 0x149   : > { %v2217_v61 = vpack.c.bf16 %v1478_v59, %v1477_v57  ;;  %v2297_v62 = vpack.c.bf16 %v1510_v60, %v1509_v58 }
 0x14a   : > { %v994_v63 = vpop.f32.mrb[24].mxu0  ;;  %v1122_v0 = vpop.f32.mrb[24].mxu1 }
 0x14b   : > { %2353 = vst [vmem:[%s2777_s8 + $0x28] sm:$0xff] %v2217_v61   ;;  %2369 = vst [vmem:[%s2777_s8 + $0xa8] sm:$0xff] %v2297_v62   ;;  %v1415_v1 = vadd.f32 %v2767_v17, %v994_v63  ;;  %v1447_v2 = vadd.f32 %v2767_v17, %v1122_v0  ;;  %v996_v3 = vpop.f32.mrb[25].mxu0  ;;  %v1124_v4 = vpop.f32.mrb[25].mxu1 }
 0x14c   : > { %v997_v5 = vpop.f32.mrb[26].mxu0  ;;  %v1125_v6 = vpop.f32.mrb[26].mxu1 }
 0x14d   : > { %v1416_v7 = vadd.f32 %v2767_v17, %v997_v5  ;;  %v1448_v8 = vadd.f32 %v2767_v17, %v1125_v6  ;;  %v999_v9 = vpop.f32.mrb[27].mxu0  ;;  %v1127_v10 = vpop.f32.mrb[27].mxu1  ;;  %v1479_v11 = vmax.f32 %v1415_v1, 0.0  ;;  %v1511_v12 = vmax.f32 %v1447_v2, 0.0 }
 0x14f   : > { %v1480_v13 = vmax.f32 %v1416_v7, 0.0  ;;  %v1512_v14 = vmax.f32 %v1448_v8, 0.0 }
 0x151   : > { %v2222_v15 = vpack.c.bf16 %v1480_v13, %v1479_v11  ;;  %v2302_v16 = vpack.c.bf16 %v1512_v14, %v1511_v12 }
 0x152   : > { %v1002_v18 = vpop.f32.mrb[28].mxu0  ;;  %v1130_v19 = vpop.f32.mrb[28].mxu1 }
 0x153   : > { %2354 = vst [vmem:[%s2777_s8 + $0x30] sm:$0xff] %v2222_v15   ;;  %2370 = vst [vmem:[%s2777_s8 + $0xb0] sm:$0xff] %v2302_v16   ;;  %v1417_v20 = vadd.f32 %v2767_v17, %v1002_v18  ;;  %v1449_v21 = vadd.f32 %v2767_v17, %v1130_v19  ;;  %v1004_v22 = vpop.f32.mrb[29].mxu0  ;;  %v1132_v23 = vpop.f32.mrb[29].mxu1 }
 0x154   : > { %v1005_v24 = vpop.f32.mrb[30].mxu0  ;;  %v1133_v25 = vpop.f32.mrb[30].mxu1 }
 0x155   : > { %v1418_v26 = vadd.f32 %v2767_v17, %v1005_v24  ;;  %v1450_v27 = vadd.f32 %v2767_v17, %v1133_v25  ;;  %v1007_v28 = vpop.f32.mrb[31].mxu0  ;;  %v1135_v29 = vpop.f32.mrb[31].mxu1  ;;  %v1481_v30 = vmax.f32 %v1417_v20, 0.0  ;;  %v1513_v31 = vmax.f32 %v1449_v21, 0.0 }
 0x157   : > { %v1482_v32 = vmax.f32 %v1418_v26, 0.0  ;;  %v1514_v33 = vmax.f32 %v1450_v27, 0.0 }
 0x159   : > { %v2227_v34 = vpack.c.bf16 %v1482_v32, %v1481_v30  ;;  %v2307_v35 = vpack.c.bf16 %v1514_v33, %v1513_v31 }
 0x15a   : > { %v1010_v36 = vpop.f32.mrb[32].mxu0  ;;  %v1138_v37 = vpop.f32.mrb[32].mxu1 }
 0x15b   : > { %2355 = vst [vmem:[%s2777_s8 + $0x38] sm:$0xff] %v2227_v34   ;;  %2371 = vst [vmem:[%s2777_s8 + $0xb8] sm:$0xff] %v2307_v35   ;;  %v1419_v38 = vadd.f32 %v2767_v17, %v1010_v36  ;;  %v1451_v39 = vadd.f32 %v2767_v17, %v1138_v37  ;;  %v1012_v40 = vpop.f32.mrb[33].mxu0  ;;  %v1140_v41 = vpop.f32.mrb[33].mxu1 }
 0x15c   : > { %v1013_v42 = vpop.f32.mrb[34].mxu0  ;;  %v1141_v43 = vpop.f32.mrb[34].mxu1 }
 0x15d   : > { %v1420_v44 = vadd.f32 %v2767_v17, %v1013_v42  ;;  %v1452_v45 = vadd.f32 %v2767_v17, %v1141_v43  ;;  %v1015_v46 = vpop.f32.mrb[35].mxu0  ;;  %v1143_v47 = vpop.f32.mrb[35].mxu1  ;;  %v1483_v48 = vmax.f32 %v1419_v38, 0.0  ;;  %v1515_v49 = vmax.f32 %v1451_v39, 0.0 }
 0x15f   : > { %v1484_v50 = vmax.f32 %v1420_v44, 0.0  ;;  %v1516_v51 = vmax.f32 %v1452_v45, 0.0 }
 0x161   : > { %v2232_v52 = vpack.c.bf16 %v1484_v50, %v1483_v48  ;;  %v2312_v53 = vpack.c.bf16 %v1516_v51, %v1515_v49 }
 0x162   : > { %v1018_v54 = vpop.f32.mrb[36].mxu0  ;;  %v1146_v55 = vpop.f32.mrb[36].mxu1 }
 0x163   : > { %2356 = vst [vmem:[%s2777_s8 + $0x40] sm:$0xff] %v2232_v52   ;;  %2372 = vst [vmem:[%s2777_s8 + $0xc0] sm:$0xff] %v2312_v53   ;;  %v1421_v56 = vadd.f32 %v2767_v17, %v1018_v54  ;;  %v1453_v57 = vadd.f32 %v2767_v17, %v1146_v55  ;;  %v1020_v58 = vpop.f32.mrb[37].mxu0  ;;  %v1148_v59 = vpop.f32.mrb[37].mxu1 }
 0x164   : > { %v1021_v60 = vpop.f32.mrb[38].mxu0  ;;  %v1149_v61 = vpop.f32.mrb[38].mxu1 }
 0x165   : > { %v1422_v62 = vadd.f32 %v2767_v17, %v1021_v60  ;;  %v1454_v63 = vadd.f32 %v2767_v17, %v1149_v61  ;;  %v1023_v0 = vpop.f32.mrb[39].mxu0  ;;  %v1151_v1 = vpop.f32.mrb[39].mxu1  ;;  %v1485_v2 = vmax.f32 %v1421_v56, 0.0  ;;  %v1517_v3 = vmax.f32 %v1453_v57, 0.0 }
 0x167   : > { %v1486_v4 = vmax.f32 %v1422_v62, 0.0  ;;  %v1518_v5 = vmax.f32 %v1454_v63, 0.0 }
 0x169   : > { %v2237_v6 = vpack.c.bf16 %v1486_v4, %v1485_v2  ;;  %v2317_v7 = vpack.c.bf16 %v1518_v5, %v1517_v3 }
 0x16a   : > { %v1026_v8 = vpop.f32.mrb[40].mxu0  ;;  %v1154_v9 = vpop.f32.mrb[40].mxu1 }
 0x16b   : > { %2357 = vst [vmem:[%s2777_s8 + $0x48] sm:$0xff] %v2237_v6   ;;  %2373 = vst [vmem:[%s2777_s8 + $0xc8] sm:$0xff] %v2317_v7   ;;  %v1423_v10 = vadd.f32 %v2767_v17, %v1026_v8  ;;  %v1455_v11 = vadd.f32 %v2767_v17, %v1154_v9  ;;  %v1028_v12 = vpop.f32.mrb[41].mxu0  ;;  %v1156_v13 = vpop.f32.mrb[41].mxu1 }
 0x16c   : > { %v1029_v14 = vpop.f32.mrb[42].mxu0  ;;  %v1157_v15 = vpop.f32.mrb[42].mxu1 }
 0x16d   : > { %v1424_v16 = vadd.f32 %v2767_v17, %v1029_v14  ;;  %v1456_v18 = vadd.f32 %v2767_v17, %v1157_v15  ;;  %v1031_v19 = vpop.f32.mrb[43].mxu0  ;;  %v1159_v20 = vpop.f32.mrb[43].mxu1  ;;  %v1487_v21 = vmax.f32 %v1423_v10, 0.0  ;;  %v1519_v22 = vmax.f32 %v1455_v11, 0.0 }
 0x16f   : > { %v1488_v23 = vmax.f32 %v1424_v16, 0.0  ;;  %v1520_v24 = vmax.f32 %v1456_v18, 0.0 }
 0x171   : > { %v2242_v25 = vpack.c.bf16 %v1488_v23, %v1487_v21  ;;  %v2322_v26 = vpack.c.bf16 %v1520_v24, %v1519_v22 }
 0x172   : > { %v1034_v27 = vpop.f32.mrb[44].mxu0  ;;  %v1162_v28 = vpop.f32.mrb[44].mxu1 }
 0x173   : > { %2358 = vst [vmem:[%s2777_s8 + $0x50] sm:$0xff] %v2242_v25   ;;  %2374 = vst [vmem:[%s2777_s8 + $0xd0] sm:$0xff] %v2322_v26   ;;  %v1425_v29 = vadd.f32 %v2767_v17, %v1034_v27  ;;  %v1457_v30 = vadd.f32 %v2767_v17, %v1162_v28  ;;  %v1036_v31 = vpop.f32.mrb[45].mxu0  ;;  %v1164_v32 = vpop.f32.mrb[45].mxu1 }
 0x174   : > { %v1037_v33 = vpop.f32.mrb[46].mxu0  ;;  %v1165_v34 = vpop.f32.mrb[46].mxu1 }
 0x175   : > { %v1426_v35 = vadd.f32 %v2767_v17, %v1037_v33  ;;  %v1458_v36 = vadd.f32 %v2767_v17, %v1165_v34  ;;  %v1039_v37 = vpop.f32.mrb[47].mxu0  ;;  %v1167_v38 = vpop.f32.mrb[47].mxu1  ;;  %v1489_v39 = vmax.f32 %v1425_v29, 0.0  ;;  %v1521_v40 = vmax.f32 %v1457_v30, 0.0 }
 0x177   : > { %v1490_v41 = vmax.f32 %v1426_v35, 0.0  ;;  %v1522_v42 = vmax.f32 %v1458_v36, 0.0 }
 0x179   : > { %v2247_v43 = vpack.c.bf16 %v1490_v41, %v1489_v39  ;;  %v2327_v44 = vpack.c.bf16 %v1522_v42, %v1521_v40 }
 0x17a   : > { %v1042_v45 = vpop.f32.mrb[48].mxu0  ;;  %v1170_v46 = vpop.f32.mrb[48].mxu1 }
 0x17b   : > { %2359 = vst [vmem:[%s2777_s8 + $0x58] sm:$0xff] %v2247_v43   ;;  %2375 = vst [vmem:[%s2777_s8 + $0xd8] sm:$0xff] %v2327_v44   ;;  %v1427_v47 = vadd.f32 %v2767_v17, %v1042_v45  ;;  %v1459_v48 = vadd.f32 %v2767_v17, %v1170_v46  ;;  %v1044_v49 = vpop.f32.mrb[49].mxu0  ;;  %v1172_v50 = vpop.f32.mrb[49].mxu1 }
 0x17c   : > { %v1045_v51 = vpop.f32.mrb[50].mxu0  ;;  %v1173_v52 = vpop.f32.mrb[50].mxu1 }
 0x17d   : > { %v1428_v53 = vadd.f32 %v2767_v17, %v1045_v51  ;;  %v1460_v54 = vadd.f32 %v2767_v17, %v1173_v52  ;;  %v1047_v55 = vpop.f32.mrb[51].mxu0  ;;  %v1175_v56 = vpop.f32.mrb[51].mxu1  ;;  %v1491_v57 = vmax.f32 %v1427_v47, 0.0  ;;  %v1523_v58 = vmax.f32 %v1459_v48, 0.0 }
 0x17f   : > { %v1492_v59 = vmax.f32 %v1428_v53, 0.0  ;;  %v1524_v60 = vmax.f32 %v1460_v54, 0.0 }
 0x181   : > { %v2252_v61 = vpack.c.bf16 %v1492_v59, %v1491_v57  ;;  %v2332_v62 = vpack.c.bf16 %v1524_v60, %v1523_v58 }
 0x182   : > { %v1050_v63 = vpop.f32.mrb[52].mxu0  ;;  %v1178_v0 = vpop.f32.mrb[52].mxu1 }
 0x183   : > { %2360 = vst [vmem:[%s2777_s8 + $0x60] sm:$0xff] %v2252_v61   ;;  %2376 = vst [vmem:[%s2777_s8 + $0xe0] sm:$0xff] %v2332_v62   ;;  %v1429_v1 = vadd.f32 %v2767_v17, %v1050_v63  ;;  %v1461_v2 = vadd.f32 %v2767_v17, %v1178_v0  ;;  %v1052_v3 = vpop.f32.mrb[53].mxu0  ;;  %v1180_v4 = vpop.f32.mrb[53].mxu1 }
 0x184   : > { %v1053_v5 = vpop.f32.mrb[54].mxu0  ;;  %v1181_v6 = vpop.f32.mrb[54].mxu1 }
 0x185   : > { %v1430_v7 = vadd.f32 %v2767_v17, %v1053_v5  ;;  %v1462_v8 = vadd.f32 %v2767_v17, %v1181_v6  ;;  %v1055_v9 = vpop.f32.mrb[55].mxu0  ;;  %v1183_v10 = vpop.f32.mrb[55].mxu1  ;;  %v1493_v11 = vmax.f32 %v1429_v1, 0.0  ;;  %v1525_v12 = vmax.f32 %v1461_v2, 0.0 }
 0x187   : > { %v1494_v13 = vmax.f32 %v1430_v7, 0.0  ;;  %v1526_v14 = vmax.f32 %v1462_v8, 0.0 }
 0x189   : > { %v2257_v15 = vpack.c.bf16 %v1494_v13, %v1493_v11  ;;  %v2337_v16 = vpack.c.bf16 %v1526_v14, %v1525_v12 }
 0x18a   : > { %v1058_v18 = vpop.f32.mrb[56].mxu0  ;;  %v1186_v19 = vpop.f32.mrb[56].mxu1 }
 0x18b   : > { %2361 = vst [vmem:[%s2777_s8 + $0x68] sm:$0xff] %v2257_v15   ;;  %2377 = vst [vmem:[%s2777_s8 + $0xe8] sm:$0xff] %v2337_v16   ;;  %v1431_v20 = vadd.f32 %v2767_v17, %v1058_v18  ;;  %v1463_v21 = vadd.f32 %v2767_v17, %v1186_v19  ;;  %v1060_v22 = vpop.f32.mrb[57].mxu0  ;;  %v1188_v23 = vpop.f32.mrb[57].mxu1 }
 0x18c   : > { %v1061_v24 = vpop.f32.mrb[58].mxu0  ;;  %v1189_v25 = vpop.f32.mrb[58].mxu1 }
 0x18d   : > { %v1432_v26 = vadd.f32 %v2767_v17, %v1061_v24  ;;  %v1464_v27 = vadd.f32 %v2767_v17, %v1189_v25  ;;  %v1063_v28 = vpop.f32.mrb[59].mxu0  ;;  %v1191_v29 = vpop.f32.mrb[59].mxu1  ;;  %v1495_v30 = vmax.f32 %v1431_v20, 0.0  ;;  %v1527_v31 = vmax.f32 %v1463_v21, 0.0 }
 0x18f   : > { %v1496_v32 = vmax.f32 %v1432_v26, 0.0  ;;  %v1528_v33 = vmax.f32 %v1464_v27, 0.0 }
 0x191   : > { %v2262_v34 = vpack.c.bf16 %v1496_v32, %v1495_v30  ;;  %v2342_v35 = vpack.c.bf16 %v1528_v33, %v1527_v31 }
 0x192   : > { %v1066_v36 = vpop.f32.mrb[60].mxu0  ;;  %v1194_v37 = vpop.f32.mrb[60].mxu1 }
 0x193   : > { %2362 = vst [vmem:[%s2777_s8 + $0x70] sm:$0xff] %v2262_v34   ;;  %2378 = vst [vmem:[%s2777_s8 + $0xf0] sm:$0xff] %v2342_v35   ;;  %v1433_v38 = vadd.f32 %v2767_v17, %v1066_v36  ;;  %v1465_v39 = vadd.f32 %v2767_v17, %v1194_v37  ;;  %v1068_v40 = vpop.f32.mrb[61].mxu0  ;;  %v1196_v41 = vpop.f32.mrb[61].mxu1 }
 0x194   : > { %v1069_v42 = vpop.f32.mrb[62].mxu0  ;;  %v1197_v43 = vpop.f32.mrb[62].mxu1 }
 0x195   : > { %v1434_v44 = vadd.f32 %v2767_v17, %v1069_v42  ;;  %v1466_v45 = vadd.f32 %v2767_v17, %v1197_v43  ;;  %v1071_v46 = vpop.f32.mrb[63].mxu0  ;;  %v1199_v47 = vpop.f32.mrb[63].mxu1  ;;  %v1497_v48 = vmax.f32 %v1433_v38, 0.0  ;;  %v1529_v49 = vmax.f32 %v1465_v39, 0.0 }
 0x197   : > { %v1498_v50 = vmax.f32 %v1434_v44, 0.0  ;;  %v1530_v51 = vmax.f32 %v1466_v45, 0.0 }
 0x199   : > { %v2267_v52 = vpack.c.bf16 %v1498_v50, %v1497_v48  ;;  %v2347_v53 = vpack.c.bf16 %v1530_v51, %v1529_v49 }
 0x19b   : > { %2363 = vst [vmem:[%s2777_s8 + $0x78] sm:$0xff] %v2267_v52   ;;  %2379 = vst [vmem:[%s2777_s8 + $0xf8] sm:$0xff] %v2347_v53  }
 0x19c PF: > { %s13_s14 = sadd.s32 1, %s2571_s14   ;;  %s2884_s12 = smov %s2567_s13 }
 0x19d   : > { %p10_p5 = scmp.ge.s32.totalorder %s13_s14, 6   ;;  %s2885_s13 = smov %s2887_s15 }
 0x19f   :  { %12 = sbr.rel (!%p10_p5) target bundleno = 2 (0x2), region = 76 }

// kernel: vgg_loss.41
= control target key start
LH: loop header
LB: loop body
LE: loop exit
PB: predicated region body
PF: predicated region fallthrough
CT: control target
= control target key end

     0   :  { %vm465_vm0 = vcmask 125952   ;;  %s1583_s0 = inlined_call_operand.vmem [shape: bf16[512,16], index: 0, kind: input, shape index: {}]   ;;  %s1584_s1 = inlined_call_operand.vmem [shape: bf16[512,16], index: 1, kind: input, shape index: {}]   ;;  %s1585_s2 = inlined_call_operand.vmem [shape: bf16[512,16], index: 2, kind: input, shape index: {}]   ;;  %s1586_s3 = inlined_call_operand.vmem [shape: bf16[512,16], index: 3, kind: input, shape index: {}]   ;;  %s1587_s4 = inlined_call_operand.vmem [shape: bf16[512,16], index: 4, kind: output, shape index: {}]  }
   0x1   :  { %v17_v0 = vld [vmem:[%s1583_s0] sm:$0xf]  ;;  %v18_v5 = vld [vmem:[%s1583_s0 + $0x4] sm:$0xf]  ;;  %v19_v11 = vld [vmem:[%s1583_s0 + $0x8] sm:$0xf] }
   0x2   :  { %v81_v1 = vld [vmem:[%s1584_s1] sm:$0xf]  ;;  %v82_v6 = vld [vmem:[%s1584_s1 + $0x4] sm:$0xf]  ;;  %v83_v13 = vld [vmem:[%s1584_s1 + $0x8] sm:$0xf] }
   0x3   :  { %v209_v2 = vld [vmem:[%s1585_s2] sm:$0xf]  ;;  %v145_v3 = vmax.bf16 %v81_v1, %v17_v0  ;;  %v146_v8 = vmax.bf16 %v82_v6, %v18_v5  ;;  %v210_v9 = vld [vmem:[%s1585_s2 + $0x4] sm:$0xf]  ;;  %v211_v14 = vld [vmem:[%s1585_s2 + $0x8] sm:$0xf]  ;;  %v147_v17 = vmax.bf16 %v83_v13, %v19_v11 }
   0x4   :  { %v273_v4 = vld [vmem:[%s1586_s3] sm:$0xf]  ;;  %v274_v10 = vld [vmem:[%s1586_s3 + $0x4] sm:$0xf]  ;;  %v275_v15 = vld [vmem:[%s1586_s3 + $0x8] sm:$0xf] }
   0x5   :  { %v337_v7 = vmax.bf16 %v273_v4, %v209_v2  ;;  %v338_v12 = vmax.bf16 %v274_v10, %v210_v9  ;;  %v339_v18 = vmax.bf16 %v275_v15, %v211_v14  ;;  %v20_v19 = vld [vmem:[%s1583_s0 + $0xc] sm:$0xf]  ;;  %v21_v25 = vld [vmem:[%s1583_s0 + $0x10] sm:$0xf]  ;;  %v22_v32 = vld [vmem:[%s1583_s0 + $0x14] sm:$0xf] }
   0x6   :  { %v84_v20 = vld [vmem:[%s1584_s1 + $0xc] sm:$0xf]  ;;  %v85_v26 = vld [vmem:[%s1584_s1 + $0x10] sm:$0xf]  ;;  %v86_v34 = vld [vmem:[%s1584_s1 + $0x14] sm:$0xf] }
   0x7   :  { %v401_v16 = vmax.bf16 %v337_v7, %v145_v3  ;;  %v212_v21 = vld [vmem:[%s1585_s2 + $0xc] sm:$0xf]  ;;  %v402_v22 = vmax.bf16 %v338_v12, %v146_v8  ;;  %v148_v23 = vmax.bf16 %v84_v20, %v20_v19  ;;  %v403_v27 = vmax.bf16 %v339_v18, %v147_v17  ;;  %v213_v30 = vld [vmem:[%s1585_s2 + $0x10] sm:$0xf]  ;;  %v214_v35 = vld [vmem:[%s1585_s2 + $0x14] sm:$0xf] }
   0x8   :  { %v276_v24 = vld [vmem:[%s1586_s3 + $0xc] sm:$0xf]  ;;  %v149_v29 = vmax.bf16 %v85_v26, %v21_v25  ;;  %v277_v31 = vld [vmem:[%s1586_s3 + $0x10] sm:$0xf]  ;;  %v278_v36 = vld [vmem:[%s1586_s3 + $0x14] sm:$0xf]  ;;  %v150_v38 = vmax.bf16 %v86_v34, %v22_v32 }
   0x9   :  { %466 = vst.msk [vmem:[%s1587_s4] sm:$0xf] %vm465_vm0, %v401_v16  ;;  %v340_v28 = vmax.bf16 %v276_v24, %v212_v21  ;;  %467 = vst.msk [vmem:[%s1587_s4 + $0x4] sm:$0xf] %vm465_vm0, %v402_v22  ;;  %v341_v33 = vmax.bf16 %v277_v31, %v213_v30  ;;  %v342_v39 = vmax.bf16 %v278_v36, %v214_v35  ;;  %v23_v40 = vld [vmem:[%s1583_s0 + $0x18] sm:$0xf] }
   0xa   :  { %468 = vst.msk [vmem:[%s1587_s4 + $0x8] sm:$0xf] %vm465_vm0, %v403_v27  ;;  %v87_v41 = vld [vmem:[%s1584_s1 + $0x18] sm:$0xf]  ;;  %v24_v46 = vld [vmem:[%s1583_s0 + $0x1c] sm:$0xf] }
   0xb   :  { %v404_v37 = vmax.bf16 %v340_v28, %v148_v23  ;;  %v215_v42 = vld [vmem:[%s1585_s2 + $0x18] sm:$0xf]  ;;  %v405_v43 = vmax.bf16 %v341_v33, %v149_v29  ;;  %v151_v44 = vmax.bf16 %v87_v41, %v23_v40  ;;  %v88_v47 = vld [vmem:[%s1584_s1 + $0x1c] sm:$0xf]  ;;  %v406_v48 = vmax.bf16 %v342_v39, %v150_v38  ;;  %v25_v53 = vld [vmem:[%s1583_s0 + $0x20] sm:$0xf] }
   0xc   :  { %v279_v45 = vld [vmem:[%s1586_s3 + $0x18] sm:$0xf]  ;;  %v152_v50 = vmax.bf16 %v88_v47, %v24_v46  ;;  %v216_v51 = vld [vmem:[%s1585_s2 + $0x1c] sm:$0xf]  ;;  %v89_v55 = vld [vmem:[%s1584_s1 + $0x20] sm:$0xf] }
   0xd   :  { %469 = vst.msk [vmem:[%s1587_s4 + $0xc] sm:$0xf] %vm465_vm0, %v404_v37  ;;  %v343_v49 = vmax.bf16 %v279_v45, %v215_v42  ;;  %v280_v52 = vld [vmem:[%s1586_s3 + $0x1c] sm:$0xf]  ;;  %470 = vst.msk [vmem:[%s1587_s4 + $0x10] sm:$0xf] %vm465_vm0, %v405_v43  ;;  %v153_v59 = vmax.bf16 %v89_v55, %v25_v53 }
   0xe   :  { %v344_v54 = vmax.bf16 %v280_v52, %v216_v51  ;;  %v217_v56 = vld [vmem:[%s1585_s2 + $0x20] sm:$0xf]  ;;  %471 = vst.msk [vmem:[%s1587_s4 + $0x14] sm:$0xf] %vm465_vm0, %v406_v48  ;;  %v26_v61 = vld [vmem:[%s1583_s0 + $0x24] sm:$0xf] }
   0xf   :  { %v281_v57 = vld [vmem:[%s1586_s3 + $0x20] sm:$0xf]  ;;  %v407_v58 = vmax.bf16 %v343_v49, %v151_v44  ;;  %v90_v62 = vld [vmem:[%s1584_s1 + $0x24] sm:$0xf]  ;;  %v27_v3 = vld [vmem:[%s1583_s0 + $0x28] sm:$0xf] }
  0x10   :  { %v345_v60 = vmax.bf16 %v281_v57, %v217_v56  ;;  %v218_v63 = vld [vmem:[%s1585_s2 + $0x24] sm:$0xf]  ;;  %v408_v0 = vmax.bf16 %v344_v54, %v152_v50  ;;  %v154_v1 = vmax.bf16 %v90_v62, %v26_v61  ;;  %v91_v4 = vld [vmem:[%s1584_s1 + $0x28] sm:$0xf]  ;;  %v28_v10 = vld [vmem:[%s1583_s0 + $0x2c] sm:$0xf] }
  0x11   :  { %v282_v2 = vld [vmem:[%s1586_s3 + $0x24] sm:$0xf]  ;;  %472 = vst.msk [vmem:[%s1587_s4 + $0x18] sm:$0xf] %vm465_vm0, %v407_v58  ;;  %v155_v7 = vmax.bf16 %v91_v4, %v27_v3  ;;  %v219_v8 = vld [vmem:[%s1585_s2 + $0x28] sm:$0xf] }
  0x12   :  { %v409_v5 = vmax.bf16 %v345_v60, %v153_v59  ;;  %v346_v6 = vmax.bf16 %v282_v2, %v218_v63  ;;  %v283_v9 = vld [vmem:[%s1586_s3 + $0x28] sm:$0xf]  ;;  %473 = vst.msk [vmem:[%s1587_s4 + $0x1c] sm:$0xf] %vm465_vm0, %v408_v0  ;;  %v92_v12 = vld [vmem:[%s1584_s1 + $0x2c] sm:$0xf] }
  0x13   :  { %v347_v11 = vmax.bf16 %v283_v9, %v219_v8  ;;  %v220_v13 = vld [vmem:[%s1585_s2 + $0x2c] sm:$0xf]  ;;  %v156_v16 = vmax.bf16 %v92_v12, %v28_v10  ;;  %v29_v18 = vld [vmem:[%s1583_s0 + $0x30] sm:$0xf]  ;;  %v30_v24 = vld [vmem:[%s1583_s0 + $0x34] sm:$0xf] }
  0x14   :  { %v284_v14 = vld [vmem:[%s1586_s3 + $0x2c] sm:$0xf]  ;;  %474 = vst.msk [vmem:[%s1587_s4 + $0x20] sm:$0xf] %vm465_vm0, %v409_v5  ;;  %v410_v15 = vmax.bf16 %v346_v6, %v154_v1  ;;  %v93_v19 = vld [vmem:[%s1584_s1 + $0x30] sm:$0xf] }
  0x15   :  { %v348_v17 = vmax.bf16 %v284_v14, %v220_v13  ;;  %v221_v20 = vld [vmem:[%s1585_s2 + $0x30] sm:$0xf]  ;;  %v411_v21 = vmax.bf16 %v347_v11, %v155_v7  ;;  %v157_v22 = vmax.bf16 %v93_v19, %v29_v18  ;;  %v94_v25 = vld [vmem:[%s1584_s1 + $0x34] sm:$0xf]  ;;  %v31_v31 = vld [vmem:[%s1583_s0 + $0x38] sm:$0xf] }
  0x16   :  { %v285_v23 = vld [vmem:[%s1586_s3 + $0x30] sm:$0xf]  ;;  %475 = vst.msk [vmem:[%s1587_s4 + $0x24] sm:$0xf] %vm465_vm0, %v410_v15  ;;  %v158_v28 = vmax.bf16 %v94_v25, %v30_v24  ;;  %v222_v29 = vld [vmem:[%s1585_s2 + $0x34] sm:$0xf] }
  0x17   :  { %v412_v26 = vmax.bf16 %v348_v17, %v156_v16  ;;  %v349_v27 = vmax.bf16 %v285_v23, %v221_v20  ;;  %v286_v30 = vld [vmem:[%s1586_s3 + $0x34] sm:$0xf]  ;;  %476 = vst.msk [vmem:[%s1587_s4 + $0x28] sm:$0xf] %vm465_vm0, %v411_v21  ;;  %v95_v33 = vld [vmem:[%s1584_s1 + $0x38] sm:$0xf] }
  0x18   :  { %v350_v32 = vmax.bf16 %v286_v30, %v222_v29  ;;  %v223_v34 = vld [vmem:[%s1585_s2 + $0x38] sm:$0xf]  ;;  %v159_v37 = vmax.bf16 %v95_v33, %v31_v31  ;;  %v32_v39 = vld [vmem:[%s1583_s0 + $0x3c] sm:$0xf]  ;;  %v33_v45 = vld [vmem:[%s1583_s0 + $0x40] sm:$0xf] }
  0x19   :  { %v287_v35 = vld [vmem:[%s1586_s3 + $0x38] sm:$0xf]  ;;  %477 = vst.msk [vmem:[%s1587_s4 + $0x2c] sm:$0xf] %vm465_vm0, %v412_v26  ;;  %v413_v36 = vmax.bf16 %v349_v27, %v157_v22  ;;  %v96_v40 = vld [vmem:[%s1584_s1 + $0x3c] sm:$0xf] }
  0x1a   :  { %v351_v38 = vmax.bf16 %v287_v35, %v223_v34  ;;  %v224_v41 = vld [vmem:[%s1585_s2 + $0x3c] sm:$0xf]  ;;  %v414_v42 = vmax.bf16 %v350_v32, %v158_v28  ;;  %v160_v43 = vmax.bf16 %v96_v40, %v32_v39  ;;  %v97_v46 = vld [vmem:[%s1584_s1 + $0x40] sm:$0xf]  ;;  %v34_v52 = vld [vmem:[%s1583_s0 + $0x44] sm:$0xf] }
  0x1b   :  { %v288_v44 = vld [vmem:[%s1586_s3 + $0x3c] sm:$0xf]  ;;  %478 = vst.msk [vmem:[%s1587_s4 + $0x30] sm:$0xf] %vm465_vm0, %v413_v36  ;;  %v161_v49 = vmax.bf16 %v97_v46, %v33_v45  ;;  %v225_v50 = vld [vmem:[%s1585_s2 + $0x40] sm:$0xf] }
  0x1c   :  { %v415_v47 = vmax.bf16 %v351_v38, %v159_v37  ;;  %v352_v48 = vmax.bf16 %v288_v44, %v224_v41  ;;  %v289_v51 = vld [vmem:[%s1586_s3 + $0x40] sm:$0xf]  ;;  %479 = vst.msk [vmem:[%s1587_s4 + $0x34] sm:$0xf] %vm465_vm0, %v414_v42  ;;  %v98_v54 = vld [vmem:[%s1584_s1 + $0x44] sm:$0xf] }
  0x1d   :  { %v353_v53 = vmax.bf16 %v289_v51, %v225_v50  ;;  %v226_v55 = vld [vmem:[%s1585_s2 + $0x44] sm:$0xf]  ;;  %v162_v58 = vmax.bf16 %v98_v54, %v34_v52  ;;  %v35_v60 = vld [vmem:[%s1583_s0 + $0x48] sm:$0xf]  ;;  %v36_v2 = vld [vmem:[%s1583_s0 + $0x4c] sm:$0xf] }
  0x1e   :  { %v290_v56 = vld [vmem:[%s1586_s3 + $0x44] sm:$0xf]  ;;  %480 = vst.msk [vmem:[%s1587_s4 + $0x38] sm:$0xf] %vm465_vm0, %v415_v47  ;;  %v416_v57 = vmax.bf16 %v352_v48, %v160_v43  ;;  %v99_v61 = vld [vmem:[%s1584_s1 + $0x48] sm:$0xf] }
  0x1f   :  { %v354_v59 = vmax.bf16 %v290_v56, %v226_v55  ;;  %v227_v62 = vld [vmem:[%s1585_s2 + $0x48] sm:$0xf]  ;;  %v417_v63 = vmax.bf16 %v353_v53, %v161_v49  ;;  %v163_v0 = vmax.bf16 %v99_v61, %v35_v60  ;;  %v100_v3 = vld [vmem:[%s1584_s1 + $0x4c] sm:$0xf]  ;;  %v37_v9 = vld [vmem:[%s1583_s0 + $0x50] sm:$0xf] }
  0x20   :  { %v291_v1 = vld [vmem:[%s1586_s3 + $0x48] sm:$0xf]  ;;  %481 = vst.msk [vmem:[%s1587_s4 + $0x3c] sm:$0xf] %vm465_vm0, %v416_v57  ;;  %v164_v6 = vmax.bf16 %v100_v3, %v36_v2  ;;  %v228_v7 = vld [vmem:[%s1585_s2 + $0x4c] sm:$0xf] }
  0x21   :  { %v418_v4 = vmax.bf16 %v354_v59, %v162_v58  ;;  %v355_v5 = vmax.bf16 %v291_v1, %v227_v62  ;;  %v292_v8 = vld [vmem:[%s1586_s3 + $0x4c] sm:$0xf]  ;;  %482 = vst.msk [vmem:[%s1587_s4 + $0x40] sm:$0xf] %vm465_vm0, %v417_v63  ;;  %v101_v11 = vld [vmem:[%s1584_s1 + $0x50] sm:$0xf] }
  0x22   :  { %v356_v10 = vmax.bf16 %v292_v8, %v228_v7  ;;  %v229_v12 = vld [vmem:[%s1585_s2 + $0x50] sm:$0xf]  ;;  %v165_v15 = vmax.bf16 %v101_v11, %v37_v9  ;;  %v38_v17 = vld [vmem:[%s1583_s0 + $0x54] sm:$0xf]  ;;  %v39_v23 = vld [vmem:[%s1583_s0 + $0x58] sm:$0xf] }
  0x23   :  { %v293_v13 = vld [vmem:[%s1586_s3 + $0x50] sm:$0xf]  ;;  %483 = vst.msk [vmem:[%s1587_s4 + $0x44] sm:$0xf] %vm465_vm0, %v418_v4  ;;  %v419_v14 = vmax.bf16 %v355_v5, %v163_v0  ;;  %v102_v18 = vld [vmem:[%s1584_s1 + $0x54] sm:$0xf] }
  0x24   :  { %v357_v16 = vmax.bf16 %v293_v13, %v229_v12  ;;  %v230_v19 = vld [vmem:[%s1585_s2 + $0x54] sm:$0xf]  ;;  %v420_v20 = vmax.bf16 %v356_v10, %v164_v6  ;;  %v166_v21 = vmax.bf16 %v102_v18, %v38_v17  ;;  %v103_v24 = vld [vmem:[%s1584_s1 + $0x58] sm:$0xf]  ;;  %v40_v30 = vld [vmem:[%s1583_s0 + $0x5c] sm:$0xf] }
  0x25   :  { %v294_v22 = vld [vmem:[%s1586_s3 + $0x54] sm:$0xf]  ;;  %484 = vst.msk [vmem:[%s1587_s4 + $0x48] sm:$0xf] %vm465_vm0, %v419_v14  ;;  %v167_v27 = vmax.bf16 %v103_v24, %v39_v23  ;;  %v231_v28 = vld [vmem:[%s1585_s2 + $0x58] sm:$0xf] }
  0x26   :  { %v421_v25 = vmax.bf16 %v357_v16, %v165_v15  ;;  %v358_v26 = vmax.bf16 %v294_v22, %v230_v19  ;;  %v295_v29 = vld [vmem:[%s1586_s3 + $0x58] sm:$0xf]  ;;  %485 = vst.msk [vmem:[%s1587_s4 + $0x4c] sm:$0xf] %vm465_vm0, %v420_v20  ;;  %v104_v32 = vld [vmem:[%s1584_s1 + $0x5c] sm:$0xf] }
  0x27   :  { %v359_v31 = vmax.bf16 %v295_v29, %v231_v28  ;;  %v232_v33 = vld [vmem:[%s1585_s2 + $0x5c] sm:$0xf]  ;;  %v168_v36 = vmax.bf16 %v104_v32, %v40_v30  ;;  %v41_v38 = vld [vmem:[%s1583_s0 + $0x60] sm:$0xf]  ;;  %v42_v44 = vld [vmem:[%s1583_s0 + $0x64] sm:$0xf] }
  0x28   :  { %v296_v34 = vld [vmem:[%s1586_s3 + $0x5c] sm:$0xf]  ;;  %486 = vst.msk [vmem:[%s1587_s4 + $0x50] sm:$0xf] %vm465_vm0, %v421_v25  ;;  %v422_v35 = vmax.bf16 %v358_v26, %v166_v21  ;;  %v105_v39 = vld [vmem:[%s1584_s1 + $0x60] sm:$0xf] }
  0x29   :  { %v360_v37 = vmax.bf16 %v296_v34, %v232_v33  ;;  %v233_v40 = vld [vmem:[%s1585_s2 + $0x60] sm:$0xf]  ;;  %v423_v41 = vmax.bf16 %v359_v31, %v167_v27  ;;  %v169_v42 = vmax.bf16 %v105_v39, %v41_v38  ;;  %v106_v45 = vld [vmem:[%s1584_s1 + $0x64] sm:$0xf]  ;;  %v43_v51 = vld [vmem:[%s1583_s0 + $0x68] sm:$0xf] }
  0x2a   :  { %v297_v43 = vld [vmem:[%s1586_s3 + $0x60] sm:$0xf]  ;;  %487 = vst.msk [vmem:[%s1587_s4 + $0x54] sm:$0xf] %vm465_vm0, %v422_v35  ;;  %v170_v48 = vmax.bf16 %v106_v45, %v42_v44  ;;  %v234_v49 = vld [vmem:[%s1585_s2 + $0x64] sm:$0xf] }
  0x2b   :  { %v424_v46 = vmax.bf16 %v360_v37, %v168_v36  ;;  %v361_v47 = vmax.bf16 %v297_v43, %v233_v40  ;;  %v298_v50 = vld [vmem:[%s1586_s3 + $0x64] sm:$0xf]  ;;  %488 = vst.msk [vmem:[%s1587_s4 + $0x58] sm:$0xf] %vm465_vm0, %v423_v41  ;;  %v107_v53 = vld [vmem:[%s1584_s1 + $0x68] sm:$0xf] }
  0x2c   :  { %v362_v52 = vmax.bf16 %v298_v50, %v234_v49  ;;  %v235_v54 = vld [vmem:[%s1585_s2 + $0x68] sm:$0xf]  ;;  %v171_v57 = vmax.bf16 %v107_v53, %v43_v51  ;;  %v44_v59 = vld [vmem:[%s1583_s0 + $0x6c] sm:$0xf]  ;;  %v45_v1 = vld [vmem:[%s1583_s0 + $0x70] sm:$0xf] }
  0x2d   :  { %v299_v55 = vld [vmem:[%s1586_s3 + $0x68] sm:$0xf]  ;;  %489 = vst.msk [vmem:[%s1587_s4 + $0x5c] sm:$0xf] %vm465_vm0, %v424_v46  ;;  %v425_v56 = vmax.bf16 %v361_v47, %v169_v42  ;;  %v108_v60 = vld [vmem:[%s1584_s1 + $0x6c] sm:$0xf] }
  0x2e   :  { %v363_v58 = vmax.bf16 %v299_v55, %v235_v54  ;;  %v236_v61 = vld [vmem:[%s1585_s2 + $0x6c] sm:$0xf]  ;;  %v426_v62 = vmax.bf16 %v362_v52, %v170_v48  ;;  %v172_v63 = vmax.bf16 %v108_v60, %v44_v59  ;;  %v109_v2 = vld [vmem:[%s1584_s1 + $0x70] sm:$0xf]  ;;  %v46_v8 = vld [vmem:[%s1583_s0 + $0x74] sm:$0xf] }
  0x2f   :  { %v300_v0 = vld [vmem:[%s1586_s3 + $0x6c] sm:$0xf]  ;;  %490 = vst.msk [vmem:[%s1587_s4 + $0x60] sm:$0xf] %vm465_vm0, %v425_v56  ;;  %v173_v5 = vmax.bf16 %v109_v2, %v45_v1  ;;  %v237_v6 = vld [vmem:[%s1585_s2 + $0x70] sm:$0xf] }
  0x30   :  { %v427_v3 = vmax.bf16 %v363_v58, %v171_v57  ;;  %v364_v4 = vmax.bf16 %v300_v0, %v236_v61  ;;  %v301_v7 = vld [vmem:[%s1586_s3 + $0x70] sm:$0xf]  ;;  %491 = vst.msk [vmem:[%s1587_s4 + $0x64] sm:$0xf] %vm465_vm0, %v426_v62  ;;  %v110_v10 = vld [vmem:[%s1584_s1 + $0x74] sm:$0xf] }
  0x31   :  { %v365_v9 = vmax.bf16 %v301_v7, %v237_v6  ;;  %v238_v11 = vld [vmem:[%s1585_s2 + $0x74] sm:$0xf]  ;;  %v174_v14 = vmax.bf16 %v110_v10, %v46_v8  ;;  %v47_v16 = vld [vmem:[%s1583_s0 + $0x78] sm:$0xf]  ;;  %v48_v22 = vld [vmem:[%s1583_s0 + $0x7c] sm:$0xf] }
  0x32   :  { %v302_v12 = vld [vmem:[%s1586_s3 + $0x74] sm:$0xf]  ;;  %492 = vst.msk [vmem:[%s1587_s4 + $0x68] sm:$0xf] %vm465_vm0, %v427_v3  ;;  %v428_v13 = vmax.bf16 %v364_v4, %v172_v63  ;;  %v111_v17 = vld [vmem:[%s1584_s1 + $0x78] sm:$0xf] }
  0x33   :  { %v366_v15 = vmax.bf16 %v302_v12, %v238_v11  ;;  %v239_v18 = vld [vmem:[%s1585_s2 + $0x78] sm:$0xf]  ;;  %v429_v19 = vmax.bf16 %v365_v9, %v173_v5  ;;  %v175_v20 = vmax.bf16 %v111_v17, %v47_v16  ;;  %v112_v23 = vld [vmem:[%s1584_s1 + $0x7c] sm:$0xf]  ;;  %v49_v29 = vld [vmem:[%s1583_s0 + $0x80] sm:$0xf] }
  0x34   :  { %v303_v21 = vld [vmem:[%s1586_s3 + $0x78] sm:$0xf]  ;;  %493 = vst.msk [vmem:[%s1587_s4 + $0x6c] sm:$0xf] %vm465_vm0, %v428_v13  ;;  %v176_v26 = vmax.bf16 %v112_v23, %v48_v22  ;;  %v240_v27 = vld [vmem:[%s1585_s2 + $0x7c] sm:$0xf] }
  0x35   :  { %v430_v24 = vmax.bf16 %v366_v15, %v174_v14  ;;  %v367_v25 = vmax.bf16 %v303_v21, %v239_v18  ;;  %v304_v28 = vld [vmem:[%s1586_s3 + $0x7c] sm:$0xf]  ;;  %494 = vst.msk [vmem:[%s1587_s4 + $0x70] sm:$0xf] %vm465_vm0, %v429_v19  ;;  %v113_v31 = vld [vmem:[%s1584_s1 + $0x80] sm:$0xf] }
  0x36   :  { %v368_v30 = vmax.bf16 %v304_v28, %v240_v27  ;;  %v241_v32 = vld [vmem:[%s1585_s2 + $0x80] sm:$0xf]  ;;  %v177_v35 = vmax.bf16 %v113_v31, %v49_v29  ;;  %v50_v37 = vld [vmem:[%s1583_s0 + $0x84] sm:$0xf]  ;;  %v51_v43 = vld [vmem:[%s1583_s0 + $0x88] sm:$0xf] }
  0x37   :  { %v305_v33 = vld [vmem:[%s1586_s3 + $0x80] sm:$0xf]  ;;  %495 = vst.msk [vmem:[%s1587_s4 + $0x74] sm:$0xf] %vm465_vm0, %v430_v24  ;;  %v431_v34 = vmax.bf16 %v367_v25, %v175_v20  ;;  %v114_v38 = vld [vmem:[%s1584_s1 + $0x84] sm:$0xf] }
  0x38   :  { %v369_v36 = vmax.bf16 %v305_v33, %v241_v32  ;;  %v242_v39 = vld [vmem:[%s1585_s2 + $0x84] sm:$0xf]  ;;  %v432_v40 = vmax.bf16 %v368_v30, %v176_v26  ;;  %v178_v41 = vmax.bf16 %v114_v38, %v50_v37  ;;  %v115_v44 = vld [vmem:[%s1584_s1 + $0x88] sm:$0xf]  ;;  %v52_v50 = vld [vmem:[%s1583_s0 + $0x8c] sm:$0xf] }
  0x39   :  { %v306_v42 = vld [vmem:[%s1586_s3 + $0x84] sm:$0xf]  ;;  %496 = vst.msk [vmem:[%s1587_s4 + $0x78] sm:$0xf] %vm465_vm0, %v431_v34  ;;  %v179_v47 = vmax.bf16 %v115_v44, %v51_v43  ;;  %v243_v48 = vld [vmem:[%s1585_s2 + $0x88] sm:$0xf] }
  0x3a   :  { %v433_v45 = vmax.bf16 %v369_v36, %v177_v35  ;;  %v370_v46 = vmax.bf16 %v306_v42, %v242_v39  ;;  %v307_v49 = vld [vmem:[%s1586_s3 + $0x88] sm:$0xf]  ;;  %497 = vst.msk [vmem:[%s1587_s4 + $0x7c] sm:$0xf] %vm465_vm0, %v432_v40  ;;  %v116_v52 = vld [vmem:[%s1584_s1 + $0x8c] sm:$0xf] }
  0x3b   :  { %v371_v51 = vmax.bf16 %v307_v49, %v243_v48  ;;  %v244_v53 = vld [vmem:[%s1585_s2 + $0x8c] sm:$0xf]  ;;  %v180_v56 = vmax.bf16 %v116_v52, %v52_v50  ;;  %v53_v58 = vld [vmem:[%s1583_s0 + $0x90] sm:$0xf]  ;;  %v54_v0 = vld [vmem:[%s1583_s0 + $0x94] sm:$0xf] }
  0x3c   :  { %v308_v54 = vld [vmem:[%s1586_s3 + $0x8c] sm:$0xf]  ;;  %498 = vst.msk [vmem:[%s1587_s4 + $0x80] sm:$0xf] %vm465_vm0, %v433_v45  ;;  %v434_v55 = vmax.bf16 %v370_v46, %v178_v41  ;;  %v117_v59 = vld [vmem:[%s1584_s1 + $0x90] sm:$0xf] }
  0x3d   :  { %v372_v57 = vmax.bf16 %v308_v54, %v244_v53  ;;  %v245_v60 = vld [vmem:[%s1585_s2 + $0x90] sm:$0xf]  ;;  %v435_v61 = vmax.bf16 %v371_v51, %v179_v47  ;;  %v181_v62 = vmax.bf16 %v117_v59, %v53_v58  ;;  %v118_v1 = vld [vmem:[%s1584_s1 + $0x94] sm:$0xf]  ;;  %v55_v7 = vld [vmem:[%s1583_s0 + $0x98] sm:$0xf] }
  0x3e   :  { %v309_v63 = vld [vmem:[%s1586_s3 + $0x90] sm:$0xf]  ;;  %499 = vst.msk [vmem:[%s1587_s4 + $0x84] sm:$0xf] %vm465_vm0, %v434_v55  ;;  %v182_v4 = vmax.bf16 %v118_v1, %v54_v0  ;;  %v246_v5 = vld [vmem:[%s1585_s2 + $0x94] sm:$0xf] }
  0x3f   :  { %v436_v2 = vmax.bf16 %v372_v57, %v180_v56  ;;  %v373_v3 = vmax.bf16 %v309_v63, %v245_v60  ;;  %v310_v6 = vld [vmem:[%s1586_s3 + $0x94] sm:$0xf]  ;;  %500 = vst.msk [vmem:[%s1587_s4 + $0x88] sm:$0xf] %vm465_vm0, %v435_v61  ;;  %v119_v9 = vld [vmem:[%s1584_s1 + $0x98] sm:$0xf] }
  0x40   :  { %v374_v8 = vmax.bf16 %v310_v6, %v246_v5  ;;  %v247_v10 = vld [vmem:[%s1585_s2 + $0x98] sm:$0xf]  ;;  %v183_v13 = vmax.bf16 %v119_v9, %v55_v7  ;;  %v56_v15 = vld [vmem:[%s1583_s0 + $0x9c] sm:$0xf]  ;;  %v57_v21 = vld [vmem:[%s1583_s0 + $0xa0] sm:$0xf] }
  0x41   :  { %v311_v11 = vld [vmem:[%s1586_s3 + $0x98] sm:$0xf]  ;;  %501 = vst.msk [vmem:[%s1587_s4 + $0x8c] sm:$0xf] %vm465_vm0, %v436_v2  ;;  %v437_v12 = vmax.bf16 %v373_v3, %v181_v62  ;;  %v120_v16 = vld [vmem:[%s1584_s1 + $0x9c] sm:$0xf] }
  0x42   :  { %v375_v14 = vmax.bf16 %v311_v11, %v247_v10  ;;  %v248_v17 = vld [vmem:[%s1585_s2 + $0x9c] sm:$0xf]  ;;  %v438_v18 = vmax.bf16 %v374_v8, %v182_v4  ;;  %v184_v19 = vmax.bf16 %v120_v16, %v56_v15  ;;  %v121_v22 = vld [vmem:[%s1584_s1 + $0xa0] sm:$0xf]  ;;  %v58_v28 = vld [vmem:[%s1583_s0 + $0xa4] sm:$0xf] }
  0x43   :  { %v312_v20 = vld [vmem:[%s1586_s3 + $0x9c] sm:$0xf]  ;;  %502 = vst.msk [vmem:[%s1587_s4 + $0x90] sm:$0xf] %vm465_vm0, %v437_v12  ;;  %v185_v25 = vmax.bf16 %v121_v22, %v57_v21  ;;  %v249_v26 = vld [vmem:[%s1585_s2 + $0xa0] sm:$0xf] }
  0x44   :  { %v439_v23 = vmax.bf16 %v375_v14, %v183_v13  ;;  %v376_v24 = vmax.bf16 %v312_v20, %v248_v17  ;;  %v313_v27 = vld [vmem:[%s1586_s3 + $0xa0] sm:$0xf]  ;;  %503 = vst.msk [vmem:[%s1587_s4 + $0x94] sm:$0xf] %vm465_vm0, %v438_v18  ;;  %v122_v30 = vld [vmem:[%s1584_s1 + $0xa4] sm:$0xf] }
  0x45   :  { %v377_v29 = vmax.bf16 %v313_v27, %v249_v26  ;;  %v250_v31 = vld [vmem:[%s1585_s2 + $0xa4] sm:$0xf]  ;;  %v186_v34 = vmax.bf16 %v122_v30, %v58_v28  ;;  %v59_v36 = vld [vmem:[%s1583_s0 + $0xa8] sm:$0xf]  ;;  %v60_v42 = vld [vmem:[%s1583_s0 + $0xac] sm:$0xf] }
  0x46   :  { %v314_v32 = vld [vmem:[%s1586_s3 + $0xa4] sm:$0xf]  ;;  %504 = vst.msk [vmem:[%s1587_s4 + $0x98] sm:$0xf] %vm465_vm0, %v439_v23  ;;  %v440_v33 = vmax.bf16 %v376_v24, %v184_v19  ;;  %v123_v37 = vld [vmem:[%s1584_s1 + $0xa8] sm:$0xf] }
  0x47   :  { %v378_v35 = vmax.bf16 %v314_v32, %v250_v31  ;;  %v251_v38 = vld [vmem:[%s1585_s2 + $0xa8] sm:$0xf]  ;;  %v441_v39 = vmax.bf16 %v377_v29, %v185_v25  ;;  %v187_v40 = vmax.bf16 %v123_v37, %v59_v36  ;;  %v124_v43 = vld [vmem:[%s1584_s1 + $0xac] sm:$0xf]  ;;  %v61_v49 = vld [vmem:[%s1583_s0 + $0xb0] sm:$0xf] }
  0x48   :  { %v315_v41 = vld [vmem:[%s1586_s3 + $0xa8] sm:$0xf]  ;;  %505 = vst.msk [vmem:[%s1587_s4 + $0x9c] sm:$0xf] %vm465_vm0, %v440_v33  ;;  %v188_v46 = vmax.bf16 %v124_v43, %v60_v42  ;;  %v252_v47 = vld [vmem:[%s1585_s2 + $0xac] sm:$0xf] }
  0x49   :  { %v442_v44 = vmax.bf16 %v378_v35, %v186_v34  ;;  %v379_v45 = vmax.bf16 %v315_v41, %v251_v38  ;;  %v316_v48 = vld [vmem:[%s1586_s3 + $0xac] sm:$0xf]  ;;  %506 = vst.msk [vmem:[%s1587_s4 + $0xa0] sm:$0xf] %vm465_vm0, %v441_v39  ;;  %v125_v51 = vld [vmem:[%s1584_s1 + $0xb0] sm:$0xf] }
  0x4a   :  { %v380_v50 = vmax.bf16 %v316_v48, %v252_v47  ;;  %v253_v52 = vld [vmem:[%s1585_s2 + $0xb0] sm:$0xf]  ;;  %v189_v55 = vmax.bf16 %v125_v51, %v61_v49  ;;  %v62_v57 = vld [vmem:[%s1583_s0 + $0xb4] sm:$0xf]  ;;  %v63_v63 = vld [vmem:[%s1583_s0 + $0xb8] sm:$0xf] }
  0x4b   :  { %v317_v53 = vld [vmem:[%s1586_s3 + $0xb0] sm:$0xf]  ;;  %507 = vst.msk [vmem:[%s1587_s4 + $0xa4] sm:$0xf] %vm465_vm0, %v442_v44  ;;  %v443_v54 = vmax.bf16 %v379_v45, %v187_v40  ;;  %v126_v58 = vld [vmem:[%s1584_s1 + $0xb4] sm:$0xf] }
  0x4c   :  { %v381_v56 = vmax.bf16 %v317_v53, %v253_v52  ;;  %v254_v59 = vld [vmem:[%s1585_s2 + $0xb4] sm:$0xf]  ;;  %v444_v60 = vmax.bf16 %v380_v50, %v188_v46  ;;  %v190_v61 = vmax.bf16 %v126_v58, %v62_v57  ;;  %v127_v0 = vld [vmem:[%s1584_s1 + $0xb8] sm:$0xf]  ;;  %v64_v6 = vld [vmem:[%s1583_s0 + $0xbc] sm:$0xf] }
  0x4d   :  { %v318_v62 = vld [vmem:[%s1586_s3 + $0xb4] sm:$0xf]  ;;  %508 = vst.msk [vmem:[%s1587_s4 + $0xa8] sm:$0xf] %vm465_vm0, %v443_v54  ;;  %v191_v3 = vmax.bf16 %v127_v0, %v63_v63  ;;  %v255_v4 = vld [vmem:[%s1585_s2 + $0xb8] sm:$0xf] }
  0x4e   :  { %v445_v1 = vmax.bf16 %v381_v56, %v189_v55  ;;  %v382_v2 = vmax.bf16 %v318_v62, %v254_v59  ;;  %v319_v5 = vld [vmem:[%s1586_s3 + $0xb8] sm:$0xf]  ;;  %509 = vst.msk [vmem:[%s1587_s4 + $0xac] sm:$0xf] %vm465_vm0, %v444_v60  ;;  %v128_v8 = vld [vmem:[%s1584_s1 + $0xbc] sm:$0xf] }
  0x4f   :  { %v383_v7 = vmax.bf16 %v319_v5, %v255_v4  ;;  %v256_v9 = vld [vmem:[%s1585_s2 + $0xbc] sm:$0xf]  ;;  %v192_v12 = vmax.bf16 %v128_v8, %v64_v6  ;;  %v65_v14 = vld [vmem:[%s1583_s0 + $0xc0] sm:$0xf]  ;;  %v66_v20 = vld [vmem:[%s1583_s0 + $0xc4] sm:$0xf] }
  0x50   :  { %v320_v10 = vld [vmem:[%s1586_s3 + $0xbc] sm:$0xf]  ;;  %510 = vst.msk [vmem:[%s1587_s4 + $0xb0] sm:$0xf] %vm465_vm0, %v445_v1  ;;  %v446_v11 = vmax.bf16 %v382_v2, %v190_v61  ;;  %v129_v15 = vld [vmem:[%s1584_s1 + $0xc0] sm:$0xf] }
  0x51   :  { %v384_v13 = vmax.bf16 %v320_v10, %v256_v9  ;;  %v257_v16 = vld [vmem:[%s1585_s2 + $0xc0] sm:$0xf]  ;;  %v447_v17 = vmax.bf16 %v383_v7, %v191_v3  ;;  %v193_v18 = vmax.bf16 %v129_v15, %v65_v14  ;;  %v130_v21 = vld [vmem:[%s1584_s1 + $0xc4] sm:$0xf]  ;;  %v67_v27 = vld [vmem:[%s1583_s0 + $0xc8] sm:$0xf] }
  0x52   :  { %v321_v19 = vld [vmem:[%s1586_s3 + $0xc0] sm:$0xf]  ;;  %511 = vst.msk [vmem:[%s1587_s4 + $0xb4] sm:$0xf] %vm465_vm0, %v446_v11  ;;  %v194_v24 = vmax.bf16 %v130_v21, %v66_v20  ;;  %v258_v25 = vld [vmem:[%s1585_s2 + $0xc4] sm:$0xf] }
  0x53   :  { %v448_v22 = vmax.bf16 %v384_v13, %v192_v12  ;;  %v385_v23 = vmax.bf16 %v321_v19, %v257_v16  ;;  %v322_v26 = vld [vmem:[%s1586_s3 + $0xc4] sm:$0xf]  ;;  %512 = vst.msk [vmem:[%s1587_s4 + $0xb8] sm:$0xf] %vm465_vm0, %v447_v17  ;;  %v131_v29 = vld [vmem:[%s1584_s1 + $0xc8] sm:$0xf] }
  0x54   :  { %v386_v28 = vmax.bf16 %v322_v26, %v258_v25  ;;  %v259_v30 = vld [vmem:[%s1585_s2 + $0xc8] sm:$0xf]  ;;  %v195_v33 = vmax.bf16 %v131_v29, %v67_v27  ;;  %v68_v35 = vld [vmem:[%s1583_s0 + $0xcc] sm:$0xf]  ;;  %v69_v41 = vld [vmem:[%s1583_s0 + $0xd0] sm:$0xf] }
  0x55   :  { %v323_v31 = vld [vmem:[%s1586_s3 + $0xc8] sm:$0xf]  ;;  %513 = vst.msk [vmem:[%s1587_s4 + $0xbc] sm:$0xf] %vm465_vm0, %v448_v22  ;;  %v449_v32 = vmax.bf16 %v385_v23, %v193_v18  ;;  %v132_v36 = vld [vmem:[%s1584_s1 + $0xcc] sm:$0xf] }
  0x56   :  { %v387_v34 = vmax.bf16 %v323_v31, %v259_v30  ;;  %v260_v37 = vld [vmem:[%s1585_s2 + $0xcc] sm:$0xf]  ;;  %v450_v38 = vmax.bf16 %v386_v28, %v194_v24  ;;  %v196_v39 = vmax.bf16 %v132_v36, %v68_v35  ;;  %v133_v42 = vld [vmem:[%s1584_s1 + $0xd0] sm:$0xf]  ;;  %v70_v48 = vld [vmem:[%s1583_s0 + $0xd4] sm:$0xf] }
  0x57   :  { %v324_v40 = vld [vmem:[%s1586_s3 + $0xcc] sm:$0xf]  ;;  %514 = vst.msk [vmem:[%s1587_s4 + $0xc0] sm:$0xf] %vm465_vm0, %v449_v32  ;;  %v197_v45 = vmax.bf16 %v133_v42, %v69_v41  ;;  %v261_v46 = vld [vmem:[%s1585_s2 + $0xd0] sm:$0xf] }
  0x58   :  { %v451_v43 = vmax.bf16 %v387_v34, %v195_v33  ;;  %v388_v44 = vmax.bf16 %v324_v40, %v260_v37  ;;  %v325_v47 = vld [vmem:[%s1586_s3 + $0xd0] sm:$0xf]  ;;  %515 = vst.msk [vmem:[%s1587_s4 + $0xc4] sm:$0xf] %vm465_vm0, %v450_v38  ;;  %v134_v50 = vld [vmem:[%s1584_s1 + $0xd4] sm:$0xf] }
  0x59   :  { %v389_v49 = vmax.bf16 %v325_v47, %v261_v46  ;;  %v262_v51 = vld [vmem:[%s1585_s2 + $0xd4] sm:$0xf]  ;;  %v198_v54 = vmax.bf16 %v134_v50, %v70_v48  ;;  %v71_v56 = vld [vmem:[%s1583_s0 + $0xd8] sm:$0xf]  ;;  %v72_v62 = vld [vmem:[%s1583_s0 + $0xdc] sm:$0xf] }
  0x5a   :  { %v326_v52 = vld [vmem:[%s1586_s3 + $0xd4] sm:$0xf]  ;;  %516 = vst.msk [vmem:[%s1587_s4 + $0xc8] sm:$0xf] %vm465_vm0, %v451_v43  ;;  %v452_v53 = vmax.bf16 %v388_v44, %v196_v39  ;;  %v135_v57 = vld [vmem:[%s1584_s1 + $0xd8] sm:$0xf] }
  0x5b   :  { %v390_v55 = vmax.bf16 %v326_v52, %v262_v51  ;;  %v263_v58 = vld [vmem:[%s1585_s2 + $0xd8] sm:$0xf]  ;;  %v453_v59 = vmax.bf16 %v389_v49, %v197_v45  ;;  %v199_v60 = vmax.bf16 %v135_v57, %v71_v56  ;;  %v136_v63 = vld [vmem:[%s1584_s1 + $0xdc] sm:$0xf]  ;;  %v73_v5 = vld [vmem:[%s1583_s0 + $0xe0] sm:$0xf] }
  0x5c   :  { %v327_v61 = vld [vmem:[%s1586_s3 + $0xd8] sm:$0xf]  ;;  %517 = vst.msk [vmem:[%s1587_s4 + $0xcc] sm:$0xf] %vm465_vm0, %v452_v53  ;;  %v200_v2 = vmax.bf16 %v136_v63, %v72_v62  ;;  %v264_v3 = vld [vmem:[%s1585_s2 + $0xdc] sm:$0xf] }
  0x5d   :  { %v454_v0 = vmax.bf16 %v390_v55, %v198_v54  ;;  %v391_v1 = vmax.bf16 %v327_v61, %v263_v58  ;;  %v328_v4 = vld [vmem:[%s1586_s3 + $0xdc] sm:$0xf]  ;;  %518 = vst.msk [vmem:[%s1587_s4 + $0xd0] sm:$0xf] %vm465_vm0, %v453_v59  ;;  %v137_v7 = vld [vmem:[%s1584_s1 + $0xe0] sm:$0xf] }
  0x5e   :  { %v392_v6 = vmax.bf16 %v328_v4, %v264_v3  ;;  %v265_v8 = vld [vmem:[%s1585_s2 + $0xe0] sm:$0xf]  ;;  %v201_v11 = vmax.bf16 %v137_v7, %v73_v5  ;;  %v74_v13 = vld [vmem:[%s1583_s0 + $0xe4] sm:$0xf]  ;;  %v75_v19 = vld [vmem:[%s1583_s0 + $0xe8] sm:$0xf] }
  0x5f   :  { %v329_v9 = vld [vmem:[%s1586_s3 + $0xe0] sm:$0xf]  ;;  %519 = vst.msk [vmem:[%s1587_s4 + $0xd4] sm:$0xf] %vm465_vm0, %v454_v0  ;;  %v455_v10 = vmax.bf16 %v391_v1, %v199_v60  ;;  %v138_v14 = vld [vmem:[%s1584_s1 + $0xe4] sm:$0xf] }
  0x60   :  { %v393_v12 = vmax.bf16 %v329_v9, %v265_v8  ;;  %v266_v15 = vld [vmem:[%s1585_s2 + $0xe4] sm:$0xf]  ;;  %v456_v16 = vmax.bf16 %v392_v6, %v200_v2  ;;  %v202_v17 = vmax.bf16 %v138_v14, %v74_v13  ;;  %v139_v20 = vld [vmem:[%s1584_s1 + $0xe8] sm:$0xf]  ;;  %v76_v26 = vld [vmem:[%s1583_s0 + $0xec] sm:$0xf] }
  0x61   :  { %v330_v18 = vld [vmem:[%s1586_s3 + $0xe4] sm:$0xf]  ;;  %520 = vst.msk [vmem:[%s1587_s4 + $0xd8] sm:$0xf] %vm465_vm0, %v455_v10  ;;  %v203_v23 = vmax.bf16 %v139_v20, %v75_v19  ;;  %v267_v24 = vld [vmem:[%s1585_s2 + $0xe8] sm:$0xf] }
  0x62   :  { %v457_v21 = vmax.bf16 %v393_v12, %v201_v11  ;;  %v394_v22 = vmax.bf16 %v330_v18, %v266_v15  ;;  %v331_v25 = vld [vmem:[%s1586_s3 + $0xe8] sm:$0xf]  ;;  %521 = vst.msk [vmem:[%s1587_s4 + $0xdc] sm:$0xf] %vm465_vm0, %v456_v16  ;;  %v140_v28 = vld [vmem:[%s1584_s1 + $0xec] sm:$0xf] }
  0x63   :  { %v395_v27 = vmax.bf16 %v331_v25, %v267_v24  ;;  %v268_v29 = vld [vmem:[%s1585_s2 + $0xec] sm:$0xf]  ;;  %v204_v32 = vmax.bf16 %v140_v28, %v76_v26  ;;  %v77_v34 = vld [vmem:[%s1583_s0 + $0xf0] sm:$0xf]  ;;  %v78_v40 = vld [vmem:[%s1583_s0 + $0xf4] sm:$0xf] }
  0x64   :  { %v332_v30 = vld [vmem:[%s1586_s3 + $0xec] sm:$0xf]  ;;  %522 = vst.msk [vmem:[%s1587_s4 + $0xe0] sm:$0xf] %vm465_vm0, %v457_v21  ;;  %v458_v31 = vmax.bf16 %v394_v22, %v202_v17  ;;  %v141_v35 = vld [vmem:[%s1584_s1 + $0xf0] sm:$0xf] }
  0x65   :  { %v396_v33 = vmax.bf16 %v332_v30, %v268_v29  ;;  %v269_v36 = vld [vmem:[%s1585_s2 + $0xf0] sm:$0xf]  ;;  %v459_v37 = vmax.bf16 %v395_v27, %v203_v23  ;;  %v205_v38 = vmax.bf16 %v141_v35, %v77_v34  ;;  %v142_v41 = vld [vmem:[%s1584_s1 + $0xf4] sm:$0xf]  ;;  %v79_v47 = vld [vmem:[%s1583_s0 + $0xf8] sm:$0xf] }
  0x66   :  { %v333_v39 = vld [vmem:[%s1586_s3 + $0xf0] sm:$0xf]  ;;  %523 = vst.msk [vmem:[%s1587_s4 + $0xe4] sm:$0xf] %vm465_vm0, %v458_v31  ;;  %v206_v44 = vmax.bf16 %v142_v41, %v78_v40  ;;  %v270_v45 = vld [vmem:[%s1585_s2 + $0xf4] sm:$0xf] }
  0x67   :  { %v460_v42 = vmax.bf16 %v396_v33, %v204_v32  ;;  %v397_v43 = vmax.bf16 %v333_v39, %v269_v36  ;;  %v334_v46 = vld [vmem:[%s1586_s3 + $0xf4] sm:$0xf]  ;;  %524 = vst.msk [vmem:[%s1587_s4 + $0xe8] sm:$0xf] %vm465_vm0, %v459_v37  ;;  %v143_v49 = vld [vmem:[%s1584_s1 + $0xf8] sm:$0xf] }
  0x68   :  { %v398_v48 = vmax.bf16 %v334_v46, %v270_v45  ;;  %v271_v50 = vld [vmem:[%s1585_s2 + $0xf8] sm:$0xf]  ;;  %v207_v53 = vmax.bf16 %v143_v49, %v79_v47  ;;  %v80_v55 = vld [vmem:[%s1583_s0 + $0xfc] sm:$0xf] }
  0x69   :  { %v335_v51 = vld [vmem:[%s1586_s3 + $0xf8] sm:$0xf]  ;;  %525 = vst.msk [vmem:[%s1587_s4 + $0xec] sm:$0xf] %vm465_vm0, %v460_v42  ;;  %v461_v52 = vmax.bf16 %v397_v43, %v205_v38  ;;  %v144_v56 = vld [vmem:[%s1584_s1 + $0xfc] sm:$0xf] }
  0x6a   :  { %v399_v54 = vmax.bf16 %v335_v51, %v271_v50  ;;  %v272_v57 = vld [vmem:[%s1585_s2 + $0xfc] sm:$0xf]  ;;  %v462_v58 = vmax.bf16 %v398_v48, %v206_v44  ;;  %v208_v59 = vmax.bf16 %v144_v56, %v80_v55 }
  0x6b   :  { %v336_v60 = vld [vmem:[%s1586_s3 + $0xfc] sm:$0xf]  ;;  %526 = vst.msk [vmem:[%s1587_s4 + $0xf0] sm:$0xf] %vm465_vm0, %v461_v52 }
  0x6c   :  { %v463_v61 = vmax.bf16 %v399_v54, %v207_v53  ;;  %v400_v62 = vmax.bf16 %v336_v60, %v272_v57  ;;  %527 = vst.msk [vmem:[%s1587_s4 + $0xf4] sm:$0xf] %vm465_vm0, %v462_v58 }
  0x6e   :  { %528 = vst.msk [vmem:[%s1587_s4 + $0xf8] sm:$0xf] %vm465_vm0, %v463_v61  ;;  %v464_v63 = vmax.bf16 %v400_v62, %v208_v59 }
  0x70   :  { %529 = vst.msk [vmem:[%s1587_s4 + $0xfc] sm:$0xf] %vm465_vm0, %v464_v63 }

// kernel: vgg_loss.74
= control target key start
LH: loop header
LB: loop body
LE: loop exit
PB: predicated region body
PF: predicated region fallthrough
CT: control target
= control target key end

     0   :  { %s403_s0 = inlined_call_operand.vmem [shape: bf16[128,128], index: 0, kind: input, shape index: {}]   ;;  %s404_s1 = inlined_call_operand.vmem [shape: bf16[128,128], index: 1, kind: input, shape index: {}]   ;;  %s405_s2 = inlined_call_operand.vmem [shape: f32[128,128], index: 2, kind: output, shape index: {}]  }
   0x1   :  { %v215_v0 = vld [vmem:[%s403_s0] sm:$0xff]   ;;  %v278_v2 = vld [vmem:[%s403_s0 + $0x8] sm:$0xff]   ;;  %v279_v8 = vld [vmem:[%s403_s0 + $0x10] sm:$0xff]  }
   0x2   :  { %v247_v1 = vld [vmem:[%s404_s1] sm:$0xff]   ;;  %v216_v3 = vunpack.c.l.bf16 %v215_v0  ;;  %v217_v5 = vunpack.c.h.bf16 %v215_v0  ;;  %v285_v7 = vld [vmem:[%s404_s1 + $0x8] sm:$0xff]   ;;  %v286_v9 = vld [vmem:[%s404_s1 + $0x10] sm:$0xff]   ;;  %v220_v10 = vunpack.c.l.bf16 %v278_v2  ;;  %v221_v12 = vunpack.c.h.bf16 %v278_v2 }
   0x3   :  { %v248_v4 = vunpack.c.l.bf16 %v247_v1  ;;  %v249_v6 = vunpack.c.h.bf16 %v247_v1  ;;  %v252_v11 = vunpack.c.l.bf16 %v285_v7  ;;  %v253_v13 = vunpack.c.h.bf16 %v285_v7  ;;  %v280_v14 = vld [vmem:[%s403_s0 + $0x18] sm:$0xff]   ;;  %v281_v24 = vld [vmem:[%s403_s0 + $0x20] sm:$0xff]   ;;  %v282_v34 = vld [vmem:[%s403_s0 + $0x28] sm:$0xff]  }
   0x4   :  { %v224_v17 = vunpack.c.l.bf16 %v279_v8  ;;  %v256_v18 = vunpack.c.l.bf16 %v286_v9  ;;  %v287_v19 = vld [vmem:[%s404_s1 + $0x18] sm:$0xff]   ;;  %v225_v22 = vunpack.c.h.bf16 %v279_v8  ;;  %v257_v23 = vunpack.c.h.bf16 %v286_v9  ;;  %v288_v29 = vld [vmem:[%s404_s1 + $0x20] sm:$0xff]   ;;  %v289_v35 = vld [vmem:[%s404_s1 + $0x28] sm:$0xff]  }
   0x5   :  { %v95_v15 = vsub.f32 %v216_v3, %v248_v4  ;;  %v96_v16 = vsub.f32 %v217_v5, %v249_v6  ;;  %v97_v20 = vsub.f32 %v220_v10, %v252_v11  ;;  %v98_v21 = vsub.f32 %v221_v12, %v253_v13  ;;  %v283_v44 = vld [vmem:[%s403_s0 + $0x30] sm:$0xff]   ;;  %v284_v54 = vld [vmem:[%s403_s0 + $0x38] sm:$0xff]  }
   0x6   :  { %v99_v27 = vsub.f32 %v224_v17, %v256_v18  ;;  %v228_v28 = vunpack.c.l.bf16 %v280_v14  ;;  %v100_v32 = vsub.f32 %v225_v22, %v257_v23  ;;  %v260_v33 = vunpack.c.l.bf16 %v287_v19  ;;  %v290_v49 = vld [vmem:[%s404_s1 + $0x30] sm:$0xff]   ;;  %v291_v59 = vld [vmem:[%s404_s1 + $0x38] sm:$0xff]  }
   0x7   :  { %v127_v25 = vand.u32 2147483647, %v95_v15  ;;  %v128_v26 = vand.u32 2147483647, %v96_v16  ;;  %v129_v30 = vand.u32 2147483647, %v97_v20  ;;  %v229_v37 = vunpack.c.h.bf16 %v280_v14 }
   0x8   :  { %v130_v31 = vand.u32 2147483647, %v98_v21  ;;  %v131_v36 = vand.u32 2147483647, %v99_v27  ;;  %v261_v38 = vunpack.c.h.bf16 %v287_v19  ;;  %v232_v39 = vunpack.c.l.bf16 %v281_v24 }
   0x9   :  { %194 = vst [vmem:[%s405_s2] sm:$0xff] %v127_v25  ;;  %195 = vst [vmem:[%s405_s2 + $0x8] sm:$0xff] %v128_v26  ;;  %v132_v40 = vand.u32 2147483647, %v100_v32  ;;  %v101_v41 = vsub.f32 %v228_v28, %v260_v33  ;;  %v264_v42 = vunpack.c.l.bf16 %v288_v29  ;;  %v233_v43 = vunpack.c.h.bf16 %v281_v24 }
   0xa   :  { %196 = vst [vmem:[%s405_s2 + $0x10] sm:$0xff] %v129_v30  ;;  %197 = vst [vmem:[%s405_s2 + $0x18] sm:$0xff] %v130_v31  ;;  %v102_v45 = vsub.f32 %v229_v37, %v261_v38  ;;  %v265_v46 = vunpack.c.h.bf16 %v288_v29  ;;  %v236_v47 = vunpack.c.l.bf16 %v282_v34  ;;  %v268_v48 = vunpack.c.l.bf16 %v289_v35 }
   0xb   :  { %198 = vst [vmem:[%s405_s2 + $0x20] sm:$0xff] %v131_v36  ;;  %199 = vst [vmem:[%s405_s2 + $0x28] sm:$0xff] %v132_v40  ;;  %v133_v50 = vand.u32 2147483647, %v101_v41  ;;  %v103_v51 = vsub.f32 %v232_v39, %v264_v42  ;;  %v237_v52 = vunpack.c.h.bf16 %v282_v34  ;;  %v269_v53 = vunpack.c.h.bf16 %v289_v35 }
   0xc   :  { %v134_v55 = vand.u32 2147483647, %v102_v45  ;;  %v104_v56 = vsub.f32 %v233_v43, %v265_v46  ;;  %v105_v57 = vsub.f32 %v236_v47, %v268_v48  ;;  %v240_v58 = vunpack.c.l.bf16 %v283_v44 }
   0xd   :  { %200 = vst [vmem:[%s405_s2 + $0x30] sm:$0xff] %v133_v50  ;;  %v135_v60 = vand.u32 2147483647, %v103_v51  ;;  %v106_v61 = vsub.f32 %v237_v52, %v269_v53  ;;  %v272_v62 = vunpack.c.l.bf16 %v290_v49  ;;  %v241_v63 = vunpack.c.h.bf16 %v283_v44 }
   0xe   :  { %201 = vst [vmem:[%s405_s2 + $0x38] sm:$0xff] %v134_v55  ;;  %v136_v0 = vand.u32 2147483647, %v104_v56  ;;  %v137_v1 = vand.u32 2147483647, %v105_v57  ;;  %v273_v2 = vunpack.c.h.bf16 %v290_v49  ;;  %v244_v3 = vunpack.c.l.bf16 %v284_v54 }
   0xf   :  { %202 = vst [vmem:[%s405_s2 + $0x40] sm:$0xff] %v135_v60  ;;  %v138_v4 = vand.u32 2147483647, %v106_v61  ;;  %v107_v5 = vsub.f32 %v240_v58, %v272_v62  ;;  %v276_v6 = vunpack.c.l.bf16 %v291_v59  ;;  %v245_v7 = vunpack.c.h.bf16 %v284_v54 }
  0x10   :  { %203 = vst [vmem:[%s405_s2 + $0x48] sm:$0xff] %v136_v0  ;;  %204 = vst [vmem:[%s405_s2 + $0x50] sm:$0xff] %v137_v1  ;;  %v108_v8 = vsub.f32 %v241_v63, %v273_v2  ;;  %v277_v9 = vunpack.c.h.bf16 %v291_v59 }
  0x11   :  { %205 = vst [vmem:[%s405_s2 + $0x58] sm:$0xff] %v138_v4  ;;  %v139_v10 = vand.u32 2147483647, %v107_v5  ;;  %v109_v11 = vsub.f32 %v244_v3, %v276_v6 }
  0x12   :  { %v140_v12 = vand.u32 2147483647, %v108_v8  ;;  %v110_v13 = vsub.f32 %v245_v7, %v277_v9 }
  0x13   :  { %206 = vst [vmem:[%s405_s2 + $0x60] sm:$0xff] %v139_v10  ;;  %v141_v14 = vand.u32 2147483647, %v109_v11 }
  0x14   :  { %207 = vst [vmem:[%s405_s2 + $0x68] sm:$0xff] %v140_v12  ;;  %v142_v15 = vand.u32 2147483647, %v110_v13 }
  0x15   :  { %208 = vst [vmem:[%s405_s2 + $0x70] sm:$0xff] %v141_v14 }
  0x16   :  { %209 = vst [vmem:[%s405_s2 + $0x78] sm:$0xff] %v142_v15 }

// kernel: vgg_loss.42
= control target key start
LH: loop header
LB: loop body
LE: loop exit
PB: predicated region body
PF: predicated region fallthrough
CT: control target
= control target key end

     0   :  { %v2147_v0 = vmov 0   ;;  %s2605_s1 = inlined_call_operand.vmem [shape: bf16[256,128], index: 1, kind: input, shape index: {}]   ;;  %s2606_s0 = inlined_call_operand.vmem [shape: bf16[512,256], index: 0, kind: input, shape index: {}]   ;;  %s2607_s2 = inlined_call_operand.vmem [shape: f32[1,128], index: 2, kind: input, shape index: {}]   ;;  %s2608_s3 = inlined_call_operand.vmem [shape: bf16[512,128], index: 3, kind: output, shape index: {}]  }
   0x1   :  { %659 = vmatprep.subr.bf16.mxu0 %v2147_v0  ;;  %2002 = vmatprep.subr.bf16.mxu1 %v2147_v0  ;;  %v2035_v1 = vld [vmem:[%s2605_s1] sm:$0xff]   ;;  %v2036_v2 = vld [vmem:[%s2605_s1 + $0x8] sm:$0xff]   ;;  %v2037_v3 = vld [vmem:[%s2605_s1 + $0x10] sm:$0xff]  }
   0x2   :  { %660 = vmatpush1.bf16.msra.mxu0 %v2035_v1  ;;  %2018 = vmatpush1.bf16.msra.mxu1 %v2035_v1  ;;  %v2038_v4 = vld [vmem:[%s2605_s1 + $0x18] sm:$0xff]   ;;  %v2039_v5 = vld [vmem:[%s2605_s1 + $0x20] sm:$0xff]   ;;  %v2040_v7 = vld [vmem:[%s2605_s1 + $0x28] sm:$0xff]  }
   0x3   :  { %661 = vmatprep.subr.bf16.mxu0 %v2147_v0  ;;  %2003 = vmatprep.subr.bf16.mxu1 %v2147_v0  ;;  %v2053_v6 = vld [vmem:[%s2606_s0 + $0x4] ss:$8 sps:$4 sm:$0xff]   ;;  %v2041_v9 = vld [vmem:[%s2605_s1 + $0x30] sm:$0xff]   ;;  %v2042_v10 = vld [vmem:[%s2605_s1 + $0x38] sm:$0xff]  }
   0x4   :  { %v2056_v8 = vld [vmem:[%s2606_s0 + $0x104] ss:$8 sps:$4 sm:$0xff]   ;;  %691 = vmatprep.mubr.bf16.mxu0 %v2053_v6  ;;  %v2045_v13 = vld [vmem:[%s2605_s1 + $0x50] sm:$0xff]   ;;  %v2046_v14 = vld [vmem:[%s2605_s1 + $0x58] sm:$0xff]  }
   0x5   :  { %819 = vmatprep.mubr.bf16.mxu1 %v2056_v8  ;;  %v2043_v11 = vld [vmem:[%s2605_s1 + $0x40] sm:$0xff]   ;;  %v2044_v12 = vld [vmem:[%s2605_s1 + $0x48] sm:$0xff]   ;;  %v2049_v17 = vld [vmem:[%s2605_s1 + $0x70] sm:$0xff]  }
   0x6   :  { %662 = vmatpush1.bf16.msra.mxu0 %v2036_v2  ;;  %2019 = vmatpush1.bf16.msra.mxu1 %v2036_v2  ;;  %v2047_v15 = vld [vmem:[%s2605_s1 + $0x60] sm:$0xff]   ;;  %v2048_v16 = vld [vmem:[%s2605_s1 + $0x68] sm:$0xff]   ;;  %v2050_v18 = vld [vmem:[%s2605_s1 + $0x78] sm:$0xff]  }
   0x7   :  { %663 = vmatprep.subr.bf16.mxu0 %v2147_v0  ;;  %2004 = vmatprep.subr.bf16.mxu1 %v2147_v0  ;;  %v2051_v19 = vld [vmem:[%s2606_s0] ss:$8 sps:$4 sm:$0xff]   ;;  %v2057_v21 = vld [vmem:[%s2606_s0 + $0x14] ss:$8 sps:$4 sm:$0xff]   ;;  %v2061_v23 = vld [vmem:[%s2606_s0 + $0x10] ss:$8 sps:$4 sm:$0xff]  }
   0x8   :  { %v2054_v20 = vld [vmem:[%s2606_s0 + $0x100] ss:$8 sps:$4 sm:$0xff]   ;;  %v2059_v22 = vld [vmem:[%s2606_s0 + $0x114] ss:$8 sps:$4 sm:$0xff]   ;;  %v2062_v24 = vld [vmem:[%s2606_s0 + $0x110] ss:$8 sps:$4 sm:$0xff]  }
   0x9   :  { %v2063_v25 = vld [vmem:[%s2606_s0 + $0x24] ss:$8 sps:$4 sm:$0xff]   ;;  %v2067_v27 = vld [vmem:[%s2606_s0 + $0x20] ss:$8 sps:$4 sm:$0xff]   ;;  %v2069_v29 = vld [vmem:[%s2606_s0 + $0x34] ss:$8 sps:$4 sm:$0xff]  }
   0xa   :  { %664 = vmatpush1.bf16.msra.mxu0 %v2037_v3  ;;  %2020 = vmatpush1.bf16.msra.mxu1 %v2037_v3  ;;  %v2065_v26 = vld [vmem:[%s2606_s0 + $0x124] ss:$8 sps:$4 sm:$0xff]   ;;  %v2068_v28 = vld [vmem:[%s2606_s0 + $0x120] ss:$8 sps:$4 sm:$0xff]   ;;  %v2071_v30 = vld [vmem:[%s2606_s0 + $0x134] ss:$8 sps:$4 sm:$0xff]  }
   0xb   :  { %665 = vmatprep.subr.bf16.mxu0 %v2147_v0  ;;  %2005 = vmatprep.subr.bf16.mxu1 %v2147_v0  ;;  %v2073_v31 = vld [vmem:[%s2606_s0 + $0x30] ss:$8 sps:$4 sm:$0xff]   ;;  %v2075_v33 = vld [vmem:[%s2606_s0 + $0x44] ss:$8 sps:$4 sm:$0xff]   ;;  %v2079_v35 = vld [vmem:[%s2606_s0 + $0x40] ss:$8 sps:$4 sm:$0xff]  }
   0xc   :  { %v2074_v32 = vld [vmem:[%s2606_s0 + $0x130] ss:$8 sps:$4 sm:$0xff]   ;;  %v2077_v34 = vld [vmem:[%s2606_s0 + $0x144] ss:$8 sps:$4 sm:$0xff]   ;;  %v2080_v36 = vld [vmem:[%s2606_s0 + $0x140] ss:$8 sps:$4 sm:$0xff]  }
   0xd   :  { %v2081_v37 = vld [vmem:[%s2606_s0 + $0x54] ss:$8 sps:$4 sm:$0xff]   ;;  %v2085_v39 = vld [vmem:[%s2606_s0 + $0x50] ss:$8 sps:$4 sm:$0xff]   ;;  %v2087_v41 = vld [vmem:[%s2606_s0 + $0x64] ss:$8 sps:$4 sm:$0xff]  }
   0xe   :  { %666 = vmatpush1.bf16.msra.mxu0 %v2038_v4  ;;  %2021 = vmatpush1.bf16.msra.mxu1 %v2038_v4  ;;  %v2083_v38 = vld [vmem:[%s2606_s0 + $0x154] ss:$8 sps:$4 sm:$0xff]   ;;  %v2086_v40 = vld [vmem:[%s2606_s0 + $0x150] ss:$8 sps:$4 sm:$0xff]   ;;  %v2089_v42 = vld [vmem:[%s2606_s0 + $0x164] ss:$8 sps:$4 sm:$0xff]  }
   0xf   :  { %667 = vmatprep.subr.bf16.mxu0 %v2147_v0  ;;  %2006 = vmatprep.subr.bf16.mxu1 %v2147_v0  ;;  %v2091_v43 = vld [vmem:[%s2606_s0 + $0x60] ss:$8 sps:$4 sm:$0xff]   ;;  %v2093_v45 = vld [vmem:[%s2606_s0 + $0x74] ss:$8 sps:$4 sm:$0xff]   ;;  %v2097_v47 = vld [vmem:[%s2606_s0 + $0x70] ss:$8 sps:$4 sm:$0xff]  }
  0x10   :  { %v2092_v44 = vld [vmem:[%s2606_s0 + $0x160] ss:$8 sps:$4 sm:$0xff]   ;;  %v2095_v46 = vld [vmem:[%s2606_s0 + $0x174] ss:$8 sps:$4 sm:$0xff]   ;;  %v2098_v48 = vld [vmem:[%s2606_s0 + $0x170] ss:$8 sps:$4 sm:$0xff]  }
  0x11   :  { %v2099_v49 = vld [vmem:[%s2606_s0 + $0x84] ss:$8 sps:$4 sm:$0xff]   ;;  %v2103_v51 = vld [vmem:[%s2606_s0 + $0x80] ss:$8 sps:$4 sm:$0xff]   ;;  %v2105_v53 = vld [vmem:[%s2606_s0 + $0x94] ss:$8 sps:$4 sm:$0xff]  }
  0x12   :  { %668 = vmatpush1.bf16.msra.mxu0 %v2039_v5  ;;  %2022 = vmatpush1.bf16.msra.mxu1 %v2039_v5  ;;  %v2101_v50 = vld [vmem:[%s2606_s0 + $0x184] ss:$8 sps:$4 sm:$0xff]   ;;  %v2104_v52 = vld [vmem:[%s2606_s0 + $0x180] ss:$8 sps:$4 sm:$0xff]   ;;  %v2107_v54 = vld [vmem:[%s2606_s0 + $0x194] ss:$8 sps:$4 sm:$0xff]  }
  0x13   :  { %669 = vmatprep.subr.bf16.mxu0 %v2147_v0  ;;  %2007 = vmatprep.subr.bf16.mxu1 %v2147_v0  ;;  %v2109_v55 = vld [vmem:[%s2606_s0 + $0x90] ss:$8 sps:$4 sm:$0xff]   ;;  %v2111_v57 = vld [vmem:[%s2606_s0 + $0xa4] ss:$8 sps:$4 sm:$0xff]   ;;  %v2115_v59 = vld [vmem:[%s2606_s0 + $0xa0] ss:$8 sps:$4 sm:$0xff]  }
  0x14   :  { %v2110_v56 = vld [vmem:[%s2606_s0 + $0x190] ss:$8 sps:$4 sm:$0xff]   ;;  %v2113_v58 = vld [vmem:[%s2606_s0 + $0x1a4] ss:$8 sps:$4 sm:$0xff]   ;;  %v2116_v60 = vld [vmem:[%s2606_s0 + $0x1a0] ss:$8 sps:$4 sm:$0xff]  }
  0x15   :  { %v2117_v61 = vld [vmem:[%s2606_s0 + $0xb4] ss:$8 sps:$4 sm:$0xff]   ;;  %v2121_v63 = vld [vmem:[%s2606_s0 + $0xb0] ss:$8 sps:$4 sm:$0xff]   ;;  %v2123_v1 = vld [vmem:[%s2606_s0 + $0xc4] ss:$8 sps:$4 sm:$0xff]  }
  0x16   :  { %670 = vmatpush1.bf16.msra.mxu0 %v2040_v7  ;;  %2023 = vmatpush1.bf16.msra.mxu1 %v2040_v7  ;;  %v2119_v62 = vld [vmem:[%s2606_s0 + $0x1b4] ss:$8 sps:$4 sm:$0xff]   ;;  %v2125_v2 = vld [vmem:[%s2606_s0 + $0x1c4] ss:$8 sps:$4 sm:$0xff]   ;;  %v2127_v3 = vld [vmem:[%s2606_s0 + $0xc0] ss:$8 sps:$4 sm:$0xff]  }
  0x17   :  { %671 = vmatprep.subr.bf16.mxu0 %v2147_v0  ;;  %2008 = vmatprep.subr.bf16.mxu1 %v2147_v0  ;;  %v2128_v4 = vld [vmem:[%s2606_s0 + $0x1c0] ss:$8 sps:$4 sm:$0xff]   ;;  %v2129_v5 = vld [vmem:[%s2606_s0 + $0xd4] ss:$8 sps:$4 sm:$0xff]   ;;  %v2133_v7 = vld [vmem:[%s2606_s0 + $0xd0] ss:$8 sps:$4 sm:$0xff]  }
  0x18   :  { %v2131_v6 = vld [vmem:[%s2606_s0 + $0x1d4] ss:$8 sps:$4 sm:$0xff]   ;;  %v2134_v8 = vld [vmem:[%s2606_s0 + $0x1d0] ss:$8 sps:$4 sm:$0xff]  }
  0x1a   :  { %672 = vmatpush1.bf16.msra.mxu0 %v2041_v9  ;;  %2024 = vmatpush1.bf16.msra.mxu1 %v2041_v9  ;;  %v2135_v9 = vld [vmem:[%s2606_s0 + $0xe4] ss:$8 sps:$4 sm:$0xff]  }
  0x1b   :  { %673 = vmatprep.subr.bf16.mxu0 %v2147_v0  ;;  %2009 = vmatprep.subr.bf16.mxu1 %v2147_v0 }
  0x1e   :  { %674 = vmatpush1.bf16.msra.mxu0 %v2042_v10  ;;  %2025 = vmatpush1.bf16.msra.mxu1 %v2042_v10  ;;  %v2137_v10 = vld [vmem:[%s2606_s0 + $0x1e4] ss:$8 sps:$4 sm:$0xff]  }
  0x1f   :  { %675 = vmatprep.subr.bf16.mxu0 %v2147_v0  ;;  %2010 = vmatprep.subr.bf16.mxu1 %v2147_v0 }
  0x22   :  { %676 = vmatpush1.bf16.msra.mxu0 %v2043_v11  ;;  %2026 = vmatpush1.bf16.msra.mxu1 %v2043_v11  ;;  %v2139_v11 = vld [vmem:[%s2606_s0 + $0xe0] ss:$8 sps:$4 sm:$0xff]  }
  0x23   :  { %677 = vmatprep.subr.bf16.mxu0 %v2147_v0  ;;  %2011 = vmatprep.subr.bf16.mxu1 %v2147_v0 }
  0x26   :  { %678 = vmatpush1.bf16.msra.mxu0 %v2044_v12  ;;  %2027 = vmatpush1.bf16.msra.mxu1 %v2044_v12  ;;  %v2140_v12 = vld [vmem:[%s2606_s0 + $0x1e0] ss:$8 sps:$4 sm:$0xff]  }
  0x27   :  { %679 = vmatprep.subr.bf16.mxu0 %v2147_v0  ;;  %2012 = vmatprep.subr.bf16.mxu1 %v2147_v0 }
  0x2a   :  { %680 = vmatpush1.bf16.msra.mxu0 %v2045_v13  ;;  %2028 = vmatpush1.bf16.msra.mxu1 %v2045_v13  ;;  %v2141_v13 = vld [vmem:[%s2606_s0 + $0xf4] ss:$8 sps:$4 sm:$0xff]  }
  0x2b   :  { %681 = vmatprep.subr.bf16.mxu0 %v2147_v0  ;;  %2013 = vmatprep.subr.bf16.mxu1 %v2147_v0 }
  0x2e   :  { %682 = vmatpush1.bf16.msra.mxu0 %v2046_v14  ;;  %2029 = vmatpush1.bf16.msra.mxu1 %v2046_v14  ;;  %v2143_v14 = vld [vmem:[%s2606_s0 + $0x1f4] ss:$8 sps:$4 sm:$0xff]  }
  0x2f   :  { %683 = vmatprep.subr.bf16.mxu0 %v2147_v0  ;;  %2014 = vmatprep.subr.bf16.mxu1 %v2147_v0 }
  0x32   :  { %684 = vmatpush1.bf16.msra.mxu0 %v2047_v15  ;;  %2030 = vmatpush1.bf16.msra.mxu1 %v2047_v15  ;;  %v2145_v15 = vld [vmem:[%s2606_s0 + $0xf0] ss:$8 sps:$4 sm:$0xff]  }
  0x33   :  { %685 = vmatprep.subr.bf16.mxu0 %v2147_v0  ;;  %2015 = vmatprep.subr.bf16.mxu1 %v2147_v0 }
  0x36   :  { %686 = vmatpush1.bf16.msra.mxu0 %v2048_v16  ;;  %2031 = vmatpush1.bf16.msra.mxu1 %v2048_v16  ;;  %v2146_v16 = vld [vmem:[%s2606_s0 + $0x1f0] ss:$8 sps:$4 sm:$0xff]  }
  0x37   :  { %687 = vmatprep.subr.bf16.mxu0 %v2147_v0  ;;  %2016 = vmatprep.subr.bf16.mxu1 %v2147_v0 }
  0x3a   :  { %688 = vmatpush1.bf16.msra.mxu0 %v2049_v17  ;;  %2032 = vmatpush1.bf16.msra.mxu1 %v2049_v17  ;;  %v2443_v17 = vld [vmem:[%s2607_s2] ss:$0 sm:$0xff] }
  0x3b   :  { %689 = vmatprep.subr.bf16.mxu0 %v2147_v0  ;;  %2017 = vmatprep.subr.bf16.mxu1 %v2147_v0  ;;  %v2122_v0 = vld [vmem:[%s2606_s0 + $0x1b0] ss:$8 sps:$4 sm:$0xff]  }
  0x3e   :  { %690 = vmatpush1.bf16.msra.mxu0 %v2050_v18  ;;  %2033 = vmatpush1.bf16.msra.mxu1 %v2050_v18 }
  0x41   :  { %692 = vmatmul.mubr.bf16.vlgmr.msra.gmra.mrb[0].mxu0 %v2051_v19  ;;  %820 = vmatmul.mubr.bf16.vlgmr.msra.gmra.mrb[0].mxu1 %v2054_v20 }
  0x42   :  { %699 = vmatprep.mubr.bf16.mxu0 %v2057_v21  ;;  %827 = vmatprep.mubr.bf16.mxu1 %v2059_v22 }
  0x49   :  { %700 = vmatmul.mubr.bf16.gmra.mrb[4].mxu0 %v2061_v23  ;;  %828 = vmatmul.mubr.bf16.gmra.mrb[4].mxu1 %v2062_v24 }
  0x4a   :  { %707 = vmatprep.mubr.bf16.mxu0 %v2063_v25  ;;  %835 = vmatprep.mubr.bf16.mxu1 %v2065_v26 }
  0x51   :  { %708 = vmatmul.mubr.bf16.gmra.mrb[8].mxu0 %v2067_v27  ;;  %836 = vmatmul.mubr.bf16.gmra.mrb[8].mxu1 %v2068_v28 }
  0x52   :  { %715 = vmatprep.mubr.bf16.mxu0 %v2069_v29  ;;  %843 = vmatprep.mubr.bf16.mxu1 %v2071_v30 }
  0x59   :  { %716 = vmatmul.mubr.bf16.gmra.mrb[12].mxu0 %v2073_v31  ;;  %844 = vmatmul.mubr.bf16.gmra.mrb[12].mxu1 %v2074_v32 }
  0x5a   :  { %723 = vmatprep.mubr.bf16.mxu0 %v2075_v33  ;;  %851 = vmatprep.mubr.bf16.mxu1 %v2077_v34 }
  0x61   :  { %724 = vmatmul.mubr.bf16.gmra.mrb[16].mxu0 %v2079_v35  ;;  %852 = vmatmul.mubr.bf16.gmra.mrb[16].mxu1 %v2080_v36 }
  0x62   :  { %731 = vmatprep.mubr.bf16.mxu0 %v2081_v37  ;;  %859 = vmatprep.mubr.bf16.mxu1 %v2083_v38 }
  0x69   :  { %732 = vmatmul.mubr.bf16.gmra.mrb[20].mxu0 %v2085_v39  ;;  %860 = vmatmul.mubr.bf16.gmra.mrb[20].mxu1 %v2086_v40 }
  0x6a   :  { %739 = vmatprep.mubr.bf16.mxu0 %v2087_v41  ;;  %867 = vmatprep.mubr.bf16.mxu1 %v2089_v42 }
  0x71   :  { %740 = vmatmul.mubr.bf16.gmra.mrb[24].mxu0 %v2091_v43  ;;  %868 = vmatmul.mubr.bf16.gmra.mrb[24].mxu1 %v2092_v44 }
  0x72   :  { %747 = vmatprep.mubr.bf16.mxu0 %v2093_v45  ;;  %875 = vmatprep.mubr.bf16.mxu1 %v2095_v46 }
  0x79   :  { %748 = vmatmul.mubr.bf16.gmra.mrb[28].mxu0 %v2097_v47  ;;  %876 = vmatmul.mubr.bf16.gmra.mrb[28].mxu1 %v2098_v48 }
  0x7a   :  { %755 = vmatprep.mubr.bf16.mxu0 %v2099_v49  ;;  %883 = vmatprep.mubr.bf16.mxu1 %v2101_v50 }
  0x81   :  { %756 = vmatmul.mubr.bf16.gmra.mrb[32].mxu0 %v2103_v51  ;;  %884 = vmatmul.mubr.bf16.gmra.mrb[32].mxu1 %v2104_v52 }
  0x82   :  { %763 = vmatprep.mubr.bf16.mxu0 %v2105_v53  ;;  %891 = vmatprep.mubr.bf16.mxu1 %v2107_v54 }
  0x89   :  { %764 = vmatmul.mubr.bf16.gmra.mrb[36].mxu0 %v2109_v55  ;;  %892 = vmatmul.mubr.bf16.gmra.mrb[36].mxu1 %v2110_v56 }
  0x8a   :  { %771 = vmatprep.mubr.bf16.mxu0 %v2111_v57  ;;  %899 = vmatprep.mubr.bf16.mxu1 %v2113_v58 }
  0x91   :  { %772 = vmatmul.mubr.bf16.gmra.mrb[40].mxu0 %v2115_v59  ;;  %900 = vmatmul.mubr.bf16.gmra.mrb[40].mxu1 %v2116_v60 }
  0x92   :  { %779 = vmatprep.mubr.bf16.mxu0 %v2117_v61  ;;  %907 = vmatprep.mubr.bf16.mxu1 %v2119_v62 }
  0x99   :  { %780 = vmatmul.mubr.bf16.gmra.mrb[44].mxu0 %v2121_v63  ;;  %908 = vmatmul.mubr.bf16.gmra.mrb[44].mxu1 %v2122_v0 }
  0x9a   :  { %787 = vmatprep.mubr.bf16.mxu0 %v2123_v1  ;;  %915 = vmatprep.mubr.bf16.mxu1 %v2125_v2 }
  0xa1   :  { %788 = vmatmul.mubr.bf16.gmra.mrb[48].mxu0 %v2127_v3  ;;  %916 = vmatmul.mubr.bf16.gmra.mrb[48].mxu1 %v2128_v4 }
  0xa2   :  { %795 = vmatprep.mubr.bf16.mxu0 %v2129_v5  ;;  %923 = vmatprep.mubr.bf16.mxu1 %v2131_v6 }
  0xa9   :  { %796 = vmatmul.mubr.bf16.gmra.mrb[52].mxu0 %v2133_v7  ;;  %924 = vmatmul.mubr.bf16.gmra.mrb[52].mxu1 %v2134_v8 }
  0xaa   :  { %803 = vmatprep.mubr.bf16.mxu0 %v2135_v9  ;;  %931 = vmatprep.mubr.bf16.mxu1 %v2137_v10 }
  0xb1   :  { %804 = vmatmul.mubr.bf16.gmra.mrb[56].mxu0 %v2139_v11  ;;  %932 = vmatmul.mubr.bf16.gmra.mrb[56].mxu1 %v2140_v12 }
  0xb2   :  { %811 = vmatprep.mubr.bf16.mxu0 %v2141_v13  ;;  %939 = vmatprep.mubr.bf16.mxu1 %v2143_v14 }
  0xb9   :  { %812 = vmatmul.mubr.bf16.gmra.mrb[60].mxu0 %v2145_v15  ;;  %940 = vmatmul.mubr.bf16.gmra.mrb[60].mxu1 %v2146_v16 }
 0x114   :  { %v693_v18 = vpop.f32.mrb[0].mxu0  ;;  %v821_v19 = vpop.f32.mrb[0].mxu1 }
 0x115   :  { %v1150_v20 = vadd.f32 %v2443_v17, %v693_v18  ;;  %v1182_v21 = vadd.f32 %v2443_v17, %v821_v19  ;;  %v695_v22 = vpop.f32.mrb[1].mxu0  ;;  %v823_v23 = vpop.f32.mrb[1].mxu1 }
 0x116   :  { %v696_v24 = vpop.f32.mrb[2].mxu0  ;;  %v824_v25 = vpop.f32.mrb[2].mxu1 }
 0x117   :  { %v1151_v26 = vadd.f32 %v2443_v17, %v696_v24  ;;  %v1183_v27 = vadd.f32 %v2443_v17, %v824_v25  ;;  %v698_v28 = vpop.f32.mrb[3].mxu0  ;;  %v826_v29 = vpop.f32.mrb[3].mxu1  ;;  %v1214_v30 = vmax.f32 %v1150_v20, 0.0  ;;  %v1246_v31 = vmax.f32 %v1182_v21, 0.0 }
 0x119   :  { %v1215_v32 = vmax.f32 %v1151_v26, 0.0  ;;  %v1247_v33 = vmax.f32 %v1183_v27, 0.0 }
 0x11b   :  { %v1814_v34 = vpack.c.bf16 %v1215_v32, %v1214_v30  ;;  %v1894_v35 = vpack.c.bf16 %v1247_v33, %v1246_v31 }
 0x11c   :  { %v701_v36 = vpop.f32.mrb[4].mxu0  ;;  %v829_v37 = vpop.f32.mrb[4].mxu1 }
 0x11d   :  { %1815 = vst [vmem:[%s2608_s3] sm:$0xff] %v1814_v34   ;;  %1986 = vst [vmem:[%s2608_s3 + $0x80] sm:$0xff] %v1894_v35   ;;  %v1152_v38 = vadd.f32 %v2443_v17, %v701_v36  ;;  %v1184_v39 = vadd.f32 %v2443_v17, %v829_v37  ;;  %v703_v40 = vpop.f32.mrb[5].mxu0  ;;  %v831_v41 = vpop.f32.mrb[5].mxu1 }
 0x11e   :  { %v704_v42 = vpop.f32.mrb[6].mxu0  ;;  %v832_v43 = vpop.f32.mrb[6].mxu1 }
 0x11f   :  { %v1153_v44 = vadd.f32 %v2443_v17, %v704_v42  ;;  %v1185_v45 = vadd.f32 %v2443_v17, %v832_v43  ;;  %v706_v46 = vpop.f32.mrb[7].mxu0  ;;  %v834_v47 = vpop.f32.mrb[7].mxu1  ;;  %v1216_v48 = vmax.f32 %v1152_v38, 0.0  ;;  %v1248_v49 = vmax.f32 %v1184_v39, 0.0 }
 0x121   :  { %v1217_v50 = vmax.f32 %v1153_v44, 0.0  ;;  %v1249_v51 = vmax.f32 %v1185_v45, 0.0 }
 0x123   :  { %v1819_v52 = vpack.c.bf16 %v1217_v50, %v1216_v48  ;;  %v1899_v53 = vpack.c.bf16 %v1249_v51, %v1248_v49 }
 0x124   :  { %v709_v54 = vpop.f32.mrb[8].mxu0  ;;  %v837_v55 = vpop.f32.mrb[8].mxu1 }
 0x125   :  { %1971 = vst [vmem:[%s2608_s3 + $0x8] sm:$0xff] %v1819_v52   ;;  %1987 = vst [vmem:[%s2608_s3 + $0x88] sm:$0xff] %v1899_v53   ;;  %v1154_v56 = vadd.f32 %v2443_v17, %v709_v54  ;;  %v1186_v57 = vadd.f32 %v2443_v17, %v837_v55  ;;  %v711_v58 = vpop.f32.mrb[9].mxu0  ;;  %v839_v59 = vpop.f32.mrb[9].mxu1 }
 0x126   :  { %v712_v60 = vpop.f32.mrb[10].mxu0  ;;  %v840_v61 = vpop.f32.mrb[10].mxu1 }
 0x127   :  { %v1155_v62 = vadd.f32 %v2443_v17, %v712_v60  ;;  %v1187_v63 = vadd.f32 %v2443_v17, %v840_v61  ;;  %v714_v0 = vpop.f32.mrb[11].mxu0  ;;  %v842_v1 = vpop.f32.mrb[11].mxu1  ;;  %v1218_v2 = vmax.f32 %v1154_v56, 0.0  ;;  %v1250_v3 = vmax.f32 %v1186_v57, 0.0 }
 0x129   :  { %v1219_v4 = vmax.f32 %v1155_v62, 0.0  ;;  %v1251_v5 = vmax.f32 %v1187_v63, 0.0 }
 0x12b   :  { %v1824_v6 = vpack.c.bf16 %v1219_v4, %v1218_v2  ;;  %v1904_v7 = vpack.c.bf16 %v1251_v5, %v1250_v3 }
 0x12c   :  { %v717_v8 = vpop.f32.mrb[12].mxu0  ;;  %v845_v9 = vpop.f32.mrb[12].mxu1 }
 0x12d   :  { %1972 = vst [vmem:[%s2608_s3 + $0x10] sm:$0xff] %v1824_v6   ;;  %1988 = vst [vmem:[%s2608_s3 + $0x90] sm:$0xff] %v1904_v7   ;;  %v1156_v10 = vadd.f32 %v2443_v17, %v717_v8  ;;  %v1188_v11 = vadd.f32 %v2443_v17, %v845_v9  ;;  %v719_v12 = vpop.f32.mrb[13].mxu0  ;;  %v847_v13 = vpop.f32.mrb[13].mxu1 }
 0x12e   :  { %v720_v14 = vpop.f32.mrb[14].mxu0  ;;  %v848_v15 = vpop.f32.mrb[14].mxu1 }
 0x12f   :  { %v1157_v16 = vadd.f32 %v2443_v17, %v720_v14  ;;  %v1189_v18 = vadd.f32 %v2443_v17, %v848_v15  ;;  %v722_v19 = vpop.f32.mrb[15].mxu0  ;;  %v850_v20 = vpop.f32.mrb[15].mxu1  ;;  %v1220_v21 = vmax.f32 %v1156_v10, 0.0  ;;  %v1252_v22 = vmax.f32 %v1188_v11, 0.0 }
 0x131   :  { %v1221_v23 = vmax.f32 %v1157_v16, 0.0  ;;  %v1253_v24 = vmax.f32 %v1189_v18, 0.0 }
 0x133   :  { %v1829_v25 = vpack.c.bf16 %v1221_v23, %v1220_v21  ;;  %v1909_v26 = vpack.c.bf16 %v1253_v24, %v1252_v22 }
 0x134   :  { %v725_v27 = vpop.f32.mrb[16].mxu0  ;;  %v853_v28 = vpop.f32.mrb[16].mxu1 }
 0x135   :  { %1973 = vst [vmem:[%s2608_s3 + $0x18] sm:$0xff] %v1829_v25   ;;  %1989 = vst [vmem:[%s2608_s3 + $0x98] sm:$0xff] %v1909_v26   ;;  %v1158_v29 = vadd.f32 %v2443_v17, %v725_v27  ;;  %v1190_v30 = vadd.f32 %v2443_v17, %v853_v28  ;;  %v727_v31 = vpop.f32.mrb[17].mxu0  ;;  %v855_v32 = vpop.f32.mrb[17].mxu1 }
 0x136   :  { %v728_v33 = vpop.f32.mrb[18].mxu0  ;;  %v856_v34 = vpop.f32.mrb[18].mxu1 }
 0x137   :  { %v1159_v35 = vadd.f32 %v2443_v17, %v728_v33  ;;  %v1191_v36 = vadd.f32 %v2443_v17, %v856_v34  ;;  %v730_v37 = vpop.f32.mrb[19].mxu0  ;;  %v858_v38 = vpop.f32.mrb[19].mxu1  ;;  %v1222_v39 = vmax.f32 %v1158_v29, 0.0  ;;  %v1254_v40 = vmax.f32 %v1190_v30, 0.0 }
 0x139   :  { %v1223_v41 = vmax.f32 %v1159_v35, 0.0  ;;  %v1255_v42 = vmax.f32 %v1191_v36, 0.0 }
 0x13b   :  { %v1834_v43 = vpack.c.bf16 %v1223_v41, %v1222_v39  ;;  %v1914_v44 = vpack.c.bf16 %v1255_v42, %v1254_v40 }
 0x13c   :  { %v733_v45 = vpop.f32.mrb[20].mxu0  ;;  %v861_v46 = vpop.f32.mrb[20].mxu1 }
 0x13d   :  { %1974 = vst [vmem:[%s2608_s3 + $0x20] sm:$0xff] %v1834_v43   ;;  %1990 = vst [vmem:[%s2608_s3 + $0xa0] sm:$0xff] %v1914_v44   ;;  %v1160_v47 = vadd.f32 %v2443_v17, %v733_v45  ;;  %v1192_v48 = vadd.f32 %v2443_v17, %v861_v46  ;;  %v735_v49 = vpop.f32.mrb[21].mxu0  ;;  %v863_v50 = vpop.f32.mrb[21].mxu1 }
 0x13e   :  { %v736_v51 = vpop.f32.mrb[22].mxu0  ;;  %v864_v52 = vpop.f32.mrb[22].mxu1 }
 0x13f   :  { %v1161_v53 = vadd.f32 %v2443_v17, %v736_v51  ;;  %v1193_v54 = vadd.f32 %v2443_v17, %v864_v52  ;;  %v738_v55 = vpop.f32.mrb[23].mxu0  ;;  %v866_v56 = vpop.f32.mrb[23].mxu1  ;;  %v1224_v57 = vmax.f32 %v1160_v47, 0.0  ;;  %v1256_v58 = vmax.f32 %v1192_v48, 0.0 }
 0x141   :  { %v1225_v59 = vmax.f32 %v1161_v53, 0.0  ;;  %v1257_v60 = vmax.f32 %v1193_v54, 0.0 }
 0x143   :  { %v1839_v61 = vpack.c.bf16 %v1225_v59, %v1224_v57  ;;  %v1919_v62 = vpack.c.bf16 %v1257_v60, %v1256_v58 }
 0x144   :  { %v741_v63 = vpop.f32.mrb[24].mxu0  ;;  %v869_v0 = vpop.f32.mrb[24].mxu1 }
 0x145   :  { %1975 = vst [vmem:[%s2608_s3 + $0x28] sm:$0xff] %v1839_v61   ;;  %1991 = vst [vmem:[%s2608_s3 + $0xa8] sm:$0xff] %v1919_v62   ;;  %v1162_v1 = vadd.f32 %v2443_v17, %v741_v63  ;;  %v1194_v2 = vadd.f32 %v2443_v17, %v869_v0  ;;  %v743_v3 = vpop.f32.mrb[25].mxu0  ;;  %v871_v4 = vpop.f32.mrb[25].mxu1 }
 0x146   :  { %v744_v5 = vpop.f32.mrb[26].mxu0  ;;  %v872_v6 = vpop.f32.mrb[26].mxu1 }
 0x147   :  { %v1163_v7 = vadd.f32 %v2443_v17, %v744_v5  ;;  %v1195_v8 = vadd.f32 %v2443_v17, %v872_v6  ;;  %v746_v9 = vpop.f32.mrb[27].mxu0  ;;  %v874_v10 = vpop.f32.mrb[27].mxu1  ;;  %v1226_v11 = vmax.f32 %v1162_v1, 0.0  ;;  %v1258_v12 = vmax.f32 %v1194_v2, 0.0 }
 0x149   :  { %v1227_v13 = vmax.f32 %v1163_v7, 0.0  ;;  %v1259_v14 = vmax.f32 %v1195_v8, 0.0 }
 0x14b   :  { %v1844_v15 = vpack.c.bf16 %v1227_v13, %v1226_v11  ;;  %v1924_v16 = vpack.c.bf16 %v1259_v14, %v1258_v12 }
 0x14c   :  { %v749_v18 = vpop.f32.mrb[28].mxu0  ;;  %v877_v19 = vpop.f32.mrb[28].mxu1 }
 0x14d   :  { %1976 = vst [vmem:[%s2608_s3 + $0x30] sm:$0xff] %v1844_v15   ;;  %1992 = vst [vmem:[%s2608_s3 + $0xb0] sm:$0xff] %v1924_v16   ;;  %v1164_v20 = vadd.f32 %v2443_v17, %v749_v18  ;;  %v1196_v21 = vadd.f32 %v2443_v17, %v877_v19  ;;  %v751_v22 = vpop.f32.mrb[29].mxu0  ;;  %v879_v23 = vpop.f32.mrb[29].mxu1 }
 0x14e   :  { %v752_v24 = vpop.f32.mrb[30].mxu0  ;;  %v880_v25 = vpop.f32.mrb[30].mxu1 }
 0x14f   :  { %v1165_v26 = vadd.f32 %v2443_v17, %v752_v24  ;;  %v1197_v27 = vadd.f32 %v2443_v17, %v880_v25  ;;  %v754_v28 = vpop.f32.mrb[31].mxu0  ;;  %v882_v29 = vpop.f32.mrb[31].mxu1  ;;  %v1228_v30 = vmax.f32 %v1164_v20, 0.0  ;;  %v1260_v31 = vmax.f32 %v1196_v21, 0.0 }
 0x151   :  { %v1229_v32 = vmax.f32 %v1165_v26, 0.0  ;;  %v1261_v33 = vmax.f32 %v1197_v27, 0.0 }
 0x153   :  { %v1849_v34 = vpack.c.bf16 %v1229_v32, %v1228_v30  ;;  %v1929_v35 = vpack.c.bf16 %v1261_v33, %v1260_v31 }
 0x154   :  { %v757_v36 = vpop.f32.mrb[32].mxu0  ;;  %v885_v37 = vpop.f32.mrb[32].mxu1 }
 0x155   :  { %1977 = vst [vmem:[%s2608_s3 + $0x38] sm:$0xff] %v1849_v34   ;;  %1993 = vst [vmem:[%s2608_s3 + $0xb8] sm:$0xff] %v1929_v35   ;;  %v1166_v38 = vadd.f32 %v2443_v17, %v757_v36  ;;  %v1198_v39 = vadd.f32 %v2443_v17, %v885_v37  ;;  %v759_v40 = vpop.f32.mrb[33].mxu0  ;;  %v887_v41 = vpop.f32.mrb[33].mxu1 }
 0x156   :  { %v760_v42 = vpop.f32.mrb[34].mxu0  ;;  %v888_v43 = vpop.f32.mrb[34].mxu1 }
 0x157   :  { %v1167_v44 = vadd.f32 %v2443_v17, %v760_v42  ;;  %v1199_v45 = vadd.f32 %v2443_v17, %v888_v43  ;;  %v762_v46 = vpop.f32.mrb[35].mxu0  ;;  %v890_v47 = vpop.f32.mrb[35].mxu1  ;;  %v1230_v48 = vmax.f32 %v1166_v38, 0.0  ;;  %v1262_v49 = vmax.f32 %v1198_v39, 0.0 }
 0x159   :  { %v1231_v50 = vmax.f32 %v1167_v44, 0.0  ;;  %v1263_v51 = vmax.f32 %v1199_v45, 0.0 }
 0x15b   :  { %v1854_v52 = vpack.c.bf16 %v1231_v50, %v1230_v48  ;;  %v1934_v53 = vpack.c.bf16 %v1263_v51, %v1262_v49 }
 0x15c   :  { %v765_v54 = vpop.f32.mrb[36].mxu0  ;;  %v893_v55 = vpop.f32.mrb[36].mxu1 }
 0x15d   :  { %1978 = vst [vmem:[%s2608_s3 + $0x40] sm:$0xff] %v1854_v52   ;;  %1994 = vst [vmem:[%s2608_s3 + $0xc0] sm:$0xff] %v1934_v53   ;;  %v1168_v56 = vadd.f32 %v2443_v17, %v765_v54  ;;  %v1200_v57 = vadd.f32 %v2443_v17, %v893_v55  ;;  %v767_v58 = vpop.f32.mrb[37].mxu0  ;;  %v895_v59 = vpop.f32.mrb[37].mxu1 }
 0x15e   :  { %v768_v60 = vpop.f32.mrb[38].mxu0  ;;  %v896_v61 = vpop.f32.mrb[38].mxu1 }
 0x15f   :  { %v1169_v62 = vadd.f32 %v2443_v17, %v768_v60  ;;  %v1201_v63 = vadd.f32 %v2443_v17, %v896_v61  ;;  %v770_v0 = vpop.f32.mrb[39].mxu0  ;;  %v898_v1 = vpop.f32.mrb[39].mxu1  ;;  %v1232_v2 = vmax.f32 %v1168_v56, 0.0  ;;  %v1264_v3 = vmax.f32 %v1200_v57, 0.0 }
 0x161   :  { %v1233_v4 = vmax.f32 %v1169_v62, 0.0  ;;  %v1265_v5 = vmax.f32 %v1201_v63, 0.0 }
 0x163   :  { %v1859_v6 = vpack.c.bf16 %v1233_v4, %v1232_v2  ;;  %v1939_v7 = vpack.c.bf16 %v1265_v5, %v1264_v3 }
 0x164   :  { %v773_v8 = vpop.f32.mrb[40].mxu0  ;;  %v901_v9 = vpop.f32.mrb[40].mxu1 }
 0x165   :  { %1979 = vst [vmem:[%s2608_s3 + $0x48] sm:$0xff] %v1859_v6   ;;  %1995 = vst [vmem:[%s2608_s3 + $0xc8] sm:$0xff] %v1939_v7   ;;  %v1170_v10 = vadd.f32 %v2443_v17, %v773_v8  ;;  %v1202_v11 = vadd.f32 %v2443_v17, %v901_v9  ;;  %v775_v12 = vpop.f32.mrb[41].mxu0  ;;  %v903_v13 = vpop.f32.mrb[41].mxu1 }
 0x166   :  { %v776_v14 = vpop.f32.mrb[42].mxu0  ;;  %v904_v15 = vpop.f32.mrb[42].mxu1 }
 0x167   :  { %v1171_v16 = vadd.f32 %v2443_v17, %v776_v14  ;;  %v1203_v18 = vadd.f32 %v2443_v17, %v904_v15  ;;  %v778_v19 = vpop.f32.mrb[43].mxu0  ;;  %v906_v20 = vpop.f32.mrb[43].mxu1  ;;  %v1234_v21 = vmax.f32 %v1170_v10, 0.0  ;;  %v1266_v22 = vmax.f32 %v1202_v11, 0.0 }
 0x169   :  { %v1235_v23 = vmax.f32 %v1171_v16, 0.0  ;;  %v1267_v24 = vmax.f32 %v1203_v18, 0.0 }
 0x16b   :  { %v1864_v25 = vpack.c.bf16 %v1235_v23, %v1234_v21  ;;  %v1944_v26 = vpack.c.bf16 %v1267_v24, %v1266_v22 }
 0x16c   :  { %v781_v27 = vpop.f32.mrb[44].mxu0  ;;  %v909_v28 = vpop.f32.mrb[44].mxu1 }
 0x16d   :  { %1980 = vst [vmem:[%s2608_s3 + $0x50] sm:$0xff] %v1864_v25   ;;  %1996 = vst [vmem:[%s2608_s3 + $0xd0] sm:$0xff] %v1944_v26   ;;  %v1172_v29 = vadd.f32 %v2443_v17, %v781_v27  ;;  %v1204_v30 = vadd.f32 %v2443_v17, %v909_v28  ;;  %v783_v31 = vpop.f32.mrb[45].mxu0  ;;  %v911_v32 = vpop.f32.mrb[45].mxu1 }
 0x16e   :  { %v784_v33 = vpop.f32.mrb[46].mxu0  ;;  %v912_v34 = vpop.f32.mrb[46].mxu1 }
 0x16f   :  { %v1173_v35 = vadd.f32 %v2443_v17, %v784_v33  ;;  %v1205_v36 = vadd.f32 %v2443_v17, %v912_v34  ;;  %v786_v37 = vpop.f32.mrb[47].mxu0  ;;  %v914_v38 = vpop.f32.mrb[47].mxu1  ;;  %v1236_v39 = vmax.f32 %v1172_v29, 0.0  ;;  %v1268_v40 = vmax.f32 %v1204_v30, 0.0 }
 0x171   :  { %v1237_v41 = vmax.f32 %v1173_v35, 0.0  ;;  %v1269_v42 = vmax.f32 %v1205_v36, 0.0 }
 0x173   :  { %v1869_v43 = vpack.c.bf16 %v1237_v41, %v1236_v39  ;;  %v1949_v44 = vpack.c.bf16 %v1269_v42, %v1268_v40 }
 0x174   :  { %v789_v45 = vpop.f32.mrb[48].mxu0  ;;  %v917_v46 = vpop.f32.mrb[48].mxu1 }
 0x175   :  { %1981 = vst [vmem:[%s2608_s3 + $0x58] sm:$0xff] %v1869_v43   ;;  %1997 = vst [vmem:[%s2608_s3 + $0xd8] sm:$0xff] %v1949_v44   ;;  %v1174_v47 = vadd.f32 %v2443_v17, %v789_v45  ;;  %v1206_v48 = vadd.f32 %v2443_v17, %v917_v46  ;;  %v791_v49 = vpop.f32.mrb[49].mxu0  ;;  %v919_v50 = vpop.f32.mrb[49].mxu1 }
 0x176   :  { %v792_v51 = vpop.f32.mrb[50].mxu0  ;;  %v920_v52 = vpop.f32.mrb[50].mxu1 }
 0x177   :  { %v1175_v53 = vadd.f32 %v2443_v17, %v792_v51  ;;  %v1207_v54 = vadd.f32 %v2443_v17, %v920_v52  ;;  %v794_v55 = vpop.f32.mrb[51].mxu0  ;;  %v922_v56 = vpop.f32.mrb[51].mxu1  ;;  %v1238_v57 = vmax.f32 %v1174_v47, 0.0  ;;  %v1270_v58 = vmax.f32 %v1206_v48, 0.0 }
 0x179   :  { %v1239_v59 = vmax.f32 %v1175_v53, 0.0  ;;  %v1271_v60 = vmax.f32 %v1207_v54, 0.0 }
 0x17b   :  { %v1874_v61 = vpack.c.bf16 %v1239_v59, %v1238_v57  ;;  %v1954_v62 = vpack.c.bf16 %v1271_v60, %v1270_v58 }
 0x17c   :  { %v797_v63 = vpop.f32.mrb[52].mxu0  ;;  %v925_v0 = vpop.f32.mrb[52].mxu1 }
 0x17d   :  { %1982 = vst [vmem:[%s2608_s3 + $0x60] sm:$0xff] %v1874_v61   ;;  %1998 = vst [vmem:[%s2608_s3 + $0xe0] sm:$0xff] %v1954_v62   ;;  %v1176_v1 = vadd.f32 %v2443_v17, %v797_v63  ;;  %v1208_v2 = vadd.f32 %v2443_v17, %v925_v0  ;;  %v799_v3 = vpop.f32.mrb[53].mxu0  ;;  %v927_v4 = vpop.f32.mrb[53].mxu1 }
 0x17e   :  { %v800_v5 = vpop.f32.mrb[54].mxu0  ;;  %v928_v6 = vpop.f32.mrb[54].mxu1 }
 0x17f   :  { %v1177_v7 = vadd.f32 %v2443_v17, %v800_v5  ;;  %v1209_v8 = vadd.f32 %v2443_v17, %v928_v6  ;;  %v802_v9 = vpop.f32.mrb[55].mxu0  ;;  %v930_v10 = vpop.f32.mrb[55].mxu1  ;;  %v1240_v11 = vmax.f32 %v1176_v1, 0.0  ;;  %v1272_v12 = vmax.f32 %v1208_v2, 0.0 }
 0x181   :  { %v1241_v13 = vmax.f32 %v1177_v7, 0.0  ;;  %v1273_v14 = vmax.f32 %v1209_v8, 0.0 }
 0x183   :  { %v1879_v15 = vpack.c.bf16 %v1241_v13, %v1240_v11  ;;  %v1959_v16 = vpack.c.bf16 %v1273_v14, %v1272_v12 }
 0x184   :  { %v805_v18 = vpop.f32.mrb[56].mxu0  ;;  %v933_v19 = vpop.f32.mrb[56].mxu1 }
 0x185   :  { %1983 = vst [vmem:[%s2608_s3 + $0x68] sm:$0xff] %v1879_v15   ;;  %1999 = vst [vmem:[%s2608_s3 + $0xe8] sm:$0xff] %v1959_v16   ;;  %v1178_v20 = vadd.f32 %v2443_v17, %v805_v18  ;;  %v1210_v21 = vadd.f32 %v2443_v17, %v933_v19  ;;  %v807_v22 = vpop.f32.mrb[57].mxu0  ;;  %v935_v23 = vpop.f32.mrb[57].mxu1 }
 0x186   :  { %v808_v24 = vpop.f32.mrb[58].mxu0  ;;  %v936_v25 = vpop.f32.mrb[58].mxu1 }
 0x187   :  { %v1179_v26 = vadd.f32 %v2443_v17, %v808_v24  ;;  %v1211_v27 = vadd.f32 %v2443_v17, %v936_v25  ;;  %v810_v28 = vpop.f32.mrb[59].mxu0  ;;  %v938_v29 = vpop.f32.mrb[59].mxu1  ;;  %v1242_v30 = vmax.f32 %v1178_v20, 0.0  ;;  %v1274_v31 = vmax.f32 %v1210_v21, 0.0 }
 0x189   :  { %v1243_v32 = vmax.f32 %v1179_v26, 0.0  ;;  %v1275_v33 = vmax.f32 %v1211_v27, 0.0 }
 0x18b   :  { %v1884_v34 = vpack.c.bf16 %v1243_v32, %v1242_v30  ;;  %v1964_v35 = vpack.c.bf16 %v1275_v33, %v1274_v31 }
 0x18c   :  { %v813_v36 = vpop.f32.mrb[60].mxu0  ;;  %v941_v37 = vpop.f32.mrb[60].mxu1 }
 0x18d   :  { %1984 = vst [vmem:[%s2608_s3 + $0x70] sm:$0xff] %v1884_v34   ;;  %2000 = vst [vmem:[%s2608_s3 + $0xf0] sm:$0xff] %v1964_v35   ;;  %v1180_v38 = vadd.f32 %v2443_v17, %v813_v36  ;;  %v1212_v39 = vadd.f32 %v2443_v17, %v941_v37  ;;  %v815_v40 = vpop.f32.mrb[61].mxu0  ;;  %v943_v41 = vpop.f32.mrb[61].mxu1 }
 0x18e   :  { %v816_v42 = vpop.f32.mrb[62].mxu0  ;;  %v944_v43 = vpop.f32.mrb[62].mxu1 }
 0x18f   :  { %v1181_v44 = vadd.f32 %v2443_v17, %v816_v42  ;;  %v1213_v45 = vadd.f32 %v2443_v17, %v944_v43  ;;  %v818_v46 = vpop.f32.mrb[63].mxu0  ;;  %v946_v47 = vpop.f32.mrb[63].mxu1  ;;  %v1244_v48 = vmax.f32 %v1180_v38, 0.0  ;;  %v1276_v49 = vmax.f32 %v1212_v39, 0.0 }
 0x191   :  { %v1245_v50 = vmax.f32 %v1181_v44, 0.0  ;;  %v1277_v51 = vmax.f32 %v1213_v45, 0.0 }
 0x193   :  { %v1889_v52 = vpack.c.bf16 %v1245_v50, %v1244_v48  ;;  %v1969_v53 = vpack.c.bf16 %v1277_v51, %v1276_v49 }
 0x195   :  { %1985 = vst [vmem:[%s2608_s3 + $0x78] sm:$0xff] %v1889_v52   ;;  %2001 = vst [vmem:[%s2608_s3 + $0xf8] sm:$0xff] %v1969_v53  }

// kernel: vgg_loss.43
= control target key start
LH: loop header
LB: loop body
LE: loop exit
PB: predicated region body
PF: predicated region fallthrough
CT: control target
= control target key end

     0   :  { %v2956_v0 = vmov 0   ;;  %s3663_s1 = inlined_call_operand.vmem [shape: bf16[384,128], index: 1, kind: input, shape index: {}]   ;;  %s3664_s0 = inlined_call_operand.vmem [shape: bf16[512,384], index: 0, kind: input, shape index: {}]   ;;  %s3665_s2 = inlined_call_operand.vmem [shape: f32[1,128], index: 2, kind: input, shape index: {}]   ;;  %s3666_s3 = inlined_call_operand.vmem [shape: bf16[512,128], index: 3, kind: output, shape index: {}]  }
   0x1   :  { %979 = vmatprep.subr.bf16.mxu0 %v2956_v0  ;;  %2771 = vmatprep.subr.bf16.mxu1 %v2956_v0  ;;  %v2804_v1 = vld [vmem:[%s3663_s1] sm:$0xff]   ;;  %v2805_v2 = vld [vmem:[%s3663_s1 + $0x8] sm:$0xff]   ;;  %v2806_v3 = vld [vmem:[%s3663_s1 + $0x10] sm:$0xff]  }
   0x2   :  { %980 = vmatpush1.bf16.msra.mxu0 %v2804_v1  ;;  %2787 = vmatpush1.bf16.msra.mxu1 %v2804_v1  ;;  %v2807_v4 = vld [vmem:[%s3663_s1 + $0x18] sm:$0xff]   ;;  %v2808_v5 = vld [vmem:[%s3663_s1 + $0x20] sm:$0xff]   ;;  %v2809_v7 = vld [vmem:[%s3663_s1 + $0x28] sm:$0xff]  }
   0x3   :  { %981 = vmatprep.subr.bf16.mxu0 %v2956_v0  ;;  %2772 = vmatprep.subr.bf16.mxu1 %v2956_v0  ;;  %v2822_v6 = vld [vmem:[%s3664_s0 + $0x4] ss:$12 sps:$4 sm:$0xff]   ;;  %v2811_v10 = vld [vmem:[%s3663_s1 + $0x38] sm:$0xff]   ;;  %v2813_v12 = vld [vmem:[%s3663_s1 + $0x48] sm:$0xff]  }
   0x4   :  { %v2825_v8 = vld [vmem:[%s3664_s0 + $0x244] ss:$12 sps:$4 sm:$0xff]   ;;  %1011 = vmatprep.mubr.bf16.mxu0 %v2822_v6  ;;  %v2815_v14 = vld [vmem:[%s3663_s1 + $0x58] sm:$0xff]   ;;  %v2817_v16 = vld [vmem:[%s3663_s1 + $0x68] sm:$0xff]  }
   0x5   :  { %1203 = vmatprep.mubr.bf16.mxu1 %v2825_v8  ;;  %v2810_v9 = vld [vmem:[%s3663_s1 + $0x30] sm:$0xff]   ;;  %v2812_v11 = vld [vmem:[%s3663_s1 + $0x40] sm:$0xff]   ;;  %v2819_v18 = vld [vmem:[%s3663_s1 + $0x78] sm:$0xff]  }
   0x6   :  { %982 = vmatpush1.bf16.msra.mxu0 %v2805_v2  ;;  %2788 = vmatpush1.bf16.msra.mxu1 %v2805_v2  ;;  %v2814_v13 = vld [vmem:[%s3663_s1 + $0x50] sm:$0xff]   ;;  %v2816_v15 = vld [vmem:[%s3663_s1 + $0x60] sm:$0xff]   ;;  %v2827_v22 = vld [vmem:[%s3664_s0 + $0x1c] ss:$12 sps:$4 sm:$0xff]  }
   0x7   :  { %983 = vmatprep.subr.bf16.mxu0 %v2956_v0  ;;  %2773 = vmatprep.subr.bf16.mxu1 %v2956_v0  ;;  %v2818_v17 = vld [vmem:[%s3663_s1 + $0x70] sm:$0xff]   ;;  %v2826_v19 = vld [vmem:[%s3663_s1 + $0x80] sm:$0xff]   ;;  %v2829_v23 = vld [vmem:[%s3664_s0 + $0x25c] ss:$12 sps:$4 sm:$0xff]  }
   0x8   :  { %v2820_v20 = vld [vmem:[%s3664_s0] ss:$12 sps:$4 sm:$0xff]   ;;  %v2840_v25 = vld [vmem:[%s3663_s1 + $0x90] sm:$0xff]   ;;  %v2831_v26 = vld [vmem:[%s3664_s0 + $0x18] ss:$12 sps:$4 sm:$0xff]  }
   0x9   :  { %v2823_v21 = vld [vmem:[%s3664_s0 + $0x240] ss:$12 sps:$4 sm:$0xff]   ;;  %v2832_v27 = vld [vmem:[%s3664_s0 + $0x258] ss:$12 sps:$4 sm:$0xff]   ;;  %v2838_v31 = vld [vmem:[%s3664_s0 + $0x30] ss:$12 sps:$4 sm:$0xff]  }
   0xa   :  { %984 = vmatpush1.bf16.msra.mxu0 %v2806_v3  ;;  %2789 = vmatpush1.bf16.msra.mxu1 %v2806_v3  ;;  %v2833_v24 = vld [vmem:[%s3663_s1 + $0x88] sm:$0xff]   ;;  %v2834_v28 = vld [vmem:[%s3664_s0 + $0x34] ss:$12 sps:$4 sm:$0xff]   ;;  %v2847_v30 = vld [vmem:[%s3663_s1 + $0x98] sm:$0xff]  }
   0xb   :  { %985 = vmatprep.subr.bf16.mxu0 %v2956_v0  ;;  %2774 = vmatprep.subr.bf16.mxu1 %v2956_v0  ;;  %v2836_v29 = vld [vmem:[%s3664_s0 + $0x274] ss:$12 sps:$4 sm:$0xff]   ;;  %v2839_v33 = vld [vmem:[%s3664_s0 + $0x270] ss:$12 sps:$4 sm:$0xff]   ;;  %v2841_v34 = vld [vmem:[%s3664_s0 + $0x4c] ss:$12 sps:$4 sm:$0xff]  }
   0xc   :  { %v2854_v32 = vld [vmem:[%s3663_s1 + $0xa0] sm:$0xff]   ;;  %v2843_v35 = vld [vmem:[%s3664_s0 + $0x28c] ss:$12 sps:$4 sm:$0xff]   ;;  %v2845_v37 = vld [vmem:[%s3664_s0 + $0x48] ss:$12 sps:$4 sm:$0xff]  }
   0xd   :  { %v2861_v36 = vld [vmem:[%s3663_s1 + $0xa8] sm:$0xff]   ;;  %v2848_v39 = vld [vmem:[%s3664_s0 + $0x64] ss:$12 sps:$4 sm:$0xff]   ;;  %v2875_v42 = vld [vmem:[%s3663_s1 + $0xb8] sm:$0xff]  }
   0xe   :  { %986 = vmatpush1.bf16.msra.mxu0 %v2807_v4  ;;  %2790 = vmatpush1.bf16.msra.mxu1 %v2807_v4  ;;  %v2846_v38 = vld [vmem:[%s3664_s0 + $0x288] ss:$12 sps:$4 sm:$0xff]   ;;  %v2850_v40 = vld [vmem:[%s3664_s0 + $0x2a4] ss:$12 sps:$4 sm:$0xff]   ;;  %v2852_v43 = vld [vmem:[%s3664_s0 + $0x60] ss:$12 sps:$4 sm:$0xff]  }
   0xf   :  { %987 = vmatprep.subr.bf16.mxu0 %v2956_v0  ;;  %2775 = vmatprep.subr.bf16.mxu1 %v2956_v0  ;;  %v2868_v41 = vld [vmem:[%s3663_s1 + $0xb0] sm:$0xff]   ;;  %v2853_v44 = vld [vmem:[%s3664_s0 + $0x2a0] ss:$12 sps:$4 sm:$0xff]   ;;  %v2855_v45 = vld [vmem:[%s3664_s0 + $0x7c] ss:$12 sps:$4 sm:$0xff]  }
  0x10   :  { %v2857_v46 = vld [vmem:[%s3664_s0 + $0x2bc] ss:$12 sps:$4 sm:$0xff]   ;;  %v2859_v47 = vld [vmem:[%s3664_s0 + $0x78] ss:$12 sps:$4 sm:$0xff]   ;;  %v2862_v49 = vld [vmem:[%s3664_s0 + $0x94] ss:$12 sps:$4 sm:$0xff]  }
  0x11   :  { %v2860_v48 = vld [vmem:[%s3664_s0 + $0x2b8] ss:$12 sps:$4 sm:$0xff]   ;;  %v2864_v50 = vld [vmem:[%s3664_s0 + $0x2d4] ss:$12 sps:$4 sm:$0xff]   ;;  %v2866_v51 = vld [vmem:[%s3664_s0 + $0x90] ss:$12 sps:$4 sm:$0xff]  }
  0x12   :  { %988 = vmatpush1.bf16.msra.mxu0 %v2808_v5  ;;  %2791 = vmatpush1.bf16.msra.mxu1 %v2808_v5  ;;  %v2867_v52 = vld [vmem:[%s3664_s0 + $0x2d0] ss:$12 sps:$4 sm:$0xff]   ;;  %v2869_v53 = vld [vmem:[%s3664_s0 + $0xac] ss:$12 sps:$4 sm:$0xff]   ;;  %v2873_v55 = vld [vmem:[%s3664_s0 + $0xa8] ss:$12 sps:$4 sm:$0xff]  }
  0x13   :  { %989 = vmatprep.subr.bf16.mxu0 %v2956_v0  ;;  %2776 = vmatprep.subr.bf16.mxu1 %v2956_v0  ;;  %v2871_v54 = vld [vmem:[%s3664_s0 + $0x2ec] ss:$12 sps:$4 sm:$0xff]   ;;  %v2874_v56 = vld [vmem:[%s3664_s0 + $0x2e8] ss:$12 sps:$4 sm:$0xff]   ;;  %v2876_v57 = vld [vmem:[%s3664_s0 + $0xc4] ss:$12 sps:$4 sm:$0xff]  }
  0x14   :  { %v2878_v58 = vld [vmem:[%s3664_s0 + $0x8] ss:$12 sps:$4 sm:$0xff]   ;;  %v2879_v59 = vld [vmem:[%s3664_s0 + $0xc0] ss:$12 sps:$4 sm:$0xff]   ;;  %v2883_v62 = vld [vmem:[%s3664_s0 + $0x38] ss:$12 sps:$4 sm:$0xff]  }
  0x15   :  { %v2880_v60 = vld [vmem:[%s3664_s0 + $0x20] ss:$12 sps:$4 sm:$0xff]   ;;  %v2881_v61 = vld [vmem:[%s3664_s0 + $0xdc] ss:$12 sps:$4 sm:$0xff]   ;;  %v2884_v63 = vld [vmem:[%s3664_s0 + $0xd8] ss:$12 sps:$4 sm:$0xff]  }
  0x16   :  { %990 = vmatpush1.bf16.msra.mxu0 %v2809_v7  ;;  %2792 = vmatpush1.bf16.msra.mxu1 %v2809_v7  ;;  %v2886_v1 = vld [vmem:[%s3664_s0 + $0xf4] ss:$12 sps:$4 sm:$0xff]   ;;  %v2889_v3 = vld [vmem:[%s3664_s0 + $0xf0] ss:$12 sps:$4 sm:$0xff]   ;;  %v2891_v5 = vld [vmem:[%s3664_s0 + $0x10c] ss:$12 sps:$4 sm:$0xff]  }
  0x17   :  { %991 = vmatprep.subr.bf16.mxu0 %v2956_v0  ;;  %2777 = vmatprep.subr.bf16.mxu1 %v2956_v0  ;;  %v2888_v2 = vld [vmem:[%s3664_s0 + $0x68] ss:$12 sps:$4 sm:$0xff]   ;;  %v2890_v4 = vld [vmem:[%s3664_s0 + $0x80] ss:$12 sps:$4 sm:$0xff]   ;;  %v2893_v6 = vld [vmem:[%s3664_s0 + $0x98] ss:$12 sps:$4 sm:$0xff]  }
  0x18   :  { %v2894_v7 = vld [vmem:[%s3664_s0 + $0x108] ss:$12 sps:$4 sm:$0xff]   ;;  %v2895_v8 = vld [vmem:[%s3664_s0 + $0xb0] ss:$12 sps:$4 sm:$0xff]  }
  0x1a   :  { %992 = vmatpush1.bf16.msra.mxu0 %v2810_v9  ;;  %2793 = vmatpush1.bf16.msra.mxu1 %v2810_v9  ;;  %v2896_v9 = vld [vmem:[%s3664_s0 + $0x124] ss:$12 sps:$4 sm:$0xff]  }
  0x1b   :  { %993 = vmatprep.subr.bf16.mxu0 %v2956_v0  ;;  %2778 = vmatprep.subr.bf16.mxu1 %v2956_v0 }
  0x1e   :  { %994 = vmatpush1.bf16.msra.mxu0 %v2811_v10  ;;  %2794 = vmatpush1.bf16.msra.mxu1 %v2811_v10  ;;  %v2898_v10 = vld [vmem:[%s3664_s0 + $0xc8] ss:$12 sps:$4 sm:$0xff]  }
  0x1f   :  { %995 = vmatprep.subr.bf16.mxu0 %v2956_v0  ;;  %2779 = vmatprep.subr.bf16.mxu1 %v2956_v0 }
  0x22   :  { %996 = vmatpush1.bf16.msra.mxu0 %v2812_v11  ;;  %2795 = vmatpush1.bf16.msra.mxu1 %v2812_v11  ;;  %v2899_v11 = vld [vmem:[%s3664_s0 + $0x120] ss:$12 sps:$4 sm:$0xff]  }
  0x23   :  { %997 = vmatprep.subr.bf16.mxu0 %v2956_v0  ;;  %2780 = vmatprep.subr.bf16.mxu1 %v2956_v0 }
  0x26   :  { %998 = vmatpush1.bf16.msra.mxu0 %v2813_v12  ;;  %2796 = vmatpush1.bf16.msra.mxu1 %v2813_v12  ;;  %v2900_v12 = vld [vmem:[%s3664_s0 + $0xe0] ss:$12 sps:$4 sm:$0xff]  }
  0x27   :  { %999 = vmatprep.subr.bf16.mxu0 %v2956_v0  ;;  %2781 = vmatprep.subr.bf16.mxu1 %v2956_v0 }
  0x2a   :  { %1000 = vmatpush1.bf16.msra.mxu0 %v2814_v13  ;;  %2797 = vmatpush1.bf16.msra.mxu1 %v2814_v13  ;;  %v2901_v13 = vld [vmem:[%s3664_s0 + $0x13c] ss:$12 sps:$4 sm:$0xff]  }
  0x2b   :  { %1001 = vmatprep.subr.bf16.mxu0 %v2956_v0  ;;  %2782 = vmatprep.subr.bf16.mxu1 %v2956_v0 }
  0x2e   :  { %1002 = vmatpush1.bf16.msra.mxu0 %v2815_v14  ;;  %2798 = vmatpush1.bf16.msra.mxu1 %v2815_v14  ;;  %v2903_v14 = vld [vmem:[%s3664_s0 + $0xf8] ss:$12 sps:$4 sm:$0xff]  }
  0x2f   :  { %1003 = vmatprep.subr.bf16.mxu0 %v2956_v0  ;;  %2783 = vmatprep.subr.bf16.mxu1 %v2956_v0 }
  0x32   :  { %1004 = vmatpush1.bf16.msra.mxu0 %v2816_v15  ;;  %2799 = vmatpush1.bf16.msra.mxu1 %v2816_v15  ;;  %v2904_v15 = vld [vmem:[%s3664_s0 + $0x138] ss:$12 sps:$4 sm:$0xff]  }
  0x33   :  { %1005 = vmatprep.subr.bf16.mxu0 %v2956_v0  ;;  %2784 = vmatprep.subr.bf16.mxu1 %v2956_v0 }
  0x36   :  { %1006 = vmatpush1.bf16.msra.mxu0 %v2817_v16  ;;  %2800 = vmatpush1.bf16.msra.mxu1 %v2817_v16  ;;  %v2905_v16 = vld [vmem:[%s3664_s0 + $0x110] ss:$12 sps:$4 sm:$0xff]  }
  0x37   :  { %1007 = vmatprep.subr.bf16.mxu0 %v2956_v0  ;;  %2785 = vmatprep.subr.bf16.mxu1 %v2956_v0 }
  0x3a   :  { %1008 = vmatpush1.bf16.msra.mxu0 %v2818_v17  ;;  %2801 = vmatpush1.bf16.msra.mxu1 %v2818_v17  ;;  %v2906_v17 = vld [vmem:[%s3664_s0 + $0x154] ss:$12 sps:$4 sm:$0xff]  }
  0x3b   :  { %1009 = vmatprep.subr.bf16.mxu0 %v2956_v0  ;;  %2786 = vmatprep.subr.bf16.mxu1 %v2956_v0  ;;  %v2885_v0 = vld [vmem:[%s3664_s0 + $0x50] ss:$12 sps:$4 sm:$0xff]  }
  0x3e   :  { %1010 = vmatpush1.bf16.msra.mxu0 %v2819_v18  ;;  %2802 = vmatpush1.bf16.msra.mxu1 %v2819_v18  ;;  %v2908_v18 = vld [vmem:[%s3664_s0 + $0x128] ss:$12 sps:$4 sm:$0xff]  }
  0x3f   :  { %2691 = vmatprep.subr.bf16.mxu1 %v2826_v19 }
  0x41   :  { %1012 = vmatmul.mubr.bf16.vlgmr.msra.gmra.mrb[0].mxu0 %v2820_v20  ;;  %1204 = vmatmul.mubr.bf16.vlgmr.msra.gmra.mrb[0].mxu1 %v2823_v21  ;;  %v2910_v20 = vld [vmem:[%s3664_s0 + $0x140] ss:$12 sps:$4 sm:$0xff]  }
  0x42   :  { %2692 = vmatpush3.bf16.msra.mxu1 %v2826_v19  ;;  %1019 = vmatprep.mubr.bf16.mxu0 %v2827_v22  ;;  %v2909_v19 = vld [vmem:[%s3664_s0 + $0x150] ss:$12 sps:$4 sm:$0xff]   ;;  %v2911_v21 = vld [vmem:[%s3664_s0 + $0x16c] ss:$12 sps:$4 sm:$0xff]  }
  0x43   :  { %1211 = vmatprep.mubr.bf16.mxu1 %v2829_v23  ;;  %2693 = vmatprep.subr.bf16.mxu1 %v2833_v24  ;;  %v2913_v22 = vld [vmem:[%s3664_s0 + $0x158] ss:$12 sps:$4 sm:$0xff]   ;;  %v2914_v23 = vld [vmem:[%s3664_s0 + $0x168] ss:$12 sps:$4 sm:$0xff]  }
  0x46   :  { %2694 = vmatpush3.bf16.msra.mxu1 %v2833_v24  ;;  %v2915_v24 = vld [vmem:[%s3664_s0 + $0x170] ss:$12 sps:$4 sm:$0xff]  }
  0x47   :  { %2695 = vmatprep.subr.bf16.mxu1 %v2840_v25 }
  0x49   :  { %1020 = vmatmul.mubr.bf16.gmra.mrb[4].mxu0 %v2831_v26  ;;  %1212 = vmatmul.mubr.bf16.gmra.mrb[4].mxu1 %v2832_v27  ;;  %v2918_v26 = vld [vmem:[%s3664_s0 + $0x188] ss:$12 sps:$4 sm:$0xff]   ;;  %v2919_v27 = vld [vmem:[%s3664_s0 + $0x180] ss:$12 sps:$4 sm:$0xff]  }
  0x4a   :  { %1027 = vmatprep.mubr.bf16.mxu0 %v2834_v28  ;;  %1219 = vmatprep.mubr.bf16.mxu1 %v2836_v29  ;;  %v2920_v28 = vld [vmem:[%s3664_s0 + $0x1a0] ss:$12 sps:$4 sm:$0xff]   ;;  %v2921_v29 = vld [vmem:[%s3664_s0 + $0x19c] ss:$12 sps:$4 sm:$0xff]  }
  0x4b   :  { %2696 = vmatpush3.bf16.msra.mxu1 %v2840_v25  ;;  %v2916_v25 = vld [vmem:[%s3664_s0 + $0x184] ss:$12 sps:$4 sm:$0xff]  }
  0x4c   :  { %2697 = vmatprep.subr.bf16.mxu1 %v2847_v30 }
  0x4f   :  { %2698 = vmatpush3.bf16.msra.mxu1 %v2847_v30  ;;  %v2923_v30 = vld [vmem:[%s3664_s0 + $0x1b8] ss:$12 sps:$4 sm:$0xff]  }
  0x50   :  { %2699 = vmatprep.subr.bf16.mxu1 %v2854_v32 }
  0x51   :  { %1028 = vmatmul.mubr.bf16.gmra.mrb[8].mxu0 %v2838_v31  ;;  %1220 = vmatmul.mubr.bf16.gmra.mrb[8].mxu1 %v2839_v33  ;;  %v2924_v31 = vld [vmem:[%s3664_s0 + $0x198] ss:$12 sps:$4 sm:$0xff]   ;;  %v2926_v33 = vld [vmem:[%s3664_s0 + $0x1b4] ss:$12 sps:$4 sm:$0xff]  }
  0x52   :  { %1035 = vmatprep.mubr.bf16.mxu0 %v2841_v34  ;;  %1227 = vmatprep.mubr.bf16.mxu1 %v2843_v35  ;;  %v2928_v34 = vld [vmem:[%s3664_s0 + $0x1e8] ss:$12 sps:$4 sm:$0xff]   ;;  %v2929_v35 = vld [vmem:[%s3664_s0 + $0x1b0] ss:$12 sps:$4 sm:$0xff]  }
  0x53   :  { %2700 = vmatpush3.bf16.msra.mxu1 %v2854_v32  ;;  %v2925_v32 = vld [vmem:[%s3664_s0 + $0x1d0] ss:$12 sps:$4 sm:$0xff]  }
  0x54   :  { %2701 = vmatprep.subr.bf16.mxu1 %v2861_v36 }
  0x57   :  { %2702 = vmatpush3.bf16.msra.mxu1 %v2861_v36  ;;  %v2930_v36 = vld [vmem:[%s3664_s0 + $0x200] ss:$12 sps:$4 sm:$0xff]  }
  0x58   :  { %2703 = vmatprep.subr.bf16.mxu1 %v2868_v41 }
  0x59   :  { %1036 = vmatmul.mubr.bf16.gmra.mrb[12].mxu0 %v2845_v37  ;;  %1228 = vmatmul.mubr.bf16.gmra.mrb[12].mxu1 %v2846_v38  ;;  %v2931_v37 = vld [vmem:[%s3664_s0 + $0x1cc] ss:$12 sps:$4 sm:$0xff]  }
  0x5a   :  { %1043 = vmatprep.mubr.bf16.mxu0 %v2848_v39  ;;  %1235 = vmatprep.mubr.bf16.mxu1 %v2850_v40  ;;  %v2933_v38 = vld [vmem:[%s3664_s0 + $0x218] ss:$12 sps:$4 sm:$0xff]   ;;  %v2934_v39 = vld [vmem:[%s3664_s0 + $0x1c8] ss:$12 sps:$4 sm:$0xff]   ;;  %v2935_v40 = vld [vmem:[%s3664_s0 + $0x230] ss:$12 sps:$4 sm:$0xff]  }
  0x5b   :  { %2704 = vmatpush3.bf16.msra.mxu1 %v2868_v41  ;;  %v2936_v41 = vld [vmem:[%s3664_s0 + $0x1e4] ss:$12 sps:$4 sm:$0xff]  }
  0x5c   :  { %2705 = vmatprep.subr.bf16.mxu1 %v2875_v42 }
  0x5f   :  { %2706 = vmatpush3.bf16.msra.mxu1 %v2875_v42  ;;  %v2938_v42 = vld [vmem:[%s3664_s0 + $0x248] ss:$12 sps:$4 sm:$0xff]  }
  0x61   :  { %1044 = vmatmul.mubr.bf16.gmra.mrb[16].mxu0 %v2852_v43  ;;  %1236 = vmatmul.mubr.bf16.gmra.mrb[16].mxu1 %v2853_v44  ;;  %v2939_v43 = vld [vmem:[%s3664_s0 + $0x1e0] ss:$12 sps:$4 sm:$0xff]  }
  0x62   :  { %1051 = vmatprep.mubr.bf16.mxu0 %v2855_v45  ;;  %1243 = vmatprep.mubr.bf16.mxu1 %v2857_v46  ;;  %v2940_v44 = vld [vmem:[%s3664_s0 + $0x260] ss:$12 sps:$4 sm:$0xff]   ;;  %v2941_v45 = vld [vmem:[%s3664_s0 + $0x1fc] ss:$12 sps:$4 sm:$0xff]   ;;  %v2943_v46 = vld [vmem:[%s3664_s0 + $0x278] ss:$12 sps:$4 sm:$0xff]  }
  0x69   :  { %1052 = vmatmul.mubr.bf16.gmra.mrb[20].mxu0 %v2859_v47  ;;  %1244 = vmatmul.mubr.bf16.gmra.mrb[20].mxu1 %v2860_v48  ;;  %v2944_v47 = vld [vmem:[%s3664_s0 + $0x1f8] ss:$12 sps:$4 sm:$0xff]   ;;  %v2945_v48 = vld [vmem:[%s3664_s0 + $0x290] ss:$12 sps:$4 sm:$0xff]  }
  0x6a   :  { %1059 = vmatprep.mubr.bf16.mxu0 %v2862_v49  ;;  %1251 = vmatprep.mubr.bf16.mxu1 %v2864_v50  ;;  %v2946_v49 = vld [vmem:[%s3664_s0 + $0x214] ss:$12 sps:$4 sm:$0xff]  }
  0x6b   :  { %v2948_v50 = vld [vmem:[%s3664_s0 + $0x2a8] ss:$12 sps:$4 sm:$0xff]  }
  0x71   :  { %1060 = vmatmul.mubr.bf16.gmra.mrb[24].mxu0 %v2866_v51  ;;  %1252 = vmatmul.mubr.bf16.gmra.mrb[24].mxu1 %v2867_v52  ;;  %v2949_v51 = vld [vmem:[%s3664_s0 + $0x210] ss:$12 sps:$4 sm:$0xff]   ;;  %v2950_v52 = vld [vmem:[%s3664_s0 + $0x2c0] ss:$12 sps:$4 sm:$0xff]  }
  0x72   :  { %1067 = vmatprep.mubr.bf16.mxu0 %v2869_v53  ;;  %1259 = vmatprep.mubr.bf16.mxu1 %v2871_v54  ;;  %v2951_v53 = vld [vmem:[%s3664_s0 + $0x22c] ss:$12 sps:$4 sm:$0xff]  }
  0x73   :  { %v2953_v54 = vld [vmem:[%s3664_s0 + $0x2d8] ss:$12 sps:$4 sm:$0xff]  }
  0x79   :  { %1068 = vmatmul.mubr.bf16.gmra.mrb[28].mxu0 %v2873_v55  ;;  %1260 = vmatmul.mubr.bf16.gmra.mrb[28].mxu1 %v2874_v56  ;;  %v2954_v55 = vld [vmem:[%s3664_s0 + $0x228] ss:$12 sps:$4 sm:$0xff]   ;;  %v2955_v56 = vld [vmem:[%s3664_s0 + $0x2f0] ss:$12 sps:$4 sm:$0xff]  }
  0x7a   :  { %1075 = vmatprep.mubr.bf16.mxu0 %v2876_v57  ;;  %2707 = vmatprep.mubr.bf16.mxu1 %v2878_v58 }
  0x81   :  { %1076 = vmatmul.mubr.bf16.gmra.mrb[32].mxu0 %v2879_v59  ;;  %2708 = vmatmul.mubr.bf16.vlgmr.msra.gmra.mrb[32].mxu1 %v2880_v60 }
  0x82   :  { %1083 = vmatprep.mubr.bf16.mxu0 %v2881_v61  ;;  %2711 = vmatprep.mubr.bf16.mxu1 %v2883_v62 }
  0x89   :  { %1084 = vmatmul.mubr.bf16.gmra.mrb[36].mxu0 %v2884_v63  ;;  %2712 = vmatmul.mubr.bf16.gmra.mrb[36].mxu1 %v2885_v0 }
  0x8a   :  { %1091 = vmatprep.mubr.bf16.mxu0 %v2886_v1  ;;  %2715 = vmatprep.mubr.bf16.mxu1 %v2888_v2 }
  0x91   :  { %1092 = vmatmul.mubr.bf16.gmra.mrb[40].mxu0 %v2889_v3  ;;  %2716 = vmatmul.mubr.bf16.gmra.mrb[40].mxu1 %v2890_v4 }
  0x92   :  { %1099 = vmatprep.mubr.bf16.mxu0 %v2891_v5  ;;  %2719 = vmatprep.mubr.bf16.mxu1 %v2893_v6 }
  0x99   :  { %1100 = vmatmul.mubr.bf16.gmra.mrb[44].mxu0 %v2894_v7  ;;  %2720 = vmatmul.mubr.bf16.gmra.mrb[44].mxu1 %v2895_v8 }
  0x9a   :  { %1107 = vmatprep.mubr.bf16.mxu0 %v2896_v9  ;;  %2723 = vmatprep.mubr.bf16.mxu1 %v2898_v10 }
  0xa1   :  { %1108 = vmatmul.mubr.bf16.gmra.mrb[48].mxu0 %v2899_v11  ;;  %2724 = vmatmul.mubr.bf16.gmra.mrb[48].mxu1 %v2900_v12 }
  0xa2   :  { %1115 = vmatprep.mubr.bf16.mxu0 %v2901_v13  ;;  %2727 = vmatprep.mubr.bf16.mxu1 %v2903_v14 }
  0xa9   :  { %1116 = vmatmul.mubr.bf16.gmra.mrb[52].mxu0 %v2904_v15  ;;  %2728 = vmatmul.mubr.bf16.gmra.mrb[52].mxu1 %v2905_v16 }
  0xaa   :  { %1123 = vmatprep.mubr.bf16.mxu0 %v2906_v17  ;;  %2731 = vmatprep.mubr.bf16.mxu1 %v2908_v18 }
  0xb1   :  { %1124 = vmatmul.mubr.bf16.gmra.mrb[56].mxu0 %v2909_v19  ;;  %2732 = vmatmul.mubr.bf16.gmra.mrb[56].mxu1 %v2910_v20 }
  0xb2   :  { %1131 = vmatprep.mubr.bf16.mxu0 %v2911_v21  ;;  %2735 = vmatprep.mubr.bf16.mxu1 %v2913_v22 }
  0xb9   :  { %1132 = vmatmul.mubr.bf16.gmra.mrb[60].mxu0 %v2914_v23  ;;  %2736 = vmatmul.mubr.bf16.gmra.mrb[60].mxu1 %v2915_v24 }
  0xba   :  { %1139 = vmatprep.mubr.bf16.mxu0 %v2916_v25  ;;  %2739 = vmatprep.mubr.bf16.mxu1 %v2918_v26 }
  0xc1   :  { %1140 = vmatmul.mubr.bf16.gmra.mrb[64].mxu0 %v2919_v27  ;;  %2740 = vmatmul.mubr.bf16.gmra.mrb[64].mxu1 %v2920_v28 }
  0xc2   :  { %1147 = vmatprep.mubr.bf16.mxu0 %v2921_v29  ;;  %2743 = vmatprep.mubr.bf16.mxu1 %v2923_v30 }
  0xc9   :  { %1148 = vmatmul.mubr.bf16.gmra.mrb[68].mxu0 %v2924_v31  ;;  %2744 = vmatmul.mubr.bf16.gmra.mrb[68].mxu1 %v2925_v32 }
  0xca   :  { %1155 = vmatprep.mubr.bf16.mxu0 %v2926_v33  ;;  %2747 = vmatprep.mubr.bf16.mxu1 %v2928_v34 }
  0xd1   :  { %1156 = vmatmul.mubr.bf16.gmra.mrb[72].mxu0 %v2929_v35  ;;  %2748 = vmatmul.mubr.bf16.gmra.mrb[72].mxu1 %v2930_v36 }
  0xd2   :  { %1163 = vmatprep.mubr.bf16.mxu0 %v2931_v37  ;;  %2751 = vmatprep.mubr.bf16.mxu1 %v2933_v38 }
  0xd9   :  { %1164 = vmatmul.mubr.bf16.gmra.mrb[76].mxu0 %v2934_v39  ;;  %2752 = vmatmul.mubr.bf16.gmra.mrb[76].mxu1 %v2935_v40 }
  0xda   :  { %1171 = vmatprep.mubr.bf16.mxu0 %v2936_v41  ;;  %2755 = vmatprep.mubr.bf16.mxu1 %v2938_v42 }
  0xe1   :  { %1172 = vmatmul.mubr.bf16.gmra.mrb[80].mxu0 %v2939_v43  ;;  %2756 = vmatmul.mubr.bf16.gmra.mrb[80].mxu1 %v2940_v44 }
  0xe2   :  { %1179 = vmatprep.mubr.bf16.mxu0 %v2941_v45  ;;  %2759 = vmatprep.mubr.bf16.mxu1 %v2943_v46 }
  0xe9   :  { %1180 = vmatmul.mubr.bf16.gmra.mrb[84].mxu0 %v2944_v47  ;;  %2760 = vmatmul.mubr.bf16.gmra.mrb[84].mxu1 %v2945_v48 }
  0xea   :  { %1187 = vmatprep.mubr.bf16.mxu0 %v2946_v49  ;;  %2763 = vmatprep.mubr.bf16.mxu1 %v2948_v50 }
  0xf1   :  { %1188 = vmatmul.mubr.bf16.gmra.mrb[88].mxu0 %v2949_v51  ;;  %2764 = vmatmul.mubr.bf16.gmra.mrb[88].mxu1 %v2950_v52 }
  0xf2   :  { %1195 = vmatprep.mubr.bf16.mxu0 %v2951_v53  ;;  %2767 = vmatprep.mubr.bf16.mxu1 %v2953_v54 }
  0xf9   :  { %1196 = vmatmul.mubr.bf16.gmra.mrb[92].mxu0 %v2954_v55  ;;  %2768 = vmatmul.mubr.bf16.gmra.mrb[92].mxu1 %v2955_v56 }
 0x114   :  { %v3369_v57 = vpop.f32.mrb[0].mxu0  ;;  %v3371_v58 = vpop.f32.mrb[0].mxu1 }
 0x115   :  { %v1015_v59 = vpop.f32.mrb[1].mxu0  ;;  %v1207_v60 = vpop.f32.mrb[1].mxu1 }
 0x116   :  { %v3373_v61 = vpop.f32.mrb[2].mxu0  ;;  %v3375_v62 = vpop.f32.mrb[2].mxu1 }
 0x117   :  { %v1018_v63 = vpop.f32.mrb[3].mxu0  ;;  %v1210_v0 = vpop.f32.mrb[3].mxu1 }
 0x118   :  { %v3436_v63 = vld [vmem:[%s3665_s2] ss:$0 sm:$0xff] }
 0x11c   :  { %v1021_v1 = vpop.f32.mrb[4].mxu0  ;;  %v3377_v2 = vpop.f32.mrb[4].mxu1 }
 0x11d   :  { %v1023_v3 = vpop.f32.mrb[5].mxu0  ;;  %v1215_v4 = vpop.f32.mrb[5].mxu1 }
 0x11e   :  { %v3379_v5 = vpop.f32.mrb[6].mxu0  ;;  %v3381_v6 = vpop.f32.mrb[6].mxu1 }
 0x11f   :  { %v1026_v7 = vpop.f32.mrb[7].mxu0  ;;  %v1218_v8 = vpop.f32.mrb[7].mxu1 }
 0x124   :  { %v3383_v9 = vpop.f32.mrb[8].mxu0  ;;  %v3385_v10 = vpop.f32.mrb[8].mxu1 }
 0x125   :  { %v1031_v11 = vpop.f32.mrb[9].mxu0  ;;  %v1223_v12 = vpop.f32.mrb[9].mxu1 }
 0x126   :  { %v3387_v13 = vpop.f32.mrb[10].mxu0  ;;  %v3389_v14 = vpop.f32.mrb[10].mxu1 }
 0x127   :  { %v1034_v15 = vpop.f32.mrb[11].mxu0  ;;  %v1226_v16 = vpop.f32.mrb[11].mxu1 }
 0x12c   :  { %v3391_v17 = vpop.f32.mrb[12].mxu0  ;;  %v3393_v18 = vpop.f32.mrb[12].mxu1 }
 0x12d   :  { %v1039_v19 = vpop.f32.mrb[13].mxu0  ;;  %v1231_v20 = vpop.f32.mrb[13].mxu1 }
 0x12e   :  { %v3395_v21 = vpop.f32.mrb[14].mxu0  ;;  %v3397_v22 = vpop.f32.mrb[14].mxu1 }
 0x12f   :  { %v1042_v23 = vpop.f32.mrb[15].mxu0  ;;  %v1234_v24 = vpop.f32.mrb[15].mxu1 }
 0x134   :  { %v3399_v25 = vpop.f32.mrb[16].mxu0  ;;  %v3401_v26 = vpop.f32.mrb[16].mxu1 }
 0x135   :  { %v1047_v27 = vpop.f32.mrb[17].mxu0  ;;  %v1239_v28 = vpop.f32.mrb[17].mxu1 }
 0x136   :  { %v3403_v29 = vpop.f32.mrb[18].mxu0  ;;  %v3405_v30 = vpop.f32.mrb[18].mxu1 }
 0x137   :  { %v1050_v31 = vpop.f32.mrb[19].mxu0  ;;  %v1242_v32 = vpop.f32.mrb[19].mxu1 }
 0x13c   :  { %v3407_v33 = vpop.f32.mrb[20].mxu0  ;;  %v3409_v34 = vpop.f32.mrb[20].mxu1 }
 0x13d   :  { %v1055_v35 = vpop.f32.mrb[21].mxu0  ;;  %v1247_v36 = vpop.f32.mrb[21].mxu1 }
 0x13e   :  { %v3411_v37 = vpop.f32.mrb[22].mxu0  ;;  %v3413_v38 = vpop.f32.mrb[22].mxu1 }
 0x13f   :  { %v1058_v39 = vpop.f32.mrb[23].mxu0  ;;  %v1250_v40 = vpop.f32.mrb[23].mxu1 }
 0x144   :  { %v3415_v41 = vpop.f32.mrb[24].mxu0  ;;  %v3417_v42 = vpop.f32.mrb[24].mxu1 }
 0x145   :  { %v1063_v43 = vpop.f32.mrb[25].mxu0  ;;  %v1255_v44 = vpop.f32.mrb[25].mxu1 }
 0x146   :  { %v3419_v45 = vpop.f32.mrb[26].mxu0  ;;  %v3421_v46 = vpop.f32.mrb[26].mxu1 }
 0x147   :  { %v1066_v47 = vpop.f32.mrb[27].mxu0  ;;  %v1258_v48 = vpop.f32.mrb[27].mxu1 }
 0x14c   :  { %v3423_v49 = vpop.f32.mrb[28].mxu0  ;;  %v3425_v50 = vpop.f32.mrb[28].mxu1 }
 0x14d   :  { %v1071_v51 = vpop.f32.mrb[29].mxu0  ;;  %v1263_v52 = vpop.f32.mrb[29].mxu1 }
 0x14e   :  { %v3427_v53 = vpop.f32.mrb[30].mxu0  ;;  %v3429_v54 = vpop.f32.mrb[30].mxu1 }
 0x14f   :  { %v1074_v55 = vpop.f32.mrb[31].mxu0  ;;  %v1266_v56 = vpop.f32.mrb[31].mxu1 }
 0x154   :  { %v3431_v59 = vpop.f32.mrb[32].mxu0  ;;  %v2709_v60 = vpop.f32.mrb[32].mxu1 }
 0x155   :  { %v1311_v0 = vadd.f32 %v2709_v60, %v1021_v1  ;;  %v1079_v3 = vpop.f32.mrb[33].mxu0  ;;  %v1302_v4 = vpop.f32.mrb[33].mxu1 }
 0x156   :  { %v1303_v7 = vadd.f32 %v1302_v4, %v3369_v57  ;;  %v3439_v8 = vpop.f32.mrb[34].mxu0  ;;  %v2710_v11 = vpop.f32.mrb[34].mxu1 }
 0x157   :  { %v1761_v12 = vadd.f32 %v3436_v63, %v1311_v0  ;;  %v1314_v15 = vadd.f32 %v2710_v11, %v3379_v5  ;;  %v1082_v16 = vpop.f32.mrb[35].mxu0  ;;  %v1305_v19 = vpop.f32.mrb[35].mxu1 }
 0x158   :  { %v1759_v20 = vadd.f32 %v3436_v63, %v1303_v7  ;;  %v1306_v23 = vadd.f32 %v1305_v19, %v3373_v61 }
 0x159   :  { %v1762_v24 = vadd.f32 %v3436_v63, %v1314_v15  ;;  %v1825_v27 = vmax.f32 %v1761_v12, 0.0 }
 0x15a   :  { %v1760_v1 = vadd.f32 %v3436_v63, %v1306_v23  ;;  %v1823_v57 = vmax.f32 %v1759_v20, 0.0 }
 0x15b   :  { %v1826_v28 = vmax.f32 %v1762_v24, 0.0 }
 0x15c   :  { %v1824_v31 = vmax.f32 %v1760_v1, 0.0  ;;  %v3447_v32 = vpop.f32.mrb[36].mxu0  ;;  %v2713_v35 = vpop.f32.mrb[36].mxu1 }
 0x15d   :  { %v2468_v36 = vpack.c.bf16 %v1826_v28, %v1825_v27  ;;  %v1327_v5 = vadd.f32 %v2713_v35, %v3391_v17  ;;  %v1087_v39 = vpop.f32.mrb[37].mxu0  ;;  %v1318_v40 = vpop.f32.mrb[37].mxu1 }
 0x15e   :  { %v2463_v43 = vpack.c.bf16 %v1824_v31, %v1823_v57  ;;  %v1319_v44 = vadd.f32 %v1318_v40, %v3383_v9  ;;  %v3451_v61 = vpop.f32.mrb[38].mxu0  ;;  %v2714_v47 = vpop.f32.mrb[38].mxu1 }
 0x15f   :  { %2620 = vst [vmem:[%s3666_s3 + $0x8] sm:$0xff] %v2468_v36   ;;  %v1765_v48 = vadd.f32 %v3436_v63, %v1327_v5  ;;  %v1330_v51 = vadd.f32 %v2714_v47, %v3395_v21  ;;  %v1090_v52 = vpop.f32.mrb[39].mxu0  ;;  %v1321_v55 = vpop.f32.mrb[39].mxu1 }
 0x160   :  { %2464 = vst [vmem:[%s3666_s3] sm:$0xff] %v2463_v43   ;;  %v1763_v17 = vadd.f32 %v3436_v63, %v1319_v44  ;;  %v1322_v9 = vadd.f32 %v1321_v55, %v3387_v13 }
 0x161   :  { %v1766_v56 = vadd.f32 %v3436_v63, %v1330_v51  ;;  %v1829_v0 = vmax.f32 %v1765_v48, 0.0 }
 0x162   :  { %v1764_v60 = vadd.f32 %v3436_v63, %v1322_v9  ;;  %v1827_v4 = vmax.f32 %v1763_v17, 0.0 }
 0x163   :  { %v1830_v3 = vmax.f32 %v1766_v56, 0.0 }
 0x164   :  { %v1828_v7 = vmax.f32 %v1764_v60, 0.0  ;;  %v3465_v11 = vpop.f32.mrb[40].mxu0  ;;  %v2717_v21 = vpop.f32.mrb[40].mxu1 }
 0x165   :  { %v2478_v12 = vpack.c.bf16 %v1830_v3, %v1829_v0  ;;  %v1343_v15 = vadd.f32 %v2717_v21, %v3407_v33  ;;  %v1095_v16 = vpop.f32.mrb[41].mxu0  ;;  %v1334_v19 = vpop.f32.mrb[41].mxu1 }
 0x166   :  { %v2473_v20 = vpack.c.bf16 %v1828_v7, %v1827_v4  ;;  %v1335_v23 = vadd.f32 %v1334_v19, %v3399_v25  ;;  %v3469_v13 = vpop.f32.mrb[42].mxu0  ;;  %v2718_v24 = vpop.f32.mrb[42].mxu1 }
 0x167   :  { %2622 = vst [vmem:[%s3666_s3 + $0x18] sm:$0xff] %v2478_v12   ;;  %v1769_v1 = vadd.f32 %v3436_v63, %v1343_v15  ;;  %v1346_v27 = vadd.f32 %v2718_v24, %v3411_v37  ;;  %v1098_v28 = vpop.f32.mrb[43].mxu0  ;;  %v1337_v57 = vpop.f32.mrb[43].mxu1 }
 0x168   :  { %2621 = vst [vmem:[%s3666_s3 + $0x10] sm:$0xff] %v2473_v20   ;;  %v1767_v33 = vadd.f32 %v3436_v63, %v1335_v23  ;;  %v1338_v25 = vadd.f32 %v1337_v57, %v3403_v29 }
 0x169   :  { %v1770_v31 = vadd.f32 %v3436_v63, %v1346_v27  ;;  %v1833_v36 = vmax.f32 %v1769_v1, 0.0 }
 0x16a   :  { %v1768_v35 = vadd.f32 %v3436_v63, %v1338_v25  ;;  %v1831_v39 = vmax.f32 %v1767_v33, 0.0 }
 0x16b   :  { %v1834_v5 = vmax.f32 %v1770_v31, 0.0 }
 0x16c   :  { %v1832_v40 = vmax.f32 %v1768_v35, 0.0  ;;  %v1101_v43 = vpop.f32.mrb[44].mxu0  ;;  %v2721_v37 = vpop.f32.mrb[44].mxu1 }
 0x16d   :  { %v2488_v44 = vpack.c.bf16 %v1834_v5, %v1833_v36  ;;  %v1359_v47 = vadd.f32 %v2721_v37, %v3423_v49  ;;  %v1103_v48 = vpop.f32.mrb[45].mxu0  ;;  %v1350_v51 = vpop.f32.mrb[45].mxu1 }
 0x16e   :  { %v2483_v52 = vpack.c.bf16 %v1832_v40, %v1831_v39  ;;  %v1351_v55 = vadd.f32 %v1350_v51, %v3415_v41  ;;  %v1104_v17 = vpop.f32.mrb[46].mxu0  ;;  %v2722_v29 = vpop.f32.mrb[46].mxu1 }
 0x16f   :  { %2624 = vst [vmem:[%s3666_s3 + $0x28] sm:$0xff] %v2488_v44   ;;  %v1773_v9 = vadd.f32 %v3436_v63, %v1359_v47  ;;  %v1362_v56 = vadd.f32 %v2722_v29, %v3427_v53  ;;  %v1106_v60 = vpop.f32.mrb[47].mxu0  ;;  %v1353_v0 = vpop.f32.mrb[47].mxu1 }
 0x170   :  { %2623 = vst [vmem:[%s3666_s3 + $0x20] sm:$0xff] %v2483_v52   ;;  %v1771_v49 = vadd.f32 %v3436_v63, %v1351_v55  ;;  %v1354_v41 = vadd.f32 %v1353_v0, %v3419_v45 }
 0x171   :  { %v1774_v3 = vadd.f32 %v3436_v63, %v1362_v56  ;;  %v1837_v7 = vmax.f32 %v1773_v9, 0.0 }
 0x172   :  { %v1772_v4 = vadd.f32 %v3436_v63, %v1354_v41  ;;  %v1835_v12 = vmax.f32 %v1771_v49, 0.0 }
 0x173   :  { %v1838_v21 = vmax.f32 %v1774_v3, 0.0 }
 0x174   :  { %v1836_v15 = vmax.f32 %v1772_v4, 0.0  ;;  %v1109_v16 = vpop.f32.mrb[48].mxu0  ;;  %v2725_v53 = vpop.f32.mrb[48].mxu1 }
 0x175   :  { %v2498_v19 = vpack.c.bf16 %v1838_v21, %v1837_v7  ;;  %v1375_v20 = vadd.f32 %v2725_v53, %v3447_v32  ;;  %v1111_v23 = vpop.f32.mrb[49].mxu0  ;;  %v1366_v24 = vpop.f32.mrb[49].mxu1 }
 0x176   :  { %v2493_v1 = vpack.c.bf16 %v1836_v15, %v1835_v12  ;;  %v1367_v27 = vadd.f32 %v1366_v24, %v3431_v59  ;;  %v1112_v28 = vpop.f32.mrb[50].mxu0  ;;  %v2726_v45 = vpop.f32.mrb[50].mxu1 }
 0x177   :  { %2626 = vst [vmem:[%s3666_s3 + $0x38] sm:$0xff] %v2498_v19   ;;  %v1777_v57 = vadd.f32 %v3436_v63, %v1375_v20  ;;  %v1378_v33 = vadd.f32 %v2726_v45, %v3451_v61  ;;  %v1114_v25 = vpop.f32.mrb[51].mxu0  ;;  %v1369_v31 = vpop.f32.mrb[51].mxu1 }
 0x178   :  { %2625 = vst [vmem:[%s3666_s3 + $0x30] sm:$0xff] %v2493_v1   ;;  %v1775_v32 = vadd.f32 %v3436_v63, %v1367_v27  ;;  %v1370_v59 = vadd.f32 %v1369_v31, %v3439_v8 }
 0x179   :  { %v1778_v35 = vadd.f32 %v3436_v63, %v1378_v33  ;;  %v1841_v5 = vmax.f32 %v1777_v57, 0.0 }
 0x17a   :  { %v1776_v36 = vadd.f32 %v3436_v63, %v1370_v59  ;;  %v1839_v40 = vmax.f32 %v1775_v32, 0.0 }
 0x17b   :  { %v1842_v39 = vmax.f32 %v1778_v35, 0.0 }
 0x17c   :  { %v1840_v37 = vmax.f32 %v1776_v36, 0.0  ;;  %v1117_v44 = vpop.f32.mrb[52].mxu0  ;;  %v2729_v61 = vpop.f32.mrb[52].mxu1 }
 0x17d   :  { %v2508_v47 = vpack.c.bf16 %v1842_v39, %v1841_v5  ;;  %v1391_v48 = vadd.f32 %v2729_v61, %v1101_v43  ;;  %v1119_v51 = vpop.f32.mrb[53].mxu0  ;;  %v1382_v52 = vpop.f32.mrb[53].mxu1 }
 0x17e   :  { %v2503_v55 = vpack.c.bf16 %v1840_v37, %v1839_v40  ;;  %v1383_v29 = vadd.f32 %v1382_v52, %v3465_v11  ;;  %v1120_v9 = vpop.f32.mrb[54].mxu0  ;;  %v2730_v56 = vpop.f32.mrb[54].mxu1 }
 0x17f   :  { %2628 = vst [vmem:[%s3666_s3 + $0x48] sm:$0xff] %v2508_v47   ;;  %v1781_v8 = vadd.f32 %v3436_v63, %v1391_v48  ;;  %v1394_v60 = vadd.f32 %v2730_v56, %v1104_v17  ;;  %v1122_v0 = vpop.f32.mrb[55].mxu0  ;;  %v1385_v49 = vpop.f32.mrb[55].mxu1 }
 0x180   :  { %2627 = vst [vmem:[%s3666_s3 + $0x40] sm:$0xff] %v2503_v55   ;;  %v1779_v43 = vadd.f32 %v3436_v63, %v1383_v29  ;;  %v1386_v41 = vadd.f32 %v1385_v49, %v3469_v13 }
 0x181   :  { %v1782_v11 = vadd.f32 %v3436_v63, %v1394_v60  ;;  %v1845_v4 = vmax.f32 %v1781_v8, 0.0 }
 0x182   :  { %v1780_v3 = vadd.f32 %v3436_v63, %v1386_v41  ;;  %v1843_v21 = vmax.f32 %v1779_v43, 0.0 }
 0x183   :  { %v1846_v7 = vmax.f32 %v1782_v11, 0.0 }
 0x184   :  { %v1844_v12 = vmax.f32 %v1780_v3, 0.0  ;;  %v1125_v15 = vpop.f32.mrb[56].mxu0  ;;  %v2733_v17 = vpop.f32.mrb[56].mxu1 }
 0x185   :  { %v2518_v53 = vpack.c.bf16 %v1846_v7, %v1845_v4  ;;  %v1407_v19 = vadd.f32 %v2733_v17, %v1117_v44  ;;  %v1127_v20 = vpop.f32.mrb[57].mxu0  ;;  %v1398_v23 = vpop.f32.mrb[57].mxu1 }
 0x186   :  { %v2513_v24 = vpack.c.bf16 %v1844_v12, %v1843_v21  ;;  %v1399_v1 = vadd.f32 %v1398_v23, %v1109_v16  ;;  %v1128_v27 = vpop.f32.mrb[58].mxu0  ;;  %v2734_v45 = vpop.f32.mrb[58].mxu1 }
 0x187   :  { %2630 = vst [vmem:[%s3666_s3 + $0x58] sm:$0xff] %v2518_v53   ;;  %v1785_v13 = vadd.f32 %v3436_v63, %v1407_v19  ;;  %v1410_v57 = vadd.f32 %v2734_v45, %v1120_v9  ;;  %v1130_v33 = vpop.f32.mrb[59].mxu0  ;;  %v1401_v25 = vpop.f32.mrb[59].mxu1 }
 0x188   :  { %2629 = vst [vmem:[%s3666_s3 + $0x50] sm:$0xff] %v2513_v24   ;;  %v1783_v31 = vadd.f32 %v3436_v63, %v1399_v1  ;;  %v1402_v32 = vadd.f32 %v1401_v25, %v1112_v28 }
 0x189   :  { %v1786_v16 = vadd.f32 %v3436_v63, %v1410_v57  ;;  %v1849_v35 = vmax.f32 %v1785_v13, 0.0 }
 0x18a   :  { %v1784_v59 = vadd.f32 %v3436_v63, %v1402_v32  ;;  %v1847_v5 = vmax.f32 %v1783_v31, 0.0 }
 0x18b   :  { %v1850_v36 = vmax.f32 %v1786_v16, 0.0 }
 0x18c   :  { %v1848_v39 = vmax.f32 %v1784_v59, 0.0  ;;  %v1133_v40 = vpop.f32.mrb[60].mxu0  ;;  %v2737_v37 = vpop.f32.mrb[60].mxu1 }
 0x18d   :  { %v2528_v44 = vpack.c.bf16 %v1850_v36, %v1849_v35  ;;  %v1423_v61 = vadd.f32 %v2737_v37, %v1133_v40  ;;  %v1135_v47 = vpop.f32.mrb[61].mxu0  ;;  %v1414_v48 = vpop.f32.mrb[61].mxu1 }
 0x18e   :  { %v2523_v51 = vpack.c.bf16 %v1848_v39, %v1847_v5  ;;  %v1415_v52 = vadd.f32 %v1414_v48, %v1125_v15  ;;  %v1136_v55 = vpop.f32.mrb[62].mxu0  ;;  %v2738_v29 = vpop.f32.mrb[62].mxu1 }
 0x18f   :  { %2632 = vst [vmem:[%s3666_s3 + $0x68] sm:$0xff] %v2528_v44   ;;  %v1789_v28 = vadd.f32 %v3436_v63, %v1423_v61  ;;  %v1426_v9 = vadd.f32 %v2738_v29, %v1136_v55  ;;  %v1138_v56 = vpop.f32.mrb[63].mxu0  ;;  %v1417_v8 = vpop.f32.mrb[63].mxu1 }
 0x190   :  { %2631 = vst [vmem:[%s3666_s3 + $0x60] sm:$0xff] %v2523_v51   ;;  %v1787_v60 = vadd.f32 %v3436_v63, %v1415_v52  ;;  %v1418_v0 = vadd.f32 %v1417_v8, %v1128_v27 }
 0x191   :  { %v1790_v49 = vadd.f32 %v3436_v63, %v1426_v9  ;;  %v1853_v41 = vmax.f32 %v1789_v28, 0.0 }
 0x192   :  { %v1788_v43 = vadd.f32 %v3436_v63, %v1418_v0  ;;  %v1851_v3 = vmax.f32 %v1787_v60, 0.0 }
 0x193   :  { %v1854_v11 = vmax.f32 %v1790_v49, 0.0 }
 0x194   :  { %v1852_v4 = vmax.f32 %v1788_v43, 0.0  ;;  %v1141_v7 = vpop.f32.mrb[64].mxu0  ;;  %v2741_v21 = vpop.f32.mrb[64].mxu1 }
 0x195   :  { %v2538_v12 = vpack.c.bf16 %v1854_v11, %v1853_v41  ;;  %v1143_v15 = vpop.f32.mrb[65].mxu0  ;;  %v1430_v17 = vpop.f32.mrb[65].mxu1 }
 0x196   :  { %v2533_v53 = vpack.c.bf16 %v1852_v4, %v1851_v3  ;;  %v1431_v19 = vadd.f32 %v1430_v17, %v1141_v7  ;;  %v1144_v20 = vpop.f32.mrb[66].mxu0  ;;  %v2742_v23 = vpop.f32.mrb[66].mxu1 }
 0x197   :  { %2634 = vst [vmem:[%s3666_s3 + $0x78] sm:$0xff] %v2538_v12   ;;  %v1146_v24 = vpop.f32.mrb[67].mxu0  ;;  %v1433_v1 = vpop.f32.mrb[67].mxu1 }
 0x198   :  { %2633 = vst [vmem:[%s3666_s3 + $0x70] sm:$0xff] %v2533_v53   ;;  %v1791_v27 = vadd.f32 %v3436_v63, %v1431_v19  ;;  %v1434_v45 = vadd.f32 %v1433_v1, %v1144_v20 }
 0x19a   :  { %v1792_v13 = vadd.f32 %v3436_v63, %v1434_v45  ;;  %v1855_v57 = vmax.f32 %v1791_v27, 0.0 }
 0x19c   :  { %v1856_v33 = vmax.f32 %v1792_v13, 0.0  ;;  %v1149_v25 = vpop.f32.mrb[68].mxu0  ;;  %v2745_v31 = vpop.f32.mrb[68].mxu1 }
 0x19d   :  { %v1439_v32 = vadd.f32 %v2741_v21, %v1149_v25  ;;  %v1151_v16 = vpop.f32.mrb[69].mxu0  ;;  %v1446_v59 = vpop.f32.mrb[69].mxu1 }
 0x19e   :  { %v2543_v35 = vpack.c.bf16 %v1856_v33, %v1855_v57  ;;  %v1152_v36 = vpop.f32.mrb[70].mxu0  ;;  %v2746_v5 = vpop.f32.mrb[70].mxu1 }
 0x19f   :  { %v1793_v39 = vadd.f32 %v3436_v63, %v1439_v32  ;;  %v1442_v40 = vadd.f32 %v2742_v23, %v1152_v36  ;;  %v1154_v37 = vpop.f32.mrb[71].mxu0  ;;  %v1449_v44 = vpop.f32.mrb[71].mxu1 }
 0x1a0   :  { %2635 = vst [vmem:[%s3666_s3 + $0x80] sm:$0xff] %v2543_v35  }
 0x1a1   :  { %v1794_v61 = vadd.f32 %v3436_v63, %v1442_v40  ;;  %v1857_v47 = vmax.f32 %v1793_v39, 0.0 }
 0x1a3   :  { %v1858_v48 = vmax.f32 %v1794_v61, 0.0 }
 0x1a4   :  { %v1157_v51 = vpop.f32.mrb[72].mxu0  ;;  %v3556_v52 = vpop.f32.mrb[72].mxu1 }
 0x1a5   :  { %v2548_v55 = vpack.c.bf16 %v1858_v48, %v1857_v47  ;;  %v1447_v29 = vadd.f32 %v1446_v59, %v1157_v51  ;;  %v1159_v28 = vpop.f32.mrb[73].mxu0  ;;  %v1462_v9 = vpop.f32.mrb[73].mxu1 }
 0x1a6   :  { %v1160_v56 = vpop.f32.mrb[74].mxu0  ;;  %v3558_v8 = vpop.f32.mrb[74].mxu1 }
 0x1a7   :  { %2636 = vst [vmem:[%s3666_s3 + $0x88] sm:$0xff] %v2548_v55   ;;  %v1795_v60 = vadd.f32 %v3436_v63, %v1447_v29  ;;  %v1450_v0 = vadd.f32 %v1449_v44, %v1160_v56  ;;  %v1162_v49 = vpop.f32.mrb[75].mxu0  ;;  %v1465_v43 = vpop.f32.mrb[75].mxu1 }
 0x1a9   :  { %v1796_v41 = vadd.f32 %v3436_v63, %v1450_v0  ;;  %v1859_v11 = vmax.f32 %v1795_v60, 0.0 }
 0x1ab   :  { %v1860_v3 = vmax.f32 %v1796_v41, 0.0 }
 0x1ac   :  { %v1165_v4 = vpop.f32.mrb[76].mxu0  ;;  %v3565_v7 = vpop.f32.mrb[76].mxu1 }
 0x1ad   :  { %v2553_v21 = vpack.c.bf16 %v1860_v3, %v1859_v11  ;;  %v1455_v12 = vadd.f32 %v2745_v31, %v1165_v4  ;;  %v1167_v15 = vpop.f32.mrb[77].mxu0  ;;  %v3567_v17 = vpop.f32.mrb[77].mxu1 }
 0x1ae   :  { %v1168_v53 = vpop.f32.mrb[78].mxu0  ;;  %v3569_v19 = vpop.f32.mrb[78].mxu1 }
 0x1af   :  { %2637 = vst [vmem:[%s3666_s3 + $0x90] sm:$0xff] %v2553_v21   ;;  %v1797_v20 = vadd.f32 %v3436_v63, %v1455_v12  ;;  %v1458_v23 = vadd.f32 %v2746_v5, %v1168_v53  ;;  %v1170_v24 = vpop.f32.mrb[79].mxu0  ;;  %v3575_v1 = vpop.f32.mrb[79].mxu1 }
 0x1b1   :  { %v1798_v27 = vadd.f32 %v3436_v63, %v1458_v23  ;;  %v1861_v45 = vmax.f32 %v1797_v20, 0.0 }
 0x1b3   :  { %v1862_v13 = vmax.f32 %v1798_v27, 0.0 }
 0x1b4   :  { %v1173_v57 = vpop.f32.mrb[80].mxu0  ;;  %v2757_v33 = vpop.f32.mrb[80].mxu1 }
 0x1b5   :  { %v2558_v25 = vpack.c.bf16 %v1862_v13, %v1861_v45  ;;  %v1463_v31 = vadd.f32 %v1462_v9, %v1173_v57  ;;  %v1503_v32 = vadd.f32 %v2757_v33, %v3377_v2  ;;  %v1175_v16 = vpop.f32.mrb[81].mxu0  ;;  %v1494_v59 = vpop.f32.mrb[81].mxu1 }
 0x1b6   :  { %v1495_v35 = vadd.f32 %v1494_v59, %v3371_v58  ;;  %v1176_v36 = vpop.f32.mrb[82].mxu0  ;;  %v2758_v39 = vpop.f32.mrb[82].mxu1 }
 0x1b7   :  { %2638 = vst [vmem:[%s3666_s3 + $0x98] sm:$0xff] %v2558_v25   ;;  %v1799_v5 = vadd.f32 %v3436_v63, %v1463_v31  ;;  %v1809_v40 = vadd.f32 %v3436_v63, %v1503_v32  ;;  %v1466_v37 = vadd.f32 %v1465_v43, %v1176_v36  ;;  %v1506_v44 = vadd.f32 %v2758_v39, %v3381_v6  ;;  %v1178_v61 = vpop.f32.mrb[83].mxu0  ;;  %v1497_v47 = vpop.f32.mrb[83].mxu1 }
 0x1b8   :  { %v1807_v2 = vadd.f32 %v3436_v63, %v1495_v35  ;;  %v1498_v48 = vadd.f32 %v1497_v47, %v3375_v62 }
 0x1b9   :  { %v1800_v58 = vadd.f32 %v3436_v63, %v1466_v37  ;;  %v1810_v51 = vadd.f32 %v3436_v63, %v1506_v44  ;;  %v1863_v29 = vmax.f32 %v1799_v5, 0.0  ;;  %v1873_v28 = vmax.f32 %v1809_v40, 0.0 }
 0x1ba   :  { %v1808_v55 = vadd.f32 %v3436_v63, %v1498_v48  ;;  %v1871_v60 = vmax.f32 %v1807_v2, 0.0 }
 0x1bb   :  { %v1864_v9 = vmax.f32 %v1800_v58, 0.0  ;;  %v1874_v56 = vmax.f32 %v1810_v51, 0.0 }
 0x1bc   :  { %v1872_v0 = vmax.f32 %v1808_v55, 0.0  ;;  %v1181_v49 = vpop.f32.mrb[84].mxu0  ;;  %v2761_v6 = vpop.f32.mrb[84].mxu1 }
 0x1bd   :  { %v2563_v43 = vpack.c.bf16 %v1864_v9, %v1863_v29  ;;  %v2588_v41 = vpack.c.bf16 %v1874_v56, %v1873_v28  ;;  %v1471_v11 = vadd.f32 %v3556_v52, %v1181_v49  ;;  %v1519_v62 = vadd.f32 %v2761_v6, %v3393_v18  ;;  %v1183_v3 = vpop.f32.mrb[85].mxu0  ;;  %v1510_v4 = vpop.f32.mrb[85].mxu1 }
 0x1be   :  { %v2583_v21 = vpack.c.bf16 %v1872_v0, %v1871_v60  ;;  %v1511_v12 = vadd.f32 %v1510_v4, %v3385_v10  ;;  %v1184_v15 = vpop.f32.mrb[86].mxu0  ;;  %v2762_v53 = vpop.f32.mrb[86].mxu1 }
 0x1bf   :  { %2639 = vst [vmem:[%s3666_s3 + $0xa0] sm:$0xff] %v2563_v43   ;;  %2644 = vst [vmem:[%s3666_s3 + $0xc8] sm:$0xff] %v2588_v41   ;;  %v1801_v20 = vadd.f32 %v3436_v63, %v1471_v11  ;;  %v1813_v52 = vadd.f32 %v3436_v63, %v1519_v62  ;;  %v1474_v18 = vadd.f32 %v3558_v8, %v1184_v15  ;;  %v1186_v24 = vpop.f32.mrb[87].mxu0  ;;  %v1513_v10 = vpop.f32.mrb[87].mxu1 }
 0x1c0   :  { %v1522_v23 = vadd.f32 %v2762_v53, %v3397_v22  ;;  %2643 = vst [vmem:[%s3666_s3 + $0xc0] sm:$0xff] %v2583_v21   ;;  %v1811_v27 = vadd.f32 %v3436_v63, %v1511_v12  ;;  %v1514_v45 = vadd.f32 %v1513_v10, %v3389_v14 }
 0x1c1   :  { %v1802_v13 = vadd.f32 %v3436_v63, %v1474_v18  ;;  %v1865_v25 = vmax.f32 %v1801_v20, 0.0  ;;  %v1877_v8 = vmax.f32 %v1813_v52, 0.0 }
 0x1c2   :  { %v1814_v57 = vadd.f32 %v3436_v63, %v1522_v23  ;;  %v1812_v33 = vadd.f32 %v3436_v63, %v1514_v45  ;;  %v1875_v32 = vmax.f32 %v1811_v27, 0.0 }
 0x1c3   :  { %v1866_v31 = vmax.f32 %v1802_v13, 0.0 }
 0x1c4   :  { %v1878_v22 = vmax.f32 %v1814_v57, 0.0  ;;  %v1876_v16 = vmax.f32 %v1812_v33, 0.0  ;;  %v1189_v59 = vpop.f32.mrb[88].mxu0  ;;  %v2765_v35 = vpop.f32.mrb[88].mxu1 }
 0x1c5   :  { %v2568_v36 = vpack.c.bf16 %v1866_v31, %v1865_v25  ;;  %v1479_v5 = vadd.f32 %v3567_v17, %v1189_v59  ;;  %v1535_v14 = vadd.f32 %v2765_v35, %v3409_v34  ;;  %v1191_v40 = vpop.f32.mrb[89].mxu0  ;;  %v1526_v37 = vpop.f32.mrb[89].mxu1 }
 0x1c6   :  { %v2598_v39 = vpack.c.bf16 %v1878_v22, %v1877_v8  ;;  %v2593_v44 = vpack.c.bf16 %v1876_v16, %v1875_v32  ;;  %v1527_v61 = vadd.f32 %v1526_v37, %v3401_v26  ;;  %v1192_v47 = vpop.f32.mrb[90].mxu0  ;;  %v2766_v2 = vpop.f32.mrb[90].mxu1 }
 0x1c7   :  { %2640 = vst [vmem:[%s3666_s3 + $0xa8] sm:$0xff] %v2568_v36   ;;  %v1803_v48 = vadd.f32 %v3436_v63, %v1479_v5  ;;  %v1817_v17 = vadd.f32 %v3436_v63, %v1535_v14  ;;  %v1482_v34 = vadd.f32 %v3575_v1, %v1192_v47  ;;  %v1538_v58 = vadd.f32 %v2766_v2, %v3413_v38  ;;  %v1194_v51 = vpop.f32.mrb[91].mxu0  ;;  %v1529_v26 = vpop.f32.mrb[91].mxu1 }
 0x1c8   :  { %2646 = vst [vmem:[%s3666_s3 + $0xd8] sm:$0xff] %v2598_v39   ;;  %2645 = vst [vmem:[%s3666_s3 + $0xd0] sm:$0xff] %v2593_v44   ;;  %v1815_v55 = vadd.f32 %v3436_v63, %v1527_v61  ;;  %v1530_v29 = vadd.f32 %v1529_v26, %v3405_v30 }
 0x1c9   :  { %v1804_v28 = vadd.f32 %v3436_v63, %v1482_v34  ;;  %v1818_v9 = vadd.f32 %v3436_v63, %v1538_v58  ;;  %v1867_v60 = vmax.f32 %v1803_v48, 0.0  ;;  %v1881_v1 = vmax.f32 %v1817_v17, 0.0 }
 0x1ca   :  { %v1816_v56 = vadd.f32 %v3436_v63, %v1530_v29  ;;  %v1879_v49 = vmax.f32 %v1815_v55, 0.0 }
 0x1cb   :  { %v1868_v0 = vmax.f32 %v1804_v28, 0.0  ;;  %v1882_v38 = vmax.f32 %v1818_v9, 0.0 }
 0x1cc   :  { %v1880_v6 = vmax.f32 %v1816_v56, 0.0  ;;  %v1197_v43 = vpop.f32.mrb[92].mxu0  ;;  %v2769_v41 = vpop.f32.mrb[92].mxu1 }
 0x1cd   :  { %v2573_v11 = vpack.c.bf16 %v1868_v0, %v1867_v60  ;;  %v2608_v62 = vpack.c.bf16 %v1882_v38, %v1881_v1  ;;  %v1487_v3 = vadd.f32 %v3565_v7, %v1197_v43  ;;  %v1551_v30 = vadd.f32 %v2769_v41, %v3425_v50  ;;  %v1199_v4 = vpop.f32.mrb[93].mxu0  ;;  %v1542_v21 = vpop.f32.mrb[93].mxu1 }
 0x1ce   :  { %v2603_v12 = vpack.c.bf16 %v1880_v6, %v1879_v49  ;;  %v1543_v15 = vadd.f32 %v1542_v21, %v3417_v42  ;;  %v1200_v53 = vpop.f32.mrb[94].mxu0  ;;  %v2770_v20 = vpop.f32.mrb[94].mxu1 }
 0x1cf   :  { %2641 = vst [vmem:[%s3666_s3 + $0xb0] sm:$0xff] %v2573_v11   ;;  %2648 = vst [vmem:[%s3666_s3 + $0xe8] sm:$0xff] %v2608_v62   ;;  %v1805_v52 = vadd.f32 %v3436_v63, %v1487_v3  ;;  %v1821_v7 = vadd.f32 %v3436_v63, %v1551_v30  ;;  %v1490_v50 = vadd.f32 %v3569_v19, %v1200_v53  ;;  %v1202_v23 = vpop.f32.mrb[95].mxu0  ;;  %v1545_v42 = vpop.f32.mrb[95].mxu1 }
 0x1d0   :  { %v1554_v18 = vadd.f32 %v2770_v20, %v3429_v54  ;;  %2647 = vst [vmem:[%s3666_s3 + $0xe0] sm:$0xff] %v2603_v12   ;;  %v1819_v24 = vadd.f32 %v3436_v63, %v1543_v15  ;;  %v1546_v10 = vadd.f32 %v1545_v42, %v3421_v46 }
 0x1d1   :  { %v1806_v27 = vadd.f32 %v3436_v63, %v1490_v50  ;;  %v1869_v57 = vmax.f32 %v1805_v52, 0.0  ;;  %v1885_v19 = vmax.f32 %v1821_v7, 0.0 }
 0x1d2   :  { %v1822_v45 = vadd.f32 %v3436_v63, %v1554_v18  ;;  %v1820_v13 = vadd.f32 %v3436_v63, %v1546_v10  ;;  %v1883_v25 = vmax.f32 %v1819_v24, 0.0 }
 0x1d3   :  { %v1870_v33 = vmax.f32 %v1806_v27, 0.0 }
 0x1d4   :  { %v1886_v54 = vmax.f32 %v1822_v45, 0.0  ;;  %v1884_v8 = vmax.f32 %v1820_v13, 0.0 }
 0x1d5   :  { %v2578_v31 = vpack.c.bf16 %v1870_v33, %v1869_v57 }
 0x1d6   :  { %v2618_v22 = vpack.c.bf16 %v1886_v54, %v1885_v19  ;;  %v2613_v32 = vpack.c.bf16 %v1884_v8, %v1883_v25 }
 0x1d7   :  { %2642 = vst [vmem:[%s3666_s3 + $0xb8] sm:$0xff] %v2578_v31  }
 0x1d8   :  { %2650 = vst [vmem:[%s3666_s3 + $0xf8] sm:$0xff] %v2618_v22   ;;  %2649 = vst [vmem:[%s3666_s3 + $0xf0] sm:$0xff] %v2613_v32  }

// kernel: vgg_loss.44
= control target key start
LH: loop header
LB: loop body
LE: loop exit
PB: predicated region body
PF: predicated region fallthrough
CT: control target
= control target key end

     0   :  { %vm129_vm0 = vcmask 257024   ;;  %s431_s0 = inlined_call_operand.vmem [shape: bf16[128,32], index: 0, kind: input, shape index: {}]   ;;  %s432_s1 = inlined_call_operand.vmem [shape: bf16[128,32], index: 1, kind: input, shape index: {}]   ;;  %s433_s2 = inlined_call_operand.vmem [shape: bf16[128,32], index: 2, kind: input, shape index: {}]   ;;  %s434_s3 = inlined_call_operand.vmem [shape: bf16[128,32], index: 3, kind: input, shape index: {}]   ;;  %s435_s4 = inlined_call_operand.vmem [shape: bf16[128,32], index: 4, kind: output, shape index: {}]  }
   0x1   :  { %v17_v0 = vld [vmem:[%s431_s0] sm:$0xf]  ;;  %v18_v5 = vld [vmem:[%s431_s0 + $0x4] sm:$0xf]  ;;  %v19_v11 = vld [vmem:[%s431_s0 + $0x8] sm:$0xf] }
   0x2   :  { %v33_v1 = vld [vmem:[%s432_s1] sm:$0xf]  ;;  %v34_v6 = vld [vmem:[%s432_s1 + $0x4] sm:$0xf]  ;;  %v35_v13 = vld [vmem:[%s432_s1 + $0x8] sm:$0xf] }
   0x3   :  { %v65_v2 = vld [vmem:[%s433_s2] sm:$0xf]  ;;  %v49_v3 = vmax.bf16 %v33_v1, %v17_v0  ;;  %v50_v8 = vmax.bf16 %v34_v6, %v18_v5  ;;  %v66_v9 = vld [vmem:[%s433_s2 + $0x4] sm:$0xf]  ;;  %v67_v14 = vld [vmem:[%s433_s2 + $0x8] sm:$0xf]  ;;  %v51_v17 = vmax.bf16 %v35_v13, %v19_v11 }
   0x4   :  { %v81_v4 = vld [vmem:[%s434_s3] sm:$0xf]  ;;  %v82_v10 = vld [vmem:[%s434_s3 + $0x4] sm:$0xf]  ;;  %v83_v15 = vld [vmem:[%s434_s3 + $0x8] sm:$0xf] }
   0x5   :  { %v97_v7 = vmax.bf16 %v81_v4, %v65_v2  ;;  %v98_v12 = vmax.bf16 %v82_v10, %v66_v9  ;;  %v99_v18 = vmax.bf16 %v83_v15, %v67_v14  ;;  %v20_v19 = vld [vmem:[%s431_s0 + $0xc] sm:$0xf]  ;;  %v21_v25 = vld [vmem:[%s431_s0 + $0x10] sm:$0xf]  ;;  %v22_v32 = vld [vmem:[%s431_s0 + $0x14] sm:$0xf] }
   0x6   :  { %v36_v20 = vld [vmem:[%s432_s1 + $0xc] sm:$0xf]  ;;  %v37_v26 = vld [vmem:[%s432_s1 + $0x10] sm:$0xf]  ;;  %v38_v34 = vld [vmem:[%s432_s1 + $0x14] sm:$0xf] }
   0x7   :  { %v113_v16 = vmax.bf16 %v97_v7, %v49_v3  ;;  %v68_v21 = vld [vmem:[%s433_s2 + $0xc] sm:$0xf]  ;;  %v114_v22 = vmax.bf16 %v98_v12, %v50_v8  ;;  %v52_v23 = vmax.bf16 %v36_v20, %v20_v19  ;;  %v115_v27 = vmax.bf16 %v99_v18, %v51_v17  ;;  %v69_v30 = vld [vmem:[%s433_s2 + $0x10] sm:$0xf]  ;;  %v70_v35 = vld [vmem:[%s433_s2 + $0x14] sm:$0xf] }
   0x8   :  { %v84_v24 = vld [vmem:[%s434_s3 + $0xc] sm:$0xf]  ;;  %v53_v29 = vmax.bf16 %v37_v26, %v21_v25  ;;  %v85_v31 = vld [vmem:[%s434_s3 + $0x10] sm:$0xf]  ;;  %v86_v36 = vld [vmem:[%s434_s3 + $0x14] sm:$0xf]  ;;  %v54_v38 = vmax.bf16 %v38_v34, %v22_v32 }
   0x9   :  { %130 = vst.msk [vmem:[%s435_s4] sm:$0xf] %vm129_vm0, %v113_v16  ;;  %v100_v28 = vmax.bf16 %v84_v24, %v68_v21  ;;  %131 = vst.msk [vmem:[%s435_s4 + $0x4] sm:$0xf] %vm129_vm0, %v114_v22  ;;  %v101_v33 = vmax.bf16 %v85_v31, %v69_v30  ;;  %v102_v39 = vmax.bf16 %v86_v36, %v70_v35  ;;  %v23_v40 = vld [vmem:[%s431_s0 + $0x18] sm:$0xf] }
   0xa   :  { %132 = vst.msk [vmem:[%s435_s4 + $0x8] sm:$0xf] %vm129_vm0, %v115_v27  ;;  %v39_v41 = vld [vmem:[%s432_s1 + $0x18] sm:$0xf]  ;;  %v24_v46 = vld [vmem:[%s431_s0 + $0x1c] sm:$0xf] }
   0xb   :  { %v116_v37 = vmax.bf16 %v100_v28, %v52_v23  ;;  %v71_v42 = vld [vmem:[%s433_s2 + $0x18] sm:$0xf]  ;;  %v117_v43 = vmax.bf16 %v101_v33, %v53_v29  ;;  %v55_v44 = vmax.bf16 %v39_v41, %v23_v40  ;;  %v40_v47 = vld [vmem:[%s432_s1 + $0x1c] sm:$0xf]  ;;  %v118_v48 = vmax.bf16 %v102_v39, %v54_v38  ;;  %v25_v53 = vld [vmem:[%s431_s0 + $0x20] sm:$0xf] }
   0xc   :  { %v87_v45 = vld [vmem:[%s434_s3 + $0x18] sm:$0xf]  ;;  %v56_v50 = vmax.bf16 %v40_v47, %v24_v46  ;;  %v72_v51 = vld [vmem:[%s433_s2 + $0x1c] sm:$0xf]  ;;  %v41_v55 = vld [vmem:[%s432_s1 + $0x20] sm:$0xf] }
   0xd   :  { %133 = vst.msk [vmem:[%s435_s4 + $0xc] sm:$0xf] %vm129_vm0, %v116_v37  ;;  %v103_v49 = vmax.bf16 %v87_v45, %v71_v42  ;;  %v88_v52 = vld [vmem:[%s434_s3 + $0x1c] sm:$0xf]  ;;  %134 = vst.msk [vmem:[%s435_s4 + $0x10] sm:$0xf] %vm129_vm0, %v117_v43  ;;  %v57_v59 = vmax.bf16 %v41_v55, %v25_v53 }
   0xe   :  { %v104_v54 = vmax.bf16 %v88_v52, %v72_v51  ;;  %v73_v56 = vld [vmem:[%s433_s2 + $0x20] sm:$0xf]  ;;  %135 = vst.msk [vmem:[%s435_s4 + $0x14] sm:$0xf] %vm129_vm0, %v118_v48  ;;  %v26_v61 = vld [vmem:[%s431_s0 + $0x24] sm:$0xf] }
   0xf   :  { %v89_v57 = vld [vmem:[%s434_s3 + $0x20] sm:$0xf]  ;;  %v119_v58 = vmax.bf16 %v103_v49, %v55_v44  ;;  %v42_v62 = vld [vmem:[%s432_s1 + $0x24] sm:$0xf]  ;;  %v27_v3 = vld [vmem:[%s431_s0 + $0x28] sm:$0xf] }
  0x10   :  { %v105_v60 = vmax.bf16 %v89_v57, %v73_v56  ;;  %v74_v63 = vld [vmem:[%s433_s2 + $0x24] sm:$0xf]  ;;  %v120_v0 = vmax.bf16 %v104_v54, %v56_v50  ;;  %v58_v1 = vmax.bf16 %v42_v62, %v26_v61  ;;  %v43_v4 = vld [vmem:[%s432_s1 + $0x28] sm:$0xf]  ;;  %v28_v10 = vld [vmem:[%s431_s0 + $0x2c] sm:$0xf] }
  0x11   :  { %v90_v2 = vld [vmem:[%s434_s3 + $0x24] sm:$0xf]  ;;  %136 = vst.msk [vmem:[%s435_s4 + $0x18] sm:$0xf] %vm129_vm0, %v119_v58  ;;  %v59_v7 = vmax.bf16 %v43_v4, %v27_v3  ;;  %v75_v8 = vld [vmem:[%s433_s2 + $0x28] sm:$0xf] }
  0x12   :  { %v121_v5 = vmax.bf16 %v105_v60, %v57_v59  ;;  %v106_v6 = vmax.bf16 %v90_v2, %v74_v63  ;;  %v91_v9 = vld [vmem:[%s434_s3 + $0x28] sm:$0xf]  ;;  %137 = vst.msk [vmem:[%s435_s4 + $0x1c] sm:$0xf] %vm129_vm0, %v120_v0  ;;  %v44_v12 = vld [vmem:[%s432_s1 + $0x2c] sm:$0xf] }
  0x13   :  { %v107_v11 = vmax.bf16 %v91_v9, %v75_v8  ;;  %v76_v13 = vld [vmem:[%s433_s2 + $0x2c] sm:$0xf]  ;;  %v60_v16 = vmax.bf16 %v44_v12, %v28_v10  ;;  %v29_v18 = vld [vmem:[%s431_s0 + $0x30] sm:$0xf]  ;;  %v30_v24 = vld [vmem:[%s431_s0 + $0x34] sm:$0xf] }
  0x14   :  { %v92_v14 = vld [vmem:[%s434_s3 + $0x2c] sm:$0xf]  ;;  %138 = vst.msk [vmem:[%s435_s4 + $0x20] sm:$0xf] %vm129_vm0, %v121_v5  ;;  %v122_v15 = vmax.bf16 %v106_v6, %v58_v1  ;;  %v45_v19 = vld [vmem:[%s432_s1 + $0x30] sm:$0xf] }
  0x15   :  { %v108_v17 = vmax.bf16 %v92_v14, %v76_v13  ;;  %v77_v20 = vld [vmem:[%s433_s2 + $0x30] sm:$0xf]  ;;  %v123_v21 = vmax.bf16 %v107_v11, %v59_v7  ;;  %v61_v22 = vmax.bf16 %v45_v19, %v29_v18  ;;  %v46_v25 = vld [vmem:[%s432_s1 + $0x34] sm:$0xf]  ;;  %v31_v31 = vld [vmem:[%s431_s0 + $0x38] sm:$0xf] }
  0x16   :  { %v93_v23 = vld [vmem:[%s434_s3 + $0x30] sm:$0xf]  ;;  %139 = vst.msk [vmem:[%s435_s4 + $0x24] sm:$0xf] %vm129_vm0, %v122_v15  ;;  %v62_v28 = vmax.bf16 %v46_v25, %v30_v24  ;;  %v78_v29 = vld [vmem:[%s433_s2 + $0x34] sm:$0xf] }
  0x17   :  { %v124_v26 = vmax.bf16 %v108_v17, %v60_v16  ;;  %v109_v27 = vmax.bf16 %v93_v23, %v77_v20  ;;  %v94_v30 = vld [vmem:[%s434_s3 + $0x34] sm:$0xf]  ;;  %140 = vst.msk [vmem:[%s435_s4 + $0x28] sm:$0xf] %vm129_vm0, %v123_v21  ;;  %v47_v33 = vld [vmem:[%s432_s1 + $0x38] sm:$0xf] }
  0x18   :  { %v110_v32 = vmax.bf16 %v94_v30, %v78_v29  ;;  %v79_v34 = vld [vmem:[%s433_s2 + $0x38] sm:$0xf]  ;;  %v63_v37 = vmax.bf16 %v47_v33, %v31_v31  ;;  %v32_v39 = vld [vmem:[%s431_s0 + $0x3c] sm:$0xf] }
  0x19   :  { %v95_v35 = vld [vmem:[%s434_s3 + $0x38] sm:$0xf]  ;;  %141 = vst.msk [vmem:[%s435_s4 + $0x2c] sm:$0xf] %vm129_vm0, %v124_v26  ;;  %v125_v36 = vmax.bf16 %v109_v27, %v61_v22  ;;  %v48_v40 = vld [vmem:[%s432_s1 + $0x3c] sm:$0xf] }
  0x1a   :  { %v111_v38 = vmax.bf16 %v95_v35, %v79_v34  ;;  %v80_v41 = vld [vmem:[%s433_s2 + $0x3c] sm:$0xf]  ;;  %v126_v42 = vmax.bf16 %v110_v32, %v62_v28  ;;  %v64_v43 = vmax.bf16 %v48_v40, %v32_v39 }
  0x1b   :  { %v96_v44 = vld [vmem:[%s434_s3 + $0x3c] sm:$0xf]  ;;  %142 = vst.msk [vmem:[%s435_s4 + $0x30] sm:$0xf] %vm129_vm0, %v125_v36 }
  0x1c   :  { %v127_v45 = vmax.bf16 %v111_v38, %v63_v37  ;;  %v112_v46 = vmax.bf16 %v96_v44, %v80_v41  ;;  %143 = vst.msk [vmem:[%s435_s4 + $0x34] sm:$0xf] %vm129_vm0, %v126_v42 }
  0x1e   :  { %144 = vst.msk [vmem:[%s435_s4 + $0x38] sm:$0xf] %vm129_vm0, %v127_v45  ;;  %v128_v47 = vmax.bf16 %v112_v46, %v64_v43 }
  0x20   :  { %145 = vst.msk [vmem:[%s435_s4 + $0x3c] sm:$0xf] %vm129_vm0, %v128_v47 }

// kernel: vgg_loss.45
= control target key start
LH: loop header
LB: loop body
LE: loop exit
PB: predicated region body
PF: predicated region fallthrough
CT: control target
= control target key end

     0   :  { %s1276_s1 = inlined_call_operand.vmem [shape: bf16[384,128], index: 1, kind: input, shape index: {}]   ;;  %s1277_s0 = inlined_call_operand.vmem [shape: bf16[128,384], index: 0, kind: input, shape index: {}]   ;;  %s1278_s2 = inlined_call_operand.vmem [shape: f32[1,128], index: 2, kind: input, shape index: {}]   ;;  %s1279_s3 = inlined_call_operand.vmem [shape: bf16[128,128], index: 3, kind: output, shape index: {}]  }
   0x1   :  { %v1011_v0 = vld [vmem:[%s1276_s1 + $0x40] sm:$0xff]   ;;  %v1014_v3 = vld [vmem:[%s1276_s1 + $0x48] sm:$0xff]   ;;  %v1017_v6 = vld [vmem:[%s1276_s1 + $0x50] sm:$0xff]  }
   0x2   :  { %v1012_v1 = vld [vmem:[%s1276_s1] sm:$0xff]   ;;  %899 = vmatprep.subr.bf16.mxu0 %v1011_v0  ;;  %v1015_v4 = vld [vmem:[%s1276_s1 + $0x8] sm:$0xff]   ;;  %v1018_v7 = vld [vmem:[%s1276_s1 + $0x10] sm:$0xff]  }
   0x3   :  { %v1013_v2 = vld [vmem:[%s1276_s1 + $0x80] sm:$0xff]   ;;  %900 = vmatpush3.bf16.msra.mxu0 %v1012_v1  ;;  %v1016_v5 = vld [vmem:[%s1276_s1 + $0x88] sm:$0xff]   ;;  %v1019_v8 = vld [vmem:[%s1276_s1 + $0x90] sm:$0xff]  }
   0x4   :  { %979 = vmatprep.subr.bf16.mxu1 %v1013_v2  ;;  %901 = vmatprep.subr.bf16.mxu0 %v1014_v3  ;;  %v1020_v9 = vld [vmem:[%s1276_s1 + $0x58] sm:$0xff]   ;;  %v1023_v12 = vld [vmem:[%s1276_s1 + $0x60] sm:$0xff]   ;;  %v1026_v15 = vld [vmem:[%s1276_s1 + $0x68] sm:$0xff]  }
   0x5   :  { %980 = vmatpush3.bf16.msra.mxu1 %v1013_v2  ;;  %v1021_v10 = vld [vmem:[%s1276_s1 + $0x18] sm:$0xff]   ;;  %v1025_v13 = vld [vmem:[%s1276_s1 + $0xa0] sm:$0xff]   ;;  %v1028_v16 = vld [vmem:[%s1276_s1 + $0xa8] sm:$0xff]  }
   0x6   :  { %981 = vmatprep.subr.bf16.mxu1 %v1016_v5  ;;  %v1022_v11 = vld [vmem:[%s1276_s1 + $0x98] sm:$0xff]   ;;  %v1024_v14 = vld [vmem:[%s1276_s1 + $0x20] sm:$0xff]   ;;  %v1027_v17 = vld [vmem:[%s1276_s1 + $0x28] sm:$0xff]  }
   0x7   :  { %902 = vmatpush3.bf16.msra.mxu0 %v1015_v4  ;;  %v1029_v18 = vld [vmem:[%s1276_s1 + $0x70] sm:$0xff]   ;;  %v1032_v21 = vld [vmem:[%s1276_s1 + $0x78] sm:$0xff]   ;;  %v1035_v26 = vld [vmem:[%s1277_s0] ss:$12 sps:$4 sm:$0xff]  }
   0x8   :  { %903 = vmatprep.subr.bf16.mxu0 %v1017_v6  ;;  %v1030_v19 = vld [vmem:[%s1276_s1 + $0x30] sm:$0xff]   ;;  %v1034_v22 = vld [vmem:[%s1276_s1 + $0xb8] sm:$0xff]   ;;  %v1039_v28 = vld [vmem:[%s1277_s0 + $0x20] ss:$12 sps:$4 sm:$0xff]  }
   0x9   :  { %982 = vmatpush3.bf16.msra.mxu1 %v1016_v5  ;;  %v1031_v20 = vld [vmem:[%s1276_s1 + $0xb0] sm:$0xff]   ;;  %v1033_v25 = vld [vmem:[%s1276_s1 + $0x38] sm:$0xff]   ;;  %v1055_v36 = vld [vmem:[%s1277_s0 + $0x80] ss:$12 sps:$4 sm:$0xff]  }
   0xa   :  { %983 = vmatprep.subr.bf16.mxu1 %v1019_v8  ;;  %v1037_v23 = vld [vmem:[%s1277_s0 + $0x4] ss:$12 sps:$4 sm:$0xff]   ;;  %v1038_v24 = vld [vmem:[%s1277_s0 + $0x8] ss:$12 sps:$4 sm:$0xff]   ;;  %v1048_v35 = vld [vmem:[%s1277_s0 + $0x4c] ss:$12 sps:$4 sm:$0xff]  }
   0xb   :  { %904 = vmatpush3.bf16.msra.mxu0 %v1018_v7  ;;  %435 = vmatprep.mubr.bf16.mxu0 %v1037_v23  ;;  %v1040_v27 = vld [vmem:[%s1277_s0 + $0x1c] ss:$12 sps:$4 sm:$0xff]   ;;  %v1046_v29 = vld [vmem:[%s1277_s0 + $0x38] ss:$12 sps:$4 sm:$0xff]   ;;  %v1043_v31 = vld [vmem:[%s1277_s0 + $0x34] ss:$12 sps:$4 sm:$0xff]  }
   0xc   :  { %905 = vmatprep.subr.bf16.mxu0 %v1020_v9  ;;  %995 = vmatprep.mubr.bf16.mxu1 %v1038_v24  ;;  %v1042_v30 = vld [vmem:[%s1277_s0 + $0x18] ss:$12 sps:$4 sm:$0xff]   ;;  %v1047_v32 = vld [vmem:[%s1277_s0 + $0x50] ss:$12 sps:$4 sm:$0xff]   ;;  %v1054_v33 = vld [vmem:[%s1277_s0 + $0x68] ss:$12 sps:$4 sm:$0xff]  }
   0xd   :  { %984 = vmatpush3.bf16.msra.mxu1 %v1019_v8  ;;  %v1045_v34 = vld [vmem:[%s1277_s0 + $0x30] ss:$12 sps:$4 sm:$0xff]   ;;  %v1062_v37 = vld [vmem:[%s1277_s0 + $0x98] ss:$12 sps:$4 sm:$0xff]   ;;  %v1050_v38 = vld [vmem:[%s1277_s0 + $0x48] ss:$12 sps:$4 sm:$0xff]  }
   0xe   :  { %985 = vmatprep.subr.bf16.mxu1 %v1022_v11  ;;  %v1051_v39 = vld [vmem:[%s1277_s0 + $0x64] ss:$12 sps:$4 sm:$0xff]   ;;  %v1053_v41 = vld [vmem:[%s1277_s0 + $0x60] ss:$12 sps:$4 sm:$0xff]   ;;  %v1056_v42 = vld [vmem:[%s1277_s0 + $0x7c] ss:$12 sps:$4 sm:$0xff]  }
   0xf   :  { %906 = vmatpush3.bf16.msra.mxu0 %v1021_v10  ;;  %v1063_v40 = vld [vmem:[%s1277_s0 + $0xb0] ss:$12 sps:$4 sm:$0xff]   ;;  %v1058_v43 = vld [vmem:[%s1277_s0 + $0x78] ss:$12 sps:$4 sm:$0xff]   ;;  %v1059_v44 = vld [vmem:[%s1277_s0 + $0x94] ss:$12 sps:$4 sm:$0xff]  }
  0x10   :  { %907 = vmatprep.subr.bf16.mxu0 %v1023_v12  ;;  %v1061_v45 = vld [vmem:[%s1277_s0 + $0x90] ss:$12 sps:$4 sm:$0xff]   ;;  %v1064_v46 = vld [vmem:[%s1277_s0 + $0xac] ss:$12 sps:$4 sm:$0xff]   ;;  %v1066_v47 = vld [vmem:[%s1277_s0 + $0xa8] ss:$12 sps:$4 sm:$0xff]  }
  0x11   :  { %986 = vmatpush3.bf16.msra.mxu1 %v1022_v11  ;;  %v1234_v55 = vld [vmem:[%s1278_s2] ss:$0 sm:$0xff] }
  0x12   :  { %987 = vmatprep.subr.bf16.mxu1 %v1025_v13 }
  0x13   :  { %908 = vmatpush3.bf16.msra.mxu0 %v1024_v14 }
  0x14   :  { %909 = vmatprep.subr.bf16.mxu0 %v1026_v15 }
  0x15   :  { %988 = vmatpush3.bf16.msra.mxu1 %v1025_v13 }
  0x16   :  { %989 = vmatprep.subr.bf16.mxu1 %v1028_v16 }
  0x17   :  { %910 = vmatpush3.bf16.msra.mxu0 %v1027_v17 }
  0x18   :  { %911 = vmatprep.subr.bf16.mxu0 %v1029_v18 }
  0x19   :  { %990 = vmatpush3.bf16.msra.mxu1 %v1028_v16 }
  0x1a   :  { %991 = vmatprep.subr.bf16.mxu1 %v1031_v20 }
  0x1b   :  { %912 = vmatpush3.bf16.msra.mxu0 %v1030_v19 }
  0x1c   :  { %913 = vmatprep.subr.bf16.mxu0 %v1032_v21 }
  0x1d   :  { %992 = vmatpush3.bf16.msra.mxu1 %v1031_v20 }
  0x1e   :  { %993 = vmatprep.subr.bf16.mxu1 %v1034_v22 }
  0x1f   :  { %914 = vmatpush3.bf16.msra.mxu0 %v1033_v25 }
  0x21   :  { %994 = vmatpush3.bf16.msra.mxu1 %v1034_v22 }
  0x22   :  { %436 = vmatmul.mubr.bf16.vlgmr.msra.gmra.mrb[0].mxu0 %v1035_v26 }
  0x23   :  { %443 = vmatprep.mubr.bf16.mxu0 %v1040_v27 }
  0x24   :  { %996 = vmatmul.mubr.bf16.vlgmr.msra.gmra.mrb[0].mxu1 %v1039_v28 }
  0x25   :  { %999 = vmatprep.mubr.bf16.mxu1 %v1046_v29 }
  0x2a   :  { %444 = vmatmul.mubr.bf16.gmra.mrb[4].mxu0 %v1042_v30 }
  0x2b   :  { %451 = vmatprep.mubr.bf16.mxu0 %v1043_v31 }
  0x2c   :  { %1000 = vmatmul.mubr.bf16.gmra.mrb[4].mxu1 %v1047_v32 }
  0x2d   :  { %1003 = vmatprep.mubr.bf16.mxu1 %v1054_v33 }
  0x32   :  { %452 = vmatmul.mubr.bf16.gmra.mrb[8].mxu0 %v1045_v34 }
  0x33   :  { %459 = vmatprep.mubr.bf16.mxu0 %v1048_v35 }
  0x34   :  { %1004 = vmatmul.mubr.bf16.gmra.mrb[8].mxu1 %v1055_v36 }
  0x35   :  { %1007 = vmatprep.mubr.bf16.mxu1 %v1062_v37 }
  0x3a   :  { %460 = vmatmul.mubr.bf16.gmra.mrb[12].mxu0 %v1050_v38 }
  0x3b   :  { %467 = vmatprep.mubr.bf16.mxu0 %v1051_v39 }
  0x3c   :  { %1008 = vmatmul.mubr.bf16.gmra.mrb[12].mxu1 %v1063_v40 }
  0x42   :  { %468 = vmatmul.mubr.bf16.gmra.mrb[16].mxu0 %v1053_v41 }
  0x43   :  { %475 = vmatprep.mubr.bf16.mxu0 %v1056_v42 }
  0x4a   :  { %476 = vmatmul.mubr.bf16.gmra.mrb[20].mxu0 %v1058_v43 }
  0x4b   :  { %483 = vmatprep.mubr.bf16.mxu0 %v1059_v44 }
  0x52   :  { %484 = vmatmul.mubr.bf16.gmra.mrb[24].mxu0 %v1061_v45 }
  0x53   :  { %491 = vmatprep.mubr.bf16.mxu0 %v1064_v46 }
  0x5a   :  { %492 = vmatmul.mubr.bf16.gmra.mrb[28].mxu0 %v1066_v47 }
  0xf5   :  { %v915_v48 = vpop.f32.mrb[0].mxu0 }
  0xf6   :  { %v916_v49 = vpop.f32.mrb[1].mxu0 }
  0xf7   :  { %v917_v50 = vadd.f32 %v916_v49, %v915_v48  ;;  %v918_v51 = vpop.f32.mrb[2].mxu0  ;;  %v997_v52 = vpop.f32.mrb[0].mxu1 }
  0xf8   :  { %v919_v53 = vpop.f32.mrb[3].mxu0  ;;  %v534_v54 = vpop.f32.mrb[1].mxu1 }
  0xf9   :  { %v920_v56 = vadd.f32 %v919_v53, %v918_v51  ;;  %v535_v57 = vadd.f32 %v917_v50, %v534_v54  ;;  %v998_v58 = vpop.f32.mrb[2].mxu1 }
  0xfa   :  { %v537_v59 = vpop.f32.mrb[3].mxu1 }
  0xfb   :  { %v655_v60 = vadd.f32 %v1234_v55, %v535_v57  ;;  %v538_v61 = vadd.f32 %v920_v56, %v537_v59 }
  0xfd   :  { %v656_v62 = vadd.f32 %v1234_v55, %v538_v61  ;;  %v921_v63 = vpop.f32.mrb[4].mxu0  ;;  %v671_v1 = vmax.f32 %v655_v60, 0.0 }
  0xfe   :  { %v922_v0 = vpop.f32.mrb[5].mxu0 }
  0xff   :  { %v672_v2 = vmax.f32 %v656_v62, 0.0  ;;  %v923_v3 = vadd.f32 %v922_v0, %v921_v63  ;;  %v924_v4 = vpop.f32.mrb[6].mxu0  ;;  %v1001_v5 = vpop.f32.mrb[4].mxu1 }
 0x100   :  { %v925_v6 = vpop.f32.mrb[7].mxu0  ;;  %v550_v7 = vpop.f32.mrb[5].mxu1 }
 0x101   :  { %v855_v8 = vpack.c.bf16 %v672_v2, %v671_v1  ;;  %v543_v9 = vadd.f32 %v997_v52, %v923_v3  ;;  %v926_v10 = vadd.f32 %v925_v6, %v924_v4  ;;  %v1002_v11 = vpop.f32.mrb[6].mxu1 }
 0x102   :  { %v553_v12 = vpop.f32.mrb[7].mxu1 }
 0x103   :  { %856 = vst [vmem:[%s1279_s3] sm:$0xff] %v855_v8   ;;  %v657_v13 = vadd.f32 %v1234_v55, %v543_v9  ;;  %v546_v14 = vadd.f32 %v998_v58, %v926_v10 }
 0x105   :  { %v658_v15 = vadd.f32 %v1234_v55, %v546_v14  ;;  %v927_v16 = vpop.f32.mrb[8].mxu0  ;;  %v673_v18 = vmax.f32 %v657_v13, 0.0 }
 0x106   :  { %v928_v17 = vpop.f32.mrb[9].mxu0 }
 0x107   :  { %v674_v19 = vmax.f32 %v658_v15, 0.0  ;;  %v929_v20 = vadd.f32 %v928_v17, %v927_v16  ;;  %v930_v21 = vpop.f32.mrb[10].mxu0  ;;  %v1005_v22 = vpop.f32.mrb[8].mxu1 }
 0x108   :  { %v931_v23 = vpop.f32.mrb[11].mxu0  ;;  %v566_v24 = vpop.f32.mrb[9].mxu1 }
 0x109   :  { %v860_v25 = vpack.c.bf16 %v674_v19, %v673_v18  ;;  %v932_v26 = vadd.f32 %v931_v23, %v930_v21  ;;  %v551_v27 = vadd.f32 %v929_v20, %v550_v7  ;;  %v1006_v28 = vpop.f32.mrb[10].mxu1 }
 0x10a   :  { %v569_v29 = vpop.f32.mrb[11].mxu1 }
 0x10b   :  { %892 = vst [vmem:[%s1279_s3 + $0x8] sm:$0xff] %v860_v25   ;;  %v659_v30 = vadd.f32 %v1234_v55, %v551_v27  ;;  %v554_v31 = vadd.f32 %v932_v26, %v553_v12 }
 0x10d   :  { %v660_v32 = vadd.f32 %v1234_v55, %v554_v31  ;;  %v933_v33 = vpop.f32.mrb[12].mxu0  ;;  %v675_v35 = vmax.f32 %v659_v30, 0.0 }
 0x10e   :  { %v934_v34 = vpop.f32.mrb[13].mxu0 }
 0x10f   :  { %v676_v36 = vmax.f32 %v660_v32, 0.0  ;;  %v935_v37 = vadd.f32 %v934_v34, %v933_v33  ;;  %v936_v38 = vpop.f32.mrb[14].mxu0  ;;  %v1009_v39 = vpop.f32.mrb[12].mxu1 }
 0x110   :  { %v937_v40 = vpop.f32.mrb[15].mxu0  ;;  %v582_v41 = vpop.f32.mrb[13].mxu1 }
 0x111   :  { %v865_v42 = vpack.c.bf16 %v676_v36, %v675_v35  ;;  %v559_v43 = vadd.f32 %v1001_v5, %v935_v37  ;;  %v938_v44 = vadd.f32 %v937_v40, %v936_v38  ;;  %v1010_v45 = vpop.f32.mrb[14].mxu1 }
 0x112   :  { %v585_v46 = vpop.f32.mrb[15].mxu1 }
 0x113   :  { %893 = vst [vmem:[%s1279_s3 + $0x10] sm:$0xff] %v865_v42   ;;  %v661_v47 = vadd.f32 %v1234_v55, %v559_v43  ;;  %v562_v48 = vadd.f32 %v1002_v11, %v938_v44 }
 0x115   :  { %v662_v49 = vadd.f32 %v1234_v55, %v562_v48  ;;  %v939_v50 = vpop.f32.mrb[16].mxu0  ;;  %v677_v52 = vmax.f32 %v661_v47, 0.0 }
 0x116   :  { %v940_v51 = vpop.f32.mrb[17].mxu0 }
 0x117   :  { %v678_v53 = vmax.f32 %v662_v49, 0.0  ;;  %v941_v54 = vadd.f32 %v940_v51, %v939_v50  ;;  %v942_v56 = vpop.f32.mrb[18].mxu0 }
 0x118   :  { %v943_v57 = vpop.f32.mrb[19].mxu0 }
 0x119   :  { %v870_v58 = vpack.c.bf16 %v678_v53, %v677_v52  ;;  %v944_v59 = vadd.f32 %v943_v57, %v942_v56  ;;  %v567_v60 = vadd.f32 %v941_v54, %v566_v24 }
 0x11b   :  { %894 = vst [vmem:[%s1279_s3 + $0x18] sm:$0xff] %v870_v58   ;;  %v663_v61 = vadd.f32 %v1234_v55, %v567_v60  ;;  %v570_v62 = vadd.f32 %v944_v59, %v569_v29 }
 0x11d   :  { %v664_v63 = vadd.f32 %v1234_v55, %v570_v62  ;;  %v945_v0 = vpop.f32.mrb[20].mxu0  ;;  %v679_v2 = vmax.f32 %v663_v61, 0.0 }
 0x11e   :  { %v946_v1 = vpop.f32.mrb[21].mxu0 }
 0x11f   :  { %v680_v3 = vmax.f32 %v664_v63, 0.0  ;;  %v947_v4 = vadd.f32 %v946_v1, %v945_v0  ;;  %v948_v5 = vpop.f32.mrb[22].mxu0 }
 0x120   :  { %v949_v6 = vpop.f32.mrb[23].mxu0 }
 0x121   :  { %v875_v7 = vpack.c.bf16 %v680_v3, %v679_v2  ;;  %v575_v8 = vadd.f32 %v1005_v22, %v947_v4  ;;  %v950_v9 = vadd.f32 %v949_v6, %v948_v5 }
 0x123   :  { %895 = vst [vmem:[%s1279_s3 + $0x20] sm:$0xff] %v875_v7   ;;  %v665_v10 = vadd.f32 %v1234_v55, %v575_v8  ;;  %v578_v11 = vadd.f32 %v1006_v28, %v950_v9 }
 0x125   :  { %v666_v12 = vadd.f32 %v1234_v55, %v578_v11  ;;  %v951_v13 = vpop.f32.mrb[24].mxu0  ;;  %v681_v15 = vmax.f32 %v665_v10, 0.0 }
 0x126   :  { %v952_v14 = vpop.f32.mrb[25].mxu0 }
 0x127   :  { %v682_v16 = vmax.f32 %v666_v12, 0.0  ;;  %v953_v17 = vadd.f32 %v952_v14, %v951_v13  ;;  %v954_v18 = vpop.f32.mrb[26].mxu0 }
 0x128   :  { %v955_v19 = vpop.f32.mrb[27].mxu0 }
 0x129   :  { %v880_v20 = vpack.c.bf16 %v682_v16, %v681_v15  ;;  %v956_v21 = vadd.f32 %v955_v19, %v954_v18  ;;  %v583_v22 = vadd.f32 %v953_v17, %v582_v41 }
 0x12b   :  { %896 = vst [vmem:[%s1279_s3 + $0x28] sm:$0xff] %v880_v20   ;;  %v667_v23 = vadd.f32 %v1234_v55, %v583_v22  ;;  %v586_v24 = vadd.f32 %v956_v21, %v585_v46 }
 0x12d   :  { %v668_v25 = vadd.f32 %v1234_v55, %v586_v24  ;;  %v957_v26 = vpop.f32.mrb[28].mxu0  ;;  %v683_v28 = vmax.f32 %v667_v23, 0.0 }
 0x12e   :  { %v958_v27 = vpop.f32.mrb[29].mxu0 }
 0x12f   :  { %v684_v29 = vmax.f32 %v668_v25, 0.0  ;;  %v959_v30 = vadd.f32 %v958_v27, %v957_v26  ;;  %v960_v31 = vpop.f32.mrb[30].mxu0 }
 0x130   :  { %v961_v32 = vpop.f32.mrb[31].mxu0 }
 0x131   :  { %v885_v33 = vpack.c.bf16 %v684_v29, %v683_v28  ;;  %v591_v34 = vadd.f32 %v1009_v39, %v959_v30  ;;  %v962_v35 = vadd.f32 %v961_v32, %v960_v31 }
 0x133   :  { %897 = vst [vmem:[%s1279_s3 + $0x30] sm:$0xff] %v885_v33   ;;  %v669_v36 = vadd.f32 %v1234_v55, %v591_v34  ;;  %v594_v37 = vadd.f32 %v1010_v45, %v962_v35 }
 0x135   :  { %v670_v38 = vadd.f32 %v1234_v55, %v594_v37  ;;  %v685_v40 = vmax.f32 %v669_v36, 0.0 }
 0x137   :  { %v686_v41 = vmax.f32 %v670_v38, 0.0 }
 0x139   :  { %v890_v42 = vpack.c.bf16 %v686_v41, %v685_v40 }
 0x13b   :  { %898 = vst [vmem:[%s1279_s3 + $0x38] sm:$0xff] %v890_v42  }

// kernel: vgg_loss.75
= control target key start
LH: loop header
LB: loop body
LE: loop exit
PB: predicated region body
PF: predicated region fallthrough
CT: control target
= control target key end

     0   :  { %s219_s0 = inlined_call_operand.vmem [shape: bf16[64,128], index: 0, kind: input, shape index: {}]   ;;  %s220_s1 = inlined_call_operand.vmem [shape: bf16[64,128], index: 1, kind: input, shape index: {}]   ;;  %s221_s2 = inlined_call_operand.vmem [shape: f32[64,128], index: 2, kind: output, shape index: {}]  }
   0x1   :  { %v119_v0 = vld [vmem:[%s219_s0] sm:$0xff]   ;;  %v150_v2 = vld [vmem:[%s219_s0 + $0x8] sm:$0xff]   ;;  %v151_v8 = vld [vmem:[%s219_s0 + $0x10] sm:$0xff]  }
   0x2   :  { %v135_v1 = vld [vmem:[%s220_s1] sm:$0xff]   ;;  %v120_v3 = vunpack.c.l.bf16 %v119_v0  ;;  %v121_v5 = vunpack.c.h.bf16 %v119_v0  ;;  %v153_v7 = vld [vmem:[%s220_s1 + $0x8] sm:$0xff]   ;;  %v154_v9 = vld [vmem:[%s220_s1 + $0x10] sm:$0xff]   ;;  %v124_v10 = vunpack.c.l.bf16 %v150_v2  ;;  %v125_v12 = vunpack.c.h.bf16 %v150_v2 }
   0x3   :  { %v136_v4 = vunpack.c.l.bf16 %v135_v1  ;;  %v137_v6 = vunpack.c.h.bf16 %v135_v1  ;;  %v140_v11 = vunpack.c.l.bf16 %v153_v7  ;;  %v141_v13 = vunpack.c.h.bf16 %v153_v7  ;;  %v152_v14 = vld [vmem:[%s219_s0 + $0x18] sm:$0xff]  }
   0x4   :  { %v128_v17 = vunpack.c.l.bf16 %v151_v8  ;;  %v144_v18 = vunpack.c.l.bf16 %v154_v9  ;;  %v155_v19 = vld [vmem:[%s220_s1 + $0x18] sm:$0xff]   ;;  %v129_v22 = vunpack.c.h.bf16 %v151_v8  ;;  %v145_v23 = vunpack.c.h.bf16 %v154_v9 }
   0x5   :  { %v55_v15 = vsub.f32 %v120_v3, %v136_v4  ;;  %v56_v16 = vsub.f32 %v121_v5, %v137_v6  ;;  %v57_v20 = vsub.f32 %v124_v10, %v140_v11  ;;  %v58_v21 = vsub.f32 %v125_v12, %v141_v13 }
   0x6   :  { %v59_v26 = vsub.f32 %v128_v17, %v144_v18  ;;  %v132_v27 = vunpack.c.l.bf16 %v152_v14  ;;  %v60_v30 = vsub.f32 %v129_v22, %v145_v23  ;;  %v148_v31 = vunpack.c.l.bf16 %v155_v19 }
   0x7   :  { %v71_v24 = vand.u32 2147483647, %v55_v15  ;;  %v72_v25 = vand.u32 2147483647, %v56_v16  ;;  %v73_v28 = vand.u32 2147483647, %v57_v20  ;;  %v133_v33 = vunpack.c.h.bf16 %v152_v14 }
   0x8   :  { %v74_v29 = vand.u32 2147483647, %v58_v21  ;;  %v75_v32 = vand.u32 2147483647, %v59_v26  ;;  %v149_v34 = vunpack.c.h.bf16 %v155_v19  ;;  %v76_v35 = vand.u32 2147483647, %v60_v30 }
   0x9   :  { %106 = vst [vmem:[%s221_s2] sm:$0xff] %v71_v24  ;;  %107 = vst [vmem:[%s221_s2 + $0x8] sm:$0xff] %v72_v25  ;;  %v61_v36 = vsub.f32 %v132_v27, %v148_v31 }
   0xa   :  { %108 = vst [vmem:[%s221_s2 + $0x10] sm:$0xff] %v73_v28  ;;  %109 = vst [vmem:[%s221_s2 + $0x18] sm:$0xff] %v74_v29  ;;  %v62_v37 = vsub.f32 %v133_v33, %v149_v34 }
   0xb   :  { %110 = vst [vmem:[%s221_s2 + $0x20] sm:$0xff] %v75_v32  ;;  %111 = vst [vmem:[%s221_s2 + $0x28] sm:$0xff] %v76_v35  ;;  %v77_v38 = vand.u32 2147483647, %v61_v36 }
   0xc   :  { %v78_v39 = vand.u32 2147483647, %v62_v37 }
   0xd   :  { %112 = vst [vmem:[%s221_s2 + $0x30] sm:$0xff] %v77_v38 }
   0xe   :  { %113 = vst [vmem:[%s221_s2 + $0x38] sm:$0xff] %v78_v39 }

// kernel: vgg_loss.46
= control target key start
LH: loop header
LB: loop body
LE: loop exit
PB: predicated region body
PF: predicated region fallthrough
CT: control target
= control target key end

     0   :  { %s1190_s12 = smov 0   ;;  %s1192_s13 = smov 0   ;;  %s1322_s0 = inlined_call_operand.vmem [shape: bf16[128,640], index: 0, kind: input, shape index: {}]   ;;  %s1323_s1 = inlined_call_operand.vmem [shape: bf16[640,128], index: 1, kind: input, shape index: {}]   ;;  %s1324_s2 = inlined_call_operand.vmem [shape: f32[1,128], index: 2, kind: input, shape index: {}]   ;;  %s1325_s3 = inlined_call_operand.vmem [shape: bf16[128,128], index: 3, kind: output, shape index: {}]  }
   0x1   :  { %s1194_s14 = smov 0   ;;  %s1196_s15 = smov 0  }
   0x2   :  { %s1198_s16 = smov 0  }
   0x3 LB: > { %s25_s17 = sadd.s32 1, %s1163_s15  ;;  %p48_p1 = scmp.ne.s32.totalorder %s1155_s13, %s1151_s12  ;;  %s1167_s16 = sphi %s1198_s16, %s13_s16   ;;  %s1163_s15 = sphi %s1196_s15, %s1329_s15   ;;  %s1159_s14 = sphi %s1194_s14, %s1328_s14   ;;  %s1155_s13 = sphi %s1192_s13, %s1327_s13   ;;  %s1151_s12 = sphi %s1190_s12, %s1326_s12  }
   0x4   : > { %p26_p0 = scmp.ge.s32.totalorder %s25_s17, 5  ;;  %p49_p2 = scmp.eq.s32.totalorder %s1167_s16, 0 }
   0x5   : > { %s41_s19 = sadd.s32 1, %s1155_s13  ;;  %p899_p5 = scmp.ge.s32.totalorder %s1167_s16, 5 }
   0x6   : > { %s1331_s17 = smov (%p26_p0, %s25_s17), 0  ;;  %p50_p3 = por %p49_p2, %p48_p1 }
   0x7   : > { %s37_s18 = ssub.s32 %s1163_s15, %s1331_s17  ;;  %162 = sbr.rel (%p899_p5) target bundleno = 28 (0x1c), region = 20 }
   0x8   : > { %p39_p4 = scmp.eq.s32.totalorder %s37_s18, 0 }
   0xa   : > { %s1225_s20 = scalar_select %p39_p4, %s1155_s13, %s41_s19  }
   0xe   : > { %165 = sbr.rel (!%p50_p3) target bundleno = 28 (0x1c), region = 24  ;;  %s167_s21 = sand.u32 (%p50_p3), 1, %s1155_s13  }
   0xf   : > { %s901_s22 = sshll.u32 (%p50_p3), %s1163_s15, 2  ;;  %s900_s23 = sshll.u32 (%p50_p3), %s167_s21, 6 }
  0x10   : > { %s1233_s26 = scalar_lea.vmem (%p50_p3), %s1322_s0, %s901_s22  ;;  %s169_s27 = scalar_lea.vmem (%p50_p3), [#allocation3], %s900_s23 }
  0x11   : > { %v190_v0 = vld [vmem:[%s1233_s26] sm:$0xf] (%p50_p3)  ;;  %v192_v1 = vld [vmem:[%s1233_s26 + $0x14] sm:$0xf] (%p50_p3)  ;;  %v194_v2 = vld [vmem:[%s1233_s26 + $0x28] sm:$0xf] (%p50_p3) }
  0x12   : > { %191 = vst [vmem:[%s169_s27] sm:$0xf] (%p50_p3), %v190_v0  ;;  %193 = vst [vmem:[%s169_s27 + $0x4] sm:$0xf] (%p50_p3), %v192_v1  ;;  %v196_v3 = vld [vmem:[%s1233_s26 + $0x3c] sm:$0xf] (%p50_p3) }
  0x13   : > { %v198_v4 = vld [vmem:[%s1233_s26 + $0x50] sm:$0xf] (%p50_p3)  ;;  %195 = vst [vmem:[%s169_s27 + $0x8] sm:$0xf] (%p50_p3), %v194_v2  ;;  %197 = vst [vmem:[%s169_s27 + $0xc] sm:$0xf] (%p50_p3), %v196_v3 }
  0x14   : > { %199 = vst [vmem:[%s169_s27 + $0x10] sm:$0xf] (%p50_p3), %v198_v4  ;;  %v200_v5 = vld [vmem:[%s1233_s26 + $0x64] sm:$0xf] (%p50_p3)  ;;  %v202_v6 = vld [vmem:[%s1233_s26 + $0x78] sm:$0xf] (%p50_p3) }
  0x15   : > { %v204_v7 = vld [vmem:[%s1233_s26 + $0x8c] sm:$0xf]  ;;  %201 = vst [vmem:[%s169_s27 + $0x14] sm:$0xf] %v200_v5  ;;  %203 = vst [vmem:[%s169_s27 + $0x18] sm:$0xf] %v202_v6 }
  0x16   : > { %205 = vst [vmem:[%s169_s27 + $0x1c] sm:$0xf] %v204_v7  ;;  %v206_v8 = vld [vmem:[%s1233_s26 + $0xa0] sm:$0xf]  ;;  %v208_v9 = vld [vmem:[%s1233_s26 + $0xb4] sm:$0xf] }
  0x17   : > { %v210_v10 = vld [vmem:[%s1233_s26 + $0xc8] sm:$0xf]  ;;  %207 = vst [vmem:[%s169_s27 + $0x20] sm:$0xf] %v206_v8  ;;  %209 = vst [vmem:[%s169_s27 + $0x24] sm:$0xf] %v208_v9 }
  0x18   : > { %211 = vst [vmem:[%s169_s27 + $0x28] sm:$0xf] %v210_v10  ;;  %v212_v11 = vld [vmem:[%s1233_s26 + $0xdc] sm:$0xf]  ;;  %v214_v12 = vld [vmem:[%s1233_s26 + $0xf0] sm:$0xf] }
  0x19   : > { %v216_v13 = vld [vmem:[%s1233_s26 + $0x104] sm:$0xf]  ;;  %213 = vst [vmem:[%s169_s27 + $0x2c] sm:$0xf] %v212_v11  ;;  %215 = vst [vmem:[%s169_s27 + $0x30] sm:$0xf] %v214_v12 }
  0x1a   : > { %217 = vst [vmem:[%s169_s27 + $0x34] sm:$0xf] %v216_v13  ;;  %v218_v14 = vld [vmem:[%s1233_s26 + $0x118] sm:$0xf]  ;;  %v220_v15 = vld [vmem:[%s1233_s26 + $0x12c] sm:$0xf] }
  0x1b   : > { %219 = vst [vmem:[%s169_s27 + $0x38] sm:$0xf] %v218_v14  ;;  %221 = vst [vmem:[%s169_s27 + $0x3c] sm:$0xf] %v220_v15 }
  0x1c PF: > { %p902_p6 = scmp.ge.s32.totalorder %s1167_s16, 1  ;;  %p287_p7 = scmp.lt.s32.totalorder %s1167_s16, 6 }
  0x1e   : > { %p288_p8 = pnand %p902_p6, %p287_p7 }
  0x1f   : > { %s294_s28 = sand.u32 (!%p288_p8), 1, %s1151_s12   ;;  %s904_s29 = sshll.u32 (!%p288_p8), %s1159_s14, 4 }
  0x20   : > { %291 = sbr.rel (%p288_p8) target bundleno = 323 (0x143), region = 69  ;;  %s903_s30 = sshll.u32 (!%p288_p8), %s294_s28, 6 }
  0x21   : > { %p333_p9 = scmp.lt.s32.totalorder (!%p288_p8), %s904_s29, 79  ;;  %s1260_s8 = scalar_lea.vmem (!%p288_p8), [#allocation3], %s903_s30 }
  0x22   : > { %p906_p10 = scmp.ne.s32.totalorder (!%p288_p8), %s1159_s14, 0 }
  0x27   : > { %s1333_s29 = smov (!%p333_p9, %s904_s29), 79  ;;  %357 = sbr.rel (%p906_p10) target bundleno = 49 (0x31), region = 77 }
  0x28   : > { %s905_s4 = sshll.u32 %s1333_s29, 2  ;;  %v1169_v16 = vmov (!%p906_p10), 0.0  }
  0x29   : > { %s1258_s7 = scalar_lea.vmem %s1323_s1, %s905_s4  ;;  %358 = vst [vmem:[#allocation2] sm:$0xff] (!%p906_p10), %v1169_v16  ;;  %359 = vst [vmem:[#allocation2 + $0x8] sm:$0xff] (!%p906_p10), %v1169_v16 }
  0x2a   : > { %360 = vst [vmem:[#allocation2 + $0x10] sm:$0xff] (!%p906_p10), %v1169_v16  ;;  %361 = vst [vmem:[#allocation2 + $0x18] sm:$0xff] (!%p906_p10), %v1169_v16 }
  0x2b   : > { %362 = vst [vmem:[#allocation2 + $0x20] sm:$0xff] (!%p906_p10), %v1169_v16  ;;  %363 = vst [vmem:[#allocation2 + $0x28] sm:$0xff] (!%p906_p10), %v1169_v16 }
  0x2c   : > { %364 = vst [vmem:[#allocation2 + $0x30] sm:$0xff] (!%p906_p10), %v1169_v16  ;;  %365 = vst [vmem:[#allocation2 + $0x38] sm:$0xff] (!%p906_p10), %v1169_v16 }
  0x2d   : > { %366 = vst [vmem:[#allocation2 + $0x40] sm:$0xff] (!%p906_p10), %v1169_v16  ;;  %367 = vst [vmem:[#allocation2 + $0x48] sm:$0xff] (!%p906_p10), %v1169_v16 }
  0x2e   : > { %368 = vst [vmem:[#allocation2 + $0x50] sm:$0xff] %v1169_v16  ;;  %369 = vst [vmem:[#allocation2 + $0x58] sm:$0xff] %v1169_v16 }
  0x2f   : > { %370 = vst [vmem:[#allocation2 + $0x60] sm:$0xff] %v1169_v16  ;;  %371 = vst [vmem:[#allocation2 + $0x68] sm:$0xff] %v1169_v16 }
  0x30   : > { %372 = vst [vmem:[#allocation2 + $0x70] sm:$0xff] %v1169_v16  ;;  %373 = vst [vmem:[#allocation2 + $0x78] sm:$0xff] %v1169_v16 }
  0x31 PF: > { %v1113_v17 = vld [vmem:[%s1258_s7] sm:$0xff]   ;;  %v1114_v18 = vld [vmem:[%s1258_s7 + $0x8] sm:$0xff]   ;;  %v1115_v19 = vld [vmem:[%s1258_s7 + $0x10] sm:$0xff]   ;;  %p923_p11 = scmp.ne.s32.totalorder %s1159_s14, 4 }
  0x32   : > { %1024 = vmatprep.subr.bf16.mxu0 %v1113_v17  ;;  %1056 = vmatprep.subr.bf16.mxu1 %v1113_v17  ;;  %v1116_v20 = vld [vmem:[%s1258_s7 + $0x18] sm:$0xff]   ;;  %v1121_v21 = vld [vmem:[%s1260_s8] sm:$0xff]   ;;  %v1118_v24 = vld [vmem:[%s1258_s7 + $0x28] sm:$0xff]  }
  0x33   : > { %1025 = vmatpush3.bf16.msra.mxu0 %v1113_v17  ;;  %1064 = vmatpush3.bf16.msra.mxu1 %v1113_v17  ;;  %v1122_v22 = vld [vmem:[%s1260_s8 + $0x20] sm:$0xff]   ;;  %v1119_v25 = vld [vmem:[%s1258_s7 + $0x30] sm:$0xff]   ;;  %v1120_v26 = vld [vmem:[%s1258_s7 + $0x38] sm:$0xff]  }
  0x34   : > { %1026 = vmatprep.subr.bf16.mxu0 %v1114_v18  ;;  %1057 = vmatprep.subr.bf16.mxu1 %v1114_v18  ;;  %v1117_v23 = vld [vmem:[%s1258_s7 + $0x20] sm:$0xff]   ;;  %v1123_v27 = vld [vmem:[%s1260_s8 + $0x8] sm:$0xff]   ;;  %v1125_v29 = vld [vmem:[%s1260_s8 + $0x10] sm:$0xff]  }
  0x35   : > { %1040 = vmatprep.mubr.bf16.mxu0 %v1121_v21  ;;  %1048 = vmatprep.mubr.bf16.mxu1 %v1122_v22  ;;  %v1124_v28 = vld [vmem:[%s1260_s8 + $0x28] sm:$0xff]   ;;  %v1126_v30 = vld [vmem:[%s1260_s8 + $0x30] sm:$0xff]   ;;  %v1127_v31 = vld [vmem:[%s1260_s8 + $0x18] sm:$0xff]  }
  0x36   : > { %v1128_v32 = vld [vmem:[%s1260_s8 + $0x38] sm:$0xff]   ;;  %v376_v33 = vld [vmem:[#allocation2 + $0x10] sm:$0xff]  ;;  %v374_v35 = vld [vmem:[#allocation2] sm:$0xff] }
  0x37   : > { %1027 = vmatpush3.bf16.msra.mxu0 %v1114_v18  ;;  %1065 = vmatpush3.bf16.msra.mxu1 %v1114_v18  ;;  %v384_v34 = vld [vmem:[#allocation2 + $0x50] sm:$0xff]  ;;  %v382_v36 = vld [vmem:[#allocation2 + $0x40] sm:$0xff]  ;;  %v377_v39 = vld [vmem:[#allocation2 + $0x18] sm:$0xff] }
  0x38   : > { %1028 = vmatprep.subr.bf16.mxu0 %v1115_v19  ;;  %1058 = vmatprep.subr.bf16.mxu1 %v1115_v19  ;;  %v385_v40 = vld [vmem:[#allocation2 + $0x58] sm:$0xff]  ;;  %v375_v45 = vld [vmem:[#allocation2 + $0x8] sm:$0xff]  ;;  %v380_v57 = vld [vmem:[#allocation2 + $0x30] sm:$0xff] }
  0x39   : > { %v383_v46 = vld [vmem:[#allocation2 + $0x48] sm:$0xff]  ;;  %v388_v58 = vld [vmem:[#allocation2 + $0x70] sm:$0xff]  ;;  %v378_v59 = vld [vmem:[#allocation2 + $0x20] sm:$0xff] }
  0x3a   : > { %v386_v60 = vld [vmem:[#allocation2 + $0x60] sm:$0xff]  ;;  %v381_v63 = vld [vmem:[#allocation2 + $0x38] sm:$0xff]  ;;  %v379_v5 = vld [vmem:[#allocation2 + $0x28] sm:$0xff] }
  0x3b   : > { %1029 = vmatpush3.bf16.msra.mxu0 %v1115_v19  ;;  %1066 = vmatpush3.bf16.msra.mxu1 %v1115_v19  ;;  %v389_v0 = vld [vmem:[#allocation2 + $0x78] sm:$0xff]  ;;  %v387_v6 = vld [vmem:[#allocation2 + $0x68] sm:$0xff]  ;;  %v924_v19 = vld [vmem:[%s1324_s2] ss:$0 sm:$0xff] (!%p923_p11) }
  0x3c   : > { %1030 = vmatprep.subr.bf16.mxu0 %v1116_v20  ;;  %1059 = vmatprep.subr.bf16.mxu1 %v1116_v20 }
  0x3f   : > { %1031 = vmatpush3.bf16.msra.mxu0 %v1116_v20  ;;  %1067 = vmatpush3.bf16.msra.mxu1 %v1116_v20 }
  0x40   : > { %1032 = vmatprep.subr.bf16.mxu0 %v1117_v23  ;;  %1060 = vmatprep.subr.bf16.mxu1 %v1117_v23 }
  0x43   : > { %1033 = vmatpush3.bf16.msra.mxu0 %v1117_v23  ;;  %1068 = vmatpush3.bf16.msra.mxu1 %v1117_v23 }
  0x44   : > { %1034 = vmatprep.subr.bf16.mxu0 %v1118_v24  ;;  %1061 = vmatprep.subr.bf16.mxu1 %v1118_v24 }
  0x47   : > { %1035 = vmatpush3.bf16.msra.mxu0 %v1118_v24  ;;  %1069 = vmatpush3.bf16.msra.mxu1 %v1118_v24 }
  0x48   : > { %1036 = vmatprep.subr.bf16.mxu0 %v1119_v25  ;;  %1062 = vmatprep.subr.bf16.mxu1 %v1119_v25 }
  0x4b   : > { %1037 = vmatpush3.bf16.msra.mxu0 %v1119_v25  ;;  %1070 = vmatpush3.bf16.msra.mxu1 %v1119_v25 }
  0x4c   : > { %1038 = vmatprep.subr.bf16.mxu0 %v1120_v26  ;;  %1063 = vmatprep.subr.bf16.mxu1 %v1120_v26 }
  0x4f   : > { %1039 = vmatpush3.bf16.msra.mxu0 %v1120_v26  ;;  %1071 = vmatpush3.bf16.msra.mxu1 %v1120_v26 }
  0x52   : > { %1041 = vmatmul.mubr.bf16.vlgmr.msra.gmra.mrb[0].mxu0 %v1123_v27  ;;  %1049 = vmatmul.mubr.bf16.vlgmr.msra.gmra.mrb[0].mxu1 %v1124_v28 }
  0x53   : > { %1044 = vmatprep.mubr.bf16.mxu0 %v1125_v29  ;;  %1052 = vmatprep.mubr.bf16.mxu1 %v1126_v30 }
  0x5a   : > { %1045 = vmatmul.mubr.bf16.gmra.mrb[4].mxu0 %v1127_v31  ;;  %1053 = vmatmul.mubr.bf16.gmra.mrb[4].mxu1 %v1128_v32 }
 0x125   : > { %v1042_v37 = vpop.f32.mrb[0].mxu0  ;;  %v1050_v38 = vpop.f32.mrb[0].mxu1 }
 0x126   : > { %v617_v41 = vadd.f32 %v1042_v37, %v376_v33  ;;  %v625_v42 = vadd.f32 %v1050_v38, %v384_v34  ;;  %v552_v43 = vpop.f32.mrb[1].mxu0  ;;  %v584_v44 = vpop.f32.mrb[1].mxu1 }
 0x127   : > { %v615_v47 = vadd.f32 %v552_v43, %v374_v35  ;;  %v623_v48 = vadd.f32 %v584_v44, %v382_v36  ;;  %v1043_v49 = vpop.f32.mrb[2].mxu0  ;;  %v1051_v50 = vpop.f32.mrb[2].mxu1 }
 0x128   : > { %633 = vst [vmem:[#allocation2 + $0x10] sm:$0xff] %v617_v41  ;;  %641 = vst [vmem:[#allocation2 + $0x50] sm:$0xff] %v625_v42  ;;  %v618_v51 = vadd.f32 %v1043_v49, %v377_v39  ;;  %v626_v52 = vadd.f32 %v1051_v50, %v385_v40  ;;  %v555_v53 = vpop.f32.mrb[3].mxu0  ;;  %v587_v54 = vpop.f32.mrb[3].mxu1 }
 0x129   : > { %631 = vst [vmem:[#allocation2] sm:$0xff] %v615_v47  ;;  %639 = vst [vmem:[#allocation2 + $0x40] sm:$0xff] %v623_v48  ;;  %v616_v55 = vadd.f32 %v555_v53, %v375_v45  ;;  %v624_v56 = vadd.f32 %v587_v54, %v383_v46 }
 0x12a   : > { %634 = vst [vmem:[#allocation2 + $0x18] sm:$0xff] %v618_v51  ;;  %642 = vst [vmem:[#allocation2 + $0x58] sm:$0xff] %v626_v52 }
 0x12b   : > { %632 = vst [vmem:[#allocation2 + $0x8] sm:$0xff] %v616_v55  ;;  %640 = vst [vmem:[#allocation2 + $0x48] sm:$0xff] %v624_v56 }
 0x12d   : > { %v1046_v61 = vpop.f32.mrb[4].mxu0  ;;  %v1054_v62 = vpop.f32.mrb[4].mxu1  ;;  %650 = sbr.rel (%p923_p11) target bundleno = 323 (0x143), region = 81 }
 0x12e   : > { %v621_v1 = vadd.f32 %v1046_v61, %v380_v57  ;;  %v629_v2 = vadd.f32 %v1054_v62, %v388_v58  ;;  %v568_v3 = vpop.f32.mrb[5].mxu0  ;;  %v600_v4 = vpop.f32.mrb[5].mxu1 }
 0x12f   : > { %v619_v7 = vadd.f32 %v568_v3, %v378_v59  ;;  %v627_v8 = vadd.f32 %v600_v4, %v386_v60  ;;  %v1047_v9 = vpop.f32.mrb[6].mxu0  ;;  %v1055_v10 = vpop.f32.mrb[6].mxu1  ;;  %v653_v22 = vld [vmem:[#allocation2 + $0x10] sm:$0xff] (!%p923_p11) }
 0x130   : > { %637 = vst [vmem:[#allocation2 + $0x30] sm:$0xff] %v621_v1  ;;  %645 = vst [vmem:[#allocation2 + $0x70] sm:$0xff] %v629_v2  ;;  %v622_v11 = vadd.f32 %v1047_v9, %v381_v63  ;;  %v630_v12 = vadd.f32 %v1055_v10, %v389_v0  ;;  %v571_v13 = vpop.f32.mrb[7].mxu0  ;;  %v603_v14 = vpop.f32.mrb[7].mxu1  ;;  %v651_v17 = vld [vmem:[#allocation2] sm:$0xff] (!%p923_p11)  ;;  %v676_v25 = vadd.f32 (!%p923_p11), %v924_v19, %v653_v22  ;;  %v661_v37 = vld [vmem:[#allocation2 + $0x50] sm:$0xff] (!%p923_p11) }
 0x131   : > { %635 = vst [vmem:[#allocation2 + $0x20] sm:$0xff] %v619_v7  ;;  %643 = vst [vmem:[#allocation2 + $0x60] sm:$0xff] %v627_v8  ;;  %v620_v15 = vadd.f32 %v571_v13, %v379_v5  ;;  %v628_v16 = vadd.f32 %v603_v14, %v387_v6  ;;  %v674_v20 = vadd.f32 (!%p923_p11), %v924_v19, %v651_v17  ;;  %v654_v23 = vld [vmem:[#allocation2 + $0x18] sm:$0xff] (!%p923_p11)  ;;  %v659_v35 = vld [vmem:[#allocation2 + $0x40] sm:$0xff] (!%p923_p11) }
 0x132   : > { %638 = vst [vmem:[#allocation2 + $0x38] sm:$0xff] %v622_v11  ;;  %646 = vst [vmem:[#allocation2 + $0x78] sm:$0xff] %v630_v12  ;;  %v652_v18 = vld [vmem:[#allocation2 + $0x8] sm:$0xff] (!%p923_p11)  ;;  %v677_v26 = vadd.f32 (!%p923_p11), %v924_v19, %v654_v23  ;;  %v692_v38 = vmax.f32 (!%p923_p11), %v676_v25, 0.0  ;;  %v662_v42 = vld [vmem:[#allocation2 + $0x58] sm:$0xff] (!%p923_p11)  ;;  %v682_v47 = vadd.f32 (!%p923_p11), %v924_v19, %v659_v35  ;;  %v684_v52 = vadd.f32 (!%p923_p11), %v924_v19, %v661_v37 }
 0x133   : > { %636 = vst [vmem:[#allocation2 + $0x28] sm:$0xff] %v620_v15  ;;  %644 = vst [vmem:[#allocation2 + $0x68] sm:$0xff] %v628_v16  ;;  %v675_v21 = vadd.f32 (!%p923_p11), %v924_v19, %v652_v18  ;;  %v690_v31 = vmax.f32 (!%p923_p11), %v674_v20, 0.0  ;;  %v660_v36 = vld [vmem:[#allocation2 + $0x48] sm:$0xff] (!%p923_p11)  ;;  %v685_v57 = vadd.f32 (!%p923_p11), %v924_v19, %v662_v42 }
 0x134   : > { %v693_v39 = vmax.f32 %v677_v26, 0.0  ;;  %v683_v51 = vadd.f32 %v924_v19, %v660_v36  ;;  %v698_v56 = vmax.f32 %v682_v47, 0.0  ;;  %v700_v61 = vmax.f32 %v684_v52, 0.0 }
 0x135   : > { %v691_v32 = vmax.f32 %v675_v21, 0.0  ;;  %v701_v63 = vmax.f32 %v685_v57, 0.0 }
 0x136   : > { %v969_v49 = vpack.c.bf16 %v693_v39, %v692_v38  ;;  %v699_v60 = vmax.f32 %v683_v51, 0.0 }
 0x137   : > { %v657_v29 = vld [vmem:[#allocation2 + $0x30] sm:$0xff]  ;;  %v964_v44 = vpack.c.bf16 %v691_v32, %v690_v31  ;;  %v989_v5 = vpack.c.bf16 %v701_v63, %v700_v61 }
 0x138   : > { %v655_v24 = vld [vmem:[#allocation2 + $0x20] sm:$0xff]  ;;  %v680_v34 = vadd.f32 %v924_v19, %v657_v29  ;;  %v665_v53 = vld [vmem:[#allocation2 + $0x70] sm:$0xff]  ;;  %1001 = vst [vmem:[%s1325_s3 + $0x8] sm:$0xff] %v969_v49   ;;  %v984_v3 = vpack.c.bf16 %v699_v60, %v698_v56 }
 0x139   : > { %v678_v28 = vadd.f32 %v924_v19, %v655_v24  ;;  %v658_v30 = vld [vmem:[#allocation2 + $0x38] sm:$0xff]  ;;  %v663_v43 = vld [vmem:[#allocation2 + $0x60] sm:$0xff]  ;;  %965 = vst [vmem:[%s1325_s3] sm:$0xff] %v964_v44   ;;  %v688_v1 = vadd.f32 %v924_v19, %v665_v53  ;;  %1005 = vst [vmem:[%s1325_s3 + $0x28] sm:$0xff] %v989_v5  }
 0x13a   : > { %v656_v27 = vld [vmem:[#allocation2 + $0x28] sm:$0xff]  ;;  %v681_v41 = vadd.f32 %v924_v19, %v658_v30  ;;  %v696_v46 = vmax.f32 %v680_v34, 0.0  ;;  %v666_v54 = vld [vmem:[#allocation2 + $0x78] sm:$0xff]  ;;  %v686_v58 = vadd.f32 %v924_v19, %v663_v43  ;;  %1004 = vst [vmem:[%s1325_s3 + $0x20] sm:$0xff] %v984_v3  }
 0x13b   : > { %v679_v33 = vadd.f32 %v924_v19, %v656_v27  ;;  %v694_v40 = vmax.f32 %v678_v28, 0.0  ;;  %v664_v48 = vld [vmem:[#allocation2 + $0x68] sm:$0xff]  ;;  %v689_v2 = vadd.f32 %v924_v19, %v666_v54  ;;  %v704_v6 = vmax.f32 %v688_v1, 0.0 }
 0x13c   : > { %v697_v50 = vmax.f32 %v681_v41, 0.0  ;;  %v687_v62 = vadd.f32 %v924_v19, %v664_v48  ;;  %v702_v0 = vmax.f32 %v686_v58, 0.0 }
 0x13d   : > { %v695_v45 = vmax.f32 %v679_v33, 0.0  ;;  %v705_v7 = vmax.f32 %v689_v2, 0.0 }
 0x13e   : > { %v979_v59 = vpack.c.bf16 %v697_v50, %v696_v46  ;;  %v703_v4 = vmax.f32 %v687_v62, 0.0 }
 0x13f   : > { %v974_v55 = vpack.c.bf16 %v695_v45, %v694_v40  ;;  %v999_v9 = vpack.c.bf16 %v705_v7, %v704_v6 }
 0x140   : > { %1003 = vst [vmem:[%s1325_s3 + $0x18] sm:$0xff] %v979_v59   ;;  %v994_v8 = vpack.c.bf16 %v703_v4, %v702_v0 }
 0x141   : > { %1002 = vst [vmem:[%s1325_s3 + $0x10] sm:$0xff] %v974_v55   ;;  %1007 = vst [vmem:[%s1325_s3 + $0x38] sm:$0xff] %v999_v9  }
 0x142   : > { %1006 = vst [vmem:[%s1325_s3 + $0x30] sm:$0xff] %v994_v8  }
 0x143 PF: > { %s13_s16 = sadd.s32 1, %s1167_s16   ;;  %s1326_s12 = smov %s1155_s13 }
 0x144   : > { %p10_p12 = scmp.ge.s32.totalorder %s13_s16, 7   ;;  %s1327_s13 = smov %s1225_s20 }
 0x145   : > { %s1328_s14 = smov %s1163_s15  ;;  %s1329_s15 = smov %s1331_s17 }
 0x146   :  { %12 = sbr.rel (!%p10_p12) target bundleno = 3 (0x3), region = 122 }

// kernel: vgg_loss.49
= control target key start
LH: loop header
LB: loop body
LE: loop exit
PB: predicated region body
PF: predicated region fallthrough
CT: control target
= control target key end

     0   :  { %vm45_vm0 = vcmask 519168   ;;  %s143_s0 = inlined_call_operand.vmem [shape: bf16[32,64], index: 0, kind: input, shape index: {}]   ;;  %s144_s1 = inlined_call_operand.vmem [shape: bf16[32,64], index: 1, kind: input, shape index: {}]   ;;  %s145_s2 = inlined_call_operand.vmem [shape: bf16[32,64], index: 2, kind: input, shape index: {}]   ;;  %s146_s3 = inlined_call_operand.vmem [shape: bf16[32,64], index: 3, kind: input, shape index: {}]   ;;  %s147_s4 = inlined_call_operand.vmem [shape: bf16[32,64], index: 4, kind: output, shape index: {}]  }
   0x1   :  { %v17_v0 = vld [vmem:[%s143_s0] sm:$0xf]  ;;  %v18_v5 = vld [vmem:[%s143_s0 + $0x4] sm:$0xf]  ;;  %v19_v11 = vld [vmem:[%s143_s0 + $0x8] sm:$0xf] }
   0x2   :  { %v21_v1 = vld [vmem:[%s144_s1] sm:$0xf]  ;;  %v22_v6 = vld [vmem:[%s144_s1 + $0x4] sm:$0xf]  ;;  %v23_v13 = vld [vmem:[%s144_s1 + $0x8] sm:$0xf] }
   0x3   :  { %v29_v2 = vld [vmem:[%s145_s2] sm:$0xf]  ;;  %v25_v3 = vmax.bf16 %v21_v1, %v17_v0  ;;  %v26_v8 = vmax.bf16 %v22_v6, %v18_v5  ;;  %v30_v9 = vld [vmem:[%s145_s2 + $0x4] sm:$0xf]  ;;  %v31_v14 = vld [vmem:[%s145_s2 + $0x8] sm:$0xf]  ;;  %v27_v17 = vmax.bf16 %v23_v13, %v19_v11 }
   0x4   :  { %v33_v4 = vld [vmem:[%s146_s3] sm:$0xf]  ;;  %v34_v10 = vld [vmem:[%s146_s3 + $0x4] sm:$0xf]  ;;  %v35_v15 = vld [vmem:[%s146_s3 + $0x8] sm:$0xf] }
   0x5   :  { %v37_v7 = vmax.bf16 %v33_v4, %v29_v2  ;;  %v38_v12 = vmax.bf16 %v34_v10, %v30_v9  ;;  %v39_v18 = vmax.bf16 %v35_v15, %v31_v14  ;;  %v20_v19 = vld [vmem:[%s143_s0 + $0xc] sm:$0xf] }
   0x6   :  { %v24_v20 = vld [vmem:[%s144_s1 + $0xc] sm:$0xf] }
   0x7   :  { %v41_v16 = vmax.bf16 %v37_v7, %v25_v3  ;;  %v32_v21 = vld [vmem:[%s145_s2 + $0xc] sm:$0xf]  ;;  %v42_v22 = vmax.bf16 %v38_v12, %v26_v8  ;;  %v28_v23 = vmax.bf16 %v24_v20, %v20_v19  ;;  %v43_v25 = vmax.bf16 %v39_v18, %v27_v17 }
   0x8   :  { %v36_v24 = vld [vmem:[%s146_s3 + $0xc] sm:$0xf] }
   0x9   :  { %46 = vst.msk [vmem:[%s147_s4] sm:$0xf] %vm45_vm0, %v41_v16  ;;  %v40_v26 = vmax.bf16 %v36_v24, %v32_v21  ;;  %47 = vst.msk [vmem:[%s147_s4 + $0x4] sm:$0xf] %vm45_vm0, %v42_v22 }
   0xa   :  { %48 = vst.msk [vmem:[%s147_s4 + $0x8] sm:$0xf] %vm45_vm0, %v43_v25 }
   0xb   :  { %v44_v27 = vmax.bf16 %v40_v26, %v28_v23 }
   0xd   :  { %49 = vst.msk [vmem:[%s147_s4 + $0xc] sm:$0xf] %vm45_vm0, %v44_v27 }

// kernel: vgg_loss.76
= control target key start
LH: loop header
LB: loop body
LE: loop exit
PB: predicated region body
PF: predicated region fallthrough
CT: control target
= control target key end

     0   :  { %s127_s0 = inlined_call_operand.vmem [shape: bf16[32,128], index: 0, kind: input, shape index: {}]   ;;  %s128_s1 = inlined_call_operand.vmem [shape: bf16[32,128], index: 1, kind: input, shape index: {}]   ;;  %s129_s2 = inlined_call_operand.vmem [shape: f32[32,128], index: 2, kind: output, shape index: {}]  }
   0x1   :  { %v71_v0 = vld [vmem:[%s127_s0] sm:$0xff]   ;;  %v86_v2 = vld [vmem:[%s127_s0 + $0x8] sm:$0xff]  }
   0x2   :  { %v79_v1 = vld [vmem:[%s128_s1] sm:$0xff]   ;;  %v72_v3 = vunpack.c.l.bf16 %v71_v0  ;;  %v73_v5 = vunpack.c.h.bf16 %v71_v0  ;;  %v87_v7 = vld [vmem:[%s128_s1 + $0x8] sm:$0xff]   ;;  %v76_v8 = vunpack.c.l.bf16 %v86_v2  ;;  %v77_v10 = vunpack.c.h.bf16 %v86_v2 }
   0x3   :  { %v80_v4 = vunpack.c.l.bf16 %v79_v1  ;;  %v81_v6 = vunpack.c.h.bf16 %v79_v1  ;;  %v84_v9 = vunpack.c.l.bf16 %v87_v7  ;;  %v85_v11 = vunpack.c.h.bf16 %v87_v7 }
   0x5   :  { %v35_v12 = vsub.f32 %v72_v3, %v80_v4  ;;  %v36_v13 = vsub.f32 %v73_v5, %v81_v6  ;;  %v37_v14 = vsub.f32 %v76_v8, %v84_v9  ;;  %v38_v15 = vsub.f32 %v77_v10, %v85_v11 }
   0x7   :  { %v43_v16 = vand.u32 2147483647, %v35_v12  ;;  %v44_v17 = vand.u32 2147483647, %v36_v13  ;;  %v45_v18 = vand.u32 2147483647, %v37_v14 }
   0x8   :  { %v46_v19 = vand.u32 2147483647, %v38_v15 }
   0x9   :  { %62 = vst [vmem:[%s129_s2] sm:$0xff] %v43_v16  ;;  %63 = vst [vmem:[%s129_s2 + $0x8] sm:$0xff] %v44_v17 }
   0xa   :  { %64 = vst [vmem:[%s129_s2 + $0x10] sm:$0xff] %v45_v18  ;;  %65 = vst [vmem:[%s129_s2 + $0x18] sm:$0xff] %v46_v19 }

// kernel: vgg_loss.50
= control target key start
LH: loop header
LB: loop body
LE: loop exit
PB: predicated region body
PF: predicated region fallthrough
CT: control target
= control target key end

     0   :  { %s796_s12 = smov 0   ;;  %s798_s13 = smov 0   ;;  %s889_s0 = inlined_call_operand.vmem [shape: bf16[32,640], index: 0, kind: input, shape index: {}]   ;;  %s890_s1 = inlined_call_operand.vmem [shape: bf16[640,128], index: 1, kind: input, shape index: {}]   ;;  %s891_s2 = inlined_call_operand.vmem [shape: f32[1,128], index: 2, kind: input, shape index: {}]   ;;  %s892_s3 = inlined_call_operand.vmem [shape: bf16[32,128], index: 3, kind: output, shape index: {}]  }
   0x1   :  { %s800_s14 = smov 0   ;;  %s802_s15 = smov 0  }
   0x2   :  { %s804_s16 = smov 0  }
   0x3 LB: > { %s25_s17 = sadd.s32 1, %s769_s15  ;;  %p48_p1 = scmp.ne.s32.totalorder %s761_s13, %s757_s12  ;;  %s773_s16 = sphi %s804_s16, %s13_s16   ;;  %s769_s15 = sphi %s802_s15, %s896_s15   ;;  %s765_s14 = sphi %s800_s14, %s895_s14   ;;  %s761_s13 = sphi %s798_s13, %s894_s13   ;;  %s757_s12 = sphi %s796_s12, %s893_s12  }
   0x4   : > { %p26_p0 = scmp.ge.s32.totalorder %s25_s17, 5  ;;  %p49_p2 = scmp.eq.s32.totalorder %s773_s16, 0 }
   0x5   : > { %s41_s19 = sadd.s32 1, %s761_s13  ;;  %p611_p5 = scmp.ge.s32.totalorder %s773_s16, 5 }
   0x6   : > { %s898_s17 = smov (%p26_p0, %s25_s17), 0  ;;  %p50_p3 = por %p49_p2, %p48_p1 }
   0x7   : > { %s37_s18 = ssub.s32 %s769_s15, %s898_s17  ;;  %162 = sbr.rel (%p611_p5) target bundleno = 21 (0x15), region = 20 }
   0x8   : > { %p39_p4 = scmp.eq.s32.totalorder %s37_s18, 0 }
   0xa   : > { %s831_s20 = scalar_select %p39_p4, %s761_s13, %s41_s19  }
   0xe   : > { %165 = sbr.rel (!%p50_p3) target bundleno = 21 (0x15), region = 24  ;;  %s167_s21 = sand.u32 (%p50_p3), 1, %s761_s13  }
   0xf   : > { %s613_s22 = sshll.u32 (%p50_p3), %s769_s15, 2  ;;  %s612_s23 = sshll.u32 (%p50_p3), %s167_s21, 4 }
  0x10   : > { %s174_s26 = scalar_lea.vmem (%p50_p3), %s889_s0, %s613_s22  ;;  %s169_s27 = scalar_lea.vmem (%p50_p3), [#allocation3], %s612_s23 }
  0x11   : > { %v190_v0 = vld [vmem:[%s174_s26] sm:$0xf] (%p50_p3)  ;;  %v192_v1 = vld [vmem:[%s174_s26 + $0x14] sm:$0xf] (%p50_p3)  ;;  %v194_v2 = vld [vmem:[%s174_s26 + $0x28] sm:$0xf] (%p50_p3) }
  0x12   : > { %191 = vst [vmem:[%s169_s27] sm:$0xf] (%p50_p3), %v190_v0  ;;  %193 = vst [vmem:[%s169_s27 + $0x4] sm:$0xf] (%p50_p3), %v192_v1  ;;  %v196_v3 = vld [vmem:[%s174_s26 + $0x3c] sm:$0xf] (%p50_p3) }
  0x13   : > { %195 = vst [vmem:[%s169_s27 + $0x8] sm:$0xf] (%p50_p3), %v194_v2  ;;  %197 = vst [vmem:[%s169_s27 + $0xc] sm:$0xf] (%p50_p3), %v196_v3 }
  0x15 PF: > { %p614_p6 = scmp.ge.s32.totalorder %s773_s16, 1  ;;  %p239_p7 = scmp.lt.s32.totalorder %s773_s16, 6 }
  0x17   : > { %p240_p8 = pnand %p614_p6, %p239_p7 }
  0x18   : > { %s246_s28 = sand.u32 (!%p240_p8), 1, %s757_s12   ;;  %s616_s29 = sshll.u32 (!%p240_p8), %s765_s14, 4 }
  0x19   : > { %243 = sbr.rel (%p240_p8) target bundleno = 304 (0x130), region = 69  ;;  %s843_s30 = sshll.u32 (!%p240_p8), %s246_s28, 4 }
  0x1a   : > { %p285_p9 = scmp.lt.s32.totalorder (!%p240_p8), %s616_s29, 79  ;;  %s248_s8 = scalar_lea.vmem (!%p240_p8), [#allocation3], %s843_s30 }
  0x1b   : > { %p618_p10 = scmp.ne.s32.totalorder (!%p240_p8), %s765_s14, 0 }
  0x20   : > { %s900_s29 = smov (!%p285_p9, %s616_s29), 79  ;;  %309 = sbr.rel (%p618_p10) target bundleno = 39 (0x27), region = 77 }
  0x21   : > { %s617_s4 = sshll.u32 %s900_s29, 2  ;;  %v775_v4 = vmov (!%p618_p10), 0.0  }
  0x22   : > { %s848_s7 = scalar_lea.vmem %s890_s1, %s617_s4  ;;  %310 = vst [vmem:[#allocation2] sm:$0xff] (!%p618_p10), %v775_v4  ;;  %311 = vst [vmem:[#allocation2 + $0x8] sm:$0xff] (!%p618_p10), %v775_v4 }
  0x23   : > { %312 = vst [vmem:[#allocation2 + $0x10] sm:$0xff] (!%p618_p10), %v775_v4  ;;  %313 = vst [vmem:[#allocation2 + $0x18] sm:$0xff] (!%p618_p10), %v775_v4 }
  0x27 PF: > { %v725_v5 = vld [vmem:[%s848_s7] sm:$0xff]   ;;  %v726_v6 = vld [vmem:[%s848_s7 + $0x8] sm:$0xff]   ;;  %v727_v7 = vld [vmem:[%s848_s7 + $0x10] sm:$0xff]   ;;  %p629_p11 = scmp.ne.s32.totalorder %s765_s14, 4 }
  0x28   : > { %664 = vmatprep.subr.bf16.mxu0 %v725_v5  ;;  %v728_v8 = vld [vmem:[%s848_s7 + $0x18] sm:$0xff]   ;;  %v733_v9 = vld [vmem:[%s248_s8] sm:$0xff]   ;;  %v730_v11 = vld [vmem:[%s848_s7 + $0x28] sm:$0xff]  }
  0x29   : > { %665 = vmatpush3.bf16.msra.mxu0 %v725_v5  ;;  %680 = vmatprep.mubr.bf16.mxu0 %v733_v9  ;;  %v729_v10 = vld [vmem:[%s848_s7 + $0x20] sm:$0xff]   ;;  %v731_v12 = vld [vmem:[%s848_s7 + $0x30] sm:$0xff]   ;;  %v732_v13 = vld [vmem:[%s848_s7 + $0x38] sm:$0xff]  }
  0x2a   : > { %666 = vmatprep.subr.bf16.mxu0 %v726_v6  ;;  %v734_v14 = vld [vmem:[%s248_s8 + $0x8] sm:$0xff]   ;;  %v316_v15 = vld [vmem:[#allocation2 + $0x10] sm:$0xff]  ;;  %v314_v16 = vld [vmem:[#allocation2] sm:$0xff] }
  0x2b   : > { %v317_v18 = vld [vmem:[#allocation2 + $0x18] sm:$0xff]  ;;  %v315_v21 = vld [vmem:[#allocation2 + $0x8] sm:$0xff]  ;;  %v630_v29 = vld [vmem:[%s891_s2] ss:$0 sm:$0xff] (!%p629_p11) }
  0x2d   : > { %667 = vmatpush3.bf16.msra.mxu0 %v726_v6 }
  0x2e   : > { %668 = vmatprep.subr.bf16.mxu0 %v727_v7 }
  0x31   : > { %669 = vmatpush3.bf16.msra.mxu0 %v727_v7 }
  0x32   : > { %670 = vmatprep.subr.bf16.mxu0 %v728_v8 }
  0x35   : > { %671 = vmatpush3.bf16.msra.mxu0 %v728_v8 }
  0x36   : > { %672 = vmatprep.subr.bf16.mxu0 %v729_v10 }
  0x39   : > { %673 = vmatpush3.bf16.msra.mxu0 %v729_v10 }
  0x3a   : > { %674 = vmatprep.subr.bf16.mxu0 %v730_v11 }
  0x3d   : > { %675 = vmatpush3.bf16.msra.mxu0 %v730_v11 }
  0x3e   : > { %676 = vmatprep.subr.bf16.mxu0 %v731_v12 }
  0x41   : > { %677 = vmatpush3.bf16.msra.mxu0 %v731_v12 }
  0x42   : > { %678 = vmatprep.subr.bf16.mxu0 %v732_v13 }
  0x45   : > { %679 = vmatpush3.bf16.msra.mxu0 %v732_v13 }
  0x48   : > { %681 = vmatmul.mubr.bf16.vlgmr.msra.gmra.mrb[0].mxu0 %v734_v14 }
 0x11b   : > { %v682_v17 = vpop.f32.mrb[0].mxu0  ;;  %458 = sbr.rel (%p629_p11) target bundleno = 304 (0x130), region = 81 }
 0x11c   : > { %v449_v19 = vadd.f32 %v682_v17, %v316_v15  ;;  %v432_v20 = vpop.f32.mrb[1].mxu0 }
 0x11d   : > { %v447_v22 = vadd.f32 %v432_v20, %v314_v16  ;;  %v683_v23 = vpop.f32.mrb[2].mxu0 }
 0x11e   : > { %453 = vst [vmem:[#allocation2 + $0x10] sm:$0xff] %v449_v19  ;;  %v450_v24 = vadd.f32 %v683_v23, %v317_v18  ;;  %v435_v25 = vpop.f32.mrb[3].mxu0 }
 0x11f   : > { %451 = vst [vmem:[#allocation2] sm:$0xff] %v447_v22  ;;  %v448_v26 = vadd.f32 %v435_v25, %v315_v21 }
 0x120   : > { %454 = vst [vmem:[#allocation2 + $0x18] sm:$0xff] %v450_v24 }
 0x121   : > { %452 = vst [vmem:[#allocation2 + $0x8] sm:$0xff] %v448_v26 }
 0x125   : > { %v461_v32 = vld [vmem:[#allocation2 + $0x10] sm:$0xff] }
 0x126   : > { %v459_v27 = vld [vmem:[#allocation2] sm:$0xff]  ;;  %v472_v34 = vadd.f32 %v630_v29, %v461_v32 }
 0x127   : > { %v470_v30 = vadd.f32 %v630_v29, %v459_v27  ;;  %v462_v33 = vld [vmem:[#allocation2 + $0x18] sm:$0xff] }
 0x128   : > { %v460_v28 = vld [vmem:[#allocation2 + $0x8] sm:$0xff]  ;;  %v473_v35 = vadd.f32 %v630_v29, %v462_v33  ;;  %v476_v38 = vmax.f32 %v472_v34, 0.0 }
 0x129   : > { %v471_v31 = vadd.f32 %v630_v29, %v460_v28  ;;  %v474_v36 = vmax.f32 %v470_v30, 0.0 }
 0x12a   : > { %v477_v39 = vmax.f32 %v473_v35, 0.0 }
 0x12b   : > { %v475_v37 = vmax.f32 %v471_v31, 0.0 }
 0x12c   : > { %v651_v41 = vpack.c.bf16 %v477_v39, %v476_v38 }
 0x12d   : > { %v646_v40 = vpack.c.bf16 %v475_v37, %v474_v36 }
 0x12e   : > { %653 = vst [vmem:[%s892_s3 + $0x8] sm:$0xff] %v651_v41  }
 0x12f   : > { %647 = vst [vmem:[%s892_s3] sm:$0xff] %v646_v40  }
 0x130 PF: > { %s13_s16 = sadd.s32 1, %s773_s16   ;;  %s893_s12 = smov %s761_s13 }
 0x131   : > { %p10_p12 = scmp.ge.s32.totalorder %s13_s16, 7   ;;  %s894_s13 = smov %s831_s20 }
 0x132   : > { %s895_s14 = smov %s769_s15  ;;  %s896_s15 = smov %s898_s17 }
 0x133   :  { %12 = sbr.rel (!%p10_p12) target bundleno = 3 (0x3), region = 122 }

// kernel: vgg_loss.68
= control target key start
LH: loop header
LB: loop body
LE: loop exit
PB: predicated region body
PF: predicated region fallthrough
CT: control target
= control target key end

     0   :  { %s1071_s12 = smov 0   ;;  %s1073_s13 = smov 0   ;;  %s1181_s0 = inlined_call_operand.vmem [shape: bf16[32,1152], index: 0, kind: input, shape index: {}]   ;;  %s1182_s1 = inlined_call_operand.vmem [shape: bf16[1152,128], index: 1, kind: input, shape index: {}]   ;;  %s1183_s2 = inlined_call_operand.vmem [shape: f32[1,128], index: 2, kind: input, shape index: {}]   ;;  %s1184_s3 = inlined_call_operand.vmem [shape: bf16[32,128], index: 3, kind: output, shape index: {}]  }
   0x1   :  { %s1075_s14 = smov 0   ;;  %s1077_s15 = smov 0  }
   0x2   :  { %s1079_s16 = smov 0  }
   0x3 LB: > { %s25_s17 = sadd.s32 1, %s1044_s15  ;;  %p48_p1 = scmp.ne.s32.totalorder %s1036_s13, %s1032_s12  ;;  %s1048_s16 = sphi %s1079_s16, %s13_s16   ;;  %s1044_s15 = sphi %s1077_s15, %s1188_s15   ;;  %s1040_s14 = sphi %s1075_s14, %s1187_s14   ;;  %s1036_s13 = sphi %s1073_s13, %s1186_s13   ;;  %s1032_s12 = sphi %s1071_s12, %s1185_s12  }
   0x4   : > { %p26_p0 = scmp.ge.s32.totalorder %s25_s17, 3  ;;  %p49_p2 = scmp.eq.s32.totalorder %s1048_s16, 0 }
   0x5   : > { %s41_s19 = sadd.s32 1, %s1036_s13  ;;  %p808_p5 = scmp.ge.s32.totalorder %s1048_s16, 3 }
   0x6   : > { %s1190_s17 = smov (%p26_p0, %s25_s17), 0  ;;  %p50_p3 = por %p49_p2, %p48_p1 }
   0x7   : > { %s37_s18 = ssub.s32 %s1044_s15, %s1190_s17  ;;  %162 = sbr.rel (%p808_p5) target bundleno = 23 (0x17), region = 20 }
   0x8   : > { %p39_p4 = scmp.eq.s32.totalorder %s37_s18, 0 }
   0xa   : > { %s1106_s20 = scalar_select %p39_p4, %s1036_s13, %s41_s19  }
   0xe   : > { %165 = sbr.rel (!%p50_p3) target bundleno = 23 (0x17), region = 24  ;;  %s167_s21 = sand.u32 (%p50_p3), 1, %s1036_s13  }
   0xf   : > { %s861_s22 = smul.u32 (%p50_p3), 12, %s1044_s15 }
  0x10   : > { %s935_s23 = smul.u32 (%p50_p3), 48, %s167_s21 }
  0x11   : > { %s175_s26 = scalar_lea.vmem (%p50_p3), %s1181_s0, %s861_s22 }
  0x12   : > { %v190_v0 = vld [vmem:[%s175_s26] sm:$0xff] (%p50_p3)  ;;  %v194_v2 = vld [vmem:[%s175_s26 + $0x48] sm:$0xff] (%p50_p3)  ;;  %s169_s27 = scalar_lea.vmem (%p50_p3), [#allocation3], %s935_s23  ;;  %v814_v6 = vld [vmem:[%s175_s26 + $0x50] sm:$0xf] (%p50_p3) }
  0x13   : > { %v192_v1 = vld [vmem:[%s175_s26 + $0x24] sm:$0xff] (%p50_p3)  ;;  %191 = vst [vmem:[%s169_s27] sm:$0xff] (%p50_p3), %v190_v0  ;;  %195 = vst [vmem:[%s169_s27 + $0x18] sm:$0xff] (%p50_p3), %v194_v2  ;;  %v196_v3 = vld [vmem:[%s175_s26 + $0x6c] sm:$0xff] (%p50_p3) }
  0x14   : > { %193 = vst [vmem:[%s169_s27 + $0xc] sm:$0xff] (%p50_p3), %v192_v1  ;;  %v810_v4 = vld [vmem:[%s175_s26 + $0x8] sm:$0xf] (%p50_p3)  ;;  %v812_v5 = vld [vmem:[%s175_s26 + $0x2c] sm:$0xf] (%p50_p3)  ;;  %197 = vst [vmem:[%s169_s27 + $0x24] sm:$0xff] (%p50_p3), %v196_v3 }
  0x15   : > { %811 = vst [vmem:[%s169_s27 + $0x8] sm:$0xf] %v810_v4  ;;  %813 = vst [vmem:[%s169_s27 + $0x14] sm:$0xf] %v812_v5  ;;  %v816_v7 = vld [vmem:[%s175_s26 + $0x74] sm:$0xf] }
  0x16   : > { %815 = vst [vmem:[%s169_s27 + $0x20] sm:$0xf] %v814_v6  ;;  %817 = vst [vmem:[%s169_s27 + $0x2c] sm:$0xf] %v816_v7 }
  0x17 PF: > { %p818_p6 = scmp.ge.s32.totalorder %s1048_s16, 1  ;;  %p229_p7 = scmp.lt.s32.totalorder %s1048_s16, 4 }
  0x19   : > { %p230_p8 = pnand %p818_p6, %p229_p7 }
  0x1a   : > { %s236_s28 = sand.u32 (!%p230_p8), 1, %s1032_s12   ;;  %s275_s29 = smul.u32 (!%p230_p8), 48, %s1040_s14 }
  0x1b   : > { %233 = sbr.rel (%p230_p8) target bundleno = 318 (0x13e), region = 54  ;;  %p820_p10 = scmp.ne.s32.totalorder (!%p230_p8), %s1040_s14, 0 }
  0x1c   : > { %s936_s30 = smul.u32 (!%p230_p8), 48, %s236_s28  ;;  %p276_p9 = scmp.lt.s32.totalorder (!%p230_p8), %s275_s29, 143 }
  0x1e   : > { %s1123_s8 = scalar_lea.vmem (!%p230_p8), [#allocation3], %s936_s30 }
  0x22   : > { %s1192_s29 = smov (!%p276_p9, %s275_s29), 143  ;;  %300 = sbr.rel (%p820_p10) target bundleno = 41 (0x29), region = 62 }
  0x23   : > { %s819_s4 = sshll.u32 %s1192_s29, 2  ;;  %v1050_v8 = vmov (!%p820_p10), 0.0  }
  0x24   : > { %s1121_s7 = scalar_lea.vmem %s1182_s1, %s819_s4  ;;  %301 = vst [vmem:[#allocation2] sm:$0xff] (!%p820_p10), %v1050_v8  ;;  %302 = vst [vmem:[#allocation2 + $0x8] sm:$0xff] (!%p820_p10), %v1050_v8 }
  0x25   : > { %303 = vst [vmem:[#allocation2 + $0x10] sm:$0xff] (!%p820_p10), %v1050_v8  ;;  %304 = vst [vmem:[#allocation2 + $0x18] sm:$0xff] (!%p820_p10), %v1050_v8 }
  0x29 PF: > { %v978_v9 = vld [vmem:[%s1121_s7 + $0x40] sm:$0xff]   ;;  %v981_v12 = vld [vmem:[%s1121_s7 + $0x48] sm:$0xff]   ;;  %v984_v15 = vld [vmem:[%s1121_s7 + $0x50] sm:$0xff]   ;;  %p851_p11 = scmp.ne.s32.totalorder %s1040_s14, 2 }
  0x2a   : > { %v979_v10 = vld [vmem:[%s1121_s7] sm:$0xff]   ;;  %877 = vmatprep.subr.bf16.mxu0 %v978_v9  ;;  %v982_v13 = vld [vmem:[%s1121_s7 + $0x8] sm:$0xff]   ;;  %v985_v16 = vld [vmem:[%s1121_s7 + $0x10] sm:$0xff]  }
  0x2b   : > { %v980_v11 = vld [vmem:[%s1121_s7 + $0x80] sm:$0xff]   ;;  %878 = vmatpush3.bf16.msra.mxu0 %v979_v10  ;;  %v983_v14 = vld [vmem:[%s1121_s7 + $0x88] sm:$0xff]   ;;  %v986_v17 = vld [vmem:[%s1121_s7 + $0x90] sm:$0xff]  }
  0x2c   : > { %915 = vmatprep.subr.bf16.mxu1 %v980_v11  ;;  %879 = vmatprep.subr.bf16.mxu0 %v981_v12  ;;  %v987_v18 = vld [vmem:[%s1121_s7 + $0x58] sm:$0xff]   ;;  %v990_v21 = vld [vmem:[%s1121_s7 + $0x60] sm:$0xff]   ;;  %v993_v24 = vld [vmem:[%s1121_s7 + $0x68] sm:$0xff]  }
  0x2d   : > { %916 = vmatpush3.bf16.msra.mxu1 %v980_v11  ;;  %v988_v19 = vld [vmem:[%s1121_s7 + $0x18] sm:$0xff]   ;;  %v992_v22 = vld [vmem:[%s1121_s7 + $0xa0] sm:$0xff]   ;;  %v995_v25 = vld [vmem:[%s1121_s7 + $0xa8] sm:$0xff]  }
  0x2e   : > { %917 = vmatprep.subr.bf16.mxu1 %v983_v14  ;;  %v989_v20 = vld [vmem:[%s1121_s7 + $0x98] sm:$0xff]   ;;  %v991_v23 = vld [vmem:[%s1121_s7 + $0x20] sm:$0xff]   ;;  %v994_v26 = vld [vmem:[%s1121_s7 + $0x28] sm:$0xff]  }
  0x2f   : > { %880 = vmatpush3.bf16.msra.mxu0 %v982_v13  ;;  %v996_v27 = vld [vmem:[%s1121_s7 + $0x70] sm:$0xff]   ;;  %v999_v30 = vld [vmem:[%s1121_s7 + $0x78] sm:$0xff]   ;;  %v305_v45 = vld [vmem:[#allocation2] sm:$0xff] }
  0x30   : > { %881 = vmatprep.subr.bf16.mxu0 %v984_v15  ;;  %v997_v28 = vld [vmem:[%s1121_s7 + $0x30] sm:$0xff]   ;;  %v1001_v31 = vld [vmem:[%s1121_s7 + $0xb8] sm:$0xff]   ;;  %v306_v50 = vld [vmem:[#allocation2 + $0x8] sm:$0xff] }
  0x31   : > { %918 = vmatpush3.bf16.msra.mxu1 %v983_v14  ;;  %v998_v29 = vld [vmem:[%s1121_s7 + $0xb0] sm:$0xff]   ;;  %v1000_v34 = vld [vmem:[%s1121_s7 + $0x38] sm:$0xff]   ;;  %v852_v5 = vld [vmem:[%s1183_s2] ss:$0 sm:$0xff] (!%p851_p11) }
  0x32   : > { %919 = vmatprep.subr.bf16.mxu1 %v986_v17  ;;  %v1004_v32 = vld [vmem:[%s1123_s8 + $0x4] ss:$12 sps:$4 sm:$0xff]   ;;  %v1005_v33 = vld [vmem:[%s1123_s8 + $0x8] ss:$12 sps:$4 sm:$0xff]   ;;  %v1002_v35 = vld [vmem:[%s1123_s8] ss:$12 sps:$4 sm:$0xff]  }
  0x33   : > { %882 = vmatpush3.bf16.msra.mxu0 %v985_v16  ;;  %573 = vmatprep.mubr.bf16.mxu0 %v1004_v32  ;;  %v1007_v36 = vld [vmem:[%s1123_s8 + $0x1c] ss:$12 sps:$4 sm:$0xff]   ;;  %v1006_v37 = vld [vmem:[%s1123_s8 + $0x20] ss:$12 sps:$4 sm:$0xff]   ;;  %v1009_v38 = vld [vmem:[%s1123_s8 + $0x18] ss:$12 sps:$4 sm:$0xff]  }
  0x34   : > { %883 = vmatprep.subr.bf16.mxu0 %v987_v18  ;;  %931 = vmatprep.mubr.bf16.mxu1 %v1005_v33  ;;  %v307_v59 = vld [vmem:[#allocation2 + $0x10] sm:$0xff]  ;;  %v308_v63 = vld [vmem:[#allocation2 + $0x18] sm:$0xff] }
  0x35   : > { %920 = vmatpush3.bf16.msra.mxu1 %v986_v17 }
  0x36   : > { %921 = vmatprep.subr.bf16.mxu1 %v989_v20 }
  0x37   : > { %884 = vmatpush3.bf16.msra.mxu0 %v988_v19 }
  0x38   : > { %885 = vmatprep.subr.bf16.mxu0 %v990_v21 }
  0x39   : > { %922 = vmatpush3.bf16.msra.mxu1 %v989_v20 }
  0x3a   : > { %923 = vmatprep.subr.bf16.mxu1 %v992_v22 }
  0x3b   : > { %886 = vmatpush3.bf16.msra.mxu0 %v991_v23 }
  0x3c   : > { %887 = vmatprep.subr.bf16.mxu0 %v993_v24 }
  0x3d   : > { %924 = vmatpush3.bf16.msra.mxu1 %v992_v22 }
  0x3e   : > { %925 = vmatprep.subr.bf16.mxu1 %v995_v25 }
  0x3f   : > { %888 = vmatpush3.bf16.msra.mxu0 %v994_v26 }
  0x40   : > { %889 = vmatprep.subr.bf16.mxu0 %v996_v27 }
  0x41   : > { %926 = vmatpush3.bf16.msra.mxu1 %v995_v25 }
  0x42   : > { %927 = vmatprep.subr.bf16.mxu1 %v998_v29 }
  0x43   : > { %890 = vmatpush3.bf16.msra.mxu0 %v997_v28 }
  0x44   : > { %891 = vmatprep.subr.bf16.mxu0 %v999_v30 }
  0x45   : > { %928 = vmatpush3.bf16.msra.mxu1 %v998_v29 }
  0x46   : > { %929 = vmatprep.subr.bf16.mxu1 %v1001_v31 }
  0x47   : > { %892 = vmatpush3.bf16.msra.mxu0 %v1000_v34 }
  0x49   : > { %930 = vmatpush3.bf16.msra.mxu1 %v1001_v31 }
  0x4a   : > { %574 = vmatmul.mubr.bf16.vlgmr.msra.gmra.mrb[0].mxu0 %v1002_v35 }
  0x4b   : > { %581 = vmatprep.mubr.bf16.mxu0 %v1007_v36 }
  0x4c   : > { %932 = vmatmul.mubr.bf16.vlgmr.msra.gmra.mrb[0].mxu1 %v1006_v37 }
  0x52   : > { %582 = vmatmul.mubr.bf16.gmra.mrb[4].mxu0 %v1009_v38 }
 0x11d   : > { %v893_v39 = vpop.f32.mrb[0].mxu0 }
 0x11e   : > { %v894_v40 = vpop.f32.mrb[1].mxu0 }
 0x11f   : > { %v895_v41 = vadd.f32 %v894_v40, %v893_v39  ;;  %v896_v42 = vpop.f32.mrb[2].mxu0  ;;  %v933_v43 = vpop.f32.mrb[0].mxu1 }
 0x120   : > { %v897_v44 = vpop.f32.mrb[3].mxu0  ;;  %v624_v46 = vpop.f32.mrb[1].mxu1 }
 0x121   : > { %v898_v47 = vadd.f32 %v897_v44, %v896_v42  ;;  %v625_v48 = vadd.f32 %v895_v41, %v624_v46  ;;  %v934_v49 = vpop.f32.mrb[2].mxu1 }
 0x122   : > { %v627_v51 = vpop.f32.mrb[3].mxu1 }
 0x123   : > { %v639_v52 = vadd.f32 %v625_v48, %v305_v45  ;;  %v628_v53 = vadd.f32 %v898_v47, %v627_v51 }
 0x125   : > { %643 = vst [vmem:[#allocation2] sm:$0xff] %v639_v52  ;;  %v640_v54 = vadd.f32 %v628_v53, %v306_v50  ;;  %v899_v55 = vpop.f32.mrb[4].mxu0 }
 0x126   : > { %v900_v56 = vpop.f32.mrb[5].mxu0 }
 0x127   : > { %644 = vst [vmem:[#allocation2 + $0x8] sm:$0xff] %v640_v54  ;;  %v901_v57 = vadd.f32 %v900_v56, %v899_v55  ;;  %v902_v58 = vpop.f32.mrb[6].mxu0 }
 0x128   : > { %v903_v60 = vpop.f32.mrb[7].mxu0 }
 0x129   : > { %v633_v61 = vadd.f32 %v933_v43, %v901_v57  ;;  %v904_v62 = vadd.f32 %v903_v60, %v902_v58  ;;  %650 = sbr.rel (%p851_p11) target bundleno = 318 (0x13e), region = 66 }
 0x12b   : > { %v641_v0 = vadd.f32 %v633_v61, %v307_v59  ;;  %v636_v1 = vadd.f32 %v934_v49, %v904_v62 }
 0x12c   : > { %v651_v3 = vld [vmem:[#allocation2] sm:$0xff] (!%p851_p11) }
 0x12d   : > { %645 = vst [vmem:[#allocation2 + $0x10] sm:$0xff] %v641_v0  ;;  %v642_v2 = vadd.f32 %v636_v1, %v308_v63  ;;  %v662_v6 = vadd.f32 (!%p851_p11), %v852_v5, %v651_v3 }
 0x12e   : > { %v652_v4 = vld [vmem:[#allocation2 + $0x8] sm:$0xff] (!%p851_p11) }
 0x12f   : > { %646 = vst [vmem:[#allocation2 + $0x18] sm:$0xff] %v642_v2  ;;  %v663_v7 = vadd.f32 (!%p851_p11), %v852_v5, %v652_v4  ;;  %v666_v12 = vmax.f32 (!%p851_p11), %v662_v6, 0.0 }
 0x131   : > { %v667_v13 = vmax.f32 %v663_v7, 0.0 }
 0x133   : > { %v869_v16 = vpack.c.bf16 %v667_v13, %v666_v12 }
 0x134   : > { %v653_v8 = vld [vmem:[#allocation2 + $0x10] sm:$0xff] }
 0x135   : > { %v664_v10 = vadd.f32 %v852_v5, %v653_v8  ;;  %870 = vst [vmem:[%s1184_s3] sm:$0xff] %v869_v16  }
 0x136   : > { %v654_v9 = vld [vmem:[#allocation2 + $0x18] sm:$0xff] }
 0x137   : > { %v665_v11 = vadd.f32 %v852_v5, %v654_v9  ;;  %v668_v14 = vmax.f32 %v664_v10, 0.0 }
 0x139   : > { %v669_v15 = vmax.f32 %v665_v11, 0.0 }
 0x13b   : > { %v874_v17 = vpack.c.bf16 %v669_v15, %v668_v14 }
 0x13d   : > { %876 = vst [vmem:[%s1184_s3 + $0x8] sm:$0xff] %v874_v17  }
 0x13e PF: > { %s13_s16 = sadd.s32 1, %s1048_s16   ;;  %s1185_s12 = smov %s1036_s13 }
 0x13f   : > { %p10_p12 = scmp.ge.s32.totalorder %s13_s16, 5   ;;  %s1186_s13 = smov %s1106_s20 }
 0x140   : > { %s1187_s14 = smov %s1044_s15  ;;  %s1188_s15 = smov %s1190_s17 }
 0x141   :  { %12 = sbr.rel (!%p10_p12) target bundleno = 3 (0x3), region = 113 }

// kernel: vgg_loss.71
= control target key start
LH: loop header
LB: loop body
LE: loop exit
PB: predicated region body
PF: predicated region fallthrough
CT: control target
= control target key end

     0   :  { %s95_s0 = inlined_call_operand.vmem [shape: bf16[16,128], index: 0, kind: input, shape index: {}]   ;;  %s96_s1 = inlined_call_operand.vmem [shape: bf16[16,128], index: 1, kind: input, shape index: {}]   ;;  %s97_s2 = inlined_call_operand.vmem [shape: bf16[16,128], index: 2, kind: input, shape index: {}]   ;;  %s98_s3 = inlined_call_operand.vmem [shape: bf16[16,128], index: 3, kind: input, shape index: {}]   ;;  %s99_s4 = inlined_call_operand.vmem [shape: bf16[16,128], index: 4, kind: output, shape index: {}]  }
   0x1   :  { %v17_v0 = vld [vmem:[%s95_s0] sm:$0xf]  ;;  %v18_v1 = vld [vmem:[%s95_s0 + $0x4] sm:$0xf] }
   0x2   :  { %v19_v2 = vld [vmem:[%s96_s1] sm:$0xf]  ;;  %v20_v3 = vld [vmem:[%s96_s1 + $0x4] sm:$0xf] }
   0x3   :  { %v21_v4 = vmax.bf16 %v19_v2, %v17_v0  ;;  %v23_v5 = vld [vmem:[%s97_s2] sm:$0xf]  ;;  %v24_v6 = vld [vmem:[%s97_s2 + $0x4] sm:$0xf]  ;;  %v22_v7 = vmax.bf16 %v20_v3, %v18_v1 }
   0x4   :  { %v25_v8 = vld [vmem:[%s98_s3] sm:$0xf]  ;;  %v26_v9 = vld [vmem:[%s98_s3 + $0x4] sm:$0xf] }
   0x5   :  { %v27_v10 = vmax.bf16 %v25_v8, %v23_v5  ;;  %v28_v11 = vmax.bf16 %v26_v9, %v24_v6 }
   0x7   :  { %v29_v12 = vmax.bf16 %v27_v10, %v21_v4  ;;  %v30_v13 = vmax.bf16 %v28_v11, %v22_v7 }
   0x9   :  { %v42_v14 = vcombine.low %v29_v12, %v30_v13 }
   0xb   :  { %41 = vst [vmem:[%s99_s4] sm:$0xff] %v42_v14  }

// kernel: vgg_loss.77
= control target key start
LH: loop header
LB: loop body
LE: loop exit
PB: predicated region body
PF: predicated region fallthrough
CT: control target
= control target key end

     0   :  { %s81_s0 = inlined_call_operand.vmem [shape: bf16[16,128], index: 0, kind: input, shape index: {}]   ;;  %s82_s1 = inlined_call_operand.vmem [shape: bf16[16,128], index: 1, kind: input, shape index: {}]   ;;  %s83_s2 = inlined_call_operand.vmem [shape: f32[16,128], index: 2, kind: output, shape index: {}]  }
   0x1   :  { %v47_v0 = vld [vmem:[%s81_s0] sm:$0xff]  }
   0x2   :  { %v51_v1 = vld [vmem:[%s82_s1] sm:$0xff]   ;;  %v48_v2 = vunpack.c.l.bf16 %v47_v0  ;;  %v49_v4 = vunpack.c.h.bf16 %v47_v0 }
   0x3   :  { %v52_v3 = vunpack.c.l.bf16 %v51_v1  ;;  %v53_v5 = vunpack.c.h.bf16 %v51_v1 }
   0x5   :  { %v25_v6 = vsub.f32 %v48_v2, %v52_v3  ;;  %v26_v7 = vsub.f32 %v49_v4, %v53_v5 }
   0x7   :  { %v29_v8 = vand.u32 2147483647, %v25_v6  ;;  %v30_v9 = vand.u32 2147483647, %v26_v7 }
   0x9   :  { %40 = vst [vmem:[%s83_s2] sm:$0xff] %v29_v8  ;;  %41 = vst [vmem:[%s83_s2 + $0x8] sm:$0xff] %v30_v9 }

// kernel: vgg_loss.72
= control target key start
LH: loop header
LB: loop body
LE: loop exit
PB: predicated region body
PF: predicated region fallthrough
CT: control target
= control target key end

     0   :  { %s979_s12 = smov 0   ;;  %s981_s13 = smov 0   ;;  %s1083_s0 = inlined_call_operand.vmem [shape: bf16[16,1152], index: 0, kind: input, shape index: {}]   ;;  %s1084_s1 = inlined_call_operand.vmem [shape: bf16[1152,128], index: 1, kind: input, shape index: {}]   ;;  %s1085_s2 = inlined_call_operand.vmem [shape: f32[1,128], index: 2, kind: input, shape index: {}]   ;;  %s1086_s3 = inlined_call_operand.vmem [shape: bf16[16,128], index: 3, kind: output, shape index: {}]  }
   0x1   :  { %s983_s14 = smov 0   ;;  %s985_s15 = smov 0  }
   0x2   :  { %s987_s16 = smov 0  }
   0x3 LB: > { %s25_s17 = sadd.s32 1, %s950_s15  ;;  %p48_p1 = scmp.ne.s32.totalorder %s942_s13, %s938_s12  ;;  %s954_s16 = sphi %s987_s16, %s13_s16   ;;  %s950_s15 = sphi %s985_s15, %s1090_s15   ;;  %s946_s14 = sphi %s983_s14, %s1089_s14   ;;  %s942_s13 = sphi %s981_s13, %s1088_s13   ;;  %s938_s12 = sphi %s979_s12, %s1087_s12  }
   0x4   : > { %p26_p0 = scmp.ge.s32.totalorder %s25_s17, 3  ;;  %p49_p2 = scmp.eq.s32.totalorder %s954_s16, 0 }
   0x5   : > { %s41_s19 = sadd.s32 1, %s942_s13  ;;  %p740_p5 = scmp.ge.s32.totalorder %s954_s16, 3 }
   0x6   : > { %s1092_s17 = smov (%p26_p0, %s25_s17), 0  ;;  %p50_p3 = por %p49_p2, %p48_p1 }
   0x7   : > { %s37_s18 = ssub.s32 %s950_s15, %s1092_s17  ;;  %162 = sbr.rel (%p740_p5) target bundleno = 21 (0x15), region = 20 }
   0x8   : > { %p39_p4 = scmp.eq.s32.totalorder %s37_s18, 0 }
   0xa   : > { %s1014_s20 = scalar_select %p39_p4, %s942_s13, %s41_s19  }
   0xe   : > { %165 = sbr.rel (!%p50_p3) target bundleno = 21 (0x15), region = 24  ;;  %s167_s21 = sand.u32 (%p50_p3), 1, %s942_s13  }
   0xf   : > { %s784_s22 = smul.u32 (%p50_p3), 12, %s950_s15 }
  0x10   : > { %s843_s23 = smul.u32 (%p50_p3), 24, %s167_s21 }
  0x11   : > { %s175_s26 = scalar_lea.vmem (%p50_p3), %s1083_s0, %s784_s22 }
  0x12   : > { %v190_v0 = vld [vmem:[%s175_s26] sm:$0xff] (%p50_p3)  ;;  %v742_v2 = vld [vmem:[%s175_s26 + $0x8] sm:$0xf] (%p50_p3)  ;;  %s169_s27 = scalar_lea.vmem (%p50_p3), [#allocation3], %s843_s23  ;;  %v744_v3 = vld [vmem:[%s175_s26 + $0x2c] sm:$0xf] (%p50_p3) }
  0x13   : > { %v192_v1 = vld [vmem:[%s175_s26 + $0x24] sm:$0xff] (%p50_p3)  ;;  %191 = vst [vmem:[%s169_s27] sm:$0xff] (%p50_p3), %v190_v0  ;;  %743 = vst [vmem:[%s169_s27 + $0x8] sm:$0xf] (%p50_p3), %v742_v2 }
  0x14   : > { %193 = vst [vmem:[%s169_s27 + $0xc] sm:$0xff] (%p50_p3), %v192_v1  ;;  %745 = vst [vmem:[%s169_s27 + $0x14] sm:$0xf] (%p50_p3), %v744_v3 }
  0x15 PF: > { %p746_p6 = scmp.ge.s32.totalorder %s954_s16, 1  ;;  %p221_p7 = scmp.lt.s32.totalorder %s954_s16, 4 }
  0x17   : > { %p222_p8 = pnand %p746_p6, %p221_p7 }
  0x18   : > { %s228_s28 = sand.u32 (!%p222_p8), 1, %s938_s12   ;;  %s267_s29 = smul.u32 (!%p222_p8), 48, %s946_s14 }
  0x19   : > { %225 = sbr.rel (%p222_p8) target bundleno = 308 (0x134), region = 54  ;;  %p748_p10 = scmp.ne.s32.totalorder (!%p222_p8), %s946_s14, 0 }
  0x1a   : > { %s844_s30 = smul.u32 (!%p222_p8), 24, %s228_s28  ;;  %p268_p9 = scmp.lt.s32.totalorder (!%p222_p8), %s267_s29, 143 }
  0x1c   : > { %s1031_s8 = scalar_lea.vmem (!%p222_p8), [#allocation3], %s844_s30 }
  0x20   : > { %s1094_s29 = smov (!%p268_p9, %s267_s29), 143  ;;  %292 = sbr.rel (%p748_p10) target bundleno = 39 (0x27), region = 62 }
  0x21   : > { %s747_s4 = sshll.u32 %s1094_s29, 2  ;;  %v956_v4 = vmov (!%p748_p10), 0.0  }
  0x22   : > { %s1029_s7 = scalar_lea.vmem %s1084_s1, %s747_s4  ;;  %293 = vst [vmem:[#allocation2] sm:$0xff] (!%p748_p10), %v956_v4  ;;  %294 = vst [vmem:[#allocation2 + $0x8] sm:$0xff] (!%p748_p10), %v956_v4 }
  0x27 PF: > { %v888_v5 = vld [vmem:[%s1029_s7 + $0x40] sm:$0xff]   ;;  %v957_v6 = vmov 0.0   ;;  %vm958_vm0 = vmmov 0   ;;  %v891_v9 = vld [vmem:[%s1029_s7 + $0x48] sm:$0xff]   ;;  %v894_v12 = vld [vmem:[%s1029_s7 + $0x50] sm:$0xff]   ;;  %p776_p11 = scmp.ne.s32.totalorder %s946_s14, 2 }
  0x28   : > { %823 = vmatprep.subr.bf16.mxu1 %v957_v6  ;;  %v889_v7 = vld [vmem:[%s1029_s7] sm:$0xff]   ;;  %792 = vmatprep.subr.bf16.mxu0 %v888_v5  ;;  %v892_v10 = vld [vmem:[%s1029_s7 + $0x8] sm:$0xff]   ;;  %v895_v13 = vld [vmem:[%s1029_s7 + $0x10] sm:$0xff]  }
  0x29   : > { %v890_v8 = vld [vmem:[%s1029_s7 + $0x80] sm:$0xff]   ;;  %839 = vmatprep.mubr.msk.bf16.mxu1 %vm958_vm0, %v957_v6  ;;  %793 = vmatpush3.bf16.msra.mxu0 %v889_v7  ;;  %v893_v11 = vld [vmem:[%s1029_s7 + $0x88] sm:$0xff]   ;;  %v896_v14 = vld [vmem:[%s1029_s7 + $0x90] sm:$0xff]  }
  0x2a   : > { %824 = vmatpush3.bf16.msra.mxu1 %v890_v8  ;;  %794 = vmatprep.subr.bf16.mxu0 %v891_v9  ;;  %v897_v15 = vld [vmem:[%s1029_s7 + $0x58] sm:$0xff]   ;;  %v900_v18 = vld [vmem:[%s1029_s7 + $0x60] sm:$0xff]   ;;  %v903_v21 = vld [vmem:[%s1029_s7 + $0x68] sm:$0xff]  }
  0x2b   : > { %825 = vmatprep.subr.bf16.mxu1 %v957_v6  ;;  %v898_v16 = vld [vmem:[%s1029_s7 + $0x18] sm:$0xff]   ;;  %v901_v19 = vld [vmem:[%s1029_s7 + $0x20] sm:$0xff]   ;;  %v904_v22 = vld [vmem:[%s1029_s7 + $0x28] sm:$0xff]  }
  0x2c   : > { %v899_v17 = vld [vmem:[%s1029_s7 + $0x98] sm:$0xff]   ;;  %v902_v20 = vld [vmem:[%s1029_s7 + $0xa0] sm:$0xff]   ;;  %v905_v23 = vld [vmem:[%s1029_s7 + $0xa8] sm:$0xff]  }
  0x2d   : > { %795 = vmatpush3.bf16.msra.mxu0 %v892_v10  ;;  %v906_v24 = vld [vmem:[%s1029_s7 + $0x70] sm:$0xff]   ;;  %v909_v27 = vld [vmem:[%s1029_s7 + $0x78] sm:$0xff]   ;;  %v295_v39 = vld [vmem:[#allocation2] sm:$0xff] }
  0x2e   : > { %826 = vmatpush3.bf16.msra.mxu1 %v893_v11  ;;  %796 = vmatprep.subr.bf16.mxu0 %v894_v12  ;;  %v907_v25 = vld [vmem:[%s1029_s7 + $0x30] sm:$0xff]   ;;  %v910_v29 = vld [vmem:[%s1029_s7 + $0x38] sm:$0xff]   ;;  %v296_v45 = vld [vmem:[#allocation2 + $0x8] sm:$0xff] }
  0x2f   : > { %827 = vmatprep.subr.bf16.mxu1 %v957_v6  ;;  %v908_v26 = vld [vmem:[%s1029_s7 + $0xb0] sm:$0xff]   ;;  %v911_v30 = vld [vmem:[%s1029_s7 + $0xb8] sm:$0xff]   ;;  %v777_v51 = vld [vmem:[%s1085_s2] ss:$0 sm:$0xff] (!%p776_p11) }
  0x30   : > { %v914_v28 = vld [vmem:[%s1031_s8 + $0x4] ss:$12 sps:$4 sm:$0xff]   ;;  %v912_v31 = vld [vmem:[%s1031_s8] ss:$12 sps:$4 sm:$0xff]   ;;  %v915_v32 = vld [vmem:[%s1031_s8 + $0x8] ss:$12 sps:$4 sm:$0xff]  }
  0x31   : > { %797 = vmatpush3.bf16.msra.mxu0 %v895_v13  ;;  %541 = vmatprep.mubr.bf16.mxu0 %v914_v28 }
  0x32   : > { %828 = vmatpush3.bf16.msra.mxu1 %v896_v14  ;;  %798 = vmatprep.subr.bf16.mxu0 %v897_v15 }
  0x33   : > { %829 = vmatprep.subr.bf16.mxu1 %v957_v6 }
  0x35   : > { %799 = vmatpush3.bf16.msra.mxu0 %v898_v16 }
  0x36   : > { %830 = vmatpush3.bf16.msra.mxu1 %v899_v17  ;;  %800 = vmatprep.subr.bf16.mxu0 %v900_v18 }
  0x37   : > { %831 = vmatprep.subr.bf16.mxu1 %v957_v6 }
  0x39   : > { %801 = vmatpush3.bf16.msra.mxu0 %v901_v19 }
  0x3a   : > { %832 = vmatpush3.bf16.msra.mxu1 %v902_v20  ;;  %802 = vmatprep.subr.bf16.mxu0 %v903_v21 }
  0x3b   : > { %833 = vmatprep.subr.bf16.mxu1 %v957_v6 }
  0x3d   : > { %803 = vmatpush3.bf16.msra.mxu0 %v904_v22 }
  0x3e   : > { %834 = vmatpush3.bf16.msra.mxu1 %v905_v23  ;;  %804 = vmatprep.subr.bf16.mxu0 %v906_v24 }
  0x3f   : > { %835 = vmatprep.subr.bf16.mxu1 %v957_v6 }
  0x41   : > { %805 = vmatpush3.bf16.msra.mxu0 %v907_v25 }
  0x42   : > { %836 = vmatpush3.bf16.msra.mxu1 %v908_v26  ;;  %806 = vmatprep.subr.bf16.mxu0 %v909_v27 }
  0x43   : > { %837 = vmatprep.subr.bf16.mxu1 %v957_v6 }
  0x45   : > { %807 = vmatpush3.bf16.msra.mxu0 %v910_v29 }
  0x46   : > { %838 = vmatpush3.bf16.msra.mxu1 %v911_v30 }
  0x48   : > { %542 = vmatmul.mubr.bf16.vlgmr.msra.gmra.mrb[0].mxu0 %v912_v31 }
  0x49   : > { %840 = vmatmul.mubr.bf16.vlgmr.msra.gmra.mrb[0].mxu1 %v915_v32 }
 0x11b   : > { %v808_v33 = vpop.f32.mrb[0].mxu0 }
 0x11c   : > { %v584_v34 = vpop.f32.mrb[0].mxu1  ;;  %v809_v35 = vpop.f32.mrb[1].mxu0 }
 0x11d   : > { %v810_v36 = vadd.f32 %v809_v35, %v808_v33  ;;  %v841_v37 = vpop.f32.mrb[1].mxu1  ;;  %v811_v38 = vpop.f32.mrb[2].mxu0 }
 0x11e   : > { %v587_v40 = vpop.f32.mrb[2].mxu1  ;;  %v812_v41 = vpop.f32.mrb[3].mxu0 }
 0x11f   : > { %v585_v42 = vadd.f32 %v810_v36, %v584_v34  ;;  %v813_v43 = vadd.f32 %v812_v41, %v811_v38  ;;  %v842_v44 = vpop.f32.mrb[3].mxu1  ;;  %598 = sbr.rel (%p776_p11) target bundleno = 308 (0x134), region = 66 }
 0x121   : > { %v591_v46 = vadd.f32 %v585_v42, %v295_v39  ;;  %v588_v47 = vadd.f32 %v813_v43, %v587_v40 }
 0x123   : > { %593 = vst [vmem:[#allocation2] sm:$0xff] %v591_v46  ;;  %v592_v48 = vadd.f32 %v588_v47, %v296_v45 }
 0x125   : > { %594 = vst [vmem:[#allocation2 + $0x8] sm:$0xff] %v592_v48 }
 0x12a   : > { %v599_v49 = vld [vmem:[#allocation2] sm:$0xff] }
 0x12b   : > { %v608_v52 = vadd.f32 %v777_v51, %v599_v49 }
 0x12c   : > { %v600_v50 = vld [vmem:[#allocation2 + $0x8] sm:$0xff] }
 0x12d   : > { %v609_v53 = vadd.f32 %v777_v51, %v600_v50  ;;  %v610_v54 = vmax.f32 %v608_v52, 0.0 }
 0x12f   : > { %v611_v55 = vmax.f32 %v609_v53, 0.0 }
 0x131   : > { %v790_v56 = vpack.c.bf16 %v611_v55, %v610_v54 }
 0x133   : > { %791 = vst [vmem:[%s1086_s3] sm:$0xff] %v790_v56  }
 0x134 PF: > { %s13_s16 = sadd.s32 1, %s954_s16   ;;  %s1087_s12 = smov %s942_s13 }
 0x135   : > { %p10_p12 = scmp.ge.s32.totalorder %s13_s16, 5   ;;  %s1088_s13 = smov %s1014_s20 }
 0x136   : > { %s1089_s14 = smov %s950_s15  ;;  %s1090_s15 = smov %s1092_s17 }
 0x137   :  { %12 = sbr.rel (!%p10_p12) target bundleno = 3 (0x3), region = 113 }

</bundles_post_ra>
